<compile_context>
chip_gen: v6e
topology: v6e:2x2x1
jax: 0.10.0
libtpu: 0.0.40
codegen_flags: <defaults>
</compile_context>

<pallas_src>
import functools

import jax
import jax.numpy as jnp
from jax.experimental import pallas as pl
from jax.experimental.pallas import tpu as pltpu


# ------------------------------ fused kernel --------------------------------


def _rdb5c_kernel(x_ref, m_ref, w1_ref, b1_ref, w2_ref, b2_ref, w3_ref, b3_ref,
                  w4_ref, b4_ref, w5_ref, b5_ref, o_ref, bank_ref,
                  *, nf, gc, W, L):
    """Fused ResidualDenseBlock_5C forward for one batch tile.

    x_ref    : (nf, L)        f32   channels on sublanes, Bt*H*W pixels on lanes
    m_ref    : (9, L)         f32   per-tap border-validity masks (0/1)
    w*_ref   : (9*Cout, Cin)  bf16  tap-stacked weights (_pack_weight_stacked)
    b*_ref   : (Cout, L)      f32   bias pre-broadcast over lanes
    o_ref    : (nf, L)        f32
    bank_ref : (nf+4*gc, L)   bf16  unshifted dense-block activations
    """

    def conv(w_ref, b_ref, cin, cout, lrelu):
        # 3x3 "same" conv over the first `cin` bank rows: 9 per-tap matmuls,
        # shifted on the OUTPUT via pltpu.roll (XLU) + precomputed border mask.
        xb = bank_ref[pl.ds(0, cin), :]                       # (cin, L) bf16
        # Centre tap (kh=kw=1): no shift, mask all-ones -> accumulator init.
        acc = b_ref[...] + jnp.dot(w_ref[pl.ds(4 * cout, cout), :], xb,
                                   preferred_element_type=jnp.float32)
        for t in (0, 1, 2, 3, 5, 6, 7, 8):
            d = (t // 3 - 1) * W + (t % 3 - 1)                # flat spatial shift
            y = jnp.dot(w_ref[pl.ds(t * cout, cout), :], xb,
                        preferred_element_type=jnp.float32)   # (cout, L)
            y = pltpu.roll(y, shift=(-d) % L, axis=1)         # out[p] <- y[p+d]
            acc = acc + m_ref[pl.ds(t, 1), :] * y
        if lrelu:
            acc = jnp.maximum(acc, 0.2 * acc)                 # LeakyReLU(0.2)
        return acc

    # Cast once to bf16 and append each stage to the running channel bank.
    bank_ref[pl.ds(0, nf), :] = x_ref[...].astype(jnp.bfloat16)
    c = nf
    h = conv(w1_ref, b1_ref, c, gc, True)
    bank_ref[pl.ds(c, gc), :] = h.astype(jnp.bfloat16)
    c += gc
    h = conv(w2_ref, b2_ref, c, gc, True)
    bank_ref[pl.ds(c, gc), :] = h.astype(jnp.bfloat16)
    c += gc
    h = conv(w3_ref, b3_ref, c, gc, True)
    bank_ref[pl.ds(c, gc), :] = h.astype(jnp.bfloat16)
    c += gc
    h = conv(w4_ref, b4_ref, c, gc, True)
    bank_ref[pl.ds(c, gc), :] = h.astype(jnp.bfloat16)
    c += gc
    h5 = conv(w5_ref, b5_ref, c, nf, False)                   # (nf, L) f32
    o_ref[...] = (h5 * 0.2 + x_ref[...]).astype(o_ref.dtype)  # residual, f32


# -------------------------- wrapper / weight packing -------------------------


def _pack_weight_stacked(w_oihw):
    """(Cout, Cin, 3, 3) OIHW -> (9*Cout, Cin) bf16, tap-major row blocks.

    Row block t = kh*3 + kw holds W[:, :, kh, kw]; Cin order matches the
    dense-block concat order (x, x1, x2, x3, x4) so no per-block reshuffle."""
    cout = w_oihw.shape[0]
    cin = w_oihw.shape[1]
    w = jnp.transpose(w_oihw, (2, 3, 0, 1)).reshape(9 * cout, cin)
    return w.astype(jnp.bfloat16)


def _border_masks(H, W, bt):
    """(9, bt*H*W) f32 validity masks for the 9 taps of a padded 3x3 conv.

    Also zeroes every position where a flat roll would wrap across an image
    boundary, which is what makes batch folding onto the lane axis legal."""
    p = jnp.arange(H * W, dtype=jnp.int32)
    hh, ww = p // W, p % W
    rows = []
    for kh in range(3):
        for kw in range(3):
            dh, dw = kh - 1, kw - 1
            rows.append((hh + dh >= 0) & (hh + dh < H)
                        & (ww + dw >= 0) & (ww + dw < W))
    return jnp.tile(jnp.stack(rows).astype(jnp.float32), (1, bt))


def residual_dense_block_5c(x_nchw, params, *, nf=32, gc=16, max_batch_tile=4):
    """Forward pass matching the PyTorch module; x_nchw: (N, nf, H, W) f32."""
    N, C, H, W = x_nchw.shape
    assert C == nf
    HW = H * W
    ctot = nf + 4 * gc

    # Fold Bt images into the lane axis per grid step.
    bt = min(N, max_batch_tile)
    while N % bt:
        bt -= 1
    L = bt * HW
    assert bt == N or (L % 128 == 0 and nf % 8 == 0), (
        "batch-tiled blocks need lane width % 128 == 0 and nf % 8 == 0")

    masks = _border_masks(H, W, bt)                            # (9, L) f32

    packed = []
    for w, b in params:
        cout = w.shape[0]
        packed.append(_pack_weight_stacked(w))                 # (9*cout, cin) bf16
        packed.append(jnp.broadcast_to(                        # (cout, L) f32
            b.astype(jnp.float32).reshape(cout, 1), (cout, L)))

    # Channel-major layout with batch folded onto the lane axis: (nf, N*HW).
    x2d = jnp.transpose(x_nchw.reshape(N, nf, HW), (1, 0, 2)).reshape(nf, N * HW)

    def const_spec(shape):            # grid-invariant operand (loaded once)
        return pl.BlockSpec(shape, lambda g: (0,) * len(shape))

    in_specs = [pl.BlockSpec((nf, L), lambda g: (0, g)),
                const_spec(masks.shape)]
    in_specs += [const_spec(a.shape) for a in packed]

    kernel = functools.partial(_rdb5c_kernel, nf=nf, gc=gc, W=W, L=L)
    out2d = pl.pallas_call(
        kernel,
        out_shape=jax.ShapeDtypeStruct((nf, N * HW), x_nchw.dtype),
        grid_spec=pltpu.PrefetchScalarGridSpec(
            num_scalar_prefetch=0,
            grid=(N // bt,),
            in_specs=in_specs,
            out_specs=pl.BlockSpec((nf, L), lambda g: (0, g)),
            scratch_shapes=[pltpu.VMEM((ctot, L), jnp.bfloat16)],
        ),
        compiler_params=pltpu.CompilerParams(
            dimension_semantics=("parallel",)),
    )(x2d, masks, *packed)

    return jnp.transpose(out2d.reshape(nf, N, HW),
                         (1, 0, 2)).reshape(N, nf, H, W)


# ------------------------------ params / reference ---------------------------


def init_params(key, nf=32, gc=16):
    """PyTorch-default-style init, weights in OIHW (Cout, Cin, 3, 3)."""
    shapes = [(gc, nf), (gc, nf + gc), (gc, nf + 2 * gc), (gc, nf + 3 * gc),
              (nf, nf + 4 * gc)]
    keys = jax.random.split(key, 2 * len(shapes))
    params = []
    for i, (cout, cin) in enumerate(shapes):
        bound = 1.0 / (cin * 9) ** 0.5
        w = jax.random.uniform(keys[2 * i], (cout, cin, 3, 3), jnp.float32,
                               -bound, bound)
        b = jax.random.uniform(keys[2 * i + 1], (cout,), jnp.float32,
                               -bound, bound)
        params.append((w, b))
    return params


def ref_forward(x, params):
    def conv(v, w, b):
        y = jax.lax.conv_general_dilated(
            v, w, window_strides=(1, 1), padding=((1, 1), (1, 1)),
            dimension_numbers=("NCHW", "OIHW", "NCHW"),
            precision=jax.lax.Precision.HIGHEST)
        return y + b[None, :, None, None]

    lrelu = lambda v: jnp.where(v >= 0, v, 0.2 * v)
    (w1, b1), (w2, b2), (w3, b3), (w4, b4), (w5, b5) = params
    x1 = lrelu(conv(x, w1, b1))
    x2 = lrelu(conv(jnp.concatenate([x, x1], 1), w2, b2))
    x3 = lrelu(conv(jnp.concatenate([x, x1, x2], 1), w3, b3))
    x4 = lrelu(conv(jnp.concatenate([x, x1, x2, x3], 1), w4, b4))
    x5 = conv(jnp.concatenate([x, x1, x2, x3, x4], 1), w5, b5)
    return x5 * 0.2 + x


# ----------------------------------- main ------------------------------------

if __name__ == "__main__":
    nf, gc = 32, 16
    N, H, W = 2, 16, 16

    key = jax.random.PRNGKey(0)
    kx, kp = jax.random.split(key)
    x = jax.random.normal(kx, (N, nf, H, W), jnp.float32)   # PyTorch NCHW
    params = init_params(kp, nf=nf, gc=gc)

    fwd = jax.jit(functools.partial(residual_dense_block_5c, nf=nf, gc=gc))
    out = jax.block_until_ready(fwd(x, params))
    assert out.shape == (N, nf, H, W), out.shape

    ref = jax.block_until_ready(ref_forward(x, params))
    # bf16 MXU inputs with f32 accumulation vs. an f32-HIGHEST reference.
    max_err = float(jnp.max(jnp.abs(out - ref)))
    assert jnp.allclose(out, ref, atol=3e-2, rtol=3e-2), max_err

    print("KERNEL_OK")
</pallas_src>

<mosaic_0001>
module attributes {stable_mosaic.version = 11 : i64} {
  func.func @_rdb5c_kernel(%arg0: i32, %arg1: memref<32x512xf32, #tpu.memory_space<vmem>>, %arg2: memref<9x512xf32, #tpu.memory_space<vmem>>, %arg3: memref<144x32xbf16, #tpu.memory_space<vmem>>, %arg4: memref<16x512xf32, #tpu.memory_space<vmem>>, %arg5: memref<144x48xbf16, #tpu.memory_space<vmem>>, %arg6: memref<16x512xf32, #tpu.memory_space<vmem>>, %arg7: memref<144x64xbf16, #tpu.memory_space<vmem>>, %arg8: memref<16x512xf32, #tpu.memory_space<vmem>>, %arg9: memref<144x80xbf16, #tpu.memory_space<vmem>>, %arg10: memref<16x512xf32, #tpu.memory_space<vmem>>, %arg11: memref<288x96xbf16, #tpu.memory_space<vmem>>, %arg12: memref<32x512xf32, #tpu.memory_space<vmem>>, %arg13: memref<32x512xf32, #tpu.memory_space<vmem>>, %arg14: memref<96x512xbf16, #tpu.memory_space<vmem>>) attributes {dimension_semantics = [#tpu.dimension_semantics<parallel>], iteration_bounds = array<i64: 1>, scalar_prefetch = 0 : i64, scratch_operands = 1 : i64, tpu.core_type = #tpu.core_type<tc>, window_params = [{transform_indices = @transform_0, window_bounds = array<i64: 32, 512>}, {pipeline_mode = #tpu.pipeline_mode<synchronous>, transform_indices = @transform_1, window_bounds = array<i64: 9, 512>}, {pipeline_mode = #tpu.pipeline_mode<synchronous>, transform_indices = @transform_2, window_bounds = array<i64: 144, 32>}, {pipeline_mode = #tpu.pipeline_mode<synchronous>, transform_indices = @transform_3, window_bounds = array<i64: 16, 512>}, {pipeline_mode = #tpu.pipeline_mode<synchronous>, transform_indices = @transform_4, window_bounds = array<i64: 144, 48>}, {pipeline_mode = #tpu.pipeline_mode<synchronous>, transform_indices = @transform_5, window_bounds = array<i64: 16, 512>}, {pipeline_mode = #tpu.pipeline_mode<synchronous>, transform_indices = @transform_6, window_bounds = array<i64: 144, 64>}, {pipeline_mode = #tpu.pipeline_mode<synchronous>, transform_indices = @transform_7, window_bounds = array<i64: 16, 512>}, {pipeline_mode = #tpu.pipeline_mode<synchronous>, transform_indices = @transform_8, window_bounds = array<i64: 144, 80>}, {pipeline_mode = #tpu.pipeline_mode<synchronous>, transform_indices = @transform_9, window_bounds = array<i64: 16, 512>}, {pipeline_mode = #tpu.pipeline_mode<synchronous>, transform_indices = @transform_10, window_bounds = array<i64: 288, 96>}, {pipeline_mode = #tpu.pipeline_mode<synchronous>, transform_indices = @transform_11, window_bounds = array<i64: 32, 512>}, {transform_indices = @transform_12, window_bounds = array<i64: 32, 512>}]} {
    %c0 = arith.constant 0 : index
    %c0_0 = arith.constant 0 : index
    %0 = vector.load %arg1[%c0, %c0_0] : memref<32x512xf32, #tpu.memory_space<vmem>>, vector<32x512xf32>
    %1 = arith.truncf %0 : vector<32x512xf32> to vector<32x512xbf16>
    %c0_1 = arith.constant 0 : index
    %c0_2 = arith.constant 0 : index
    %2 = vector.load %arg14[%c0_1, %c0_2] : memref<96x512xbf16, #tpu.memory_space<vmem>>, vector<32x512xbf16>
    tpu.vector_store %arg14[%c0_1, %c0_2], %1 {strides = array<i32>} : memref<96x512xbf16, #tpu.memory_space<vmem>>, vector<32x512xbf16>,
    %c0_3 = arith.constant 0 : index
    %c0_4 = arith.constant 0 : index
    %3 = vector.load %arg14[%c0_3, %c0_4] : memref<96x512xbf16, #tpu.memory_space<vmem>>, vector<32x512xbf16>
    %c0_5 = arith.constant 0 : index
    %c0_6 = arith.constant 0 : index
    %4 = vector.load %arg4[%c0_5, %c0_6] : memref<16x512xf32, #tpu.memory_space<vmem>>, vector<16x512xf32>
    %c64 = arith.constant 64 : index
    %c0_7 = arith.constant 0 : index
    %5 = vector.load %arg3[%c64, %c0_7] : memref<144x32xbf16, #tpu.memory_space<vmem>>, vector<16x32xbf16>
    %cst = arith.constant dense<0.000000e+00> : vector<16x512xf32>
    %6 = tpu.matmul %5, %3, %cst {dimension_numbers = #tpu.dot_dimension_numbers<[1], [0], [0], [1], [0, 0, 1, 1], [], []>} : vector<16x32xbf16>, vector<32x512xbf16>, vector<16x512xf32> -> vector<16x512xf32>
    %7 = arith.addf %4, %6 : vector<16x512xf32>
    %c0_8 = arith.constant 0 : index
    %c0_9 = arith.constant 0 : index
    %8 = vector.load %arg3[%c0_8, %c0_9] : memref<144x32xbf16, #tpu.memory_space<vmem>>, vector<16x32xbf16>
    %cst_10 = arith.constant dense<0.000000e+00> : vector<16x512xf32>
    %9 = tpu.matmul %8, %3, %cst_10 {dimension_numbers = #tpu.dot_dimension_numbers<[1], [0], [0], [1], [0, 0, 1, 1], [], []>} : vector<16x32xbf16>, vector<32x512xbf16>, vector<16x512xf32> -> vector<16x512xf32>
    %c17_i32 = arith.constant 17 : i32
    %10 = tpu.dynamic_rotate %9 by %c17_i32 dim 1 : vector<16x512xf32>, i32 -> vector<16x512xf32>
    %c0_11 = arith.constant 0 : index
    %c0_12 = arith.constant 0 : index
    %11 = vector.load %arg2[%c0_11, %c0_12] : memref<9x512xf32, #tpu.memory_space<vmem>>, vector<1x512xf32>
    %12 = vector.broadcast %11 : vector<1x512xf32> to vector<16x512xf32>
    %13 = arith.mulf %12, %10 : vector<16x512xf32>
    %14 = arith.addf %7, %13 : vector<16x512xf32>
    %c16 = arith.constant 16 : index
    %c0_13 = arith.constant 0 : index
    %15 = vector.load %arg3[%c16, %c0_13] : memref<144x32xbf16, #tpu.memory_space<vmem>>, vector<16x32xbf16>
    %cst_14 = arith.constant dense<0.000000e+00> : vector<16x512xf32>
    %16 = tpu.matmul %15, %3, %cst_14 {dimension_numbers = #tpu.dot_dimension_numbers<[1], [0], [0], [1], [0, 0, 1, 1], [], []>} : vector<16x32xbf16>, vector<32x512xbf16>, vector<16x512xf32> -> vector<16x512xf32>
    %c16_i32 = arith.constant 16 : i32
    %17 = tpu.dynamic_rotate %16 by %c16_i32 dim 1 : vector<16x512xf32>, i32 -> vector<16x512xf32>
    %c1 = arith.constant 1 : index
    %c0_15 = arith.constant 0 : index
    %18 = vector.load %arg2[%c1, %c0_15] : memref<9x512xf32, #tpu.memory_space<vmem>>, vector<1x512xf32>
    %19 = vector.broadcast %18 : vector<1x512xf32> to vector<16x512xf32>
    %20 = arith.mulf %19, %17 : vector<16x512xf32>
    %21 = arith.addf %14, %20 : vector<16x512xf32>
    %c32 = arith.constant 32 : index
    %c0_16 = arith.constant 0 : index
    %22 = vector.load %arg3[%c32, %c0_16] : memref<144x32xbf16, #tpu.memory_space<vmem>>, vector<16x32xbf16>
    %cst_17 = arith.constant dense<0.000000e+00> : vector<16x512xf32>
    %23 = tpu.matmul %22, %3, %cst_17 {dimension_numbers = #tpu.dot_dimension_numbers<[1], [0], [0], [1], [0, 0, 1, 1], [], []>} : vector<16x32xbf16>, vector<32x512xbf16>, vector<16x512xf32> -> vector<16x512xf32>
    %c15_i32 = arith.constant 15 : i32
    %24 = tpu.dynamic_rotate %23 by %c15_i32 dim 1 : vector<16x512xf32>, i32 -> vector<16x512xf32>
    %c2 = arith.constant 2 : index
    %c0_18 = arith.constant 0 : index
    %25 = vector.load %arg2[%c2, %c0_18] : memref<9x512xf32, #tpu.memory_space<vmem>>, vector<1x512xf32>
    %26 = vector.broadcast %25 : vector<1x512xf32> to vector<16x512xf32>
    %27 = arith.mulf %26, %24 : vector<16x512xf32>
    %28 = arith.addf %21, %27 : vector<16x512xf32>
    %c48 = arith.constant 48 : index
    %c0_19 = arith.constant 0 : index
    %29 = vector.load %arg3[%c48, %c0_19] : memref<144x32xbf16, #tpu.memory_space<vmem>>, vector<16x32xbf16>
    %cst_20 = arith.constant dense<0.000000e+00> : vector<16x512xf32>
    %30 = tpu.matmul %29, %3, %cst_20 {dimension_numbers = #tpu.dot_dimension_numbers<[1], [0], [0], [1], [0, 0, 1, 1], [], []>} : vector<16x32xbf16>, vector<32x512xbf16>, vector<16x512xf32> -> vector<16x512xf32>
    %c1_i32 = arith.constant 1 : i32
    %31 = tpu.dynamic_rotate %30 by %c1_i32 dim 1 : vector<16x512xf32>, i32 -> vector<16x512xf32>
    %c3 = arith.constant 3 : index
    %c0_21 = arith.constant 0 : index
    %32 = vector.load %arg2[%c3, %c0_21] : memref<9x512xf32, #tpu.memory_space<vmem>>, vector<1x512xf32>
    %33 = vector.broadcast %32 : vector<1x512xf32> to vector<16x512xf32>
    %34 = arith.mulf %33, %31 : vector<16x512xf32>
    %35 = arith.addf %28, %34 : vector<16x512xf32>
    %c80 = arith.constant 80 : index
    %c0_22 = arith.constant 0 : index
    %36 = vector.load %arg3[%c80, %c0_22] : memref<144x32xbf16, #tpu.memory_space<vmem>>, vector<16x32xbf16>
    %cst_23 = arith.constant dense<0.000000e+00> : vector<16x512xf32>
    %37 = tpu.matmul %36, %3, %cst_23 {dimension_numbers = #tpu.dot_dimension_numbers<[1], [0], [0], [1], [0, 0, 1, 1], [], []>} : vector<16x32xbf16>, vector<32x512xbf16>, vector<16x512xf32> -> vector<16x512xf32>
    %c511_i32 = arith.constant 511 : i32
    %38 = tpu.dynamic_rotate %37 by %c511_i32 dim 1 : vector<16x512xf32>, i32 -> vector<16x512xf32>
    %c5 = arith.constant 5 : index
    %c0_24 = arith.constant 0 : index
    %39 = vector.load %arg2[%c5, %c0_24] : memref<9x512xf32, #tpu.memory_space<vmem>>, vector<1x512xf32>
    %40 = vector.broadcast %39 : vector<1x512xf32> to vector<16x512xf32>
    %41 = arith.mulf %40, %38 : vector<16x512xf32>
    %42 = arith.addf %35, %41 : vector<16x512xf32>
    %c96 = arith.constant 96 : index
    %c0_25 = arith.constant 0 : index
    %43 = vector.load %arg3[%c96, %c0_25] : memref<144x32xbf16, #tpu.memory_space<vmem>>, vector<16x32xbf16>
    %cst_26 = arith.constant dense<0.000000e+00> : vector<16x512xf32>
    %44 = tpu.matmul %43, %3, %cst_26 {dimension_numbers = #tpu.dot_dimension_numbers<[1], [0], [0], [1], [0, 0, 1, 1], [], []>} : vector<16x32xbf16>, vector<32x512xbf16>, vector<16x512xf32> -> vector<16x512xf32>
    %c497_i32 = arith.constant 497 : i32
    %45 = tpu.dynamic_rotate %44 by %c497_i32 dim 1 : vector<16x512xf32>, i32 -> vector<16x512xf32>
    %c6 = arith.constant 6 : index
    %c0_27 = arith.constant 0 : index
    %46 = vector.load %arg2[%c6, %c0_27] : memref<9x512xf32, #tpu.memory_space<vmem>>, vector<1x512xf32>
    %47 = vector.broadcast %46 : vector<1x512xf32> to vector<16x512xf32>
    %48 = arith.mulf %47, %45 : vector<16x512xf32>
    %49 = arith.addf %42, %48 : vector<16x512xf32>
    %c112 = arith.constant 112 : index
    %c0_28 = arith.constant 0 : index
    %50 = vector.load %arg3[%c112, %c0_28] : memref<144x32xbf16, #tpu.memory_space<vmem>>, vector<16x32xbf16>
    %cst_29 = arith.constant dense<0.000000e+00> : vector<16x512xf32>
    %51 = tpu.matmul %50, %3, %cst_29 {dimension_numbers = #tpu.dot_dimension_numbers<[1], [0], [0], [1], [0, 0, 1, 1], [], []>} : vector<16x32xbf16>, vector<32x512xbf16>, vector<16x512xf32> -> vector<16x512xf32>
    %c496_i32 = arith.constant 496 : i32
    %52 = tpu.dynamic_rotate %51 by %c496_i32 dim 1 : vector<16x512xf32>, i32 -> vector<16x512xf32>
    %c7 = arith.constant 7 : index
    %c0_30 = arith.constant 0 : index
    %53 = vector.load %arg2[%c7, %c0_30] : memref<9x512xf32, #tpu.memory_space<vmem>>, vector<1x512xf32>
    %54 = vector.broadcast %53 : vector<1x512xf32> to vector<16x512xf32>
    %55 = arith.mulf %54, %52 : vector<16x512xf32>
    %56 = arith.addf %49, %55 : vector<16x512xf32>
    %c128 = arith.constant 128 : index
    %c0_31 = arith.constant 0 : index
    %57 = vector.load %arg3[%c128, %c0_31] : memref<144x32xbf16, #tpu.memory_space<vmem>>, vector<16x32xbf16>
    %cst_32 = arith.constant dense<0.000000e+00> : vector<16x512xf32>
    %58 = tpu.matmul %57, %3, %cst_32 {dimension_numbers = #tpu.dot_dimension_numbers<[1], [0], [0], [1], [0, 0, 1, 1], [], []>} : vector<16x32xbf16>, vector<32x512xbf16>, vector<16x512xf32> -> vector<16x512xf32>
    %c495_i32 = arith.constant 495 : i32
    %59 = tpu.dynamic_rotate %58 by %c495_i32 dim 1 : vector<16x512xf32>, i32 -> vector<16x512xf32>
    %c8 = arith.constant 8 : index
    %c0_33 = arith.constant 0 : index
    %60 = vector.load %arg2[%c8, %c0_33] : memref<9x512xf32, #tpu.memory_space<vmem>>, vector<1x512xf32>
    %61 = vector.broadcast %60 : vector<1x512xf32> to vector<16x512xf32>
    %62 = arith.mulf %61, %59 : vector<16x512xf32>
    %63 = arith.addf %56, %62 : vector<16x512xf32>
    %cst_34 = arith.constant 2.000000e-01 : f32
    %64 = vector.broadcast %cst_34 : f32 to vector<16x512xf32>
    %65 = arith.mulf %64, %63 : vector<16x512xf32>
    %66 = arith.maximumf %63, %65 : vector<16x512xf32>
    %67 = arith.truncf %66 : vector<16x512xf32> to vector<16x512xbf16>
    %c32_35 = arith.constant 32 : index
    %c0_36 = arith.constant 0 : index
    %68 = vector.load %arg14[%c32_35, %c0_36] : memref<96x512xbf16, #tpu.memory_space<vmem>>, vector<16x512xbf16>
    tpu.vector_store %arg14[%c32_35, %c0_36], %67 {strides = array<i32>} : memref<96x512xbf16, #tpu.memory_space<vmem>>, vector<16x512xbf16>,
    %c0_37 = arith.constant 0 : index
    %c0_38 = arith.constant 0 : index
    %69 = vector.load %arg14[%c0_37, %c0_38] : memref<96x512xbf16, #tpu.memory_space<vmem>>, vector<48x512xbf16>
    %c0_39 = arith.constant 0 : index
    %c0_40 = arith.constant 0 : index
    %70 = vector.load %arg6[%c0_39, %c0_40] : memref<16x512xf32, #tpu.memory_space<vmem>>, vector<16x512xf32>
    %c64_41 = arith.constant 64 : index
    %c0_42 = arith.constant 0 : index
    %71 = vector.load %arg5[%c64_41, %c0_42] : memref<144x48xbf16, #tpu.memory_space<vmem>>, vector<16x48xbf16>
    %cst_43 = arith.constant dense<0.000000e+00> : vector<16x512xf32>
    %72 = tpu.matmul %71, %69, %cst_43 {dimension_numbers = #tpu.dot_dimension_numbers<[1], [0], [0], [1], [0, 0, 1, 1], [], []>} : vector<16x48xbf16>, vector<48x512xbf16>, vector<16x512xf32> -> vector<16x512xf32>
    %73 = arith.addf %70, %72 : vector<16x512xf32>
    %c0_44 = arith.constant 0 : index
    %c0_45 = arith.constant 0 : index
    %74 = vector.load %arg5[%c0_44, %c0_45] : memref<144x48xbf16, #tpu.memory_space<vmem>>, vector<16x48xbf16>
    %cst_46 = arith.constant dense<0.000000e+00> : vector<16x512xf32>
    %75 = tpu.matmul %74, %69, %cst_46 {dimension_numbers = #tpu.dot_dimension_numbers<[1], [0], [0], [1], [0, 0, 1, 1], [], []>} : vector<16x48xbf16>, vector<48x512xbf16>, vector<16x512xf32> -> vector<16x512xf32>
    %c17_i32_47 = arith.constant 17 : i32
    %76 = tpu.dynamic_rotate %75 by %c17_i32_47 dim 1 : vector<16x512xf32>, i32 -> vector<16x512xf32>
    %c0_48 = arith.constant 0 : index
    %c0_49 = arith.constant 0 : index
    %77 = vector.load %arg2[%c0_48, %c0_49] : memref<9x512xf32, #tpu.memory_space<vmem>>, vector<1x512xf32>
    %78 = vector.broadcast %77 : vector<1x512xf32> to vector<16x512xf32>
    %79 = arith.mulf %78, %76 : vector<16x512xf32>
    %80 = arith.addf %73, %79 : vector<16x512xf32>
    %c16_50 = arith.constant 16 : index
    %c0_51 = arith.constant 0 : index
    %81 = vector.load %arg5[%c16_50, %c0_51] : memref<144x48xbf16, #tpu.memory_space<vmem>>, vector<16x48xbf16>
    %cst_52 = arith.constant dense<0.000000e+00> : vector<16x512xf32>
    %82 = tpu.matmul %81, %69, %cst_52 {dimension_numbers = #tpu.dot_dimension_numbers<[1], [0], [0], [1], [0, 0, 1, 1], [], []>} : vector<16x48xbf16>, vector<48x512xbf16>, vector<16x512xf32> -> vector<16x512xf32>
    %c16_i32_53 = arith.constant 16 : i32
    %83 = tpu.dynamic_rotate %82 by %c16_i32_53 dim 1 : vector<16x512xf32>, i32 -> vector<16x512xf32>
    %c1_54 = arith.constant 1 : index
    %c0_55 = arith.constant 0 : index
    %84 = vector.load %arg2[%c1_54, %c0_55] : memref<9x512xf32, #tpu.memory_space<vmem>>, vector<1x512xf32>
    %85 = vector.broadcast %84 : vector<1x512xf32> to vector<16x512xf32>
    %86 = arith.mulf %85, %83 : vector<16x512xf32>
    %87 = arith.addf %80, %86 : vector<16x512xf32>
    %c32_56 = arith.constant 32 : index
    %c0_57 = arith.constant 0 : index
    %88 = vector.load %arg5[%c32_56, %c0_57] : memref<144x48xbf16, #tpu.memory_space<vmem>>, vector<16x48xbf16>
    %cst_58 = arith.constant dense<0.000000e+00> : vector<16x512xf32>
    %89 = tpu.matmul %88, %69, %cst_58 {dimension_numbers = #tpu.dot_dimension_numbers<[1], [0], [0], [1], [0, 0, 1, 1], [], []>} : vector<16x48xbf16>, vector<48x512xbf16>, vector<16x512xf32> -> vector<16x512xf32>
    %c15_i32_59 = arith.constant 15 : i32
    %90 = tpu.dynamic_rotate %89 by %c15_i32_59 dim 1 : vector<16x512xf32>, i32 -> vector<16x512xf32>
    %c2_60 = arith.constant 2 : index
    %c0_61 = arith.constant 0 : index
    %91 = vector.load %arg2[%c2_60, %c0_61] : memref<9x512xf32, #tpu.memory_space<vmem>>, vector<1x512xf32>
    %92 = vector.broadcast %91 : vector<1x512xf32> to vector<16x512xf32>
    %93 = arith.mulf %92, %90 : vector<16x512xf32>
    %94 = arith.addf %87, %93 : vector<16x512xf32>
    %c48_62 = arith.constant 48 : index
    %c0_63 = arith.constant 0 : index
    %95 = vector.load %arg5[%c48_62, %c0_63] : memref<144x48xbf16, #tpu.memory_space<vmem>>, vector<16x48xbf16>
    %cst_64 = arith.constant dense<0.000000e+00> : vector<16x512xf32>
    %96 = tpu.matmul %95, %69, %cst_64 {dimension_numbers = #tpu.dot_dimension_numbers<[1], [0], [0], [1], [0, 0, 1, 1], [], []>} : vector<16x48xbf16>, vector<48x512xbf16>, vector<16x512xf32> -> vector<16x512xf32>
    %c1_i32_65 = arith.constant 1 : i32
    %97 = tpu.dynamic_rotate %96 by %c1_i32_65 dim 1 : vector<16x512xf32>, i32 -> vector<16x512xf32>
    %c3_66 = arith.constant 3 : index
    %c0_67 = arith.constant 0 : index
    %98 = vector.load %arg2[%c3_66, %c0_67] : memref<9x512xf32, #tpu.memory_space<vmem>>, vector<1x512xf32>
    %99 = vector.broadcast %98 : vector<1x512xf32> to vector<16x512xf32>
    %100 = arith.mulf %99, %97 : vector<16x512xf32>
    %101 = arith.addf %94, %100 : vector<16x512xf32>
    %c80_68 = arith.constant 80 : index
    %c0_69 = arith.constant 0 : index
    %102 = vector.load %arg5[%c80_68, %c0_69] : memref<144x48xbf16, #tpu.memory_space<vmem>>, vector<16x48xbf16>
    %cst_70 = arith.constant dense<0.000000e+00> : vector<16x512xf32>
    %103 = tpu.matmul %102, %69, %cst_70 {dimension_numbers = #tpu.dot_dimension_numbers<[1], [0], [0], [1], [0, 0, 1, 1], [], []>} : vector<16x48xbf16>, vector<48x512xbf16>, vector<16x512xf32> -> vector<16x512xf32>
    %c511_i32_71 = arith.constant 511 : i32
    %104 = tpu.dynamic_rotate %103 by %c511_i32_71 dim 1 : vector<16x512xf32>, i32 -> vector<16x512xf32>
    %c5_72 = arith.constant 5 : index
    %c0_73 = arith.constant 0 : index
    %105 = vector.load %arg2[%c5_72, %c0_73] : memref<9x512xf32, #tpu.memory_space<vmem>>, vector<1x512xf32>
    %106 = vector.broadcast %105 : vector<1x512xf32> to vector<16x512xf32>
    %107 = arith.mulf %106, %104 : vector<16x512xf32>
    %108 = arith.addf %101, %107 : vector<16x512xf32>
    %c96_74 = arith.constant 96 : index
    %c0_75 = arith.constant 0 : index
    %109 = vector.load %arg5[%c96_74, %c0_75] : memref<144x48xbf16, #tpu.memory_space<vmem>>, vector<16x48xbf16>
    %cst_76 = arith.constant dense<0.000000e+00> : vector<16x512xf32>
    %110 = tpu.matmul %109, %69, %cst_76 {dimension_numbers = #tpu.dot_dimension_numbers<[1], [0], [0], [1], [0, 0, 1, 1], [], []>} : vector<16x48xbf16>, vector<48x512xbf16>, vector<16x512xf32> -> vector<16x512xf32>
    %c497_i32_77 = arith.constant 497 : i32
    %111 = tpu.dynamic_rotate %110 by %c497_i32_77 dim 1 : vector<16x512xf32>, i32 -> vector<16x512xf32>
    %c6_78 = arith.constant 6 : index
    %c0_79 = arith.constant 0 : index
    %112 = vector.load %arg2[%c6_78, %c0_79] : memref<9x512xf32, #tpu.memory_space<vmem>>, vector<1x512xf32>
    %113 = vector.broadcast %112 : vector<1x512xf32> to vector<16x512xf32>
    %114 = arith.mulf %113, %111 : vector<16x512xf32>
    %115 = arith.addf %108, %114 : vector<16x512xf32>
    %c112_80 = arith.constant 112 : index
    %c0_81 = arith.constant 0 : index
    %116 = vector.load %arg5[%c112_80, %c0_81] : memref<144x48xbf16, #tpu.memory_space<vmem>>, vector<16x48xbf16>
    %cst_82 = arith.constant dense<0.000000e+00> : vector<16x512xf32>
    %117 = tpu.matmul %116, %69, %cst_82 {dimension_numbers = #tpu.dot_dimension_numbers<[1], [0], [0], [1], [0, 0, 1, 1], [], []>} : vector<16x48xbf16>, vector<48x512xbf16>, vector<16x512xf32> -> vector<16x512xf32>
    %c496_i32_83 = arith.constant 496 : i32
    %118 = tpu.dynamic_rotate %117 by %c496_i32_83 dim 1 : vector<16x512xf32>, i32 -> vector<16x512xf32>
    %c7_84 = arith.constant 7 : index
    %c0_85 = arith.constant 0 : index
    %119 = vector.load %arg2[%c7_84, %c0_85] : memref<9x512xf32, #tpu.memory_space<vmem>>, vector<1x512xf32>
    %120 = vector.broadcast %119 : vector<1x512xf32> to vector<16x512xf32>
    %121 = arith.mulf %120, %118 : vector<16x512xf32>
    %122 = arith.addf %115, %121 : vector<16x512xf32>
    %c128_86 = arith.constant 128 : index
    %c0_87 = arith.constant 0 : index
    %123 = vector.load %arg5[%c128_86, %c0_87] : memref<144x48xbf16, #tpu.memory_space<vmem>>, vector<16x48xbf16>
    %cst_88 = arith.constant dense<0.000000e+00> : vector<16x512xf32>
    %124 = tpu.matmul %123, %69, %cst_88 {dimension_numbers = #tpu.dot_dimension_numbers<[1], [0], [0], [1], [0, 0, 1, 1], [], []>} : vector<16x48xbf16>, vector<48x512xbf16>, vector<16x512xf32> -> vector<16x512xf32>
    %c495_i32_89 = arith.constant 495 : i32
    %125 = tpu.dynamic_rotate %124 by %c495_i32_89 dim 1 : vector<16x512xf32>, i32 -> vector<16x512xf32>
    %c8_90 = arith.constant 8 : index
    %c0_91 = arith.constant 0 : index
    %126 = vector.load %arg2[%c8_90, %c0_91] : memref<9x512xf32, #tpu.memory_space<vmem>>, vector<1x512xf32>
    %127 = vector.broadcast %126 : vector<1x512xf32> to vector<16x512xf32>
    %128 = arith.mulf %127, %125 : vector<16x512xf32>
    %129 = arith.addf %122, %128 : vector<16x512xf32>
    %cst_92 = arith.constant 2.000000e-01 : f32
    %130 = vector.broadcast %cst_92 : f32 to vector<16x512xf32>
    %131 = arith.mulf %130, %129 : vector<16x512xf32>
    %132 = arith.maximumf %129, %131 : vector<16x512xf32>
    %133 = arith.truncf %132 : vector<16x512xf32> to vector<16x512xbf16>
    %c48_93 = arith.constant 48 : index
    %c0_94 = arith.constant 0 : index
    %134 = vector.load %arg14[%c48_93, %c0_94] : memref<96x512xbf16, #tpu.memory_space<vmem>>, vector<16x512xbf16>
    tpu.vector_store %arg14[%c48_93, %c0_94], %133 {strides = array<i32>} : memref<96x512xbf16, #tpu.memory_space<vmem>>, vector<16x512xbf16>,
    %c0_95 = arith.constant 0 : index
    %c0_96 = arith.constant 0 : index
    %135 = vector.load %arg14[%c0_95, %c0_96] : memref<96x512xbf16, #tpu.memory_space<vmem>>, vector<64x512xbf16>
    %c0_97 = arith.constant 0 : index
    %c0_98 = arith.constant 0 : index
    %136 = vector.load %arg8[%c0_97, %c0_98] : memref<16x512xf32, #tpu.memory_space<vmem>>, vector<16x512xf32>
    %c64_99 = arith.constant 64 : index
    %c0_100 = arith.constant 0 : index
    %137 = vector.load %arg7[%c64_99, %c0_100] : memref<144x64xbf16, #tpu.memory_space<vmem>>, vector<16x64xbf16>
    %cst_101 = arith.constant dense<0.000000e+00> : vector<16x512xf32>
    %138 = tpu.matmul %137, %135, %cst_101 {dimension_numbers = #tpu.dot_dimension_numbers<[1], [0], [0], [1], [0, 0, 1, 1], [], []>} : vector<16x64xbf16>, vector<64x512xbf16>, vector<16x512xf32> -> vector<16x512xf32>
    %139 = arith.addf %136, %138 : vector<16x512xf32>
    %c0_102 = arith.constant 0 : index
    %c0_103 = arith.constant 0 : index
    %140 = vector.load %arg7[%c0_102, %c0_103] : memref<144x64xbf16, #tpu.memory_space<vmem>>, vector<16x64xbf16>
    %cst_104 = arith.constant dense<0.000000e+00> : vector<16x512xf32>
    %141 = tpu.matmul %140, %135, %cst_104 {dimension_numbers = #tpu.dot_dimension_numbers<[1], [0], [0], [1], [0, 0, 1, 1], [], []>} : vector<16x64xbf16>, vector<64x512xbf16>, vector<16x512xf32> -> vector<16x512xf32>
    %c17_i32_105 = arith.constant 17 : i32
    %142 = tpu.dynamic_rotate %141 by %c17_i32_105 dim 1 : vector<16x512xf32>, i32 -> vector<16x512xf32>
    %c0_106 = arith.constant 0 : index
    %c0_107 = arith.constant 0 : index
    %143 = vector.load %arg2[%c0_106, %c0_107] : memref<9x512xf32, #tpu.memory_space<vmem>>, vector<1x512xf32>
    %144 = vector.broadcast %143 : vector<1x512xf32> to vector<16x512xf32>
    %145 = arith.mulf %144, %142 : vector<16x512xf32>
    %146 = arith.addf %139, %145 : vector<16x512xf32>
    %c16_108 = arith.constant 16 : index
    %c0_109 = arith.constant 0 : index
    %147 = vector.load %arg7[%c16_108, %c0_109] : memref<144x64xbf16, #tpu.memory_space<vmem>>, vector<16x64xbf16>
    %cst_110 = arith.constant dense<0.000000e+00> : vector<16x512xf32>
    %148 = tpu.matmul %147, %135, %cst_110 {dimension_numbers = #tpu.dot_dimension_numbers<[1], [0], [0], [1], [0, 0, 1, 1], [], []>} : vector<16x64xbf16>, vector<64x512xbf16>, vector<16x512xf32> -> vector<16x512xf32>
    %c16_i32_111 = arith.constant 16 : i32
    %149 = tpu.dynamic_rotate %148 by %c16_i32_111 dim 1 : vector<16x512xf32>, i32 -> vector<16x512xf32>
    %c1_112 = arith.constant 1 : index
    %c0_113 = arith.constant 0 : index
    %150 = vector.load %arg2[%c1_112, %c0_113] : memref<9x512xf32, #tpu.memory_space<vmem>>, vector<1x512xf32>
    %151 = vector.broadcast %150 : vector<1x512xf32> to vector<16x512xf32>
    %152 = arith.mulf %151, %149 : vector<16x512xf32>
    %153 = arith.addf %146, %152 : vector<16x512xf32>
    %c32_114 = arith.constant 32 : index
    %c0_115 = arith.constant 0 : index
    %154 = vector.load %arg7[%c32_114, %c0_115] : memref<144x64xbf16, #tpu.memory_space<vmem>>, vector<16x64xbf16>
    %cst_116 = arith.constant dense<0.000000e+00> : vector<16x512xf32>
    %155 = tpu.matmul %154, %135, %cst_116 {dimension_numbers = #tpu.dot_dimension_numbers<[1], [0], [0], [1], [0, 0, 1, 1], [], []>} : vector<16x64xbf16>, vector<64x512xbf16>, vector<16x512xf32> -> vector<16x512xf32>
    %c15_i32_117 = arith.constant 15 : i32
    %156 = tpu.dynamic_rotate %155 by %c15_i32_117 dim 1 : vector<16x512xf32>, i32 -> vector<16x512xf32>
    %c2_118 = arith.constant 2 : index
    %c0_119 = arith.constant 0 : index
    %157 = vector.load %arg2[%c2_118, %c0_119] : memref<9x512xf32, #tpu.memory_space<vmem>>, vector<1x512xf32>
    %158 = vector.broadcast %157 : vector<1x512xf32> to vector<16x512xf32>
    %159 = arith.mulf %158, %156 : vector<16x512xf32>
    %160 = arith.addf %153, %159 : vector<16x512xf32>
    %c48_120 = arith.constant 48 : index
    %c0_121 = arith.constant 0 : index
    %161 = vector.load %arg7[%c48_120, %c0_121] : memref<144x64xbf16, #tpu.memory_space<vmem>>, vector<16x64xbf16>
    %cst_122 = arith.constant dense<0.000000e+00> : vector<16x512xf32>
    %162 = tpu.matmul %161, %135, %cst_122 {dimension_numbers = #tpu.dot_dimension_numbers<[1], [0], [0], [1], [0, 0, 1, 1], [], []>} : vector<16x64xbf16>, vector<64x512xbf16>, vector<16x512xf32> -> vector<16x512xf32>
    %c1_i32_123 = arith.constant 1 : i32
    %163 = tpu.dynamic_rotate %162 by %c1_i32_123 dim 1 : vector<16x512xf32>, i32 -> vector<16x512xf32>
    %c3_124 = arith.constant 3 : index
    %c0_125 = arith.constant 0 : index
    %164 = vector.load %arg2[%c3_124, %c0_125] : memref<9x512xf32, #tpu.memory_space<vmem>>, vector<1x512xf32>
    %165 = vector.broadcast %164 : vector<1x512xf32> to vector<16x512xf32>
    %166 = arith.mulf %165, %163 : vector<16x512xf32>
    %167 = arith.addf %160, %166 : vector<16x512xf32>
    %c80_126 = arith.constant 80 : index
    %c0_127 = arith.constant 0 : index
    %168 = vector.load %arg7[%c80_126, %c0_127] : memref<144x64xbf16, #tpu.memory_space<vmem>>, vector<16x64xbf16>
    %cst_128 = arith.constant dense<0.000000e+00> : vector<16x512xf32>
    %169 = tpu.matmul %168, %135, %cst_128 {dimension_numbers = #tpu.dot_dimension_numbers<[1], [0], [0], [1], [0, 0, 1, 1], [], []>} : vector<16x64xbf16>, vector<64x512xbf16>, vector<16x512xf32> -> vector<16x512xf32>
    %c511_i32_129 = arith.constant 511 : i32
    %170 = tpu.dynamic_rotate %169 by %c511_i32_129 dim 1 : vector<16x512xf32>, i32 -> vector<16x512xf32>
    %c5_130 = arith.constant 5 : index
    %c0_131 = arith.constant 0 : index
    %171 = vector.load %arg2[%c5_130, %c0_131] : memref<9x512xf32, #tpu.memory_space<vmem>>, vector<1x512xf32>
    %172 = vector.broadcast %171 : vector<1x512xf32> to vector<16x512xf32>
    %173 = arith.mulf %172, %170 : vector<16x512xf32>
    %174 = arith.addf %167, %173 : vector<16x512xf32>
    %c96_132 = arith.constant 96 : index
    %c0_133 = arith.constant 0 : index
    %175 = vector.load %arg7[%c96_132, %c0_133] : memref<144x64xbf16, #tpu.memory_space<vmem>>, vector<16x64xbf16>
    %cst_134 = arith.constant dense<0.000000e+00> : vector<16x512xf32>
    %176 = tpu.matmul %175, %135, %cst_134 {dimension_numbers = #tpu.dot_dimension_numbers<[1], [0], [0], [1], [0, 0, 1, 1], [], []>} : vector<16x64xbf16>, vector<64x512xbf16>, vector<16x512xf32> -> vector<16x512xf32>
    %c497_i32_135 = arith.constant 497 : i32
    %177 = tpu.dynamic_rotate %176 by %c497_i32_135 dim 1 : vector<16x512xf32>, i32 -> vector<16x512xf32>
    %c6_136 = arith.constant 6 : index
    %c0_137 = arith.constant 0 : index
    %178 = vector.load %arg2[%c6_136, %c0_137] : memref<9x512xf32, #tpu.memory_space<vmem>>, vector<1x512xf32>
    %179 = vector.broadcast %178 : vector<1x512xf32> to vector<16x512xf32>
    %180 = arith.mulf %179, %177 : vector<16x512xf32>
    %181 = arith.addf %174, %180 : vector<16x512xf32>
    %c112_138 = arith.constant 112 : index
    %c0_139 = arith.constant 0 : index
    %182 = vector.load %arg7[%c112_138, %c0_139] : memref<144x64xbf16, #tpu.memory_space<vmem>>, vector<16x64xbf16>
    %cst_140 = arith.constant dense<0.000000e+00> : vector<16x512xf32>
    %183 = tpu.matmul %182, %135, %cst_140 {dimension_numbers = #tpu.dot_dimension_numbers<[1], [0], [0], [1], [0, 0, 1, 1], [], []>} : vector<16x64xbf16>, vector<64x512xbf16>, vector<16x512xf32> -> vector<16x512xf32>
    %c496_i32_141 = arith.constant 496 : i32
    %184 = tpu.dynamic_rotate %183 by %c496_i32_141 dim 1 : vector<16x512xf32>, i32 -> vector<16x512xf32>
    %c7_142 = arith.constant 7 : index
    %c0_143 = arith.constant 0 : index
    %185 = vector.load %arg2[%c7_142, %c0_143] : memref<9x512xf32, #tpu.memory_space<vmem>>, vector<1x512xf32>
    %186 = vector.broadcast %185 : vector<1x512xf32> to vector<16x512xf32>
    %187 = arith.mulf %186, %184 : vector<16x512xf32>
    %188 = arith.addf %181, %187 : vector<16x512xf32>
    %c128_144 = arith.constant 128 : index
    %c0_145 = arith.constant 0 : index
    %189 = vector.load %arg7[%c128_144, %c0_145] : memref<144x64xbf16, #tpu.memory_space<vmem>>, vector<16x64xbf16>
    %cst_146 = arith.constant dense<0.000000e+00> : vector<16x512xf32>
    %190 = tpu.matmul %189, %135, %cst_146 {dimension_numbers = #tpu.dot_dimension_numbers<[1], [0], [0], [1], [0, 0, 1, 1], [], []>} : vector<16x64xbf16>, vector<64x512xbf16>, vector<16x512xf32> -> vector<16x512xf32>
    %c495_i32_147 = arith.constant 495 : i32
    %191 = tpu.dynamic_rotate %190 by %c495_i32_147 dim 1 : vector<16x512xf32>, i32 -> vector<16x512xf32>
    %c8_148 = arith.constant 8 : index
    %c0_149 = arith.constant 0 : index
    %192 = vector.load %arg2[%c8_148, %c0_149] : memref<9x512xf32, #tpu.memory_space<vmem>>, vector<1x512xf32>
    %193 = vector.broadcast %192 : vector<1x512xf32> to vector<16x512xf32>
    %194 = arith.mulf %193, %191 : vector<16x512xf32>
    %195 = arith.addf %188, %194 : vector<16x512xf32>
    %cst_150 = arith.constant 2.000000e-01 : f32
    %196 = vector.broadcast %cst_150 : f32 to vector<16x512xf32>
    %197 = arith.mulf %196, %195 : vector<16x512xf32>
    %198 = arith.maximumf %195, %197 : vector<16x512xf32>
    %199 = arith.truncf %198 : vector<16x512xf32> to vector<16x512xbf16>
    %c64_151 = arith.constant 64 : index
    %c0_152 = arith.constant 0 : index
    %200 = vector.load %arg14[%c64_151, %c0_152] : memref<96x512xbf16, #tpu.memory_space<vmem>>, vector<16x512xbf16>
    tpu.vector_store %arg14[%c64_151, %c0_152], %199 {strides = array<i32>} : memref<96x512xbf16, #tpu.memory_space<vmem>>, vector<16x512xbf16>,
    %c0_153 = arith.constant 0 : index
    %c0_154 = arith.constant 0 : index
    %201 = vector.load %arg14[%c0_153, %c0_154] : memref<96x512xbf16, #tpu.memory_space<vmem>>, vector<80x512xbf16>
    %c0_155 = arith.constant 0 : index
    %c0_156 = arith.constant 0 : index
    %202 = vector.load %arg10[%c0_155, %c0_156] : memref<16x512xf32, #tpu.memory_space<vmem>>, vector<16x512xf32>
    %c64_157 = arith.constant 64 : index
    %c0_158 = arith.constant 0 : index
    %203 = vector.load %arg9[%c64_157, %c0_158] : memref<144x80xbf16, #tpu.memory_space<vmem>>, vector<16x80xbf16>
    %cst_159 = arith.constant dense<0.000000e+00> : vector<16x512xf32>
    %204 = tpu.matmul %203, %201, %cst_159 {dimension_numbers = #tpu.dot_dimension_numbers<[1], [0], [0], [1], [0, 0, 1, 1], [], []>} : vector<16x80xbf16>, vector<80x512xbf16>, vector<16x512xf32> -> vector<16x512xf32>
    %205 = arith.addf %202, %204 : vector<16x512xf32>
    %c0_160 = arith.constant 0 : index
    %c0_161 = arith.constant 0 : index
    %206 = vector.load %arg9[%c0_160, %c0_161] : memref<144x80xbf16, #tpu.memory_space<vmem>>, vector<16x80xbf16>
    %cst_162 = arith.constant dense<0.000000e+00> : vector<16x512xf32>
    %207 = tpu.matmul %206, %201, %cst_162 {dimension_numbers = #tpu.dot_dimension_numbers<[1], [0], [0], [1], [0, 0, 1, 1], [], []>} : vector<16x80xbf16>, vector<80x512xbf16>, vector<16x512xf32> -> vector<16x512xf32>
    %c17_i32_163 = arith.constant 17 : i32
    %208 = tpu.dynamic_rotate %207 by %c17_i32_163 dim 1 : vector<16x512xf32>, i32 -> vector<16x512xf32>
    %c0_164 = arith.constant 0 : index
    %c0_165 = arith.constant 0 : index
    %209 = vector.load %arg2[%c0_164, %c0_165] : memref<9x512xf32, #tpu.memory_space<vmem>>, vector<1x512xf32>
    %210 = vector.broadcast %209 : vector<1x512xf32> to vector<16x512xf32>
    %211 = arith.mulf %210, %208 : vector<16x512xf32>
    %212 = arith.addf %205, %211 : vector<16x512xf32>
    %c16_166 = arith.constant 16 : index
    %c0_167 = arith.constant 0 : index
    %213 = vector.load %arg9[%c16_166, %c0_167] : memref<144x80xbf16, #tpu.memory_space<vmem>>, vector<16x80xbf16>
    %cst_168 = arith.constant dense<0.000000e+00> : vector<16x512xf32>
    %214 = tpu.matmul %213, %201, %cst_168 {dimension_numbers = #tpu.dot_dimension_numbers<[1], [0], [0], [1], [0, 0, 1, 1], [], []>} : vector<16x80xbf16>, vector<80x512xbf16>, vector<16x512xf32> -> vector<16x512xf32>
    %c16_i32_169 = arith.constant 16 : i32
    %215 = tpu.dynamic_rotate %214 by %c16_i32_169 dim 1 : vector<16x512xf32>, i32 -> vector<16x512xf32>
    %c1_170 = arith.constant 1 : index
    %c0_171 = arith.constant 0 : index
    %216 = vector.load %arg2[%c1_170, %c0_171] : memref<9x512xf32, #tpu.memory_space<vmem>>, vector<1x512xf32>
    %217 = vector.broadcast %216 : vector<1x512xf32> to vector<16x512xf32>
    %218 = arith.mulf %217, %215 : vector<16x512xf32>
    %219 = arith.addf %212, %218 : vector<16x512xf32>
    %c32_172 = arith.constant 32 : index
    %c0_173 = arith.constant 0 : index
    %220 = vector.load %arg9[%c32_172, %c0_173] : memref<144x80xbf16, #tpu.memory_space<vmem>>, vector<16x80xbf16>
    %cst_174 = arith.constant dense<0.000000e+00> : vector<16x512xf32>
    %221 = tpu.matmul %220, %201, %cst_174 {dimension_numbers = #tpu.dot_dimension_numbers<[1], [0], [0], [1], [0, 0, 1, 1], [], []>} : vector<16x80xbf16>, vector<80x512xbf16>, vector<16x512xf32> -> vector<16x512xf32>
    %c15_i32_175 = arith.constant 15 : i32
    %222 = tpu.dynamic_rotate %221 by %c15_i32_175 dim 1 : vector<16x512xf32>, i32 -> vector<16x512xf32>
    %c2_176 = arith.constant 2 : index
    %c0_177 = arith.constant 0 : index
    %223 = vector.load %arg2[%c2_176, %c0_177] : memref<9x512xf32, #tpu.memory_space<vmem>>, vector<1x512xf32>
    %224 = vector.broadcast %223 : vector<1x512xf32> to vector<16x512xf32>
    %225 = arith.mulf %224, %222 : vector<16x512xf32>
    %226 = arith.addf %219, %225 : vector<16x512xf32>
    %c48_178 = arith.constant 48 : index
    %c0_179 = arith.constant 0 : index
    %227 = vector.load %arg9[%c48_178, %c0_179] : memref<144x80xbf16, #tpu.memory_space<vmem>>, vector<16x80xbf16>
    %cst_180 = arith.constant dense<0.000000e+00> : vector<16x512xf32>
    %228 = tpu.matmul %227, %201, %cst_180 {dimension_numbers = #tpu.dot_dimension_numbers<[1], [0], [0], [1], [0, 0, 1, 1], [], []>} : vector<16x80xbf16>, vector<80x512xbf16>, vector<16x512xf32> -> vector<16x512xf32>
    %c1_i32_181 = arith.constant 1 : i32
    %229 = tpu.dynamic_rotate %228 by %c1_i32_181 dim 1 : vector<16x512xf32>, i32 -> vector<16x512xf32>
    %c3_182 = arith.constant 3 : index
    %c0_183 = arith.constant 0 : index
    %230 = vector.load %arg2[%c3_182, %c0_183] : memref<9x512xf32, #tpu.memory_space<vmem>>, vector<1x512xf32>
    %231 = vector.broadcast %230 : vector<1x512xf32> to vector<16x512xf32>
    %232 = arith.mulf %231, %229 : vector<16x512xf32>
    %233 = arith.addf %226, %232 : vector<16x512xf32>
    %c80_184 = arith.constant 80 : index
    %c0_185 = arith.constant 0 : index
    %234 = vector.load %arg9[%c80_184, %c0_185] : memref<144x80xbf16, #tpu.memory_space<vmem>>, vector<16x80xbf16>
    %cst_186 = arith.constant dense<0.000000e+00> : vector<16x512xf32>
    %235 = tpu.matmul %234, %201, %cst_186 {dimension_numbers = #tpu.dot_dimension_numbers<[1], [0], [0], [1], [0, 0, 1, 1], [], []>} : vector<16x80xbf16>, vector<80x512xbf16>, vector<16x512xf32> -> vector<16x512xf32>
    %c511_i32_187 = arith.constant 511 : i32
    %236 = tpu.dynamic_rotate %235 by %c511_i32_187 dim 1 : vector<16x512xf32>, i32 -> vector<16x512xf32>
    %c5_188 = arith.constant 5 : index
    %c0_189 = arith.constant 0 : index
    %237 = vector.load %arg2[%c5_188, %c0_189] : memref<9x512xf32, #tpu.memory_space<vmem>>, vector<1x512xf32>
    %238 = vector.broadcast %237 : vector<1x512xf32> to vector<16x512xf32>
    %239 = arith.mulf %238, %236 : vector<16x512xf32>
    %240 = arith.addf %233, %239 : vector<16x512xf32>
    %c96_190 = arith.constant 96 : index
    %c0_191 = arith.constant 0 : index
    %241 = vector.load %arg9[%c96_190, %c0_191] : memref<144x80xbf16, #tpu.memory_space<vmem>>, vector<16x80xbf16>
    %cst_192 = arith.constant dense<0.000000e+00> : vector<16x512xf32>
    %242 = tpu.matmul %241, %201, %cst_192 {dimension_numbers = #tpu.dot_dimension_numbers<[1], [0], [0], [1], [0, 0, 1, 1], [], []>} : vector<16x80xbf16>, vector<80x512xbf16>, vector<16x512xf32> -> vector<16x512xf32>
    %c497_i32_193 = arith.constant 497 : i32
    %243 = tpu.dynamic_rotate %242 by %c497_i32_193 dim 1 : vector<16x512xf32>, i32 -> vector<16x512xf32>
    %c6_194 = arith.constant 6 : index
    %c0_195 = arith.constant 0 : index
    %244 = vector.load %arg2[%c6_194, %c0_195] : memref<9x512xf32, #tpu.memory_space<vmem>>, vector<1x512xf32>
    %245 = vector.broadcast %244 : vector<1x512xf32> to vector<16x512xf32>
    %246 = arith.mulf %245, %243 : vector<16x512xf32>
    %247 = arith.addf %240, %246 : vector<16x512xf32>
    %c112_196 = arith.constant 112 : index
    %c0_197 = arith.constant 0 : index
    %248 = vector.load %arg9[%c112_196, %c0_197] : memref<144x80xbf16, #tpu.memory_space<vmem>>, vector<16x80xbf16>
    %cst_198 = arith.constant dense<0.000000e+00> : vector<16x512xf32>
    %249 = tpu.matmul %248, %201, %cst_198 {dimension_numbers = #tpu.dot_dimension_numbers<[1], [0], [0], [1], [0, 0, 1, 1], [], []>} : vector<16x80xbf16>, vector<80x512xbf16>, vector<16x512xf32> -> vector<16x512xf32>
    %c496_i32_199 = arith.constant 496 : i32
    %250 = tpu.dynamic_rotate %249 by %c496_i32_199 dim 1 : vector<16x512xf32>, i32 -> vector<16x512xf32>
    %c7_200 = arith.constant 7 : index
    %c0_201 = arith.constant 0 : index
    %251 = vector.load %arg2[%c7_200, %c0_201] : memref<9x512xf32, #tpu.memory_space<vmem>>, vector<1x512xf32>
    %252 = vector.broadcast %251 : vector<1x512xf32> to vector<16x512xf32>
    %253 = arith.mulf %252, %250 : vector<16x512xf32>
    %254 = arith.addf %247, %253 : vector<16x512xf32>
    %c128_202 = arith.constant 128 : index
    %c0_203 = arith.constant 0 : index
    %255 = vector.load %arg9[%c128_202, %c0_203] : memref<144x80xbf16, #tpu.memory_space<vmem>>, vector<16x80xbf16>
    %cst_204 = arith.constant dense<0.000000e+00> : vector<16x512xf32>
    %256 = tpu.matmul %255, %201, %cst_204 {dimension_numbers = #tpu.dot_dimension_numbers<[1], [0], [0], [1], [0, 0, 1, 1], [], []>} : vector<16x80xbf16>, vector<80x512xbf16>, vector<16x512xf32> -> vector<16x512xf32>
    %c495_i32_205 = arith.constant 495 : i32
    %257 = tpu.dynamic_rotate %256 by %c495_i32_205 dim 1 : vector<16x512xf32>, i32 -> vector<16x512xf32>
    %c8_206 = arith.constant 8 : index
    %c0_207 = arith.constant 0 : index
    %258 = vector.load %arg2[%c8_206, %c0_207] : memref<9x512xf32, #tpu.memory_space<vmem>>, vector<1x512xf32>
    %259 = vector.broadcast %258 : vector<1x512xf32> to vector<16x512xf32>
    %260 = arith.mulf %259, %257 : vector<16x512xf32>
    %261 = arith.addf %254, %260 : vector<16x512xf32>
    %cst_208 = arith.constant 2.000000e-01 : f32
    %262 = vector.broadcast %cst_208 : f32 to vector<16x512xf32>
    %263 = arith.mulf %262, %261 : vector<16x512xf32>
    %264 = arith.maximumf %261, %263 : vector<16x512xf32>
    %265 = arith.truncf %264 : vector<16x512xf32> to vector<16x512xbf16>
    %c80_209 = arith.constant 80 : index
    %c0_210 = arith.constant 0 : index
    %266 = vector.load %arg14[%c80_209, %c0_210] : memref<96x512xbf16, #tpu.memory_space<vmem>>, vector<16x512xbf16>
    tpu.vector_store %arg14[%c80_209, %c0_210], %265 {strides = array<i32>} : memref<96x512xbf16, #tpu.memory_space<vmem>>, vector<16x512xbf16>,
    %c0_211 = arith.constant 0 : index
    %c0_212 = arith.constant 0 : index
    %267 = vector.load %arg14[%c0_211, %c0_212] : memref<96x512xbf16, #tpu.memory_space<vmem>>, vector<96x512xbf16>
    %c0_213 = arith.constant 0 : index
    %c0_214 = arith.constant 0 : index
    %268 = vector.load %arg12[%c0_213, %c0_214] : memref<32x512xf32, #tpu.memory_space<vmem>>, vector<32x512xf32>
    %c128_215 = arith.constant 128 : index
    %c0_216 = arith.constant 0 : index
    %269 = vector.load %arg11[%c128_215, %c0_216] : memref<288x96xbf16, #tpu.memory_space<vmem>>, vector<32x96xbf16>
    %cst_217 = arith.constant dense<0.000000e+00> : vector<32x512xf32>
    %270 = tpu.matmul %269, %267, %cst_217 {dimension_numbers = #tpu.dot_dimension_numbers<[1], [0], [0], [1], [0, 0, 1, 1], [], []>} : vector<32x96xbf16>, vector<96x512xbf16>, vector<32x512xf32> -> vector<32x512xf32>
    %271 = arith.addf %268, %270 : vector<32x512xf32>
    %c0_218 = arith.constant 0 : index
    %c0_219 = arith.constant 0 : index
    %272 = vector.load %arg11[%c0_218, %c0_219] : memref<288x96xbf16, #tpu.memory_space<vmem>>, vector<32x96xbf16>
    %cst_220 = arith.constant dense<0.000000e+00> : vector<32x512xf32>
    %273 = tpu.matmul %272, %267, %cst_220 {dimension_numbers = #tpu.dot_dimension_numbers<[1], [0], [0], [1], [0, 0, 1, 1], [], []>} : vector<32x96xbf16>, vector<96x512xbf16>, vector<32x512xf32> -> vector<32x512xf32>
    %c17_i32_221 = arith.constant 17 : i32
    %274 = tpu.dynamic_rotate %273 by %c17_i32_221 dim 1 : vector<32x512xf32>, i32 -> vector<32x512xf32>
    %c0_222 = arith.constant 0 : index
    %c0_223 = arith.constant 0 : index
    %275 = vector.load %arg2[%c0_222, %c0_223] : memref<9x512xf32, #tpu.memory_space<vmem>>, vector<1x512xf32>
    %276 = vector.broadcast %275 : vector<1x512xf32> to vector<32x512xf32>
    %277 = arith.mulf %276, %274 : vector<32x512xf32>
    %278 = arith.addf %271, %277 : vector<32x512xf32>
    %c32_224 = arith.constant 32 : index
    %c0_225 = arith.constant 0 : index
    %279 = vector.load %arg11[%c32_224, %c0_225] : memref<288x96xbf16, #tpu.memory_space<vmem>>, vector<32x96xbf16>
    %cst_226 = arith.constant dense<0.000000e+00> : vector<32x512xf32>
    %280 = tpu.matmul %279, %267, %cst_226 {dimension_numbers = #tpu.dot_dimension_numbers<[1], [0], [0], [1], [0, 0, 1, 1], [], []>} : vector<32x96xbf16>, vector<96x512xbf16>, vector<32x512xf32> -> vector<32x512xf32>
    %c16_i32_227 = arith.constant 16 : i32
    %281 = tpu.dynamic_rotate %280 by %c16_i32_227 dim 1 : vector<32x512xf32>, i32 -> vector<32x512xf32>
    %c1_228 = arith.constant 1 : index
    %c0_229 = arith.constant 0 : index
    %282 = vector.load %arg2[%c1_228, %c0_229] : memref<9x512xf32, #tpu.memory_space<vmem>>, vector<1x512xf32>
    %283 = vector.broadcast %282 : vector<1x512xf32> to vector<32x512xf32>
    %284 = arith.mulf %283, %281 : vector<32x512xf32>
    %285 = arith.addf %278, %284 : vector<32x512xf32>
    %c64_230 = arith.constant 64 : index
    %c0_231 = arith.constant 0 : index
    %286 = vector.load %arg11[%c64_230, %c0_231] : memref<288x96xbf16, #tpu.memory_space<vmem>>, vector<32x96xbf16>
    %cst_232 = arith.constant dense<0.000000e+00> : vector<32x512xf32>
    %287 = tpu.matmul %286, %267, %cst_232 {dimension_numbers = #tpu.dot_dimension_numbers<[1], [0], [0], [1], [0, 0, 1, 1], [], []>} : vector<32x96xbf16>, vector<96x512xbf16>, vector<32x512xf32> -> vector<32x512xf32>
    %c15_i32_233 = arith.constant 15 : i32
    %288 = tpu.dynamic_rotate %287 by %c15_i32_233 dim 1 : vector<32x512xf32>, i32 -> vector<32x512xf32>
    %c2_234 = arith.constant 2 : index
    %c0_235 = arith.constant 0 : index
    %289 = vector.load %arg2[%c2_234, %c0_235] : memref<9x512xf32, #tpu.memory_space<vmem>>, vector<1x512xf32>
    %290 = vector.broadcast %289 : vector<1x512xf32> to vector<32x512xf32>
    %291 = arith.mulf %290, %288 : vector<32x512xf32>
    %292 = arith.addf %285, %291 : vector<32x512xf32>
    %c96_236 = arith.constant 96 : index
    %c0_237 = arith.constant 0 : index
    %293 = vector.load %arg11[%c96_236, %c0_237] : memref<288x96xbf16, #tpu.memory_space<vmem>>, vector<32x96xbf16>
    %cst_238 = arith.constant dense<0.000000e+00> : vector<32x512xf32>
    %294 = tpu.matmul %293, %267, %cst_238 {dimension_numbers = #tpu.dot_dimension_numbers<[1], [0], [0], [1], [0, 0, 1, 1], [], []>} : vector<32x96xbf16>, vector<96x512xbf16>, vector<32x512xf32> -> vector<32x512xf32>
    %c1_i32_239 = arith.constant 1 : i32
    %295 = tpu.dynamic_rotate %294 by %c1_i32_239 dim 1 : vector<32x512xf32>, i32 -> vector<32x512xf32>
    %c3_240 = arith.constant 3 : index
    %c0_241 = arith.constant 0 : index
    %296 = vector.load %arg2[%c3_240, %c0_241] : memref<9x512xf32, #tpu.memory_space<vmem>>, vector<1x512xf32>
    %297 = vector.broadcast %296 : vector<1x512xf32> to vector<32x512xf32>
    %298 = arith.mulf %297, %295 : vector<32x512xf32>
    %299 = arith.addf %292, %298 : vector<32x512xf32>
    %c160 = arith.constant 160 : index
    %c0_242 = arith.constant 0 : index
    %300 = vector.load %arg11[%c160, %c0_242] : memref<288x96xbf16, #tpu.memory_space<vmem>>, vector<32x96xbf16>
    %cst_243 = arith.constant dense<0.000000e+00> : vector<32x512xf32>
    %301 = tpu.matmul %300, %267, %cst_243 {dimension_numbers = #tpu.dot_dimension_numbers<[1], [0], [0], [1], [0, 0, 1, 1], [], []>} : vector<32x96xbf16>, vector<96x512xbf16>, vector<32x512xf32> -> vector<32x512xf32>
    %c511_i32_244 = arith.constant 511 : i32
    %302 = tpu.dynamic_rotate %301 by %c511_i32_244 dim 1 : vector<32x512xf32>, i32 -> vector<32x512xf32>
    %c5_245 = arith.constant 5 : index
    %c0_246 = arith.constant 0 : index
    %303 = vector.load %arg2[%c5_245, %c0_246] : memref<9x512xf32, #tpu.memory_space<vmem>>, vector<1x512xf32>
    %304 = vector.broadcast %303 : vector<1x512xf32> to vector<32x512xf32>
    %305 = arith.mulf %304, %302 : vector<32x512xf32>
    %306 = arith.addf %299, %305 : vector<32x512xf32>
    %c192 = arith.constant 192 : index
    %c0_247 = arith.constant 0 : index
    %307 = vector.load %arg11[%c192, %c0_247] : memref<288x96xbf16, #tpu.memory_space<vmem>>, vector<32x96xbf16>
    %cst_248 = arith.constant dense<0.000000e+00> : vector<32x512xf32>
    %308 = tpu.matmul %307, %267, %cst_248 {dimension_numbers = #tpu.dot_dimension_numbers<[1], [0], [0], [1], [0, 0, 1, 1], [], []>} : vector<32x96xbf16>, vector<96x512xbf16>, vector<32x512xf32> -> vector<32x512xf32>
    %c497_i32_249 = arith.constant 497 : i32
    %309 = tpu.dynamic_rotate %308 by %c497_i32_249 dim 1 : vector<32x512xf32>, i32 -> vector<32x512xf32>
    %c6_250 = arith.constant 6 : index
    %c0_251 = arith.constant 0 : index
    %310 = vector.load %arg2[%c6_250, %c0_251] : memref<9x512xf32, #tpu.memory_space<vmem>>, vector<1x512xf32>
    %311 = vector.broadcast %310 : vector<1x512xf32> to vector<32x512xf32>
    %312 = arith.mulf %311, %309 : vector<32x512xf32>
    %313 = arith.addf %306, %312 : vector<32x512xf32>
    %c224 = arith.constant 224 : index
    %c0_252 = arith.constant 0 : index
    %314 = vector.load %arg11[%c224, %c0_252] : memref<288x96xbf16, #tpu.memory_space<vmem>>, vector<32x96xbf16>
    %cst_253 = arith.constant dense<0.000000e+00> : vector<32x512xf32>
    %315 = tpu.matmul %314, %267, %cst_253 {dimension_numbers = #tpu.dot_dimension_numbers<[1], [0], [0], [1], [0, 0, 1, 1], [], []>} : vector<32x96xbf16>, vector<96x512xbf16>, vector<32x512xf32> -> vector<32x512xf32>
    %c496_i32_254 = arith.constant 496 : i32
    %316 = tpu.dynamic_rotate %315 by %c496_i32_254 dim 1 : vector<32x512xf32>, i32 -> vector<32x512xf32>
    %c7_255 = arith.constant 7 : index
    %c0_256 = arith.constant 0 : index
    %317 = vector.load %arg2[%c7_255, %c0_256] : memref<9x512xf32, #tpu.memory_space<vmem>>, vector<1x512xf32>
    %318 = vector.broadcast %317 : vector<1x512xf32> to vector<32x512xf32>
    %319 = arith.mulf %318, %316 : vector<32x512xf32>
    %320 = arith.addf %313, %319 : vector<32x512xf32>
    %c256 = arith.constant 256 : index
    %c0_257 = arith.constant 0 : index
    %321 = vector.load %arg11[%c256, %c0_257] : memref<288x96xbf16, #tpu.memory_space<vmem>>, vector<32x96xbf16>
    %cst_258 = arith.constant dense<0.000000e+00> : vector<32x512xf32>
    %322 = tpu.matmul %321, %267, %cst_258 {dimension_numbers = #tpu.dot_dimension_numbers<[1], [0], [0], [1], [0, 0, 1, 1], [], []>} : vector<32x96xbf16>, vector<96x512xbf16>, vector<32x512xf32> -> vector<32x512xf32>
    %c495_i32_259 = arith.constant 495 : i32
    %323 = tpu.dynamic_rotate %322 by %c495_i32_259 dim 1 : vector<32x512xf32>, i32 -> vector<32x512xf32>
    %c8_260 = arith.constant 8 : index
    %c0_261 = arith.constant 0 : index
    %324 = vector.load %arg2[%c8_260, %c0_261] : memref<9x512xf32, #tpu.memory_space<vmem>>, vector<1x512xf32>
    %325 = vector.broadcast %324 : vector<1x512xf32> to vector<32x512xf32>
    %326 = arith.mulf %325, %323 : vector<32x512xf32>
    %327 = arith.addf %320, %326 : vector<32x512xf32>
    %cst_262 = arith.constant 2.000000e-01 : f32
    %328 = vector.broadcast %cst_262 : f32 to vector<32x512xf32>
    %329 = arith.mulf %327, %328 : vector<32x512xf32>
    %c0_263 = arith.constant 0 : index
    %c0_264 = arith.constant 0 : index
    %330 = vector.load %arg1[%c0_263, %c0_264] : memref<32x512xf32, #tpu.memory_space<vmem>>, vector<32x512xf32>
    %331 = arith.addf %329, %330 : vector<32x512xf32>
    %c0_265 = arith.constant 0 : index
    %c0_266 = arith.constant 0 : index
    %332 = vector.load %arg13[%c0_265, %c0_266] : memref<32x512xf32, #tpu.memory_space<vmem>>, vector<32x512xf32>
    tpu.vector_store %arg13[%c0_265, %c0_266], %331 {strides = array<i32>} : memref<32x512xf32, #tpu.memory_space<vmem>>, vector<32x512xf32>,
    return
  }
  func.func @transform_0(%arg0: i32) -> (i32, i32) {
    %c0_i32 = arith.constant 0 : i32
    %c0_i32_0 = arith.constant 0 : i32
    return %c0_i32, %arg0 : i32, i32
  }
  func.func @transform_1(%arg0: i32) -> (i32, i32) {
    %c0_i32 = arith.constant 0 : i32
    %c0_i32_0 = arith.constant 0 : i32
    %c0_i32_1 = arith.constant 0 : i32
    return %c0_i32, %c0_i32_0 : i32, i32
  }
  func.func @transform_2(%arg0: i32) -> (i32, i32) {
    %c0_i32 = arith.constant 0 : i32
    %c0_i32_0 = arith.constant 0 : i32
    %c0_i32_1 = arith.constant 0 : i32
    return %c0_i32, %c0_i32_0 : i32, i32
  }
  func.func @transform_3(%arg0: i32) -> (i32, i32) {
    %c0_i32 = arith.constant 0 : i32
    %c0_i32_0 = arith.constant 0 : i32
    %c0_i32_1 = arith.constant 0 : i32
    return %c0_i32, %c0_i32_0 : i32, i32
  }
  func.func @transform_4(%arg0: i32) -> (i32, i32) {
    %c0_i32 = arith.constant 0 : i32
    %c0_i32_0 = arith.constant 0 : i32
    %c0_i32_1 = arith.constant 0 : i32
    return %c0_i32, %c0_i32_0 : i32, i32
  }
  func.func @transform_5(%arg0: i32) -> (i32, i32) {
    %c0_i32 = arith.constant 0 : i32
    %c0_i32_0 = arith.constant 0 : i32
    %c0_i32_1 = arith.constant 0 : i32
    return %c0_i32, %c0_i32_0 : i32, i32
  }
  func.func @transform_6(%arg0: i32) -> (i32, i32) {
    %c0_i32 = arith.constant 0 : i32
    %c0_i32_0 = arith.constant 0 : i32
    %c0_i32_1 = arith.constant 0 : i32
    return %c0_i32, %c0_i32_0 : i32, i32
  }
  func.func @transform_7(%arg0: i32) -> (i32, i32) {
    %c0_i32 = arith.constant 0 : i32
    %c0_i32_0 = arith.constant 0 : i32
    %c0_i32_1 = arith.constant 0 : i32
    return %c0_i32, %c0_i32_0 : i32, i32
  }
  func.func @transform_8(%arg0: i32) -> (i32, i32) {
    %c0_i32 = arith.constant 0 : i32
    %c0_i32_0 = arith.constant 0 : i32
    %c0_i32_1 = arith.constant 0 : i32
    return %c0_i32, %c0_i32_0 : i32, i32
  }
  func.func @transform_9(%arg0: i32) -> (i32, i32) {
    %c0_i32 = arith.constant 0 : i32
    %c0_i32_0 = arith.constant 0 : i32
    %c0_i32_1 = arith.constant 0 : i32
    return %c0_i32, %c0_i32_0 : i32, i32
  }
  func.func @transform_10(%arg0: i32) -> (i32, i32) {
    %c0_i32 = arith.constant 0 : i32
    %c0_i32_0 = arith.constant 0 : i32
    %c0_i32_1 = arith.constant 0 : i32
    return %c0_i32, %c0_i32_0 : i32, i32
  }
  func.func @transform_11(%arg0: i32) -> (i32, i32) {
    %c0_i32 = arith.constant 0 : i32
    %c0_i32_0 = arith.constant 0 : i32
    %c0_i32_1 = arith.constant 0 : i32
    return %c0_i32, %c0_i32_0 : i32, i32
  }
  func.func @transform_12(%arg0: i32) -> (i32, i32) {
    %c0_i32 = arith.constant 0 : i32
    %c0_i32_0 = arith.constant 0 : i32
    return %c0_i32, %arg0 : i32, i32
  }
}

</mosaic_0001>

<bundles_post_ra>
// kernel: residual_dense_block_5c.1
= control target key start
LH: loop header
LB: loop body
LE: loop exit
PB: predicated region body
PF: predicated region fallthrough
CT: control target
= control target key end

     0   :  { %v13793_v3 = vmov 0   ;;  %vm177_vm0 = vcmask 261120   ;;  %s8760_s17 = smov 16   ;;  %s8761_s18 = smov 15   ;;  %vm1687_vm9 = vcmask 392192   ;;  %vm3204_vm10 = vcmask 523264   ;;  %s13780_s0 = inlined_call_operand.vmem [shape: f32[32,512], index: 0, kind: input, shape index: {}]   ;;  %s13781_s2 = inlined_call_operand.vmem [shape: bf16[144,32], index: 2, kind: input, shape index: {}]   ;;  %s13782_s4 = inlined_call_operand.vmem [shape: bf16[144,48], index: 4, kind: input, shape index: {}]   ;;  %s13783_s3 = inlined_call_operand.vmem [shape: f32[16,512], index: 3, kind: input, shape index: {}]   ;;  %s13784_s1 = inlined_call_operand.vmem [shape: f32[9,512], index: 1, kind: input, shape index: {}]   ;;  %s13785_s6 = inlined_call_operand.vmem [shape: bf16[144,64], index: 6, kind: input, shape index: {}]   ;;  %s13786_s5 = inlined_call_operand.vmem [shape: f32[16,512], index: 5, kind: input, shape index: {}]   ;;  %s13787_s8 = inlined_call_operand.vmem [shape: bf16[144,80], index: 8, kind: input, shape index: {}]   ;;  %s13788_s7 = inlined_call_operand.vmem [shape: f32[16,512], index: 7, kind: input, shape index: {}]   ;;  %s13789_s10 = inlined_call_operand.vmem [shape: bf16[288,96], index: 10, kind: input, shape index: {}]   ;;  %s13790_s9 = inlined_call_operand.vmem [shape: f32[16,512], index: 9, kind: input, shape index: {}]   ;;  %s13791_s11 = inlined_call_operand.vmem [shape: f32[32,512], index: 11, kind: input, shape index: {}]   ;;  %s13792_s12 = inlined_call_operand.vmem [shape: f32[32,512], index: 12, kind: output, shape index: {}]  }
   0x1   :  { %v51_v0 = vld [vmem:[%s13780_s0 + $0x48] sm:$0xff]  ;;  %v53_v2 = vld [vmem:[%s13780_s0 + $0x58] sm:$0xff]  ;;  %213 = vmatprep.mubr.bf16.mxu0 %v13793_v3  ;;  %256 = vmatprep.mubr.bf16.mxu1 %v13793_v3  ;;  %v50_v6 = vld [vmem:[%s13780_s0 + $0x40] sm:$0xff]  ;;  %s8762_s19 = smov 1   ;;  %s8763_s20 = smov 127   ;;  %vm4745_vm11 = vcmask 654336  }
   0x2   :  { %v55_v1 = vld [vmem:[%s13780_s0 + $0x68] sm:$0xff]  ;;  %v57_v5 = vld [vmem:[%s13780_s0 + $0x78] sm:$0xff]  ;;  %v54_v7 = vld [vmem:[%s13780_s0 + $0x60] sm:$0xff]  ;;  %s8764_s21 = smov 113   ;;  %s8765_s22 = smov 112   ;;  %vm6325_vm12 = vcmask 785408  }
   0x3   :  { %v8843_v4 = vpack.c.bf16 %v55_v1, %v51_v0  ;;  %v8854_v8 = vpack.c.bf16 %v57_v5, %v53_v2  ;;  %v8856_v9 = vpack.c.bf16 %v54_v7, %v50_v6  ;;  %v52_v10 = vld [vmem:[%s13780_s0 + $0x50] sm:$0xff]  ;;  %v43_v12 = vld [vmem:[%s13780_s0 + $0x8] sm:$0xff]  ;;  %v45_v15 = vld [vmem:[%s13780_s0 + $0x18] sm:$0xff]  ;;  %s8766_s23 = smov 111  }
   0x4   :  { %v56_v11 = vld [vmem:[%s13780_s0 + $0x70] sm:$0xff]  ;;  %v47_v14 = vld [vmem:[%s13780_s0 + $0x28] sm:$0xff]  ;;  %v49_v16 = vld [vmem:[%s13780_s0 + $0x38] sm:$0xff] }
   0x5   :  { %14015 = vst [vmem:[#allocation3_spill] sm:$0xff] %v8843_v4  ;;  %14016 = vst [vmem:[#allocation4_spill] sm:$0xff] %v8854_v8  ;;  %193 = vmatprep.subr.bf16.mxu0 %v8843_v4  ;;  %v8868_v13 = vpack.c.bf16 %v56_v11, %v52_v10  ;;  %236 = vmatprep.subr.bf16.mxu1 %v8854_v8  ;;  %v8881_v17 = vpack.c.bf16 %v47_v14, %v43_v12  ;;  %v42_v19 = vld [vmem:[%s13780_s0] sm:$0xff]  ;;  %v44_v21 = vld [vmem:[%s13780_s0 + $0x10] sm:$0xff] }
   0x6   :  { %14017 = vst [vmem:[#allocation5_spill] sm:$0xff] %v8856_v9  ;;  %194 = vmatpush1.bf16.msra.mxu0 %v8856_v9  ;;  %v8883_v18 = vpack.c.bf16 %v49_v16, %v45_v15  ;;  %v46_v20 = vld [vmem:[%s13780_s0 + $0x20] sm:$0xff]  ;;  %v48_v23 = vld [vmem:[%s13780_s0 + $0x30] sm:$0xff]  ;;  %v8706_v27 = vld [vmem:[%s13781_s2 + $0x8] sm:$0xff]  }
   0x7   :  { %14018 = vst [vmem:[#allocation6_spill] sm:$0xff] %v8868_v13  ;;  %14019 = vst [vmem:[#allocation7_spill] sm:$0xff] %v8881_v17  ;;  %237 = vmatpush1.bf16.msra.mxu1 %v8868_v13  ;;  %v8895_v22 = vpack.c.bf16 %v46_v20, %v42_v19  ;;  %195 = vmatprep.subr.bf16.mxu0 %v8881_v17  ;;  %v8902_v24 = vpack.c.bf16 %v48_v23, %v44_v21  ;;  %v8704_v25 = vld [vmem:[%s13781_s2 + $0x20] sm:$0xff]   ;;  %v8707_v28 = vld [vmem:[%s13781_s2 + $0x10] sm:$0xff]  }
   0x8   :  { %14020 = vst [vmem:[#allocation8_spill] sm:$0xff] %v8883_v18  ;;  %238 = vmatprep.subr.bf16.mxu1 %v8883_v18  ;;  %v8705_v26 = vld [vmem:[%s13781_s2] sm:$0xff]   ;;  %v8708_v29 = vld [vmem:[%s13781_s2 + $0x18] sm:$0xff]   ;;  %v8709_v30 = vld [vmem:[%s13781_s2 + $0x28] sm:$0xff]  }
   0x9   :  { %14021 = vst [vmem:[#allocation9_spill] sm:$0xff] %v8895_v22  ;;  %14022 = vst [vmem:[#allocation10_spill] sm:$0xff] %v8902_v24  ;;  %v8710_v31 = vld [vmem:[%s13781_s2 + $0x30] sm:$0xff]   ;;  %v8711_v32 = vld [vmem:[%s13781_s2 + $0x38] sm:$0xff]  }
   0xa   :  { %196 = vmatpush1.bf16.msra.mxu0 %v8895_v22  ;;  %v8712_v33 = vld [vmem:[%s13781_s2 + $0x40] sm:$0xff]   ;;  %s8759_s2 = smov 17  }
   0xb   :  { %239 = vmatpush1.bf16.msra.mxu1 %v8902_v24  ;;  %297 = vmatprep.subr.bf16.mxu0 %v8843_v4 }
   0xc   :  { %340 = vmatprep.subr.bf16.mxu1 %v8854_v8 }
   0xd   :  { %8363 = vmatmul.mubr.msk.bf16.vlgmr.msra.gmra.mxu0 %vm177_vm0, %v8704_v25 }
   0xe   :  { %8364 = vmatmul.mubr.msk.bf16.vlgmr.msra.gmra.mxu1 %vm177_vm0, %v8704_v25  ;;  %298 = vmatpush1.bf16.msra.mxu0 %v8856_v9 }
   0xf   :  { %341 = vmatpush1.bf16.msra.mxu1 %v8868_v13  ;;  %299 = vmatprep.subr.bf16.mxu0 %v8881_v17 }
  0x10   :  { %342 = vmatprep.subr.bf16.mxu1 %v8883_v18  ;;  %317 = vmatprep.mubr.bf16.mxu0 %v13793_v3 }
  0x11   :  { %360 = vmatprep.mubr.bf16.mxu1 %v13793_v3 }
  0x12   :  { %300 = vmatpush1.bf16.msra.mxu0 %v8895_v22 }
  0x13   :  { %343 = vmatpush1.bf16.msra.mxu1 %v8902_v24  ;;  %458 = vmatprep.subr.bf16.mxu0 %v8843_v4 }
  0x14   :  { %501 = vmatprep.subr.bf16.mxu1 %v8854_v8 }
  0x15   :  { %8366 = vmatmul.mubr.msk.bf16.vlgmr.msra.gmra.mxu0 %vm177_vm0, %v8705_v26 }
  0x16   :  { %8367 = vmatmul.mubr.msk.bf16.vlgmr.msra.gmra.mxu1 %vm177_vm0, %v8705_v26  ;;  %459 = vmatpush1.bf16.msra.mxu0 %v8856_v9 }
  0x17   :  { %460 = vmatprep.subr.bf16.mxu0 %v8881_v17  ;;  %502 = vmatpush1.bf16.msra.mxu1 %v8868_v13 }
  0x18   :  { %478 = vmatprep.mubr.bf16.mxu0 %v13793_v3  ;;  %503 = vmatprep.subr.bf16.mxu1 %v8883_v18 }
  0x19   :  { %521 = vmatprep.mubr.bf16.mxu1 %v13793_v3 }
  0x1a   :  { %461 = vmatpush1.bf16.msra.mxu0 %v8895_v22 }
  0x1b   :  { %504 = vmatpush1.bf16.msra.mxu1 %v8902_v24  ;;  %618 = vmatprep.subr.bf16.mxu0 %v8843_v4 }
  0x1c   :  { %661 = vmatprep.subr.bf16.mxu1 %v8854_v8 }
  0x1d   :  { %8369 = vmatmul.mubr.msk.bf16.vlgmr.msra.gmra.mxu0 %vm177_vm0, %v8706_v27 }
  0x1e   :  { %8370 = vmatmul.mubr.msk.bf16.vlgmr.msra.gmra.mxu1 %vm177_vm0, %v8706_v27  ;;  %619 = vmatpush1.bf16.msra.mxu0 %v8856_v9 }
  0x1f   :  { %620 = vmatprep.subr.bf16.mxu0 %v8881_v17  ;;  %662 = vmatpush1.bf16.msra.mxu1 %v8868_v13 }
  0x20   :  { %638 = vmatprep.mubr.bf16.mxu0 %v13793_v3  ;;  %663 = vmatprep.subr.bf16.mxu1 %v8883_v18 }
  0x21   :  { %681 = vmatprep.mubr.bf16.mxu1 %v13793_v3 }
  0x22   :  { %621 = vmatpush1.bf16.msra.mxu0 %v8895_v22 }
  0x23   :  { %664 = vmatpush1.bf16.msra.mxu1 %v8902_v24  ;;  %778 = vmatprep.subr.bf16.mxu0 %v8843_v4 }
  0x24   :  { %821 = vmatprep.subr.bf16.mxu1 %v8854_v8 }
  0x25   :  { %8373 = vmatmul.mubr.msk.bf16.vlgmr.msra.gmra.mxu0 %vm177_vm0, %v8707_v28 }
  0x26   :  { %8374 = vmatmul.mubr.msk.bf16.vlgmr.msra.gmra.mxu1 %vm177_vm0, %v8707_v28  ;;  %779 = vmatpush1.bf16.msra.mxu0 %v8856_v9 }
  0x27   :  { %780 = vmatprep.subr.bf16.mxu0 %v8881_v17  ;;  %822 = vmatpush1.bf16.msra.mxu1 %v8868_v13 }
  0x28   :  { %798 = vmatprep.mubr.bf16.mxu0 %v13793_v3  ;;  %823 = vmatprep.subr.bf16.mxu1 %v8883_v18 }
  0x29   :  { %841 = vmatprep.mubr.bf16.mxu1 %v13793_v3 }
  0x2a   :  { %781 = vmatpush1.bf16.msra.mxu0 %v8895_v22 }
  0x2b   :  { %824 = vmatpush1.bf16.msra.mxu1 %v8902_v24  ;;  %938 = vmatprep.subr.bf16.mxu0 %v8843_v4 }
  0x2c   :  { %981 = vmatprep.subr.bf16.mxu1 %v8854_v8 }
  0x2d   :  { %8377 = vmatmul.mubr.msk.bf16.vlgmr.msra.gmra.mxu0 %vm177_vm0, %v8708_v29 }
  0x2e   :  { %8378 = vmatmul.mubr.msk.bf16.vlgmr.msra.gmra.mxu1 %vm177_vm0, %v8708_v29  ;;  %939 = vmatpush1.bf16.msra.mxu0 %v8856_v9 }
  0x2f   :  { %940 = vmatprep.subr.bf16.mxu0 %v8881_v17  ;;  %982 = vmatpush1.bf16.msra.mxu1 %v8868_v13 }
  0x30   :  { %958 = vmatprep.mubr.bf16.mxu0 %v13793_v3  ;;  %983 = vmatprep.subr.bf16.mxu1 %v8883_v18 }
  0x31   :  { %1001 = vmatprep.mubr.bf16.mxu1 %v13793_v3 }
  0x32   :  { %941 = vmatpush1.bf16.msra.mxu0 %v8895_v22 }
  0x33   :  { %984 = vmatpush1.bf16.msra.mxu1 %v8902_v24  ;;  %1098 = vmatprep.subr.bf16.mxu0 %v8843_v4 }
  0x34   :  { %1141 = vmatprep.subr.bf16.mxu1 %v8854_v8 }
  0x35   :  { %8381 = vmatmul.mubr.msk.bf16.vlgmr.msra.gmra.mxu0 %vm177_vm0, %v8709_v30 }
  0x36   :  { %8382 = vmatmul.mubr.msk.bf16.vlgmr.msra.gmra.mxu1 %vm177_vm0, %v8709_v30  ;;  %1099 = vmatpush1.bf16.msra.mxu0 %v8856_v9 }
  0x37   :  { %1100 = vmatprep.subr.bf16.mxu0 %v8881_v17  ;;  %1142 = vmatpush1.bf16.msra.mxu1 %v8868_v13 }
  0x38   :  { %1118 = vmatprep.mubr.bf16.mxu0 %v13793_v3  ;;  %1143 = vmatprep.subr.bf16.mxu1 %v8883_v18 }
  0x39   :  { %1161 = vmatprep.mubr.bf16.mxu1 %v13793_v3 }
  0x3a   :  { %1101 = vmatpush1.bf16.msra.mxu0 %v8895_v22 }
  0x3b   :  { %1144 = vmatpush1.bf16.msra.mxu1 %v8902_v24  ;;  %1258 = vmatprep.subr.bf16.mxu0 %v8843_v4 }
  0x3c   :  { %1301 = vmatprep.subr.bf16.mxu1 %v8854_v8 }
  0x3d   :  { %8385 = vmatmul.mubr.msk.bf16.vlgmr.msra.gmra.mxu0 %vm177_vm0, %v8710_v31 }
  0x3e   :  { %8386 = vmatmul.mubr.msk.bf16.vlgmr.msra.gmra.mxu1 %vm177_vm0, %v8710_v31  ;;  %1259 = vmatpush1.bf16.msra.mxu0 %v8856_v9 }
  0x3f   :  { %1260 = vmatprep.subr.bf16.mxu0 %v8881_v17  ;;  %1302 = vmatpush1.bf16.msra.mxu1 %v8868_v13 }
  0x40   :  { %1278 = vmatprep.mubr.bf16.mxu0 %v13793_v3  ;;  %1303 = vmatprep.subr.bf16.mxu1 %v8883_v18 }
  0x41   :  { %1321 = vmatprep.mubr.bf16.mxu1 %v13793_v3 }
  0x42   :  { %1261 = vmatpush1.bf16.msra.mxu0 %v8895_v22 }
  0x43   :  { %1304 = vmatpush1.bf16.msra.mxu1 %v8902_v24  ;;  %1418 = vmatprep.subr.bf16.mxu0 %v8843_v4 }
  0x44   :  { %1461 = vmatprep.subr.bf16.mxu1 %v8854_v8 }
  0x45   :  { %8389 = vmatmul.mubr.msk.bf16.vlgmr.msra.gmra.mxu0 %vm177_vm0, %v8711_v32 }
  0x46   :  { %8390 = vmatmul.mubr.msk.bf16.vlgmr.msra.gmra.mxu1 %vm177_vm0, %v8711_v32  ;;  %1419 = vmatpush1.bf16.msra.mxu0 %v8856_v9 }
  0x47   :  { %1420 = vmatprep.subr.bf16.mxu0 %v8881_v17  ;;  %1462 = vmatpush1.bf16.msra.mxu1 %v8868_v13  ;;  %v8371_v17 = vld [vmem:[%s13784_s1 + $0x1] ss:$8 sm:$0xf] }
  0x48   :  { %1438 = vmatprep.mubr.bf16.mxu0 %v13793_v3  ;;  %1463 = vmatprep.subr.bf16.mxu1 %v8883_v18 }
  0x49   :  { %1481 = vmatprep.mubr.bf16.mxu1 %v13793_v3 }
  0x4a   :  { %1421 = vmatpush1.bf16.msra.mxu0 %v8895_v22 }
  0x4b   :  { %1464 = vmatpush1.bf16.msra.mxu1 %v8902_v24  ;;  %v127_v24 = vld [vmem:[%s13783_s3 + $0x28] sm:$0xff] }
  0x4d   :  { %8393 = vmatmul.mubr.msk.bf16.vlgmr.msra.gmra.mxu0 %vm177_vm0, %v8712_v33 }
  0x4e   :  { %8394 = vmatmul.mubr.msk.bf16.vlgmr.msra.gmra.mxu1 %vm177_vm0, %v8712_v33  ;;  %1723 = vmatprep.mubr.bf16.mxu0 %v13793_v3 }
  0x4f   :  { %1766 = vmatprep.mubr.bf16.mxu1 %v13793_v3  ;;  %v128_v3 = vld [vmem:[%s13783_s3 + $0x30] sm:$0xff] }
  0xcd   :  { %v9033_v34 = vpop.f32.mrf.mxu0 }
  0xce   :  { %v9035_v35 = vpop.f32.mrf.mxu1 }
  0xcf   :  { %v9037_v36 = vpop.f32.mrf.mxu0 }
  0xd0   :  { %v9039_v37 = vpop.f32.mrf.mxu1 }
  0xd1   :  { %v9041_v38 = vpop.f32.mrf.mxu0 }
  0xd2   :  { %v9043_v39 = vpop.f32.mrf.mxu1 }
  0xd3   :  { %v9045_v40 = vpop.f32.mrf.mxu0 }
  0xd4   :  { %v9047_v41 = vpop.f32.mrf.mxu1 }
  0xd5   :  { %v319_v42 = vpop.f32.mrf.mxu0 }
  0xd6   :  { %v362_v43 = vpop.f32.mrf.mxu1  ;;  %371 = vrot.lane.b32.xlu0 %v319_v42, %s8759_s2 }
  0xd7   :  { %v321_v44 = vpop.f32.mrf.mxu0 }
  0xd8   :  { %v364_v45 = vpop.f32.mrf.mxu1  ;;  %375 = vrot.lane.b32.xlu1 %v321_v44, %s8759_s2 }
  0xd9   :  { %v323_v46 = vpop.f32.mrf.mxu0 }
  0xda   :  { %379 = vrot.lane.b32.xlu0 %v362_v43, %s8759_s2  ;;  %v366_v47 = vpop.f32.mrf.mxu1 }
  0xdb   :  { %v325_v48 = vpop.f32.mrf.mxu0 }
  0xdc   :  { %381 = vrot.lane.b32.xlu1 %v366_v47, %s8759_s2  ;;  %v368_v50 = vpop.f32.mrf.mxu1 }
  0xdd   :  { %v480_v49 = vpop.f32.mrf.mxu0 }
  0xde   :  { %383 = vrot.lane.b32.xlu0 %v364_v45, %s8759_s2  ;;  %v523_v52 = vpop.f32.mrf.mxu1 }
  0xdf   :  { %v482_v51 = vpop.f32.mrf.mxu0 }
  0xe0   :  { %377 = vrot.lane.b32.xlu1 %v325_v48, %s8759_s2  ;;  %v525_v54 = vpop.f32.mrf.mxu1 }
  0xe1   :  { %v484_v53 = vpop.f32.mrf.mxu0 }
  0xe2   :  { %373 = vrot.lane.b32.xlu0 %v323_v46, %s8759_s2  ;;  %v527_v55 = vpop.f32.mrf.mxu1 }
  0xe3   :  { %v486_v56 = vpop.f32.mrf.mxu0 }
  0xe4   :  { %385 = vrot.lane.b32.xlu1 %v368_v50, %s8759_s2  ;;  %v529_v58 = vpop.f32.mrf.mxu1 }
  0xe5   :  { %v640_v57 = vpop.f32.mrf.mxu0 }
  0xe6   :  { %532 = vrot.lane.b32.xlu0 %v480_v49, %s8760_s17  ;;  %v683_v60 = vpop.f32.mrf.mxu1 }
  0xe7   :  { %v642_v59 = vpop.f32.mrf.mxu0 }
  0xe8   :  { %534 = vrot.lane.b32.xlu1 %v484_v53, %s8760_s17  ;;  %v685_v62 = vpop.f32.mrf.mxu1 }
  0xe9   :  { %v644_v61 = vpop.f32.mrf.mxu0 }
  0xea   :  { %540 = vrot.lane.b32.xlu0 %v523_v52, %s8760_s17  ;;  %v687_v63 = vpop.f32.mrf.mxu1 }
  0xeb   :  { %v646_v0 = vpop.f32.mrf.mxu0 }
  0xec   :  { %542 = vrot.lane.b32.xlu1 %v527_v55, %s8760_s17  ;;  %v689_v2 = vpop.f32.mrf.mxu1 }
  0xed   :  { %v800_v1 = vpop.f32.mrf.mxu0 }
  0xee   :  { %536 = vrot.lane.b32.xlu0 %v482_v51, %s8760_s17  ;;  %v843_v6 = vpop.f32.mrf.mxu1 }
  0xef   :  { %v802_v5 = vpop.f32.mrf.mxu0 }
  0xf0   :  { %538 = vrot.lane.b32.xlu1 %v486_v56, %s8760_s17  ;;  %v845_v10 = vpop.f32.mrf.mxu1 }
  0xf1   :  { %v804_v7 = vpop.f32.mrf.mxu0 }
  0xf2   :  { %544 = vrot.lane.b32.xlu0 %v525_v54, %s8760_s17  ;;  %v847_v11 = vpop.f32.mrf.mxu1 }
  0xf3   :  { %v806_v12 = vpop.f32.mrf.mxu0 }
  0xf4   :  { %546 = vrot.lane.b32.xlu1 %v529_v58, %s8760_s17  ;;  %v849_v15 = vpop.f32.mrf.mxu1 }
  0xf5   :  { %v960_v14 = vpop.f32.mrf.mxu0 }
  0xf6   :  { %692 = vrot.lane.b32.xlu0 %v640_v57, %s8761_s18  ;;  %v1003_v19 = vpop.f32.mrf.mxu1 }
  0xf7   :  { %v962_v16 = vpop.f32.mrf.mxu0 }
  0xf8   :  { %694 = vrot.lane.b32.xlu1 %v644_v61, %s8761_s18  ;;  %v1005_v21 = vpop.f32.mrf.mxu1 }
  0xf9   :  { %v964_v20 = vpop.f32.mrf.mxu0 }
  0xfa   :  { %700 = vrot.lane.b32.xlu0 %v683_v60, %s8761_s18  ;;  %v1007_v23 = vpop.f32.mrf.mxu1 }
  0xfb   :  { %v966_v25 = vpop.f32.mrf.mxu0 }
  0xfc   :  { %702 = vrot.lane.b32.xlu1 %v687_v63, %s8761_s18  ;;  %v1009_v27 = vpop.f32.mrf.mxu1 }
  0xfd   :  { %v1120_v26 = vpop.f32.mrf.mxu0 }
  0xfe   :  { %696 = vrot.lane.b32.xlu0 %v642_v59, %s8761_s18  ;;  %v1163_v29 = vpop.f32.mrf.mxu1 }
  0xff   :  { %v1122_v28 = vpop.f32.mrf.mxu0 }
 0x100   :  { %698 = vrot.lane.b32.xlu1 %v646_v0, %s8761_s18  ;;  %v1165_v31 = vpop.f32.mrf.mxu1 }
 0x101   :  { %v1124_v30 = vpop.f32.mrf.mxu0 }
 0x102   :  { %704 = vrot.lane.b32.xlu0 %v685_v62, %s8761_s18  ;;  %v1167_v32 = vpop.f32.mrf.mxu1 }
 0x103   :  { %v1126_v33 = vpop.f32.mrf.mxu0 }
 0x104   :  { %706 = vrot.lane.b32.xlu1 %v689_v2, %s8761_s18  ;;  %v1169_v43 = vpop.f32.mrf.mxu1 }
 0x105   :  { %v1280_v42 = vpop.f32.mrf.mxu0 }
 0x106   :  { %852 = vrot.lane.b32.xlu0 %v800_v1, %s8762_s19  ;;  %v1323_v45 = vpop.f32.mrf.mxu1 }
 0x107   :  { %v1282_v44 = vpop.f32.mrf.mxu0 }
 0x108   :  { %854 = vrot.lane.b32.xlu1 %v804_v7, %s8762_s19  ;;  %v1325_v47 = vpop.f32.mrf.mxu1 }
 0x109   :  { %v1284_v46 = vpop.f32.mrf.mxu0 }
 0x10a   :  { %860 = vrot.lane.b32.xlu0 %v843_v6, %s8762_s19  ;;  %v1327_v48 = vpop.f32.mrf.mxu1 }
 0x10b   :  { %v1286_v49 = vpop.f32.mrf.mxu0 }
 0x10c   :  { %862 = vrot.lane.b32.xlu1 %v847_v11, %s8762_s19  ;;  %v1329_v51 = vpop.f32.mrf.mxu1 }
 0x10d   :  { %v1440_v50 = vpop.f32.mrf.mxu0 }
 0x10e   :  { %856 = vrot.lane.b32.xlu0 %v802_v5, %s8762_s19  ;;  %v1483_v53 = vpop.f32.mrf.mxu1 }
 0x10f   :  { %v1442_v52 = vpop.f32.mrf.mxu0 }
 0x110   :  { %858 = vrot.lane.b32.xlu1 %v806_v12, %s8762_s19  ;;  %v1485_v55 = vpop.f32.mrf.mxu1 }
 0x111   :  { %v1444_v54 = vpop.f32.mrf.mxu0 }
 0x112   :  { %864 = vrot.lane.b32.xlu0 %v845_v10, %s8762_s19  ;;  %v1487_v58 = vpop.f32.mrf.mxu1 }
 0x113   :  { %v1446_v61 = vpop.f32.mrf.mxu0 }
 0x114   :  { %866 = vrot.lane.b32.xlu1 %v849_v15, %s8762_s19  ;;  %v1489_v0 = vpop.f32.mrf.mxu1 }
 0x116   :  { %1012 = vrot.lane.b32.xlu0 %v960_v14, %s8763_s20 }
 0x118   :  { %1014 = vrot.lane.b32.xlu1 %v964_v20, %s8763_s20 }
 0x11a   :  { %1020 = vrot.lane.b32.xlu0 %v1003_v19, %s8763_s20 }
 0x11c   :  { %1022 = vrot.lane.b32.xlu1 %v1007_v23, %s8763_s20 }
 0x11e   :  { %1016 = vrot.lane.b32.xlu0 %v962_v16, %s8763_s20 }
 0x120   :  { %1018 = vrot.lane.b32.xlu1 %v966_v25, %s8763_s20 }
 0x122   :  { %1024 = vrot.lane.b32.xlu0 %v1005_v21, %s8763_s20 }
 0x124   :  { %1026 = vrot.lane.b32.xlu1 %v1009_v27, %s8763_s20 }
 0x126   :  { %1172 = vrot.lane.b32.xlu0 %v1120_v26, %s8764_s21 }
 0x128   :  { %1174 = vrot.lane.b32.xlu1 %v1124_v30, %s8764_s21 }
 0x12a   :  { %1180 = vrot.lane.b32.xlu0 %v1163_v29, %s8764_s21 }
 0x12c   :  { %1182 = vrot.lane.b32.xlu1 %v1167_v32, %s8764_s21 }
 0x12e   :  { %1176 = vrot.lane.b32.xlu0 %v1122_v28, %s8764_s21 }
 0x130   :  { %1178 = vrot.lane.b32.xlu1 %v1126_v33, %s8764_s21 }
 0x132   :  { %1184 = vrot.lane.b32.xlu0 %v1165_v31, %s8764_s21 }
 0x134   :  { %1186 = vrot.lane.b32.xlu1 %v1169_v43, %s8764_s21 }
 0x136   :  { %1332 = vrot.lane.b32.xlu0 %v1280_v42, %s8765_s22  ;;  %v387_v42 = vlaneseq }
 0x138   :  { %1334 = vrot.lane.b32.xlu1 %v1284_v46, %s8765_s22 }
 0x13a   :  { %1340 = vrot.lane.b32.xlu0 %v1323_v45, %s8765_s22  ;;  %v401_v45 = vshrl.u32 %v387_v42, 7 }
 0x13c   :  { %1342 = vrot.lane.b32.xlu1 %v1327_v48, %s8765_s22  ;;  %v9181_v48 = vand.u32 127, %v387_v42  ;;  %v126_v42 = vld [vmem:[%s13783_s3 + $0x20] sm:$0xff] }
 0x13e   :  { %1336 = vrot.lane.b32.xlu0 %v1282_v44, %s8765_s22  ;;  %vm389_vm1 = vcmp.lt.s32.totalorder %v9181_v48, 17  ;;  %vm548_vm2 = vcmp.lt.s32.totalorder %v9181_v48, 16  ;;  %vm708_vm3 = vcmp.lt.s32.totalorder %v9181_v48, 15  ;;  %vm868_vm4 = vcmp.lt.s32.totalorder %v9181_v48, 1 }
 0x13f   :  { %vm1028_vm5 = vcmp.lt.s32.totalorder %v9181_v48, 127  ;;  %vm1188_vm6 = vcmp.lt.s32.totalorder %v9181_v48, 113  ;;  %vm1348_vm7 = vcmp.lt.s32.totalorder %v9181_v48, 112  ;;  %vm1508_vm8 = vcmp.lt.s32.totalorder %v9181_v48, 111 }
 0x140   :  { %1338 = vrot.lane.b32.xlu1 %v1286_v49, %s8765_s22  ;;  %v9183_v49 = vsub.s32 1, %v401_v45 }
 0x142   :  { %1344 = vrot.lane.b32.xlu0 %v1325_v47, %s8765_s22  ;;  %14030 = vst [vmem:[#allocation18_spill] sm:$0xff] %v9183_v49 }
 0x144   :  { %1346 = vrot.lane.b32.xlu1 %v1329_v51, %s8765_s22  ;;  %v122_v51 = vld [vmem:[%s13783_s3] sm:$0xff] }
 0x145   :  { %v9220_v13 = vadd.f32 %v9033_v34, %v122_v51 }
 0x146   :  { %1492 = vrot.lane.b32.xlu0 %v1440_v50, %s8766_s23  ;;  %v9185_v50 = vsub.s32 2, %v401_v45 }
 0x148   :  { %v9106_v56 = vpop.permute.xlu0 %371  ;;  %1494 = vrot.lane.b32.xlu1 %v1444_v54, %s8766_s23  ;;  %14031 = vst [vmem:[#allocation19_spill] sm:$0xff] %v9185_v50 }
 0x14a   :  { %v9109_v57 = vpop.permute.xlu1 %375  ;;  %1500 = vrot.lane.b32.xlu0 %v1483_v53, %s8766_s23  ;;  %v9193_v53 = vsub.s32 0, %v401_v45 }
 0x14c   :  { %v9112_v59 = vpop.permute.xlu0 %379  ;;  %1502 = vrot.lane.b32.xlu1 %v1487_v58, %s8766_s23  ;;  %14032 = vst [vmem:[#allocation20_spill] sm:$0xff] %v9193_v53  ;;  %v123_v58 = vld [vmem:[%s13783_s3 + $0x8] sm:$0xff] }
 0x14d   :  { %v268_v34 = vadd.f32 %v9037_v36, %v123_v58  ;;  %v8383_v58 = vld [vmem:[%s13784_s1 + $0x5] ss:$8 sm:$0xf] }
 0x14e   :  { %v9115_v60 = vpop.permute.xlu1 %381  ;;  %1496 = vrot.lane.b32.xlu0 %v1442_v52, %s8766_s23  ;;  %v398_v52 = vld [vmem:[%s13784_s1] ss:$8 sm:$0xf] }
 0x14f   :  { %v9227_v22 = vrot.slane %v398_v52, %v9183_v49  ;;  %v9230_v8 = vrot.slane %v398_v52, %v9185_v50  ;;  %v9241_v4 = vrot.slane %v398_v52, %v9193_v53 }
 0x150   :  { %v9118_v62 = vpop.permute.xlu0 %383  ;;  %1498 = vrot.lane.b32.xlu1 %v1446_v61, %s8766_s23  ;;  %v125_v61 = vld [vmem:[%s13783_s3 + $0x18] sm:$0xff] }
 0x151   :  { %v9238_v51 = vadd.f32 %v9039_v37, %v125_v61  ;;  %v8379_v37 = vld [vmem:[%s13784_s1 + $0x3] ss:$8 sm:$0xf] }
 0x152   :  { %v9121_v63 = vpop.permute.xlu1 %377  ;;  %1504 = vrot.lane.b32.xlu0 %v1485_v55, %s8766_s23  ;;  %v124_v55 = vld [vmem:[%s13783_s3 + $0x10] sm:$0xff] }
 0x153   :  { %v269_v9 = vadd.f32 %v9035_v35, %v124_v55  ;;  %v9255_v35 = vadd.f32 %v9045_v40, %v127_v24 }
 0x154   :  { %v9124_v1 = vpop.permute.xlu0 %373  ;;  %1506 = vrot.lane.b32.xlu1 %v1489_v0, %s8766_s23  ;;  %v9206_v0 = vsub.s32 3, %v401_v45  ;;  %v129_v45 = vld [vmem:[%s13783_s3 + $0x38] sm:$0xff] }
 0x155   :  { %v9264_v55 = vadd.f32 %v9047_v41, %v129_v45  ;;  %v9297_v45 = vrot.slane %v8379_v37, %v9183_v49 }
 0x156   :  { %v9127_v2 = vpop.permute.xlu1 %385  ;;  %v9258_v36 = vrot.slane %v398_v52, %v9206_v0  ;;  %v9279_v40 = vrot.slane %v8371_v17, %v9206_v0 }
 0x157   :  { %14037 = vst [vmem:[#allocation25_spill] sm:$0xff] %v9297_v45  ;;  %v9316_v45 = vrot.slane %v8379_v37, %v9193_v53 }
 0x158   :  { %v9129_v5 = vpop.permute.xlu0 %532 }
 0x159   :  { %14040 = vst [vmem:[#allocation28_spill] sm:$0xff] %v9316_v45  ;;  %v9334_v45 = vrot.slane %v8383_v58, %v9183_v49 }
 0x15a   :  { %v9131_v6 = vpop.permute.xlu1 %534 }
 0x15b   :  { %14043 = vst [vmem:[#allocation31_spill] sm:$0xff] %v9334_v45 }
 0x15c   :  { %v9133_v7 = vpop.permute.xlu0 %540 }
 0x15e   :  { %v9135_v10 = vpop.permute.xlu1 %542 }
 0x160   :  { %v9137_v11 = vpop.permute.xlu0 %536 }
 0x162   :  { %v9139_v12 = vpop.permute.xlu1 %538 }
 0x164   :  { %v9141_v14 = vpop.permute.xlu0 %544 }
 0x166   :  { %v9143_v15 = vpop.permute.xlu1 %546 }
 0x168   :  { %v9145_v16 = vpop.permute.xlu0 %692 }
 0x16a   :  { %v9147_v19 = vpop.permute.xlu1 %694 }
 0x16c   :  { %v9149_v20 = vpop.permute.xlu0 %700 }
 0x16e   :  { %v9151_v21 = vpop.permute.xlu1 %702 }
 0x170   :  { %v9153_v23 = vpop.permute.xlu0 %696 }
 0x172   :  { %v9155_v25 = vpop.permute.xlu1 %698 }
 0x174   :  { %v9157_v26 = vpop.permute.xlu0 %704 }
 0x176   :  { %v9159_v27 = vpop.permute.xlu1 %706 }
 0x178   :  { %v9161_v28 = vpop.permute.xlu0 %852 }
 0x17a   :  { %v9163_v29 = vpop.permute.xlu1 %854 }
 0x17b   :  { %14023 = vst [vmem:[#allocation11_spill] sm:$0xff] %v9163_v29  ;;  %v9345_v29 = vrot.slane %v8383_v58, %v9206_v0 }
 0x17c   :  { %v9165_v30 = vpop.permute.xlu0 %860 }
 0x17d   :  { %14046 = vst [vmem:[#allocation34_spill] sm:$0xff] %v9345_v29 }
 0x17e   :  { %v9167_v31 = vpop.permute.xlu1 %862 }
 0x17f   :  { %14024 = vst [vmem:[#allocation12_spill] sm:$0xff] %v9167_v31 }
 0x180   :  { %v9169_v32 = vpop.permute.xlu0 %856 }
 0x182   :  { %v9171_v33 = vpop.permute.xlu1 %858 }
 0x183   :  { %14025 = vst [vmem:[#allocation13_spill] sm:$0xff] %v9171_v33 }
 0x184   :  { %v9173_v43 = vpop.permute.xlu0 %864 }
 0x185   :  { %14026 = vst [vmem:[#allocation14_spill] sm:$0xff] %v9173_v43  ;;  %v396_v43 = vsel %vm389_vm1, %v9118_v62, %v9106_v56 }
 0x186   :  { %v9175_v44 = vpop.permute.xlu1 %866 }
 0x187   :  { %14027 = vst [vmem:[#allocation15_spill] sm:$0xff] %v9175_v44  ;;  %v394_v44 = vsel %vm389_vm1, %v9106_v56, %v9109_v57 }
 0x188   :  { %v9177_v46 = vpop.permute.xlu0 %1012  ;;  %v421_v45 = vmul.f32 %v9227_v22, %v394_v44 }
 0x189   :  { %14028 = vst [vmem:[#allocation16_spill] sm:$0xff] %v9177_v46  ;;  %v9249_v46 = vadd.f32 %v9041_v38, %v126_v42  ;;  %v9268_v38 = vrot.slane %v8371_v17, %v9183_v49 }
 0x18a   :  { %v9179_v47 = vpop.permute.xlu1 %1014 }
 0x18b   :  { %14029 = vst [vmem:[#allocation17_spill] sm:$0xff] %v9179_v47  ;;  %v8375_v47 = vld [vmem:[%s13784_s1 + $0x2] ss:$8 sm:$0xf] }
 0x18c   :  { %v9195_v54 = vpop.permute.xlu0 %1020  ;;  %v9282_v52 = vrot.slane %v8375_v47, %v9183_v49  ;;  %v9285_v41 = vrot.slane %v8375_v47, %v9185_v50  ;;  %v9291_v61 = vrot.slane %v8375_v47, %v9193_v53  ;;  %v9294_v42 = vrot.slane %v8375_v47, %v9206_v0 }
 0x18d   :  { %14033 = vst [vmem:[#allocation21_spill] sm:$0xff] %v9195_v54  ;;  %v9252_v54 = vadd.f32 %v9043_v39, %v128_v3  ;;  %v9271_v3 = vrot.slane %v8371_v17, %v9185_v50  ;;  %v9276_v39 = vrot.slane %v8371_v17, %v9193_v53  ;;  %v9300_v17 = vrot.slane %v8379_v37, %v9185_v50 }
 0x18e   :  { %v9217_v18 = vpop.permute.xlu1 %1022  ;;  %v392_v47 = vsel %vm389_vm1, %v9109_v57, %v9112_v59  ;;  %v9331_v57 = vrot.slane %v8383_v58, %v9193_v53 }
 0x18f   :  { %14034 = vst [vmem:[#allocation22_spill] sm:$0xff] %v9217_v18  ;;  %14038 = vst [vmem:[#allocation26_spill] sm:$0xff] %v9300_v17  ;;  %v9319_v17 = vrot.slane %v8379_v37, %v9206_v0 }
 0x190   :  { %v9246_v18 = vpop.permute.xlu0 %1016  ;;  %14042 = vst [vmem:[#allocation30_spill] sm:$0xff] %v9331_v57  ;;  %v422_v57 = vmul.f32 %v9230_v8, %v392_v47 }
 0x191   :  { %14035 = vst [vmem:[#allocation23_spill] sm:$0xff] %v9246_v18  ;;  %v8387_v18 = vld [vmem:[%s13784_s1 + $0x6] ss:$8 sm:$0xf]  ;;  %14041 = vst [vmem:[#allocation29_spill] sm:$0xff] %v9319_v17 }
 0x192   :  { %v9273_v24 = vpop.permute.xlu1 %1018  ;;  %v8391_v17 = vld [vmem:[%s13784_s1 + $0x7] ss:$8 sm:$0xf]  ;;  %v9348_v56 = vrot.slane %v8387_v18, %v9193_v53 }
 0x193   :  { %14036 = vst [vmem:[#allocation24_spill] sm:$0xff] %v9273_v24  ;;  %v9369_v29 = vrot.slane %v8391_v17, %v9193_v53  ;;  %v9372_v31 = vrot.slane %v8391_v17, %v9183_v49  ;;  %v9377_v47 = vrot.slane %v8391_v17, %v9185_v50 }
 0x194   :  { %v9302_v24 = vpop.permute.xlu0 %1024  ;;  %14047 = vst [vmem:[#allocation35_spill] sm:$0xff] %v9348_v56  ;;  %v420_v56 = vmul.f32 %v9241_v4, %v396_v43 }
 0x195   :  { %14039 = vst [vmem:[#allocation27_spill] sm:$0xff] %v9302_v24  ;;  %v390_v24 = vsel %vm389_vm1, %v9112_v59, %v9118_v62  ;;  %v9342_v59 = vrot.slane %v8383_v58, %v9185_v50  ;;  %v9351_v62 = vrot.slane %v8387_v18, %v9183_v49  ;;  %v9364_v58 = vrot.slane %v8387_v18, %v9206_v0 }
 0x196   :  { %v9336_v37 = vpop.permute.xlu1 %1026  ;;  %14050 = vst [vmem:[#allocation38_spill] sm:$0xff] %v9372_v31  ;;  %14051 = vst [vmem:[#allocation39_spill] sm:$0xff] %v9377_v47  ;;  %v395_v31 = vsel %vm389_vm1, %v9124_v1, %v9121_v63 }
 0x197   :  { %14044 = vst [vmem:[#allocation32_spill] sm:$0xff] %v9336_v37  ;;  %14045 = vst [vmem:[#allocation33_spill] sm:$0xff] %v9342_v59  ;;  %v8395_v37 = vld [vmem:[%s13784_s1 + $0x20] ss:$8 sm:$0xf]  ;;  %v9361_v59 = vrot.slane %v8387_v18, %v9185_v50 }
 0x198   :  { %14048 = vst [vmem:[#allocation36_spill] sm:$0xff] %v9351_v62  ;;  %v9358_v33 = vpop.permute.xlu0 %1172  ;;  %v423_v62 = vmul.f32 %v9258_v36, %v390_v24  ;;  %v9383_v18 = vrot.slane %v8395_v37, %v9193_v53  ;;  %v9386_v43 = vrot.slane %v8395_v37, %v9183_v49  ;;  %v393_v24 = vsel %vm389_vm1, %v9121_v63, %v9115_v60 }
 0x199   :  { %14049 = vst [vmem:[#allocation37_spill] sm:$0xff] %v9361_v59  ;;  %v9380_v59 = vrot.slane %v8391_v17, %v9206_v0  ;;  %v9397_v47 = vrot.slane %v8395_v37, %v9185_v50  ;;  %v9400_v17 = vrot.slane %v8395_v37, %v9206_v0  ;;  %v429_v53 = vadd.f32 %v421_v45, %v268_v34 }
 0x19a   :  { %v9374_v44 = vpop.permute.xlu1 %1174  ;;  %14053 = vst [vmem:[#allocation41_spill] sm:$0xff] %v9383_v18  ;;  %14054 = vst [vmem:[#allocation42_spill] sm:$0xff] %v9386_v43  ;;  %v430_v18 = vadd.f32 %v422_v57, %v269_v9  ;;  %v391_v49 = vsel %vm389_vm1, %v9115_v60, %v9127_v2  ;;  %v397_v43 = vsel %vm389_vm1, %v9127_v2, %v9124_v1 }
 0x19b   :  { %14052 = vst [vmem:[#allocation40_spill] sm:$0xff] %v9380_v59  ;;  %v428_v63 = vadd.f32 %v420_v56, %v9220_v13  ;;  %v431_v50 = vadd.f32 %v423_v62, %v9238_v51  ;;  %v551_v9 = vsel %vm548_vm2, %v9137_v11, %v9133_v7  ;;  %v553_v60 = vsel %vm548_vm2, %v9129_v5, %v9137_v11 }
 0x19c   :  { %v9410_v59 = vpop.permute.xlu0 %1180  ;;  %v426_v34 = vmul.f32 %v9230_v8, %v393_v24  ;;  %v425_v1 = vmul.f32 %v9227_v22, %v395_v31  ;;  %v552_v13 = vsel %vm548_vm2, %v9139_v12, %v9135_v10  ;;  %v554_v2 = vsel %vm548_vm2, %v9131_v6, %v9139_v12 }
 0x19d   :  { %v424_v11 = vmul.f32 %v9241_v4, %v397_v43  ;;  %v427_v8 = vmul.f32 %v9258_v36, %v391_v49  ;;  %v549_v22 = vsel %vm548_vm2, %v9133_v7, %v9141_v14  ;;  %v555_v31 = vsel %vm548_vm2, %v9141_v14, %v9129_v5 }
 0x19e   :  { %v9433_v51 = vpop.permute.xlu1 %1182  ;;  %v581_v12 = vmul.f32 %v9268_v38, %v553_v60  ;;  %v582_v45 = vmul.f32 %v9271_v3, %v551_v9  ;;  %v550_v4 = vsel %vm548_vm2, %v9135_v10, %v9143_v15  ;;  %v556_v49 = vsel %vm548_vm2, %v9143_v15, %v9131_v6 }
 0x19f   :  { %v585_v36 = vmul.f32 %v9268_v38, %v554_v2  ;;  %v586_v5 = vmul.f32 %v9271_v3, %v552_v13  ;;  %v711_v14 = vsel %vm708_vm3, %v9153_v23, %v9149_v20  ;;  %v713_v10 = vsel %vm708_vm3, %v9145_v16, %v9153_v23 }
 0x1a0   :  { %v9455_v7 = vpop.permute.xlu0 %1176  ;;  %v580_v57 = vmul.f32 %v9276_v39, %v555_v31  ;;  %v583_v6 = vmul.f32 %v9279_v40, %v549_v22  ;;  %v712_v15 = vsel %vm708_vm3, %v9155_v25, %v9151_v21  ;;  %v714_v38 = vsel %vm708_vm3, %v9147_v19, %v9155_v25 }
 0x1a1   :  { %v434_v23 = vadd.f32 %v426_v34, %v9252_v54  ;;  %v433_v37 = vadd.f32 %v425_v1, %v9255_v35  ;;  %v584_v56 = vmul.f32 %v9276_v39, %v556_v49  ;;  %v587_v62 = vmul.f32 %v9279_v40, %v550_v4 }
 0x1a2   :  { %v9478_v3 = vpop.permute.xlu1 %1178  ;;  %v432_v43 = vadd.f32 %v424_v11, %v9249_v46  ;;  %v435_v24 = vadd.f32 %v427_v8, %v9264_v55  ;;  %v741_v9 = vmul.f32 %v9282_v52, %v713_v10  ;;  %v742_v25 = vmul.f32 %v9285_v41, %v711_v14 }
 0x1a3   :  { %v589_v13 = vadd.f32 %v581_v12, %v429_v53  ;;  %v590_v2 = vadd.f32 %v582_v45, %v430_v18  ;;  %v745_v54 = vmul.f32 %v9282_v52, %v714_v38  ;;  %v746_v35 = vmul.f32 %v9285_v41, %v712_v15  ;;  %v14055_v12 = vld [vmem:[#allocation12_spill] sm:$0xff]  ;;  %v14057_v45 = vld [vmem:[#allocation11_spill] sm:$0xff]  ;;  %v14060_v15 = vld [vmem:[#allocation26_spill] sm:$0xff] }
 0x1a4   :  { %v9488_v60 = vpop.permute.xlu0 %1184  ;;  %v593_v34 = vadd.f32 %v585_v36, %v433_v37  ;;  %v594_v39 = vadd.f32 %v586_v5, %v434_v23  ;;  %v588_v1 = vadd.f32 %v580_v57, %v428_v63  ;;  %v591_v40 = vadd.f32 %v583_v6, %v431_v50  ;;  %v14058_v5 = vld [vmem:[#allocation14_spill] sm:$0xff]  ;;  %v14059_v57 = vld [vmem:[#allocation25_spill] sm:$0xff]  ;;  %v14061_v23 = vld [vmem:[#allocation15_spill] sm:$0xff] }
 0x1a5   :  { %v592_v46 = vadd.f32 %v584_v56, %v432_v43  ;;  %v595_v55 = vadd.f32 %v587_v62, %v435_v24  ;;  %v709_v11 = vsel %vm708_vm3, %v9149_v20, %v9157_v26  ;;  %v715_v53 = vsel %vm708_vm3, %v9157_v26, %v9145_v16  ;;  %v14062_v56 = vld [vmem:[#allocation21_spill] sm:$0xff]  ;;  %v14063_v62 = vld [vmem:[#allocation23_spill] sm:$0xff]  ;;  %v14064_v24 = vld [vmem:[#allocation16_spill] sm:$0xff] }
 0x1a6   :  { %v9492_v22 = vpop.permute.xlu1 %1186  ;;  %v749_v52 = vadd.f32 %v741_v9, %v589_v13  ;;  %v750_v41 = vadd.f32 %v742_v25, %v590_v2  ;;  %v710_v50 = vsel %vm708_vm3, %v9151_v21, %v9159_v27  ;;  %v716_v18 = vsel %vm708_vm3, %v9159_v27, %v9147_v19  ;;  %v14056_v19 = vld [vmem:[#allocation13_spill] sm:$0xff]  ;;  %v14065_v25 = vld [vmem:[#allocation28_spill] sm:$0xff] }
 0x1a7   :  { %v753_v20 = vadd.f32 %v745_v54, %v593_v34  ;;  %v754_v8 = vadd.f32 %v746_v35, %v594_v39  ;;  %v871_v16 = vsel %vm868_vm4, %v9169_v32, %v9165_v30  ;;  %v873_v26 = vsel %vm868_vm4, %v9161_v28, %v9169_v32  ;;  %v14066_v2 = vld [vmem:[#allocation29_spill] sm:$0xff]  ;;  %v14067_v35 = vld [vmem:[#allocation22_spill] sm:$0xff]  ;;  %v14068_v34 = vld [vmem:[#allocation24_spill] sm:$0xff] }
 0x1a8   :  { %v9510_v63 = vpop.permute.xlu0 %1332  ;;  %v740_v21 = vmul.f32 %v9291_v61, %v715_v53  ;;  %v743_v31 = vmul.f32 %v9294_v42, %v709_v11  ;;  %v872_v27 = vsel %vm868_vm4, %v14056_v19, %v14055_v12  ;;  %v874_v4 = vsel %vm868_vm4, %v14057_v45, %v14056_v19  ;;  %v14069_v11 = vld [vmem:[#allocation17_spill] sm:$0xff] }
 0x1a9   :  { %v744_v32 = vmul.f32 %v9291_v61, %v716_v18  ;;  %v747_v36 = vmul.f32 %v9294_v42, %v710_v50  ;;  %v869_v14 = vsel %vm868_vm4, %v9165_v30, %v14058_v5  ;;  %v875_v10 = vsel %vm868_vm4, %v14058_v5, %v9161_v28  ;;  %v14071_v5 = vld [vmem:[#allocation31_spill] sm:$0xff] }
 0x1aa   :  { %v9531_v49 = vpop.permute.xlu1 %1334  ;;  %v901_v6 = vmul.f32 %v14059_v57, %v873_v26  ;;  %v902_v38 = vmul.f32 %v14060_v15, %v871_v16  ;;  %v870_v61 = vsel %vm868_vm4, %v14055_v12, %v14061_v23  ;;  %v876_v42 = vsel %vm868_vm4, %v14061_v23, %v14057_v45  ;;  %v14070_v45 = vld [vmem:[#allocation30_spill] sm:$0xff] }
 0x1ab   :  { %v905_v37 = vmul.f32 %v14059_v57, %v874_v4  ;;  %v906_v28 = vmul.f32 %v14060_v15, %v872_v27  ;;  %v1031_v43 = vsel %vm1028_vm5, %v14063_v62, %v14062_v56  ;;  %v1033_v9 = vsel %vm1028_vm5, %v14064_v24, %v14063_v62 }
 0x1ac   :  { %v9553_v30 = vpop.permute.xlu0 %1340  ;;  %v900_v13 = vmul.f32 %v14065_v25, %v875_v10  ;;  %v903_v54 = vmul.f32 %v14066_v2, %v869_v14  ;;  %v1032_v39 = vsel %vm1028_vm5, %v14068_v34, %v14067_v35  ;;  %v1034_v53 = vsel %vm1028_vm5, %v14069_v11, %v14068_v34 }
 0x1ad   :  { %v748_v18 = vadd.f32 %v740_v21, %v588_v1  ;;  %v751_v16 = vadd.f32 %v743_v31, %v591_v40  ;;  %v904_v26 = vmul.f32 %v14065_v25, %v876_v42  ;;  %v907_v12 = vmul.f32 %v14066_v2, %v870_v61 }
 0x1ae   :  { %v9575_v50 = vpop.permute.xlu1 %1342  ;;  %v752_v19 = vadd.f32 %v744_v32, %v592_v46  ;;  %v755_v27 = vadd.f32 %v747_v36, %v595_v55  ;;  %v1060_v4 = vmul.f32 %v14070_v45, %v1033_v9  ;;  %v1061_v14 = vmul.f32 %v14071_v5, %v1031_v43  ;;  %v14072_v46 = vld [vmem:[#allocation27_spill] sm:$0xff]  ;;  %v14073_v36 = vld [vmem:[#allocation32_spill] sm:$0xff]  ;;  %v14074_v43 = vld [vmem:[#allocation33_spill] sm:$0xff] }
 0x1af   :  { %v909_v57 = vadd.f32 %v901_v6, %v749_v52  ;;  %v910_v15 = vadd.f32 %v902_v38, %v750_v41  ;;  %v1064_v23 = vmul.f32 %v14070_v45, %v1034_v53  ;;  %v1065_v62 = vmul.f32 %v14071_v5, %v1032_v39  ;;  %v14075_v9 = vld [vmem:[#allocation34_spill] sm:$0xff]  ;;  %v14076_v53 = vld [vmem:[#allocation35_spill] sm:$0xff] }
 0x1b0   :  { %v1337_v10 = vpop.permute.xlu0 %1336  ;;  %v913_v34 = vadd.f32 %v905_v37, %v753_v20  ;;  %v914_v1 = vadd.f32 %v906_v28, %v754_v8  ;;  %v908_v40 = vadd.f32 %v900_v13, %v748_v18  ;;  %v911_v21 = vadd.f32 %v903_v54, %v751_v16 }
 0x1b1   :  { %v912_v42 = vadd.f32 %v904_v26, %v752_v19  ;;  %v915_v61 = vadd.f32 %v907_v12, %v755_v27  ;;  %v1029_v55 = vsel %vm1028_vm5, %v14062_v56, %v14072_v46  ;;  %v1035_v52 = vsel %vm1028_vm5, %v14072_v46, %v14064_v24 }
 0x1b2   :  { %v1339_v31 = vpop.permute.xlu1 %1338  ;;  %v1068_v41 = vadd.f32 %v1060_v4, %v908_v40  ;;  %v1069_v32 = vadd.f32 %v1061_v14, %v909_v57  ;;  %v1030_v20 = vsel %vm1028_vm5, %v14067_v35, %v14073_v36  ;;  %v1036_v8 = vsel %vm1028_vm5, %v14073_v36, %v14069_v11  ;;  %v14078_v4 = vld [vmem:[#allocation37_spill] sm:$0xff]  ;;  %v14079_v40 = vld [vmem:[#allocation38_spill] sm:$0xff] }
 0x1b3   :  { %v1072_v38 = vadd.f32 %v1064_v23, %v912_v42  ;;  %v1073_v37 = vadd.f32 %v1065_v62, %v913_v34  ;;  %v1191_v28 = vsel %vm1188_vm6, %v9455_v7, %v9410_v59  ;;  %v1193_v56 = vsel %vm1188_vm6, %v9358_v33, %v9455_v7 }
 0x1b4   :  { %v1345_v6 = vpop.permute.xlu0 %1344  ;;  %v1062_v24 = vmul.f32 %v14074_v43, %v1029_v55  ;;  %v1063_v25 = vmul.f32 %v14075_v9, %v1035_v52  ;;  %v1192_v13 = vsel %vm1188_vm6, %v9478_v3, %v9433_v51  ;;  %v1194_v2 = vsel %vm1188_vm6, %v9374_v44, %v9478_v3  ;;  %v14077_v3 = vld [vmem:[#allocation36_spill] sm:$0xff] }
 0x1b5   :  { %v1066_v35 = vmul.f32 %v14074_v43, %v1030_v20  ;;  %v1067_v7 = vmul.f32 %v14075_v9, %v1036_v8  ;;  %v1189_v39 = vsel %vm1188_vm6, %v9410_v59, %v9488_v60  ;;  %v1195_v11 = vsel %vm1188_vm6, %v9488_v60, %v9358_v33  ;;  %v14080_v43 = vld [vmem:[#allocation39_spill] sm:$0xff]  ;;  %v14081_v9 = vld [vmem:[#allocation40_spill] sm:$0xff] }
 0x1b6   :  { %v1347_v54 = vpop.permute.xlu1 %1346  ;;  %v1220_v18 = vmul.f32 %v14076_v53, %v1193_v56  ;;  %v1221_v16 = vmul.f32 %v14077_v3, %v1191_v28  ;;  %v1190_v26 = vsel %vm1188_vm6, %v9433_v51, %v9492_v22  ;;  %v1196_v12 = vsel %vm1188_vm6, %v9492_v22, %v9374_v44 }
 0x1b7   :  { %v1224_v19 = vmul.f32 %v14076_v53, %v1194_v2  ;;  %v1225_v27 = vmul.f32 %v14077_v3, %v1192_v13  ;;  %v1351_v33 = vsel %vm1348_vm7, %v1337_v10, %v9553_v30  ;;  %v1353_v60 = vsel %vm1348_vm7, %v9510_v63, %v1337_v10 }
 0x1b8   :  { %v1493_v59 = vpop.permute.xlu0 %1492  ;;  %v1070_v45 = vadd.f32 %v1062_v24, %v910_v15  ;;  %v1071_v51 = vadd.f32 %v1063_v25, %v911_v21  ;;  %v1222_v5 = vmul.f32 %v14078_v4, %v1189_v39  ;;  %v1223_v14 = vmul.f32 %v9364_v58, %v1195_v11 }
 0x1b9   :  { %v1226_v22 = vmul.f32 %v14078_v4, %v1190_v26  ;;  %v1227_v57 = vmul.f32 %v9364_v58, %v1196_v12  ;;  %v1352_v23 = vsel %vm1348_vm7, %v1339_v31, %v9575_v50  ;;  %v1354_v62 = vsel %vm1348_vm7, %v9531_v49, %v1339_v31 }
 0x1ba   :  { %v1495_v44 = vpop.permute.xlu1 %1494  ;;  %v1074_v10 = vadd.f32 %v1066_v35, %v914_v1  ;;  %v1075_v15 = vadd.f32 %v1067_v7, %v915_v61  ;;  %v1380_v34 = vmul.f32 %v9369_v29, %v1353_v60  ;;  %v1381_v21 = vmul.f32 %v14079_v40, %v1351_v33  ;;  %v14082_v35 = vld [vmem:[#allocation41_spill] sm:$0xff] }
 0x1bb   :  { %v1228_v46 = vadd.f32 %v1220_v18, %v1068_v41  ;;  %v1229_v55 = vadd.f32 %v1221_v16, %v1069_v32  ;;  %v1232_v52 = vadd.f32 %v1224_v19, %v1072_v38  ;;  %v1233_v36 = vadd.f32 %v1225_v27, %v1073_v37 }
 0x1bc   :  { %v1501_v42 = vpop.permute.xlu0 %1500  ;;  %v1384_v58 = vmul.f32 %v9369_v29, %v1354_v62  ;;  %v1385_v20 = vmul.f32 %v14079_v40, %v1352_v23  ;;  %v1349_v8 = vsel %vm1348_vm7, %v9553_v30, %v1345_v6  ;;  %v1355_v1 = vsel %vm1348_vm7, %v1345_v6, %v9510_v63 }
 0x1bd   :  { %v1230_v61 = vadd.f32 %v1222_v5, %v1070_v45  ;;  %v1231_v28 = vadd.f32 %v1223_v14, %v1071_v51  ;;  %v1234_v56 = vadd.f32 %v1226_v22, %v1074_v10  ;;  %v1235_v41 = vadd.f32 %v1227_v57, %v1075_v15 }
 0x1be   :  { %v1503_v31 = vpop.permute.xlu1 %1502  ;;  %v1388_v32 = vadd.f32 %v1380_v34, %v1228_v46  ;;  %v1389_v38 = vadd.f32 %v1381_v21, %v1229_v55  ;;  %v1350_v29 = vsel %vm1348_vm7, %v9575_v50, %v1347_v54  ;;  %v1356_v37 = vsel %vm1348_vm7, %v1347_v54, %v9531_v49  ;;  %v14083_v50 = vld [vmem:[#allocation42_spill] sm:$0xff] }
 0x1bf   :  { %v1382_v24 = vmul.f32 %v14080_v43, %v1349_v8  ;;  %v1383_v63 = vmul.f32 %v14081_v9, %v1355_v1  ;;  %v1392_v13 = vadd.f32 %v1384_v58, %v1232_v52  ;;  %v1393_v2 = vadd.f32 %v1385_v20, %v1233_v36 }
 0x1c0   :  { %v1497_v30 = vpop.permute.xlu0 %1496  ;;  %v1386_v49 = vmul.f32 %v14080_v43, %v1350_v29  ;;  %v1387_v54 = vmul.f32 %v14081_v9, %v1356_v37  ;;  %v14086_v29 = vld [vmem:[#allocation3_spill] sm:$0xff]  ;;  %v14089_v43 = vld [vmem:[#allocation5_spill] sm:$0xff]  ;;  %v14091_v9 = vld [vmem:[#allocation4_spill] sm:$0xff] }
 0x1c1   :  { %v1511_v6 = vsel %vm1508_vm8, %v1497_v30, %v1501_v42  ;;  %v1513_v25 = vsel %vm1508_vm8, %v1493_v59, %v1497_v30  ;;  %v1390_v27 = vadd.f32 %v1382_v24, %v1230_v61  ;;  %v1391_v33 = vadd.f32 %v1383_v63, %v1231_v28  ;;  %v14090_v24 = vld [vmem:[#allocation7_spill] sm:$0xff] }
 0x1c2   :  { %v1540_v7 = vmul.f32 %v14082_v35, %v1513_v25  ;;  %v1541_v39 = vmul.f32 %v14083_v50, %v1511_v6  ;;  %v1499_v11 = vpop.permute.xlu1 %1498  ;;  %v1394_v15 = vadd.f32 %v1386_v49, %v1234_v56  ;;  %v1395_v34 = vadd.f32 %v1387_v54, %v1235_v41  ;;  %v8713_v63 = vld [vmem:[%s13782_s4 + $0x20] sm:$0xff]   ;;  %v14092_v6 = vld [vmem:[#allocation9_spill] sm:$0xff]  ;;  %v14093_v25 = vld [vmem:[#allocation6_spill] sm:$0xff] }
 0x1c3   :  { %v1512_v53 = vsel %vm1508_vm8, %v1499_v11, %v1503_v31  ;;  %v1514_v18 = vsel %vm1508_vm8, %v1495_v44, %v1499_v11  ;;  %v8717_v11 = vld [vmem:[%s13782_s4 + $0x18] sm:$0xff]   ;;  %v8718_v49 = vld [vmem:[%s13782_s4 + $0x28] sm:$0xff]   ;;  %v8719_v54 = vld [vmem:[%s13782_s4 + $0x30] sm:$0xff]  }
 0x1c4   :  { %v1548_v3 = vadd.f32 %v1540_v7, %v1388_v32  ;;  %v1549_v16 = vadd.f32 %v1541_v39, %v1389_v38  ;;  %v1544_v26 = vmul.f32 %v14082_v35, %v1514_v18  ;;  %v1545_v12 = vmul.f32 %v14083_v50, %v1512_v53  ;;  %v1505_v19 = vpop.permute.xlu0 %1504  ;;  %v14096_v35 = vld [vmem:[#allocation10_spill] sm:$0xff]  ;;  %v8714_v7 = vld [vmem:[%s13782_s4] sm:$0xff]   ;;  %v8715_v50 = vld [vmem:[%s13782_s4 + $0x8] sm:$0xff]  }
 0x1c5   :  { %v1509_v60 = vsel %vm1508_vm8, %v1501_v42, %v1505_v19  ;;  %v1515_v45 = vsel %vm1508_vm8, %v1505_v19, %v1493_v59  ;;  %v8716_v39 = vld [vmem:[%s13782_s4 + $0x10] sm:$0xff]   ;;  %v8720_v53 = vld [vmem:[%s13782_s4 + $0x38] sm:$0xff]   ;;  %v8721_v18 = vld [vmem:[%s13782_s4 + $0x40] sm:$0xff]  }
 0x1c6   :  { %v1556_v51 = vmul.f32 0.2, %v1548_v3  ;;  %v1557_v4 = vmul.f32 0.2, %v1549_v16  ;;  %v1552_v5 = vadd.f32 %v1544_v26, %v1392_v13  ;;  %v1553_v14 = vadd.f32 %v1545_v12, %v1393_v2  ;;  %v1507_v22 = vpop.permute.xlu1 %1506  ;;  %v14094_v13 = vld [vmem:[#allocation8_spill] sm:$0xff] }
 0x1c7   :  { %v1542_v57 = vmul.f32 %v9397_v47, %v1509_v60  ;;  %v1543_v23 = vmul.f32 %v9400_v17, %v1515_v45  ;;  %v1510_v62 = vsel %vm1508_vm8, %v1503_v31, %v1507_v22  ;;  %v1516_v10 = vsel %vm1508_vm8, %v1507_v22, %v1495_v44 }
 0x1c8   :  { %v1560_v40 = vmul.f32 0.2, %v1552_v5  ;;  %v1561_v21 = vmul.f32 0.2, %v1553_v14  ;;  %v1546_v46 = vmul.f32 %v9397_v47, %v1510_v62  ;;  %v1547_v55 = vmul.f32 %v9400_v17, %v1516_v10 }
 0x1c9   :  { %v1550_v59 = vadd.f32 %v1542_v57, %v1390_v27  ;;  %v1551_v42 = vadd.f32 %v1543_v23, %v1391_v33  ;;  %v1564_v52 = vmax.f32 %v1548_v3, %v1556_v51  ;;  %v1565_v36 = vmax.f32 %v1549_v16, %v1557_v4 }
 0x1ca   :  { %v1568_v58 = vmax.f32 %v1552_v5, %v1560_v40  ;;  %v1569_v20 = vmax.f32 %v1553_v14, %v1561_v21  ;;  %v1554_v31 = vadd.f32 %v1546_v46, %v1394_v15  ;;  %v1555_v61 = vadd.f32 %v1547_v55, %v1395_v34 }
 0x1cb   :  { %v1558_v8 = vmul.f32 0.2, %v1550_v59  ;;  %v1559_v1 = vmul.f32 0.2, %v1551_v42  ;;  %v14095_v2 = vmov 0  }
 0x1cc   :  { %v9701_v28 = vpack.c.bf16 %v1568_v58, %v1564_v52  ;;  %v9703_v44 = vpack.c.bf16 %v1569_v20, %v1565_v36  ;;  %v1562_v56 = vmul.f32 0.2, %v1554_v31  ;;  %v1563_v41 = vmul.f32 0.2, %v1555_v61 }
 0x1cd   :  { %v1566_v32 = vmax.f32 %v1550_v59, %v1558_v8  ;;  %v1567_v47 = vmax.f32 %v1551_v42, %v1559_v1 }
 0x1ce   :  { %14084 = vst [vmem:[#allocation12_spill] sm:$0xff] %v9701_v28  ;;  %14085 = vst [vmem:[#allocation13_spill] sm:$0xff] %v9703_v44  ;;  %1701 = vmatprep.subr.bf16.mxu0 %v9703_v44  ;;  %v1570_v38 = vmax.f32 %v1554_v31, %v1562_v56  ;;  %v1571_v17 = vmax.f32 %v1555_v61, %v1563_v41 }
 0x1cf   :  { %1702 = vmatpush1.bf16.msra.mxu0 %v9701_v28 }
 0x1d0   :  { %1703 = vmatprep.subr.bf16.mxu0 %v14086_v29  ;;  %v9708_v37 = vpack.c.bf16 %v1570_v38, %v1566_v32  ;;  %v9710_v30 = vpack.c.bf16 %v1571_v17, %v1567_v47 }
 0x1d2   :  { %14087 = vst [vmem:[#allocation11_spill] sm:$0xff] %v9708_v37  ;;  %14088 = vst [vmem:[#allocation14_spill] sm:$0xff] %v9710_v30  ;;  %1744 = vmatprep.subr.bf16.mxu1 %v9710_v30 }
 0x1d3   :  { %1704 = vmatpush1.bf16.msra.mxu0 %v14089_v43  ;;  %1745 = vmatpush1.bf16.msra.mxu1 %v9708_v37 }
 0x1d4   :  { %1705 = vmatprep.subr.bf16.mxu0 %v14090_v24  ;;  %1746 = vmatprep.subr.bf16.mxu1 %v14091_v9 }
 0x1d7   :  { %1706 = vmatpush1.bf16.msra.mxu0 %v14092_v6  ;;  %1747 = vmatpush1.bf16.msra.mxu1 %v14093_v25 }
 0x1d8   :  { %1805 = vmatprep.subr.bf16.mxu0 %v9703_v44  ;;  %1748 = vmatprep.subr.bf16.mxu1 %v14094_v13 }
 0x1da   :  { %8413 = vmatmul.mubr.msk.bf16.vlgmr.msra.gmra.mxu0 %vm1687_vm9, %v8713_v63 }
 0x1db   :  { %1806 = vmatpush1.bf16.msra.mxu0 %v9701_v28  ;;  %1827 = vmatprep.mubr.bf16.mxu0 %v14095_v2 }
 0x1dc   :  { %1749 = vmatpush1.bf16.msra.mxu1 %v14096_v35  ;;  %1807 = vmatprep.subr.bf16.mxu0 %v14086_v29 }
 0x1dd   :  { %1848 = vmatprep.subr.bf16.mxu1 %v9710_v30 }
 0x1df   :  { %8414 = vmatmul.mubr.msk.bf16.vlgmr.msra.gmra.mxu1 %vm1687_vm9, %v8713_v63  ;;  %1808 = vmatpush1.bf16.msra.mxu0 %v14089_v43 }
 0x1e0   :  { %1849 = vmatpush1.bf16.msra.mxu1 %v9708_v37  ;;  %1809 = vmatprep.subr.bf16.mxu0 %v14090_v24 }
 0x1e1   :  { %1850 = vmatprep.subr.bf16.mxu1 %v14091_v9  ;;  %1870 = vmatprep.mubr.bf16.mxu1 %v14095_v2 }
 0x1e3   :  { %1810 = vmatpush1.bf16.msra.mxu0 %v14092_v6 }
 0x1e4   :  { %1851 = vmatpush1.bf16.msra.mxu1 %v14093_v25  ;;  %1963 = vmatprep.subr.bf16.mxu0 %v9703_v44 }
 0x1e5   :  { %1852 = vmatprep.subr.bf16.mxu1 %v14094_v13 }
 0x1e6   :  { %8416 = vmatmul.mubr.msk.bf16.vlgmr.msra.gmra.mxu0 %vm1687_vm9, %v8714_v7 }
 0x1e7   :  { %1964 = vmatpush1.bf16.msra.mxu0 %v9701_v28  ;;  %1985 = vmatprep.mubr.bf16.mxu0 %v14095_v2 }
 0x1e8   :  { %1853 = vmatpush1.bf16.msra.mxu1 %v14096_v35  ;;  %1965 = vmatprep.subr.bf16.mxu0 %v14086_v29 }
 0x1e9   :  { %2006 = vmatprep.subr.bf16.mxu1 %v9710_v30 }
 0x1eb   :  { %8417 = vmatmul.mubr.msk.bf16.vlgmr.msra.gmra.mxu1 %vm1687_vm9, %v8714_v7  ;;  %1966 = vmatpush1.bf16.msra.mxu0 %v14089_v43 }
 0x1ec   :  { %2007 = vmatpush1.bf16.msra.mxu1 %v9708_v37  ;;  %1967 = vmatprep.subr.bf16.mxu0 %v14090_v24 }
 0x1ed   :  { %2008 = vmatprep.subr.bf16.mxu1 %v14091_v9  ;;  %2028 = vmatprep.mubr.bf16.mxu1 %v14095_v2 }
 0x1ef   :  { %1968 = vmatpush1.bf16.msra.mxu0 %v14092_v6 }
 0x1f0   :  { %2009 = vmatpush1.bf16.msra.mxu1 %v14093_v25  ;;  %2121 = vmatprep.subr.bf16.mxu0 %v9703_v44 }
 0x1f1   :  { %2010 = vmatprep.subr.bf16.mxu1 %v14094_v13 }
 0x1f2   :  { %8419 = vmatmul.mubr.msk.bf16.vlgmr.msra.gmra.mxu0 %vm1687_vm9, %v8715_v50 }
 0x1f3   :  { %2122 = vmatpush1.bf16.msra.mxu0 %v9701_v28  ;;  %2143 = vmatprep.mubr.bf16.mxu0 %v14095_v2 }
 0x1f4   :  { %2011 = vmatpush1.bf16.msra.mxu1 %v14096_v35  ;;  %2123 = vmatprep.subr.bf16.mxu0 %v14086_v29 }
 0x1f5   :  { %2164 = vmatprep.subr.bf16.mxu1 %v9710_v30 }
 0x1f7   :  { %8420 = vmatmul.mubr.msk.bf16.vlgmr.msra.gmra.mxu1 %vm1687_vm9, %v8715_v50  ;;  %2124 = vmatpush1.bf16.msra.mxu0 %v14089_v43 }
 0x1f8   :  { %2165 = vmatpush1.bf16.msra.mxu1 %v9708_v37  ;;  %2125 = vmatprep.subr.bf16.mxu0 %v14090_v24 }
 0x1f9   :  { %2166 = vmatprep.subr.bf16.mxu1 %v14091_v9  ;;  %2186 = vmatprep.mubr.bf16.mxu1 %v14095_v2 }
 0x1fb   :  { %2126 = vmatpush1.bf16.msra.mxu0 %v14092_v6 }
 0x1fc   :  { %2167 = vmatpush1.bf16.msra.mxu1 %v14093_v25  ;;  %2279 = vmatprep.subr.bf16.mxu0 %v9703_v44 }
 0x1fd   :  { %2168 = vmatprep.subr.bf16.mxu1 %v14094_v13 }
 0x1fe   :  { %8423 = vmatmul.mubr.msk.bf16.vlgmr.msra.gmra.mxu0 %vm1687_vm9, %v8716_v39 }
 0x1ff   :  { %2280 = vmatpush1.bf16.msra.mxu0 %v9701_v28  ;;  %2301 = vmatprep.mubr.bf16.mxu0 %v14095_v2 }
 0x200   :  { %2169 = vmatpush1.bf16.msra.mxu1 %v14096_v35  ;;  %2281 = vmatprep.subr.bf16.mxu0 %v14086_v29 }
 0x201   :  { %2322 = vmatprep.subr.bf16.mxu1 %v9710_v30 }
 0x203   :  { %8424 = vmatmul.mubr.msk.bf16.vlgmr.msra.gmra.mxu1 %vm1687_vm9, %v8716_v39  ;;  %2282 = vmatpush1.bf16.msra.mxu0 %v14089_v43 }
 0x204   :  { %2323 = vmatpush1.bf16.msra.mxu1 %v9708_v37  ;;  %2283 = vmatprep.subr.bf16.mxu0 %v14090_v24 }
 0x205   :  { %2324 = vmatprep.subr.bf16.mxu1 %v14091_v9  ;;  %2344 = vmatprep.mubr.bf16.mxu1 %v14095_v2 }
 0x207   :  { %2284 = vmatpush1.bf16.msra.mxu0 %v14092_v6 }
 0x208   :  { %2325 = vmatpush1.bf16.msra.mxu1 %v14093_v25  ;;  %2437 = vmatprep.subr.bf16.mxu0 %v9703_v44 }
 0x209   :  { %2326 = vmatprep.subr.bf16.mxu1 %v14094_v13 }
 0x20a   :  { %8427 = vmatmul.mubr.msk.bf16.vlgmr.msra.gmra.mxu0 %vm1687_vm9, %v8717_v11 }
 0x20b   :  { %2438 = vmatpush1.bf16.msra.mxu0 %v9701_v28  ;;  %2459 = vmatprep.mubr.bf16.mxu0 %v14095_v2 }
 0x20c   :  { %2327 = vmatpush1.bf16.msra.mxu1 %v14096_v35  ;;  %2439 = vmatprep.subr.bf16.mxu0 %v14086_v29 }
 0x20d   :  { %2480 = vmatprep.subr.bf16.mxu1 %v9710_v30 }
 0x20f   :  { %8428 = vmatmul.mubr.msk.bf16.vlgmr.msra.gmra.mxu1 %vm1687_vm9, %v8717_v11  ;;  %2440 = vmatpush1.bf16.msra.mxu0 %v14089_v43 }
 0x210   :  { %2481 = vmatpush1.bf16.msra.mxu1 %v9708_v37  ;;  %2441 = vmatprep.subr.bf16.mxu0 %v14090_v24 }
 0x211   :  { %2482 = vmatprep.subr.bf16.mxu1 %v14091_v9  ;;  %2502 = vmatprep.mubr.bf16.mxu1 %v14095_v2 }
 0x213   :  { %2442 = vmatpush1.bf16.msra.mxu0 %v14092_v6 }
 0x214   :  { %2483 = vmatpush1.bf16.msra.mxu1 %v14093_v25  ;;  %2595 = vmatprep.subr.bf16.mxu0 %v9703_v44 }
 0x215   :  { %2484 = vmatprep.subr.bf16.mxu1 %v14094_v13 }
 0x216   :  { %8431 = vmatmul.mubr.msk.bf16.vlgmr.msra.gmra.mxu0 %vm1687_vm9, %v8718_v49 }
 0x217   :  { %2596 = vmatpush1.bf16.msra.mxu0 %v9701_v28  ;;  %2617 = vmatprep.mubr.bf16.mxu0 %v14095_v2 }
 0x218   :  { %2485 = vmatpush1.bf16.msra.mxu1 %v14096_v35  ;;  %2597 = vmatprep.subr.bf16.mxu0 %v14086_v29 }
 0x219   :  { %2638 = vmatprep.subr.bf16.mxu1 %v9710_v30 }
 0x21b   :  { %8432 = vmatmul.mubr.msk.bf16.vlgmr.msra.gmra.mxu1 %vm1687_vm9, %v8718_v49  ;;  %2598 = vmatpush1.bf16.msra.mxu0 %v14089_v43 }
 0x21c   :  { %2639 = vmatpush1.bf16.msra.mxu1 %v9708_v37  ;;  %2599 = vmatprep.subr.bf16.mxu0 %v14090_v24 }
 0x21d   :  { %2640 = vmatprep.subr.bf16.mxu1 %v14091_v9  ;;  %2660 = vmatprep.mubr.bf16.mxu1 %v14095_v2 }
 0x21f   :  { %2600 = vmatpush1.bf16.msra.mxu0 %v14092_v6 }
 0x220   :  { %2641 = vmatpush1.bf16.msra.mxu1 %v14093_v25  ;;  %2753 = vmatprep.subr.bf16.mxu0 %v9703_v44 }
 0x221   :  { %2642 = vmatprep.subr.bf16.mxu1 %v14094_v13 }
 0x222   :  { %8435 = vmatmul.mubr.msk.bf16.vlgmr.msra.gmra.mxu0 %vm1687_vm9, %v8719_v54 }
 0x223   :  { %2754 = vmatpush1.bf16.msra.mxu0 %v9701_v28  ;;  %2775 = vmatprep.mubr.bf16.mxu0 %v14095_v2 }
 0x224   :  { %2643 = vmatpush1.bf16.msra.mxu1 %v14096_v35  ;;  %2755 = vmatprep.subr.bf16.mxu0 %v14086_v29 }
 0x225   :  { %2796 = vmatprep.subr.bf16.mxu1 %v9710_v30 }
 0x227   :  { %8436 = vmatmul.mubr.msk.bf16.vlgmr.msra.gmra.mxu1 %vm1687_vm9, %v8719_v54  ;;  %2756 = vmatpush1.bf16.msra.mxu0 %v14089_v43 }
 0x228   :  { %2797 = vmatpush1.bf16.msra.mxu1 %v9708_v37  ;;  %2757 = vmatprep.subr.bf16.mxu0 %v14090_v24 }
 0x229   :  { %2798 = vmatprep.subr.bf16.mxu1 %v14091_v9  ;;  %2818 = vmatprep.mubr.bf16.mxu1 %v14095_v2 }
 0x22b   :  { %2758 = vmatpush1.bf16.msra.mxu0 %v14092_v6 }
 0x22c   :  { %2799 = vmatpush1.bf16.msra.mxu1 %v14093_v25  ;;  %2911 = vmatprep.subr.bf16.mxu0 %v9703_v44  ;;  %v14107_v44 = vld [vmem:[#allocation18_spill] sm:$0xff] }
 0x22d   :  { %2800 = vmatprep.subr.bf16.mxu1 %v14094_v13 }
 0x22e   :  { %8439 = vmatmul.mubr.msk.bf16.vlgmr.msra.gmra.mxu0 %vm1687_vm9, %v8720_v53 }
 0x22f   :  { %2912 = vmatpush1.bf16.msra.mxu0 %v9701_v28  ;;  %2933 = vmatprep.mubr.bf16.mxu0 %v14095_v2 }
 0x230   :  { %2801 = vmatpush1.bf16.msra.mxu1 %v14096_v35  ;;  %2913 = vmatprep.subr.bf16.mxu0 %v14086_v29  ;;  %v8421_v29 = vld [vmem:[%s13784_s1 + $0x1] ss:$8 sm:$0xf] }
 0x231   :  { %2954 = vmatprep.subr.bf16.mxu1 %v9710_v30 }
 0x233   :  { %8440 = vmatmul.mubr.msk.bf16.vlgmr.msra.gmra.mxu1 %vm1687_vm9, %v8720_v53  ;;  %2914 = vmatpush1.bf16.msra.mxu0 %v14089_v43 }
 0x234   :  { %2955 = vmatpush1.bf16.msra.mxu1 %v9708_v37  ;;  %2915 = vmatprep.subr.bf16.mxu0 %v14090_v24 }
 0x235   :  { %2956 = vmatprep.subr.bf16.mxu1 %v14091_v9  ;;  %2976 = vmatprep.mubr.bf16.mxu1 %v14095_v2 }
 0x237   :  { %2916 = vmatpush1.bf16.msra.mxu0 %v14092_v6 }
 0x238   :  { %2957 = vmatpush1.bf16.msra.mxu1 %v14093_v25 }
 0x239   :  { %2958 = vmatprep.subr.bf16.mxu1 %v14094_v13  ;;  %v1619_v13 = vld [vmem:[%s13786_s5 + $0x38] sm:$0xff] }
 0x23a   :  { %8443 = vmatmul.mubr.msk.bf16.vlgmr.msra.gmra.mxu0 %vm1687_vm9, %v8721_v18 }
 0x23b   :  { %3240 = vmatprep.mubr.bf16.mxu0 %v14095_v2 }
 0x23c   :  { %2959 = vmatpush1.bf16.msra.mxu1 %v14096_v35  ;;  %v1618_v35 = vld [vmem:[%s13786_s5 + $0x30] sm:$0xff] }
 0x23f   :  { %8444 = vmatmul.mubr.msk.bf16.vlgmr.msra.gmra.mxu1 %vm1687_vm9, %v8721_v18 }
 0x240   :  { %3283 = vmatprep.mubr.bf16.mxu1 %v14095_v2  ;;  %v1905_v2 = vld [vmem:[%s13784_s1] ss:$8 sm:$0xf] }
 0x29a   :  { %v9880_v3 = vpop.f32.mrf.mxu0 }
 0x29c   :  { %v9882_v16 = vpop.f32.mrf.mxu0 }
 0x29e   :  { %v9886_v12 = vpop.f32.mrf.mxu0 }
 0x29f   :  { %v9884_v26 = vpop.f32.mrf.mxu1 }
 0x2a0   :  { %v9890_v27 = vpop.f32.mrf.mxu0 }
 0x2a1   :  { %v9888_v19 = vpop.f32.mrf.mxu1 }
 0x2a3   :  { %v9892_v33 = vpop.f32.mrf.mxu1 }
 0x2a5   :  { %v9895_v51 = vpop.f32.mrf.mxu1 }
 0x2a6   :  { %v1829_v60 = vpop.f32.mrf.mxu0 }
 0x2a7   :  { %1881 = vrot.lane.b32.xlu0 %v1829_v60, %s8759_s2 }
 0x2a8   :  { %v1831_v45 = vpop.f32.mrf.mxu0 }
 0x2aa   :  { %v1833_v4 = vpop.f32.mrf.mxu0 }
 0x2ab   :  { %v1872_v5 = vpop.f32.mrf.mxu1  ;;  %1883 = vrot.lane.b32.xlu1 %v1833_v4, %s8759_s2 }
 0x2ac   :  { %1889 = vrot.lane.b32.xlu0 %v1872_v5, %s8759_s2  ;;  %v1835_v57 = vpop.f32.mrf.mxu0 }
 0x2ad   :  { %v1874_v14 = vpop.f32.mrf.mxu1 }
 0x2af   :  { %v1876_v22 = vpop.f32.mrf.mxu1 }
 0x2b0   :  { %1885 = vrot.lane.b32.xlu0 %v1831_v45, %s8759_s2  ;;  %1891 = vrot.lane.b32.xlu1 %v1876_v22, %s8759_s2 }
 0x2b1   :  { %v1878_v62 = vpop.f32.mrf.mxu1 }
 0x2b2   :  { %v1987_v23 = vpop.f32.mrf.mxu0 }
 0x2b4   :  { %1893 = vrot.lane.b32.xlu0 %v1874_v14, %s8759_s2  ;;  %1887 = vrot.lane.b32.xlu1 %v1835_v57, %s8759_s2  ;;  %v1989_v10 = vpop.f32.mrf.mxu0 }
 0x2b6   :  { %v1991_v34 = vpop.f32.mrf.mxu0 }
 0x2b7   :  { %v2030_v15 = vpop.f32.mrf.mxu1 }
 0x2b8   :  { %1895 = vrot.lane.b32.xlu1 %v1878_v62, %s8759_s2  ;;  %2039 = vrot.lane.b32.xlu0 %v1987_v23, %s8760_s17  ;;  %v1993_v59 = vpop.f32.mrf.mxu0 }
 0x2b9   :  { %v2032_v40 = vpop.f32.mrf.mxu1 }
 0x2bb   :  { %v2034_v21 = vpop.f32.mrf.mxu1 }
 0x2bc   :  { %2047 = vrot.lane.b32.xlu0 %v2030_v15, %s8760_s17  ;;  %2041 = vrot.lane.b32.xlu1 %v1991_v34, %s8760_s17 }
 0x2bd   :  { %v2036_v46 = vpop.f32.mrf.mxu1 }
 0x2be   :  { %v2145_v42 = vpop.f32.mrf.mxu0 }
 0x2c0   :  { %2043 = vrot.lane.b32.xlu0 %v1989_v10, %s8760_s17  ;;  %2049 = vrot.lane.b32.xlu1 %v2034_v21, %s8760_s17  ;;  %v2147_v55 = vpop.f32.mrf.mxu0 }
 0x2c2   :  { %v2149_v36 = vpop.f32.mrf.mxu0 }
 0x2c3   :  { %v2188_v52 = vpop.f32.mrf.mxu1 }
 0x2c4   :  { %2051 = vrot.lane.b32.xlu0 %v2032_v40, %s8760_s17  ;;  %2045 = vrot.lane.b32.xlu1 %v1993_v59, %s8760_s17  ;;  %v2151_v8 = vpop.f32.mrf.mxu0 }
 0x2c5   :  { %v2190_v58 = vpop.f32.mrf.mxu1 }
 0x2c7   :  { %v2192_v20 = vpop.f32.mrf.mxu1 }
 0x2c8   :  { %2053 = vrot.lane.b32.xlu1 %v2036_v46, %s8760_s17  ;;  %2197 = vrot.lane.b32.xlu0 %v2145_v42, %s8761_s18 }
 0x2c9   :  { %v2194_v31 = vpop.f32.mrf.mxu1 }
 0x2ca   :  { %v2303_v1 = vpop.f32.mrf.mxu0 }
 0x2cc   :  { %2205 = vrot.lane.b32.xlu0 %v2188_v52, %s8761_s18  ;;  %2199 = vrot.lane.b32.xlu1 %v2149_v36, %s8761_s18  ;;  %v2305_v61 = vpop.f32.mrf.mxu0 }
 0x2ce   :  { %v2307_v41 = vpop.f32.mrf.mxu0 }
 0x2cf   :  { %v2346_v56 = vpop.f32.mrf.mxu1 }
 0x2d0   :  { %2201 = vrot.lane.b32.xlu0 %v2147_v55, %s8761_s18  ;;  %2207 = vrot.lane.b32.xlu1 %v2192_v20, %s8761_s18  ;;  %v2309_v38 = vpop.f32.mrf.mxu0 }
 0x2d1   :  { %v2348_v32 = vpop.f32.mrf.mxu1 }
 0x2d3   :  { %v2350_v47 = vpop.f32.mrf.mxu1 }
 0x2d4   :  { %2209 = vrot.lane.b32.xlu0 %v2190_v58, %s8761_s18  ;;  %2203 = vrot.lane.b32.xlu1 %v2151_v8, %s8761_s18 }
 0x2d5   :  { %v2352_v63 = vpop.f32.mrf.mxu1 }
 0x2d6   :  { %v2461_v17 = vpop.f32.mrf.mxu0 }
 0x2d8   :  { %2211 = vrot.lane.b32.xlu1 %v2194_v31, %s8761_s18  ;;  %2355 = vrot.lane.b32.xlu0 %v2303_v1, %s8762_s19  ;;  %v2463_v7 = vpop.f32.mrf.mxu0 }
 0x2da   :  { %v2465_v39 = vpop.f32.mrf.mxu0 }
 0x2db   :  { %v2504_v50 = vpop.f32.mrf.mxu1 }
 0x2dc   :  { %2363 = vrot.lane.b32.xlu0 %v2346_v56, %s8762_s19  ;;  %2357 = vrot.lane.b32.xlu1 %v2307_v41, %s8762_s19  ;;  %v2467_v54 = vpop.f32.mrf.mxu0 }
 0x2dd   :  { %v2506_v11 = vpop.f32.mrf.mxu1 }
 0x2df   :  { %v2508_v49 = vpop.f32.mrf.mxu1 }
 0x2e0   :  { %2359 = vrot.lane.b32.xlu0 %v2305_v61, %s8762_s19  ;;  %2365 = vrot.lane.b32.xlu1 %v2350_v47, %s8762_s19 }
 0x2e1   :  { %v2510_v18 = vpop.f32.mrf.mxu1 }
 0x2e2   :  { %v2619_v53 = vpop.f32.mrf.mxu0 }
 0x2e4   :  { %2367 = vrot.lane.b32.xlu0 %v2348_v32, %s8762_s19  ;;  %2361 = vrot.lane.b32.xlu1 %v2309_v38, %s8762_s19  ;;  %v2621_v60 = vpop.f32.mrf.mxu0 }
 0x2e6   :  { %v2623_v4 = vpop.f32.mrf.mxu0 }
 0x2e7   :  { %v2662_v45 = vpop.f32.mrf.mxu1 }
 0x2e8   :  { %2369 = vrot.lane.b32.xlu1 %v2352_v63, %s8762_s19  ;;  %2513 = vrot.lane.b32.xlu0 %v2461_v17, %s8763_s20  ;;  %v2625_v22 = vpop.f32.mrf.mxu0 }
 0x2e9   :  { %v2664_v5 = vpop.f32.mrf.mxu1 }
 0x2eb   :  { %v2666_v14 = vpop.f32.mrf.mxu1 }
 0x2ec   :  { %2521 = vrot.lane.b32.xlu0 %v2504_v50, %s8763_s20  ;;  %2515 = vrot.lane.b32.xlu1 %v2465_v39, %s8763_s20 }
 0x2ed   :  { %v2668_v23 = vpop.f32.mrf.mxu1 }
 0x2ee   :  { %v2777_v57 = vpop.f32.mrf.mxu0 }
 0x2f0   :  { %2517 = vrot.lane.b32.xlu0 %v2463_v7, %s8763_s20  ;;  %2523 = vrot.lane.b32.xlu1 %v2508_v49, %s8763_s20  ;;  %v2779_v62 = vpop.f32.mrf.mxu0 }
 0x2f2   :  { %v2781_v15 = vpop.f32.mrf.mxu0 }
 0x2f3   :  { %v2820_v10 = vpop.f32.mrf.mxu1 }
 0x2f4   :  { %2525 = vrot.lane.b32.xlu0 %v2506_v11, %s8763_s20  ;;  %2519 = vrot.lane.b32.xlu1 %v2467_v54, %s8763_s20  ;;  %v2783_v21 = vpop.f32.mrf.mxu0 }
 0x2f5   :  { %v2822_v34 = vpop.f32.mrf.mxu1 }
 0x2f7   :  { %v2824_v40 = vpop.f32.mrf.mxu1 }
 0x2f8   :  { %2527 = vrot.lane.b32.xlu1 %v2510_v18, %s8763_s20  ;;  %2671 = vrot.lane.b32.xlu0 %v2619_v53, %s8764_s21 }
 0x2f9   :  { %v2826_v42 = vpop.f32.mrf.mxu1 }
 0x2fa   :  { %v2935_v59 = vpop.f32.mrf.mxu0 }
 0x2fc   :  { %2679 = vrot.lane.b32.xlu0 %v2662_v45, %s8764_s21  ;;  %2673 = vrot.lane.b32.xlu1 %v2623_v4, %s8764_s21  ;;  %v2937_v46 = vpop.f32.mrf.mxu0 }
 0x2fe   :  { %v2939_v36 = vpop.f32.mrf.mxu0 }
 0x2ff   :  { %v2978_v55 = vpop.f32.mrf.mxu1 }
 0x300   :  { %2675 = vrot.lane.b32.xlu0 %v2621_v60, %s8764_s21  ;;  %2681 = vrot.lane.b32.xlu1 %v2666_v14, %s8764_s21  ;;  %v2941_v56 = vpop.f32.mrf.mxu0 }
 0x301   :  { %v2980_v58 = vpop.f32.mrf.mxu1 }
 0x303   :  { %v2982_v1 = vpop.f32.mrf.mxu1 }
 0x304   :  { %2683 = vrot.lane.b32.xlu0 %v2664_v5, %s8764_s21  ;;  %2677 = vrot.lane.b32.xlu1 %v2625_v22, %s8764_s21 }
 0x305   :  { %v2984_v47 = vpop.f32.mrf.mxu1 }
 0x308   :  { %2685 = vrot.lane.b32.xlu1 %v2668_v23, %s8764_s21  ;;  %2829 = vrot.lane.b32.xlu0 %v2777_v57, %s8765_s22 }
 0x30c   :  { %2837 = vrot.lane.b32.xlu0 %v2820_v10, %s8765_s22  ;;  %2831 = vrot.lane.b32.xlu1 %v2781_v15, %s8765_s22 }
 0x310   :  { %2833 = vrot.lane.b32.xlu0 %v2779_v62, %s8765_s22  ;;  %2839 = vrot.lane.b32.xlu1 %v2824_v40, %s8765_s22 }
 0x314   :  { %2841 = vrot.lane.b32.xlu0 %v2822_v34, %s8765_s22  ;;  %2835 = vrot.lane.b32.xlu1 %v2783_v21, %s8765_s22 }
 0x318   :  { %2843 = vrot.lane.b32.xlu1 %v2826_v42, %s8765_s22  ;;  %2987 = vrot.lane.b32.xlu0 %v2935_v59, %s8766_s23 }
 0x319   :  { %v9953_v52 = vpop.permute.xlu0 %1881 }
 0x31c   :  { %2995 = vrot.lane.b32.xlu0 %v2978_v55, %s8766_s23  ;;  %2989 = vrot.lane.b32.xlu1 %v2939_v36, %s8766_s23  ;;  %v1612_v55 = vld [vmem:[%s13786_s5] sm:$0xff]  ;;  %v1613_v36 = vld [vmem:[%s13786_s5 + $0x8] sm:$0xff] }
 0x31d   :  { %v9957_v20 = vpop.permute.xlu1 %1883  ;;  %v10062_v24 = vadd.f32 %v9880_v3, %v1612_v55  ;;  %v1778_v9 = vadd.f32 %v9882_v16, %v1613_v36  ;;  %v10079_v3 = vrot.slane %v1905_v2, %v14107_v44  ;;  %v14108_v55 = vld [vmem:[#allocation19_spill] sm:$0xff]  ;;  %v10089_v36 = vadd.f32 %v9895_v51, %v1619_v13 }
 0x31e   :  { %v9959_v8 = vpop.permute.xlu0 %1889  ;;  %v1918_v16 = vrot.slane %v1905_v2, %v14108_v55  ;;  %v10106_v13 = vrot.slane %v8421_v29, %v9206_v0 }
 0x320   :  { %2991 = vrot.lane.b32.xlu0 %v2937_v46, %s8766_s23  ;;  %2997 = vrot.lane.b32.xlu1 %v2982_v1, %s8766_s23  ;;  %v1614_v1 = vld [vmem:[%s13786_s5 + $0x10] sm:$0xff] }
 0x321   :  { %v1779_v37 = vadd.f32 %v9884_v26, %v1614_v1  ;;  %v10086_v26 = vadd.f32 %v9892_v33, %v1618_v35  ;;  %v8429_v1 = vld [vmem:[%s13784_s1 + $0x3] ss:$8 sm:$0xf] }
 0x322   :  { %v9963_v31 = vpop.permute.xlu0 %1885  ;;  %v9965_v61 = vpop.permute.xlu1 %1891 }
 0x324   :  { %2999 = vrot.lane.b32.xlu0 %v2980_v58, %s8766_s23  ;;  %2993 = vrot.lane.b32.xlu1 %v2941_v56, %s8766_s23  ;;  %v1616_v58 = vld [vmem:[%s13786_s5 + $0x20] sm:$0xff]  ;;  %v1617_v56 = vld [vmem:[%s13786_s5 + $0x28] sm:$0xff] }
 0x325   :  { %v10066_v43 = vadd.f32 %v9886_v12, %v1616_v58  ;;  %v10073_v30 = vadd.f32 %v9890_v27, %v1617_v56  ;;  %v8425_v12 = vld [vmem:[%s13784_s1 + $0x2] ss:$8 sm:$0xf]  ;;  %v10097_v56 = vrot.slane %v8421_v29, %v14107_v44 }
 0x326   :  { %v9969_v41 = vpop.permute.xlu0 %1893  ;;  %v9971_v32 = vpop.permute.xlu1 %1887  ;;  %v14109_v27 = vld [vmem:[#allocation20_spill] sm:$0xff] }
 0x327   :  { %v1910_v58 = vrot.slane %v1905_v2, %v14109_v27  ;;  %v10103_v35 = vrot.slane %v8421_v29, %v14109_v27 }
 0x328   :  { %3001 = vrot.lane.b32.xlu1 %v2984_v47, %s8766_s23  ;;  %v1615_v47 = vld [vmem:[%s13786_s5 + $0x18] sm:$0xff] }
 0x329   :  { %v10076_v28 = vadd.f32 %v9888_v19, %v1615_v47  ;;  %v1922_v19 = vrot.slane %v1905_v2, %v9206_v0  ;;  %v10100_v47 = vrot.slane %v8421_v29, %v14108_v55  ;;  %v8433_v2 = vld [vmem:[%s13784_s1 + $0x5] ss:$8 sm:$0xf]  ;;  %v10125_v29 = vrot.slane %v8425_v12, %v9206_v0 }
 0x32a   :  { %v9974_v38 = vpop.permute.xlu1 %1895  ;;  %v9976_v17 = vpop.permute.xlu0 %2039 }
 0x32e   :  { %v9978_v63 = vpop.permute.xlu0 %2047  ;;  %v9980_v7 = vpop.permute.xlu1 %2041 }
 0x332   :  { %v9982_v50 = vpop.permute.xlu0 %2043  ;;  %v9984_v39 = vpop.permute.xlu1 %2049 }
 0x336   :  { %v9986_v11 = vpop.permute.xlu0 %2051  ;;  %v9988_v49 = vpop.permute.xlu1 %2045 }
 0x33a   :  { %v9990_v54 = vpop.permute.xlu1 %2053  ;;  %v9992_v53 = vpop.permute.xlu0 %2197 }
 0x33e   :  { %v9994_v18 = vpop.permute.xlu0 %2205  ;;  %v9996_v60 = vpop.permute.xlu1 %2199 }
 0x342   :  { %v9998_v45 = vpop.permute.xlu0 %2201  ;;  %v10000_v4 = vpop.permute.xlu1 %2207 }
 0x346   :  { %v10002_v5 = vpop.permute.xlu0 %2209  ;;  %v10004_v14 = vpop.permute.xlu1 %2203 }
 0x34a   :  { %v10006_v22 = vpop.permute.xlu1 %2211  ;;  %v10008_v57 = vpop.permute.xlu0 %2355 }
 0x34e   :  { %v10010_v23 = vpop.permute.xlu0 %2363  ;;  %v10012_v62 = vpop.permute.xlu1 %2357 }
 0x34f   :  { %14097 = vst [vmem:[#allocation25_spill] sm:$0xff] %v10012_v62  ;;  %v10148_v62 = vrot.slane %v8429_v1, %v9206_v0 }
 0x351   :  { %14115 = vst [vmem:[#allocation33_spill] sm:$0xff] %v10148_v62 }
 0x352   :  { %v10014_v10 = vpop.permute.xlu0 %2359  ;;  %v10016_v15 = vpop.permute.xlu1 %2365 }
 0x353   :  { %14098 = vst [vmem:[#allocation26_spill] sm:$0xff] %v10016_v15  ;;  %v10154_v15 = vrot.slane %v8433_v2, %v14107_v44 }
 0x355   :  { %14117 = vst [vmem:[#allocation35_spill] sm:$0xff] %v10154_v15  ;;  %v8445_v15 = vld [vmem:[%s13784_s1 + $0x20] ss:$8 sm:$0xf] }
 0x356   :  { %v10018_v34 = vpop.permute.xlu0 %2367  ;;  %v10020_v40 = vpop.permute.xlu1 %2361 }
 0x357   :  { %14099 = vst [vmem:[#allocation15_spill] sm:$0xff] %v10018_v34  ;;  %14100 = vst [vmem:[#allocation21_spill] sm:$0xff] %v10020_v40  ;;  %v10151_v40 = vrot.slane %v8433_v2, %v14109_v27 }
 0x359   :  { %14116 = vst [vmem:[#allocation34_spill] sm:$0xff] %v10151_v40 }
 0x35a   :  { %v10022_v21 = vpop.permute.xlu1 %2369  ;;  %v10024_v59 = vpop.permute.xlu0 %2513 }
 0x35b   :  { %14101 = vst [vmem:[#allocation23_spill] sm:$0xff] %v10022_v21  ;;  %14102 = vst [vmem:[#allocation16_spill] sm:$0xff] %v10024_v59  ;;  %v10122_v59 = vrot.slane %v8425_v12, %v14109_v27  ;;  %v10145_v21 = vrot.slane %v8429_v1, %v14109_v27 }
 0x35d   :  { %14114 = vst [vmem:[#allocation32_spill] sm:$0xff] %v10145_v21 }
 0x35e   :  { %v10026_v42 = vpop.permute.xlu0 %2521  ;;  %v10028_v46 = vpop.permute.xlu1 %2515 }
 0x35f   :  { %14103 = vst [vmem:[#allocation28_spill] sm:$0xff] %v10026_v42  ;;  %14104 = vst [vmem:[#allocation29_spill] sm:$0xff] %v10028_v46  ;;  %v10116_v46 = vrot.slane %v8425_v12, %v14107_v44  ;;  %v10139_v42 = vrot.slane %v8429_v1, %v14107_v44 }
 0x361   :  { %14112 = vst [vmem:[#allocation31_spill] sm:$0xff] %v10139_v42  ;;  %v10160_v42 = vrot.slane %v8433_v2, %v14108_v55 }
 0x362   :  { %v10057_v6 = vpop.permute.xlu0 %2517  ;;  %v10059_v25 = vpop.permute.xlu1 %2523 }
 0x363   :  { %14105 = vst [vmem:[#allocation22_spill] sm:$0xff] %v10057_v6  ;;  %14106 = vst [vmem:[#allocation24_spill] sm:$0xff] %v10059_v25  ;;  %v10119_v25 = vrot.slane %v8425_v12, %v14108_v55  ;;  %v8437_v6 = vld [vmem:[%s13784_s1 + $0x6] ss:$8 sm:$0xf]  ;;  %v10142_v12 = vrot.slane %v8429_v1, %v14108_v55 }
 0x364   :  { %14118 = vst [vmem:[#allocation36_spill] sm:$0xff] %v10160_v42  ;;  %v10170_v62 = vrot.slane %v8437_v6, %v14109_v27  ;;  %v10173_v40 = vrot.slane %v8437_v6, %v14107_v44 }
 0x365   :  { %14113 = vst [vmem:[#allocation27_spill] sm:$0xff] %v10142_v12  ;;  %v10163_v12 = vrot.slane %v8433_v2, %v9206_v0  ;;  %v10180_v2 = vrot.slane %v8437_v6, %v14108_v55 }
 0x366   :  { %v10111_v33 = vpop.permute.xlu0 %2525  ;;  %v10113_v51 = vpop.permute.xlu1 %2519  ;;  %14122 = vst [vmem:[#allocation40_spill] sm:$0xff] %v10170_v62  ;;  %14123 = vst [vmem:[#allocation41_spill] sm:$0xff] %v10173_v40 }
 0x367   :  { %14110 = vst [vmem:[#allocation17_spill] sm:$0xff] %v10111_v33  ;;  %14111 = vst [vmem:[#allocation30_spill] sm:$0xff] %v10113_v51  ;;  %v1899_v51 = vsel %vm389_vm1, %v9963_v31, %v9959_v8  ;;  %v1901_v33 = vsel %vm389_vm1, %v9953_v52, %v9963_v31  ;;  %v8441_v31 = vld [vmem:[%s13784_s1 + $0x7] ss:$8 sm:$0xf] }
 0x368   :  { %14119 = vst [vmem:[#allocation37_spill] sm:$0xff] %v10163_v12  ;;  %v1928_v34 = vmul.f32 %v10079_v3, %v1901_v33  ;;  %v1929_v42 = vmul.f32 %v1918_v16, %v1899_v51  ;;  %v10189_v62 = vrot.slane %v8441_v31, %v14107_v44  ;;  %v10192_v40 = vrot.slane %v8441_v31, %v14108_v55 }
 0x369   :  { %v10195_v12 = vrot.slane %v8441_v31, %v9206_v0  ;;  %v1897_v33 = vsel %vm389_vm1, %v9959_v8, %v9969_v41  ;;  %v10206_v51 = vrot.slane %v8445_v15, %v14109_v27  ;;  %v1902_v8 = vsel %vm389_vm1, %v9957_v20, %v9971_v32 }
 0x36a   :  { %v10165_v21 = vpop.permute.xlu1 %2527  ;;  %v10167_v1 = vpop.permute.xlu0 %2671  ;;  %14125 = vst [vmem:[#allocation43_spill] sm:$0xff] %v10189_v62  ;;  %14126 = vst [vmem:[#allocation44_spill] sm:$0xff] %v10192_v40  ;;  %v10209_v62 = vrot.slane %v8445_v15, %v14107_v44  ;;  %v1937_v44 = vadd.f32 %v1929_v42, %v1779_v37  ;;  %v2059_v37 = vsel %vm548_vm2, %v9976_v17, %v9982_v50 }
 0x36b   :  { %14120 = vst [vmem:[#allocation38_spill] sm:$0xff] %v10165_v21  ;;  %14121 = vst [vmem:[#allocation39_spill] sm:$0xff] %v10167_v1  ;;  %v10183_v21 = vrot.slane %v8437_v6, %v9206_v0  ;;  %v10186_v1 = vrot.slane %v8441_v31, %v14109_v27  ;;  %v1903_v6 = vsel %vm389_vm1, %v9969_v41, %v9953_v52 }
 0x36c   :  { %14127 = vst [vmem:[#allocation45_spill] sm:$0xff] %v10195_v12  ;;  %14128 = vst [vmem:[#allocation46_spill] sm:$0xff] %v10206_v51  ;;  %v1900_v31 = vsel %vm389_vm1, %v9971_v32, %v9965_v61  ;;  %v10224_v52 = vrot.slane %v8445_v15, %v14108_v55  ;;  %v10227_v41 = vrot.slane %v8445_v15, %v9206_v0 }
 0x36d   :  { %14124 = vst [vmem:[#allocation42_spill] sm:$0xff] %v10186_v1  ;;  %14129 = vst [vmem:[#allocation47_spill] sm:$0xff] %v10209_v62  ;;  %v1936_v27 = vadd.f32 %v1928_v34, %v1778_v9  ;;  %v1898_v62 = vsel %vm389_vm1, %v9965_v61, %v9974_v38  ;;  %v1904_v32 = vsel %vm389_vm1, %v9974_v38, %v9957_v20 }
 0x36e   :  { %v10219_v12 = vpop.permute.xlu0 %2679  ;;  %v10221_v40 = vpop.permute.xlu1 %2673  ;;  %v1927_v51 = vmul.f32 %v1910_v58, %v1903_v6  ;;  %v1930_v1 = vmul.f32 %v1922_v19, %v1897_v33  ;;  %v2057_v15 = vsel %vm548_vm2, %v9982_v50, %v9978_v63  ;;  %v1932_v9 = vmul.f32 %v10079_v3, %v1902_v8 }
 0x36f   :  { %v1933_v61 = vmul.f32 %v1918_v16, %v1900_v31  ;;  %v2055_v20 = vsel %vm548_vm2, %v9978_v63, %v9986_v11  ;;  %v2061_v38 = vsel %vm548_vm2, %v9986_v11, %v9976_v17  ;;  %v1931_v34 = vmul.f32 %v1910_v58, %v1904_v32 }
 0x370   :  { %v1934_v42 = vmul.f32 %v1922_v19, %v1898_v62  ;;  %v2058_v50 = vsel %vm548_vm2, %v9988_v49, %v9984_v39  ;;  %v2060_v3 = vsel %vm548_vm2, %v9980_v7, %v9988_v49  ;;  %v2086_v33 = vmul.f32 %v10097_v56, %v2059_v37 }
 0x371   :  { %v2087_v17 = vmul.f32 %v10100_v47, %v2057_v15  ;;  %v2056_v11 = vsel %vm548_vm2, %v9984_v39, %v9990_v54  ;;  %v2062_v62 = vsel %vm548_vm2, %v9990_v54, %v9980_v7  ;;  %v2085_v49 = vmul.f32 %v10103_v35, %v2061_v38 }
 0x372   :  { %v10262_v16 = vpop.permute.xlu0 %2675  ;;  %v10264_v63 = vpop.permute.xlu1 %2681  ;;  %v2088_v58 = vmul.f32 %v10106_v13, %v2055_v20  ;;  %v2215_v19 = vsel %vm708_vm3, %v9998_v45, %v9994_v18  ;;  %v2217_v6 = vsel %vm708_vm3, %v9992_v53, %v9998_v45  ;;  %v1935_v39 = vadd.f32 %v1927_v51, %v10062_v24 }
 0x373   :  { %v1938_v31 = vadd.f32 %v1930_v1, %v10076_v28  ;;  %v2090_v7 = vmul.f32 %v10097_v56, %v2060_v3  ;;  %v2091_v54 = vmul.f32 %v10100_v47, %v2058_v50  ;;  %v1940_v8 = vadd.f32 %v1932_v9, %v10073_v30 }
 0x374   :  { %v1941_v32 = vadd.f32 %v1933_v61, %v10086_v26  ;;  %v2089_v15 = vmul.f32 %v10103_v35, %v2062_v62  ;;  %v2092_v37 = vmul.f32 %v10106_v13, %v2056_v11  ;;  %v1939_v24 = vadd.f32 %v1931_v34, %v10066_v43  ;;  %v14130_v11 = vld [vmem:[#allocation15_spill] sm:$0xff] }
 0x375   :  { %v1942_v28 = vadd.f32 %v1934_v42, %v10089_v36  ;;  %v2244_v45 = vmul.f32 %v10116_v46, %v2217_v6  ;;  %v2245_v56 = vmul.f32 %v10119_v25, %v2215_v19  ;;  %v2094_v47 = vadd.f32 %v2086_v33, %v1936_v27 }
 0x376   :  { %v10294_v20 = vpop.permute.xlu0 %2683  ;;  %v10296_v38 = vpop.permute.xlu1 %2677  ;;  %v2095_v30 = vadd.f32 %v2087_v17, %v1937_v44  ;;  %v2093_v1 = vadd.f32 %v2085_v49, %v1935_v39  ;;  %v2096_v26 = vadd.f32 %v2088_v58, %v1938_v31  ;;  %v2098_v51 = vadd.f32 %v2090_v7, %v1940_v8  ;;  %v14131_v58 = vld [vmem:[#allocation26_spill] sm:$0xff]  ;;  %v14134_v39 = vld [vmem:[#allocation31_spill] sm:$0xff] }
 0x377   :  { %v2099_v35 = vadd.f32 %v2091_v54, %v1941_v32  ;;  %v2213_v13 = vsel %vm708_vm3, %v9994_v18, %v10002_v5  ;;  %v2219_v43 = vsel %vm708_vm3, %v10002_v5, %v9992_v53  ;;  %v2097_v36 = vadd.f32 %v2089_v15, %v1939_v24  ;;  %v14135_v31 = vld [vmem:[#allocation27_spill] sm:$0xff]  ;;  %v14137_v15 = vld [vmem:[#allocation32_spill] sm:$0xff]  ;;  %v14138_v24 = vld [vmem:[#allocation33_spill] sm:$0xff] }
 0x378   :  { %v2100_v9 = vadd.f32 %v2092_v37, %v1942_v28  ;;  %v2216_v44 = vsel %vm708_vm3, %v10004_v14, %v10000_v4  ;;  %v2218_v27 = vsel %vm708_vm3, %v9996_v60, %v10004_v14  ;;  %v2252_v34 = vadd.f32 %v2244_v45, %v2094_v47  ;;  %v14136_v7 = vld [vmem:[#allocation23_spill] sm:$0xff]  ;;  %v14139_v47 = vld [vmem:[#allocation28_spill] sm:$0xff] }
 0x379   :  { %v2253_v42 = vadd.f32 %v2245_v56, %v2095_v30  ;;  %v2214_v53 = vsel %vm708_vm3, %v10000_v4, %v10006_v22  ;;  %v2220_v5 = vsel %vm708_vm3, %v10006_v22, %v9996_v60  ;;  %v2243_v50 = vmul.f32 %v10122_v59, %v2219_v43  ;;  %v14140_v30 = vld [vmem:[#allocation22_spill] sm:$0xff]  ;;  %v14141_v43 = vld [vmem:[#allocation16_spill] sm:$0xff] }
 0x37a   :  { %v10318_v61 = vpop.permute.xlu1 %2685  ;;  %v10320_v18 = vpop.permute.xlu0 %2829  ;;  %v2246_v14 = vmul.f32 %v10125_v29, %v2213_v13  ;;  %v2373_v3 = vsel %vm868_vm4, %v10014_v10, %v10010_v23  ;;  %v2375_v33 = vsel %vm868_vm4, %v10008_v57, %v10014_v10  ;;  %v2248_v4 = vmul.f32 %v10116_v46, %v2218_v27  ;;  %v14132_v10 = vld [vmem:[#allocation21_spill] sm:$0xff] }
 0x37b   :  { %v2249_v17 = vmul.f32 %v10119_v25, %v2216_v44  ;;  %v2371_v60 = vsel %vm868_vm4, %v10010_v23, %v14130_v11  ;;  %v2377_v22 = vsel %vm868_vm4, %v14130_v11, %v10008_v57  ;;  %v2247_v62 = vmul.f32 %v10122_v59, %v2220_v5  ;;  %v14133_v25 = vld [vmem:[#allocation25_spill] sm:$0xff] }
 0x37c   :  { %v2250_v49 = vmul.f32 %v10125_v29, %v2214_v53  ;;  %v2374_v46 = vsel %vm868_vm4, %v14132_v10, %v14131_v58  ;;  %v2376_v19 = vsel %vm868_vm4, %v14133_v25, %v14132_v10  ;;  %v2402_v57 = vmul.f32 %v14134_v39, %v2375_v33 }
 0x37d   :  { %v2403_v59 = vmul.f32 %v14135_v31, %v2373_v3  ;;  %v2372_v29 = vsel %vm868_vm4, %v14131_v58, %v14136_v7  ;;  %v2378_v54 = vsel %vm868_vm4, %v14136_v7, %v14133_v25  ;;  %v2251_v8 = vadd.f32 %v2243_v50, %v2093_v1  ;;  %v14143_v58 = vld [vmem:[#allocation35_spill] sm:$0xff] }
 0x37e   :  { %v10360_v23 = vpop.permute.xlu0 %2837  ;;  %v10362_v6 = vpop.permute.xlu1 %2831  ;;  %v2254_v32 = vadd.f32 %v2246_v14, %v2096_v26  ;;  %v2401_v37 = vmul.f32 %v14137_v15, %v2377_v22  ;;  %v2404_v28 = vmul.f32 %v14138_v24, %v2371_v60  ;;  %v2406_v45 = vmul.f32 %v14134_v39, %v2376_v19  ;;  %v14142_v60 = vld [vmem:[#allocation34_spill] sm:$0xff]  ;;  %v14147_v19 = vld [vmem:[#allocation29_spill] sm:$0xff] }
 0x37f   :  { %v2407_v56 = vmul.f32 %v14135_v31, %v2374_v46  ;;  %v2531_v13 = vsel %vm1028_vm5, %v14140_v30, %v14139_v47  ;;  %v2533_v44 = vsel %vm1028_vm5, %v14141_v43, %v14140_v30  ;;  %v2256_v1 = vadd.f32 %v2248_v4, %v2098_v51  ;;  %v14144_v46 = vld [vmem:[#allocation17_spill] sm:$0xff] }
 0x380   :  { %v2257_v26 = vadd.f32 %v2249_v17, %v2099_v35  ;;  %v2405_v27 = vmul.f32 %v14137_v15, %v2378_v54  ;;  %v2408_v53 = vmul.f32 %v14138_v24, %v2372_v29  ;;  %v2255_v14 = vadd.f32 %v2247_v62, %v2097_v36  ;;  %v14145_v62 = vld [vmem:[#allocation24_spill] sm:$0xff]  ;;  %v14149_v29 = vld [vmem:[#allocation37_spill] sm:$0xff] }
 0x381   :  { %v2258_v3 = vadd.f32 %v2250_v49, %v2100_v9  ;;  %v2410_v33 = vadd.f32 %v2402_v57, %v2252_v34  ;;  %v2411_v11 = vadd.f32 %v2403_v59, %v2253_v42  ;;  %v2559_v22 = vmul.f32 %v14142_v60, %v2533_v44  ;;  %v14146_v49 = vld [vmem:[#allocation30_spill] sm:$0xff]  ;;  %v14148_v59 = vld [vmem:[#allocation36_spill] sm:$0xff] }
 0x382   :  { %v2834_v5 = vpop.permute.xlu0 %2833  ;;  %v10388_v50 = vpop.permute.xlu1 %2839  ;;  %v2560_v10 = vmul.f32 %v14143_v58, %v2531_v13  ;;  %v2529_v51 = vsel %vm1028_vm5, %v14139_v47, %v14144_v46  ;;  %v2535_v35 = vsel %vm1028_vm5, %v14144_v46, %v14141_v43  ;;  %v2409_v4 = vadd.f32 %v2401_v37, %v2251_v8  ;;  %v14150_v8 = vld [vmem:[#allocation38_spill] sm:$0xff] }
 0x383   :  { %v2412_v17 = vadd.f32 %v2404_v28, %v2254_v32  ;;  %v2414_v36 = vadd.f32 %v2406_v45, %v2256_v1  ;;  %v2415_v9 = vadd.f32 %v2407_v56, %v2257_v26  ;;  %v2413_v34 = vadd.f32 %v2405_v27, %v2255_v14  ;;  %v14151_v45 = vld [vmem:[#allocation39_spill] sm:$0xff] }
 0x384   :  { %v2416_v42 = vadd.f32 %v2408_v53, %v2258_v3  ;;  %v2532_v25 = vsel %vm1028_vm5, %v14146_v49, %v14145_v62  ;;  %v2534_v39 = vsel %vm1028_vm5, %v14147_v19, %v14146_v49  ;;  %v2561_v7 = vmul.f32 %v14148_v59, %v2529_v51  ;;  %v14152_v3 = vld [vmem:[#allocation40_spill] sm:$0xff] }
 0x385   :  { %v2562_v54 = vmul.f32 %v14149_v29, %v2535_v35  ;;  %v2530_v32 = vsel %vm1028_vm5, %v14145_v62, %v14150_v8  ;;  %v2536_v15 = vsel %vm1028_vm5, %v14150_v8, %v14147_v19  ;;  %v2567_v37 = vadd.f32 %v2559_v22, %v2409_v4  ;;  %v14156_v8 = vld [vmem:[#allocation44_spill] sm:$0xff] }
 0x386   :  { %v2842_v57 = vpop.permute.xlu0 %2841  ;;  %v2836_v31 = vpop.permute.xlu1 %2835  ;;  %v2568_v24 = vadd.f32 %v2560_v10, %v2410_v33  ;;  %v2689_v28 = vsel %vm1188_vm6, %v10262_v16, %v10219_v12  ;;  %v2691_v56 = vsel %vm1188_vm6, %v14151_v45, %v10262_v16  ;;  %v2563_v47 = vmul.f32 %v14142_v60, %v2534_v39  ;;  %v14153_v33 = vld [vmem:[#allocation41_spill] sm:$0xff] }
 0x387   :  { %v2564_v30 = vmul.f32 %v14143_v58, %v2532_v25  ;;  %v2687_v13 = vsel %vm1188_vm6, %v10219_v12, %v10294_v20  ;;  %v2693_v43 = vsel %vm1188_vm6, %v10294_v20, %v14151_v45  ;;  %v2565_v44 = vmul.f32 %v14148_v59, %v2530_v32  ;;  %v14157_v32 = vld [vmem:[#allocation45_spill] sm:$0xff] }
 0x388   :  { %v2566_v1 = vmul.f32 %v14149_v29, %v2536_v15  ;;  %v2690_v16 = vsel %vm1188_vm6, %v10296_v38, %v10264_v63  ;;  %v2692_v26 = vsel %vm1188_vm6, %v10221_v40, %v10296_v38  ;;  %v2569_v53 = vadd.f32 %v2561_v7, %v2411_v11 }
 0x389   :  { %v2570_v14 = vadd.f32 %v2562_v54, %v2412_v17  ;;  %v2717_v20 = vmul.f32 %v14152_v3, %v2691_v56  ;;  %v2718_v60 = vmul.f32 %v14153_v33, %v2689_v28  ;;  %v2719_v22 = vmul.f32 %v10180_v2, %v2687_v13  ;;  %v14158_v13 = vld [vmem:[#allocation46_spill] sm:$0xff] }
 0x38a   :  { %v2844_v12 = vpop.permute.xlu1 %2843  ;;  %v2988_v27 = vpop.permute.xlu0 %2987  ;;  %v2720_v58 = vmul.f32 %v10183_v21, %v2693_v43  ;;  %v2688_v10 = vsel %vm1188_vm6, %v10264_v63, %v10318_v61  ;;  %v2694_v38 = vsel %vm1188_vm6, %v10318_v61, %v10221_v40  ;;  %v2721_v11 = vmul.f32 %v14152_v3, %v2692_v26 }
 0x38b   :  { %v2722_v46 = vmul.f32 %v14153_v33, %v2690_v16  ;;  %v2847_v51 = vsel %vm1348_vm7, %v2834_v5, %v10360_v23  ;;  %v2849_v35 = vsel %vm1348_vm7, %v10320_v18, %v2834_v5  ;;  %v2571_v4 = vadd.f32 %v2563_v47, %v2413_v34  ;;  %v14154_v34 = vld [vmem:[#allocation42_spill] sm:$0xff] }
 0x38c   :  { %v2572_v17 = vadd.f32 %v2564_v30, %v2414_v36  ;;  %v2573_v63 = vadd.f32 %v2565_v44, %v2415_v9  ;;  %v2574_v62 = vadd.f32 %v2566_v1, %v2416_v42  ;;  %v2723_v40 = vmul.f32 %v10180_v2, %v2688_v10  ;;  %v14155_v9 = vld [vmem:[#allocation43_spill] sm:$0xff] }
 0x38d   :  { %v2724_v61 = vmul.f32 %v10183_v21, %v2694_v38  ;;  %v2845_v19 = vsel %vm1348_vm7, %v10360_v23, %v2842_v57  ;;  %v2851_v39 = vsel %vm1348_vm7, %v2842_v57, %v10320_v18  ;;  %v2725_v59 = vadd.f32 %v2717_v20, %v2567_v37  ;;  %v14159_v44 = vld [vmem:[#allocation47_spill] sm:$0xff] }
 0x38e   :  { %v2996_v49 = vpop.permute.xlu0 %2995  ;;  %v2990_v25 = vpop.permute.xlu1 %2989  ;;  %v2726_v5 = vadd.f32 %v2718_v60, %v2568_v24  ;;  %v2875_v36 = vmul.f32 %v14154_v34, %v2849_v35  ;;  %v2876_v42 = vmul.f32 %v14155_v9, %v2847_v51  ;;  %v2727_v7 = vadd.f32 %v2719_v22, %v2569_v53 }
 0x38f   :  { %v2728_v29 = vadd.f32 %v2720_v58, %v2570_v14  ;;  %v2729_v54 = vadd.f32 %v2721_v11, %v2571_v4  ;;  %v2730_v2 = vadd.f32 %v2722_v46, %v2572_v17  ;;  %v2877_v21 = vmul.f32 %v14156_v8, %v2845_v19 }
 0x390   :  { %v2878_v15 = vmul.f32 %v14157_v32, %v2851_v39  ;;  %v2848_v23 = vsel %vm1348_vm7, %v2836_v31, %v10388_v50  ;;  %v2850_v18 = vsel %vm1348_vm7, %v10362_v6, %v2836_v31  ;;  %v2731_v24 = vadd.f32 %v2723_v40, %v2573_v63 }
 0x391   :  { %v2732_v28 = vadd.f32 %v2724_v61, %v2574_v62  ;;  %v2883_v47 = vadd.f32 %v2875_v36, %v2725_v59  ;;  %v2884_v30 = vadd.f32 %v2876_v42, %v2726_v5  ;;  %v2879_v16 = vmul.f32 %v14154_v34, %v2850_v18 }
 0x392   :  { %v2992_v57 = vpop.permute.xlu0 %2991  ;;  %v2998_v37 = vpop.permute.xlu1 %2997  ;;  %v2880_v31 = vmul.f32 %v14155_v9, %v2848_v23  ;;  %v2846_v26 = vsel %vm1348_vm7, %v10388_v50, %v2844_v12  ;;  %v2852_v53 = vsel %vm1348_vm7, %v2844_v12, %v10362_v6  ;;  %v2885_v14 = vadd.f32 %v2877_v21, %v2727_v7 }
 0x393   :  { %v3005_v45 = vsel %vm1508_vm8, %v2992_v57, %v2996_v49  ;;  %v3007_v56 = vsel %vm1508_vm8, %v2988_v27, %v2992_v57  ;;  %v2886_v3 = vadd.f32 %v2878_v15, %v2728_v29  ;;  %v2881_v6 = vmul.f32 %v14156_v8, %v2846_v26  ;;  %v14172_v26 = vld [vmem:[#allocation6_spill] sm:$0xff] }
 0x394   :  { %v3033_v43 = vmul.f32 %v14158_v13, %v3007_v56  ;;  %v3034_v1 = vmul.f32 %v14159_v44, %v3005_v45  ;;  %v2882_v12 = vmul.f32 %v14157_v32, %v2852_v53  ;;  %v2887_v51 = vadd.f32 %v2879_v16, %v2729_v54  ;;  %v14170_v16 = vld [vmem:[#allocation4_spill] sm:$0xff]  ;;  %v8722_v53 = vld [vmem:[%s13785_s6 + $0x20] sm:$0xff]  }
 0x395   :  { %v2888_v35 = vadd.f32 %v2880_v31, %v2730_v2  ;;  %v2889_v5 = vadd.f32 %v2881_v6, %v2731_v24  ;;  %v14171_v31 = vld [vmem:[#allocation7_spill] sm:$0xff]  ;;  %v8729_v6 = vld [vmem:[%s13785_s6 + $0x38] sm:$0xff]  }
 0x396   :  { %v3041_v20 = vadd.f32 %v3033_v43, %v2883_v47  ;;  %v3042_v33 = vadd.f32 %v3034_v1, %v2884_v30  ;;  %v3000_v60 = vpop.permute.xlu0 %2999  ;;  %v2994_v22 = vpop.permute.xlu1 %2993  ;;  %v2890_v34 = vadd.f32 %v2882_v12, %v2732_v28  ;;  %v14164_v47 = vld [vmem:[#allocation13_spill] sm:$0xff]  ;;  %v14165_v30 = vld [vmem:[#allocation12_spill] sm:$0xff]  ;;  %v14167_v43 = vld [vmem:[#allocation3_spill] sm:$0xff] }
 0x397   :  { %v3003_v58 = vsel %vm1508_vm8, %v2996_v49, %v3000_v60  ;;  %v3009_v10 = vsel %vm1508_vm8, %v3000_v60, %v2988_v27  ;;  %v3006_v38 = vsel %vm1508_vm8, %v2994_v22, %v2998_v37  ;;  %v3008_v50 = vsel %vm1508_vm8, %v2990_v25, %v2994_v22  ;;  %v14169_v1 = vld [vmem:[#allocation5_spill] sm:$0xff]  ;;  %v8723_v60 = vld [vmem:[%s13785_s6] sm:$0xff]   ;;  %v8724_v22 = vld [vmem:[%s13785_s6 + $0x8] sm:$0xff]  }
 0x398   :  { %v3035_v11 = vmul.f32 %v10224_v52, %v3003_v58  ;;  %v3036_v46 = vmul.f32 %v10227_v41, %v3009_v10  ;;  %v3037_v4 = vmul.f32 %v14158_v13, %v3008_v50  ;;  %v3038_v27 = vmul.f32 %v14159_v44, %v3006_v38  ;;  %v14166_v13 = vld [vmem:[#allocation14_spill] sm:$0xff]  ;;  %v14168_v44 = vld [vmem:[#allocation11_spill] sm:$0xff]  ;;  %v8725_v58 = vld [vmem:[%s13785_s6 + $0x10] sm:$0xff]  }
 0x399   :  { %v3049_v17 = vmul.f32 0.2, %v3041_v20  ;;  %v3050_v63 = vmul.f32 0.2, %v3042_v33  ;;  %v8726_v10 = vld [vmem:[%s13785_s6 + $0x18] sm:$0xff]   ;;  %v8727_v38 = vld [vmem:[%s13785_s6 + $0x28] sm:$0xff]  }
 0x39a   :  { %v3043_v62 = vadd.f32 %v3035_v11, %v2885_v14  ;;  %v3044_v49 = vadd.f32 %v3036_v46, %v2886_v3  ;;  %v3002_v40 = vpop.permute.xlu1 %3001  ;;  %v3045_v61 = vadd.f32 %v3037_v4, %v2887_v51  ;;  %v3046_v19 = vadd.f32 %v3038_v27, %v2888_v35  ;;  %v14173_v14 = vld [vmem:[#allocation9_spill] sm:$0xff]  ;;  %v14174_v3 = vld [vmem:[#allocation8_spill] sm:$0xff]  ;;  %v8730_v12 = vld [vmem:[%s13785_s6 + $0x40] sm:$0xff]  }
 0x39b   :  { %v3004_v39 = vsel %vm1508_vm8, %v2998_v37, %v3002_v40  ;;  %v3010_v59 = vsel %vm1508_vm8, %v3002_v40, %v2990_v25  ;;  %v3057_v21 = vmax.f32 %v3041_v20, %v3049_v17  ;;  %v3058_v32 = vmax.f32 %v3042_v33, %v3050_v63  ;;  %v14175_v20 = vld [vmem:[#allocation10_spill] sm:$0xff]  ;;  %v8728_v50 = vld [vmem:[%s13785_s6 + $0x30] sm:$0xff]  }
 0x39c   :  { %v3039_v36 = vmul.f32 %v10224_v52, %v3004_v39  ;;  %v3040_v9 = vmul.f32 %v10227_v41, %v3010_v59  ;;  %v3053_v42 = vmul.f32 0.2, %v3045_v61  ;;  %v3054_v7 = vmul.f32 0.2, %v3046_v19 }
 0x39d   :  { %v3051_v29 = vmul.f32 0.2, %v3043_v62  ;;  %v3052_v54 = vmul.f32 0.2, %v3044_v49  ;;  %v14176_v33 = vmov 0  }
 0x39e   :  { %v3047_v2 = vadd.f32 %v3039_v36, %v2889_v5  ;;  %v3048_v8 = vadd.f32 %v3040_v9, %v2890_v34  ;;  %v3061_v15 = vmax.f32 %v3045_v61, %v3053_v42  ;;  %v3062_v23 = vmax.f32 %v3046_v19, %v3054_v7 }
 0x39f   :  { %v3059_v24 = vmax.f32 %v3043_v62, %v3051_v29  ;;  %v3060_v52 = vmax.f32 %v3044_v49, %v3052_v54 }
 0x3a0   :  { %v3055_v18 = vmul.f32 0.2, %v3047_v2  ;;  %v3056_v57 = vmul.f32 0.2, %v3048_v8  ;;  %v10518_v37 = vpack.c.bf16 %v3061_v15, %v3057_v21  ;;  %v10520_v25 = vpack.c.bf16 %v3062_v23, %v3058_v32 }
 0x3a2   :  { %14160 = vst [vmem:[#allocation15_spill] sm:$0xff] %v10518_v37  ;;  %14161 = vst [vmem:[#allocation26_spill] sm:$0xff] %v10520_v25  ;;  %v3063_v28 = vmax.f32 %v3047_v2, %v3055_v18  ;;  %v3064_v41 = vmax.f32 %v3048_v8, %v3056_v57  ;;  %3216 = vmatprep.subr.bf16.mxu0 %v10520_v25 }
 0x3a3   :  { %3217 = vmatpush1.bf16.msra.mxu0 %v10518_v37 }
 0x3a4   :  { %v10523_v45 = vpack.c.bf16 %v3063_v28, %v3059_v24  ;;  %v10525_v56 = vpack.c.bf16 %v3064_v41, %v3060_v52  ;;  %3218 = vmatprep.subr.bf16.mxu0 %v14164_v47 }
 0x3a6   :  { %14162 = vst [vmem:[#allocation21_spill] sm:$0xff] %v10523_v45  ;;  %14163 = vst [vmem:[#allocation25_spill] sm:$0xff] %v10525_v56  ;;  %3259 = vmatprep.subr.bf16.mxu1 %v10525_v56 }
 0x3a7   :  { %3260 = vmatpush1.bf16.msra.mxu1 %v10523_v45  ;;  %3219 = vmatpush1.bf16.msra.mxu0 %v14165_v30 }
 0x3a8   :  { %3261 = vmatprep.subr.bf16.mxu1 %v14166_v13  ;;  %3220 = vmatprep.subr.bf16.mxu0 %v14167_v43 }
 0x3ab   :  { %3262 = vmatpush1.bf16.msra.mxu1 %v14168_v44  ;;  %3221 = vmatpush1.bf16.msra.mxu0 %v14169_v1 }
 0x3ac   :  { %3263 = vmatprep.subr.bf16.mxu1 %v14170_v16  ;;  %3222 = vmatprep.subr.bf16.mxu0 %v14171_v31 }
 0x3af   :  { %3264 = vmatpush1.bf16.msra.mxu1 %v14172_v26  ;;  %3223 = vmatpush1.bf16.msra.mxu0 %v14173_v14 }
 0x3b0   :  { %3265 = vmatprep.subr.bf16.mxu1 %v14174_v3  ;;  %3320 = vmatprep.subr.bf16.mxu0 %v10520_v25 }
 0x3b2   :  { %8467 = vmatmul.mubr.msk.bf16.vlgmr.msra.gmra.mxu0 %vm3204_vm10, %v8722_v53 }
 0x3b3   :  { %3266 = vmatpush1.bf16.msra.mxu1 %v14175_v20  ;;  %3321 = vmatpush1.bf16.msra.mxu0 %v10518_v37 }
 0x3b4   :  { %3363 = vmatprep.subr.bf16.mxu1 %v10525_v56  ;;  %3322 = vmatprep.subr.bf16.mxu0 %v14164_v47 }
 0x3b5   :  { %3344 = vmatprep.mubr.bf16.mxu0 %v14176_v33 }
 0x3b6   :  { %8468 = vmatmul.mubr.msk.bf16.vlgmr.msra.gmra.mxu1 %vm3204_vm10, %v8722_v53 }
 0x3b7   :  { %3364 = vmatpush1.bf16.msra.mxu1 %v10523_v45  ;;  %3387 = vmatprep.mubr.bf16.mxu1 %v14176_v33 }
 0x3b8   :  { %3323 = vmatpush1.bf16.msra.mxu0 %v14165_v30  ;;  %3365 = vmatprep.subr.bf16.mxu1 %v14166_v13 }
 0x3b9   :  { %3324 = vmatprep.subr.bf16.mxu0 %v14167_v43 }
 0x3bb   :  { %3366 = vmatpush1.bf16.msra.mxu1 %v14168_v44 }
 0x3bc   :  { %3325 = vmatpush1.bf16.msra.mxu0 %v14169_v1  ;;  %3367 = vmatprep.subr.bf16.mxu1 %v14170_v16 }
 0x3bd   :  { %3326 = vmatprep.subr.bf16.mxu0 %v14171_v31 }
 0x3bf   :  { %3368 = vmatpush1.bf16.msra.mxu1 %v14172_v26 }
 0x3c0   :  { %3327 = vmatpush1.bf16.msra.mxu0 %v14173_v14  ;;  %3369 = vmatprep.subr.bf16.mxu1 %v14174_v3 }
 0x3c1   :  { %3478 = vmatprep.subr.bf16.mxu0 %v10520_v25 }
 0x3c3   :  { %8470 = vmatmul.mubr.msk.bf16.vlgmr.msra.gmra.mxu0 %vm3204_vm10, %v8723_v60  ;;  %3370 = vmatpush1.bf16.msra.mxu1 %v14175_v20 }
 0x3c4   :  { %3479 = vmatpush1.bf16.msra.mxu0 %v10518_v37  ;;  %3521 = vmatprep.subr.bf16.mxu1 %v10525_v56 }
 0x3c5   :  { %3480 = vmatprep.subr.bf16.mxu0 %v14164_v47  ;;  %3502 = vmatprep.mubr.bf16.mxu0 %v14176_v33 }
 0x3c6   :  { %8471 = vmatmul.mubr.msk.bf16.vlgmr.msra.gmra.mxu1 %vm3204_vm10, %v8723_v60 }
 0x3c7   :  { %3522 = vmatpush1.bf16.msra.mxu1 %v10523_v45  ;;  %3545 = vmatprep.mubr.bf16.mxu1 %v14176_v33 }
 0x3c8   :  { %3481 = vmatpush1.bf16.msra.mxu0 %v14165_v30  ;;  %3523 = vmatprep.subr.bf16.mxu1 %v14166_v13 }
 0x3c9   :  { %3482 = vmatprep.subr.bf16.mxu0 %v14167_v43 }
 0x3cb   :  { %3524 = vmatpush1.bf16.msra.mxu1 %v14168_v44 }
 0x3cc   :  { %3483 = vmatpush1.bf16.msra.mxu0 %v14169_v1  ;;  %3525 = vmatprep.subr.bf16.mxu1 %v14170_v16 }
 0x3cd   :  { %3484 = vmatprep.subr.bf16.mxu0 %v14171_v31 }
 0x3cf   :  { %3526 = vmatpush1.bf16.msra.mxu1 %v14172_v26 }
 0x3d0   :  { %3485 = vmatpush1.bf16.msra.mxu0 %v14173_v14  ;;  %3527 = vmatprep.subr.bf16.mxu1 %v14174_v3 }
 0x3d1   :  { %3636 = vmatprep.subr.bf16.mxu0 %v10520_v25 }
 0x3d3   :  { %8473 = vmatmul.mubr.msk.bf16.vlgmr.msra.gmra.mxu0 %vm3204_vm10, %v8724_v22  ;;  %3528 = vmatpush1.bf16.msra.mxu1 %v14175_v20 }
 0x3d4   :  { %3637 = vmatpush1.bf16.msra.mxu0 %v10518_v37  ;;  %3679 = vmatprep.subr.bf16.mxu1 %v10525_v56 }
 0x3d5   :  { %3638 = vmatprep.subr.bf16.mxu0 %v14164_v47  ;;  %3660 = vmatprep.mubr.bf16.mxu0 %v14176_v33 }
 0x3d6   :  { %8474 = vmatmul.mubr.msk.bf16.vlgmr.msra.gmra.mxu1 %vm3204_vm10, %v8724_v22 }
 0x3d7   :  { %3680 = vmatpush1.bf16.msra.mxu1 %v10523_v45  ;;  %3703 = vmatprep.mubr.bf16.mxu1 %v14176_v33 }
 0x3d8   :  { %3639 = vmatpush1.bf16.msra.mxu0 %v14165_v30  ;;  %3681 = vmatprep.subr.bf16.mxu1 %v14166_v13 }
 0x3d9   :  { %3640 = vmatprep.subr.bf16.mxu0 %v14167_v43 }
 0x3db   :  { %3682 = vmatpush1.bf16.msra.mxu1 %v14168_v44 }
 0x3dc   :  { %3641 = vmatpush1.bf16.msra.mxu0 %v14169_v1  ;;  %3683 = vmatprep.subr.bf16.mxu1 %v14170_v16 }
 0x3dd   :  { %3642 = vmatprep.subr.bf16.mxu0 %v14171_v31 }
 0x3df   :  { %3684 = vmatpush1.bf16.msra.mxu1 %v14172_v26 }
 0x3e0   :  { %3643 = vmatpush1.bf16.msra.mxu0 %v14173_v14  ;;  %3685 = vmatprep.subr.bf16.mxu1 %v14174_v3 }
 0x3e1   :  { %3794 = vmatprep.subr.bf16.mxu0 %v10520_v25 }
 0x3e3   :  { %8477 = vmatmul.mubr.msk.bf16.vlgmr.msra.gmra.mxu0 %vm3204_vm10, %v8725_v58  ;;  %3686 = vmatpush1.bf16.msra.mxu1 %v14175_v20 }
 0x3e4   :  { %3795 = vmatpush1.bf16.msra.mxu0 %v10518_v37  ;;  %3837 = vmatprep.subr.bf16.mxu1 %v10525_v56 }
 0x3e5   :  { %3796 = vmatprep.subr.bf16.mxu0 %v14164_v47  ;;  %3818 = vmatprep.mubr.bf16.mxu0 %v14176_v33 }
 0x3e6   :  { %8478 = vmatmul.mubr.msk.bf16.vlgmr.msra.gmra.mxu1 %vm3204_vm10, %v8725_v58 }
 0x3e7   :  { %3838 = vmatpush1.bf16.msra.mxu1 %v10523_v45  ;;  %3861 = vmatprep.mubr.bf16.mxu1 %v14176_v33 }
 0x3e8   :  { %3797 = vmatpush1.bf16.msra.mxu0 %v14165_v30  ;;  %3839 = vmatprep.subr.bf16.mxu1 %v14166_v13 }
 0x3e9   :  { %3798 = vmatprep.subr.bf16.mxu0 %v14167_v43 }
 0x3eb   :  { %3840 = vmatpush1.bf16.msra.mxu1 %v14168_v44 }
 0x3ec   :  { %3799 = vmatpush1.bf16.msra.mxu0 %v14169_v1  ;;  %3841 = vmatprep.subr.bf16.mxu1 %v14170_v16 }
 0x3ed   :  { %3800 = vmatprep.subr.bf16.mxu0 %v14171_v31 }
 0x3ef   :  { %3842 = vmatpush1.bf16.msra.mxu1 %v14172_v26 }
 0x3f0   :  { %3801 = vmatpush1.bf16.msra.mxu0 %v14173_v14  ;;  %3843 = vmatprep.subr.bf16.mxu1 %v14174_v3 }
 0x3f1   :  { %3952 = vmatprep.subr.bf16.mxu0 %v10520_v25 }
 0x3f3   :  { %8481 = vmatmul.mubr.msk.bf16.vlgmr.msra.gmra.mxu0 %vm3204_vm10, %v8726_v10  ;;  %3844 = vmatpush1.bf16.msra.mxu1 %v14175_v20 }
 0x3f4   :  { %3953 = vmatpush1.bf16.msra.mxu0 %v10518_v37  ;;  %3995 = vmatprep.subr.bf16.mxu1 %v10525_v56 }
 0x3f5   :  { %3954 = vmatprep.subr.bf16.mxu0 %v14164_v47  ;;  %3976 = vmatprep.mubr.bf16.mxu0 %v14176_v33 }
 0x3f6   :  { %8482 = vmatmul.mubr.msk.bf16.vlgmr.msra.gmra.mxu1 %vm3204_vm10, %v8726_v10 }
 0x3f7   :  { %3996 = vmatpush1.bf16.msra.mxu1 %v10523_v45  ;;  %4019 = vmatprep.mubr.bf16.mxu1 %v14176_v33 }
 0x3f8   :  { %3955 = vmatpush1.bf16.msra.mxu0 %v14165_v30  ;;  %3997 = vmatprep.subr.bf16.mxu1 %v14166_v13 }
 0x3f9   :  { %3956 = vmatprep.subr.bf16.mxu0 %v14167_v43 }
 0x3fb   :  { %3998 = vmatpush1.bf16.msra.mxu1 %v14168_v44 }
 0x3fc   :  { %3957 = vmatpush1.bf16.msra.mxu0 %v14169_v1  ;;  %3999 = vmatprep.subr.bf16.mxu1 %v14170_v16 }
 0x3fd   :  { %3958 = vmatprep.subr.bf16.mxu0 %v14171_v31 }
 0x3ff   :  { %4000 = vmatpush1.bf16.msra.mxu1 %v14172_v26 }
 0x400   :  { %3959 = vmatpush1.bf16.msra.mxu0 %v14173_v14  ;;  %4001 = vmatprep.subr.bf16.mxu1 %v14174_v3 }
 0x401   :  { %4110 = vmatprep.subr.bf16.mxu0 %v10520_v25 }
 0x403   :  { %8485 = vmatmul.mubr.msk.bf16.vlgmr.msra.gmra.mxu0 %vm3204_vm10, %v8727_v38  ;;  %4002 = vmatpush1.bf16.msra.mxu1 %v14175_v20 }
 0x404   :  { %4111 = vmatpush1.bf16.msra.mxu0 %v10518_v37  ;;  %4153 = vmatprep.subr.bf16.mxu1 %v10525_v56 }
 0x405   :  { %4112 = vmatprep.subr.bf16.mxu0 %v14164_v47  ;;  %4134 = vmatprep.mubr.bf16.mxu0 %v14176_v33 }
 0x406   :  { %8486 = vmatmul.mubr.msk.bf16.vlgmr.msra.gmra.mxu1 %vm3204_vm10, %v8727_v38 }
 0x407   :  { %4154 = vmatpush1.bf16.msra.mxu1 %v10523_v45  ;;  %4177 = vmatprep.mubr.bf16.mxu1 %v14176_v33 }
 0x408   :  { %4113 = vmatpush1.bf16.msra.mxu0 %v14165_v30  ;;  %4155 = vmatprep.subr.bf16.mxu1 %v14166_v13 }
 0x409   :  { %4114 = vmatprep.subr.bf16.mxu0 %v14167_v43 }
 0x40b   :  { %4156 = vmatpush1.bf16.msra.mxu1 %v14168_v44 }
 0x40c   :  { %4115 = vmatpush1.bf16.msra.mxu0 %v14169_v1  ;;  %4157 = vmatprep.subr.bf16.mxu1 %v14170_v16 }
 0x40d   :  { %4116 = vmatprep.subr.bf16.mxu0 %v14171_v31 }
 0x40f   :  { %4158 = vmatpush1.bf16.msra.mxu1 %v14172_v26 }
 0x410   :  { %4117 = vmatpush1.bf16.msra.mxu0 %v14173_v14  ;;  %4159 = vmatprep.subr.bf16.mxu1 %v14174_v3 }
 0x411   :  { %4268 = vmatprep.subr.bf16.mxu0 %v10520_v25 }
 0x413   :  { %8489 = vmatmul.mubr.msk.bf16.vlgmr.msra.gmra.mxu0 %vm3204_vm10, %v8728_v50  ;;  %4160 = vmatpush1.bf16.msra.mxu1 %v14175_v20 }
 0x414   :  { %4269 = vmatpush1.bf16.msra.mxu0 %v10518_v37  ;;  %4311 = vmatprep.subr.bf16.mxu1 %v10525_v56 }
 0x415   :  { %4270 = vmatprep.subr.bf16.mxu0 %v14164_v47  ;;  %4292 = vmatprep.mubr.bf16.mxu0 %v14176_v33 }
 0x416   :  { %8490 = vmatmul.mubr.msk.bf16.vlgmr.msra.gmra.mxu1 %vm3204_vm10, %v8728_v50 }
 0x417   :  { %4312 = vmatpush1.bf16.msra.mxu1 %v10523_v45  ;;  %4335 = vmatprep.mubr.bf16.mxu1 %v14176_v33 }
 0x418   :  { %4271 = vmatpush1.bf16.msra.mxu0 %v14165_v30  ;;  %4313 = vmatprep.subr.bf16.mxu1 %v14166_v13 }
 0x419   :  { %4272 = vmatprep.subr.bf16.mxu0 %v14167_v43 }
 0x41b   :  { %4314 = vmatpush1.bf16.msra.mxu1 %v14168_v44 }
 0x41c   :  { %4273 = vmatpush1.bf16.msra.mxu0 %v14169_v1  ;;  %4315 = vmatprep.subr.bf16.mxu1 %v14170_v16 }
 0x41d   :  { %4274 = vmatprep.subr.bf16.mxu0 %v14171_v31 }
 0x41f   :  { %4316 = vmatpush1.bf16.msra.mxu1 %v14172_v26 }
 0x420   :  { %4275 = vmatpush1.bf16.msra.mxu0 %v14173_v14  ;;  %4317 = vmatprep.subr.bf16.mxu1 %v14174_v3 }
 0x421   :  { %4426 = vmatprep.subr.bf16.mxu0 %v10520_v25 }
 0x423   :  { %8493 = vmatmul.mubr.msk.bf16.vlgmr.msra.gmra.mxu0 %vm3204_vm10, %v8729_v6  ;;  %4318 = vmatpush1.bf16.msra.mxu1 %v14175_v20 }
 0x424   :  { %4427 = vmatpush1.bf16.msra.mxu0 %v10518_v37  ;;  %4469 = vmatprep.subr.bf16.mxu1 %v10525_v56  ;;  %v8475_v56 = vld [vmem:[%s13784_s1 + $0x1] ss:$8 sm:$0xf] }
 0x425   :  { %4428 = vmatprep.subr.bf16.mxu0 %v14164_v47  ;;  %4450 = vmatprep.mubr.bf16.mxu0 %v14176_v33 }
 0x426   :  { %8494 = vmatmul.mubr.msk.bf16.vlgmr.msra.gmra.mxu1 %vm3204_vm10, %v8729_v6 }
 0x427   :  { %4470 = vmatpush1.bf16.msra.mxu1 %v10523_v45  ;;  %4493 = vmatprep.mubr.bf16.mxu1 %v14176_v33 }
 0x428   :  { %4429 = vmatpush1.bf16.msra.mxu0 %v14165_v30  ;;  %4471 = vmatprep.subr.bf16.mxu1 %v14166_v13 }
 0x429   :  { %4430 = vmatprep.subr.bf16.mxu0 %v14167_v43 }
 0x42b   :  { %4472 = vmatpush1.bf16.msra.mxu1 %v14168_v44 }
 0x42c   :  { %4431 = vmatpush1.bf16.msra.mxu0 %v14169_v1  ;;  %4473 = vmatprep.subr.bf16.mxu1 %v14170_v16  ;;  %v3116_v16 = vld [vmem:[%s13788_s7 + $0x38] sm:$0xff] }
 0x42d   :  { %4432 = vmatprep.subr.bf16.mxu0 %v14171_v31  ;;  %v3115_v31 = vld [vmem:[%s13788_s7 + $0x30] sm:$0xff] }
 0x42e   :  { %v3422_v1 = vld [vmem:[%s13784_s1] ss:$8 sm:$0xf] }
 0x42f   :  { %4474 = vmatpush1.bf16.msra.mxu1 %v14172_v26  ;;  %v3112_v26 = vld [vmem:[%s13788_s7 + $0x18] sm:$0xff] }
 0x430   :  { %4433 = vmatpush1.bf16.msra.mxu0 %v14173_v14  ;;  %4475 = vmatprep.subr.bf16.mxu1 %v14174_v3  ;;  %v3111_v3 = vld [vmem:[%s13788_s7 + $0x10] sm:$0xff]  ;;  %v3114_v14 = vld [vmem:[%s13788_s7 + $0x28] sm:$0xff] }
 0x433   :  { %8497 = vmatmul.mubr.msk.bf16.vlgmr.msra.gmra.mxu0 %vm3204_vm10, %v8730_v12  ;;  %4476 = vmatpush1.bf16.msra.mxu1 %v14175_v20  ;;  %v3113_v20 = vld [vmem:[%s13788_s7 + $0x20] sm:$0xff] }
 0x434   :  { %4781 = vmatprep.mubr.bf16.mxu0 %v14176_v33 }
 0x436   :  { %8498 = vmatmul.mubr.msk.bf16.vlgmr.msra.gmra.mxu1 %vm3204_vm10, %v8730_v12 }
 0x437   :  { %4824 = vmatprep.mubr.bf16.mxu1 %v14176_v33  ;;  %v3110_v33 = vld [vmem:[%s13788_s7 + $0x8] sm:$0xff] }
 0x472   :  { %v10733_v11 = vpop.f32.mrf.mxu0 }
 0x474   :  { %v10737_v51 = vpop.f32.mrf.mxu0 }
 0x475   :  { %v3295_v30 = vadd.f32 %v10737_v51, %v3110_v33  ;;  %v3435_v51 = vrot.slane %v3422_v1, %v14108_v55 }
 0x476   :  { %v10735_v46 = vpop.f32.mrf.mxu1  ;;  %v10741_v4 = vpop.f32.mrf.mxu0 }
 0x477   :  { %v10919_v45 = vadd.f32 %v10741_v4, %v3113_v20  ;;  %v3296_v47 = vadd.f32 %v10735_v46, %v3111_v3  ;;  %v8479_v3 = vld [vmem:[%s13784_s1 + $0x2] ss:$8 sm:$0xf] }
 0x478   :  { %v10739_v35 = vpop.f32.mrf.mxu1  ;;  %v10745_v17 = vpop.f32.mrf.mxu0  ;;  %v14188_v20 = vld [vmem:[#allocation18_spill] sm:$0xff]  ;;  %v14189_v4 = vld [vmem:[#allocation20_spill] sm:$0xff] }
 0x479   :  { %v10926_v37 = vadd.f32 %v10745_v17, %v3114_v14  ;;  %v10929_v25 = vadd.f32 %v10739_v35, %v3112_v26  ;;  %v3431_v46 = vrot.slane %v3422_v1, %v14188_v20  ;;  %v3427_v14 = vrot.slane %v3422_v1, %v14189_v4 }
 0x47a   :  { %v10743_v27 = vpop.f32.mrf.mxu1  ;;  %v3439_v17 = vrot.slane %v3422_v1, %v9206_v0  ;;  %v10948_v26 = vrot.slane %v8475_v56, %v14188_v20  ;;  %v10954_v35 = vrot.slane %v8475_v56, %v14189_v4  ;;  %v8487_v1 = vld [vmem:[%s13784_s1 + $0x5] ss:$8 sm:$0xf] }
 0x47c   :  { %v10747_v62 = vpop.f32.mrf.mxu1 }
 0x47d   :  { %v10935_v33 = vadd.f32 %v10747_v62, %v3116_v16  ;;  %v10951_v16 = vrot.slane %v8475_v56, %v14108_v55 }
 0x483   :  { %v3346_v63 = vpop.f32.mrf.mxu0 }
 0x484   :  { %3398 = vrot.lane.b32.xlu0 %v3346_v63, %s8759_s2 }
 0x485   :  { %v3348_v49 = vpop.f32.mrf.mxu0 }
 0x486   :  { %v3389_v40 = vpop.f32.mrf.mxu1 }
 0x487   :  { %v3350_v61 = vpop.f32.mrf.mxu0 }
 0x488   :  { %3406 = vrot.lane.b32.xlu0 %v3389_v40, %s8759_s2  ;;  %3400 = vrot.lane.b32.xlu1 %v3350_v61, %s8759_s2  ;;  %v3391_v19 = vpop.f32.mrf.mxu1 }
 0x489   :  { %v3352_v59 = vpop.f32.mrf.mxu0 }
 0x48a   :  { %v3393_v39 = vpop.f32.mrf.mxu1 }
 0x48c   :  { %3402 = vrot.lane.b32.xlu0 %v3348_v49, %s8759_s2  ;;  %3408 = vrot.lane.b32.xlu1 %v3393_v39, %s8759_s2  ;;  %v3395_v5 = vpop.f32.mrf.mxu1 }
 0x490   :  { %3410 = vrot.lane.b32.xlu0 %v3391_v19, %s8759_s2  ;;  %3404 = vrot.lane.b32.xlu1 %v3352_v59, %s8759_s2 }
 0x493   :  { %v3504_v34 = vpop.f32.mrf.mxu0 }
 0x494   :  { %3412 = vrot.lane.b32.xlu1 %v3395_v5, %s8759_s2  ;;  %3556 = vrot.lane.b32.xlu0 %v3504_v34, %s8760_s17 }
 0x495   :  { %v3506_v36 = vpop.f32.mrf.mxu0 }
 0x496   :  { %v3547_v9 = vpop.f32.mrf.mxu1 }
 0x497   :  { %v3508_v42 = vpop.f32.mrf.mxu0 }
 0x498   :  { %3564 = vrot.lane.b32.xlu0 %v3547_v9, %s8760_s17  ;;  %3558 = vrot.lane.b32.xlu1 %v3508_v42, %s8760_s17  ;;  %v3549_v7 = vpop.f32.mrf.mxu1 }
 0x499   :  { %v3510_v54 = vpop.f32.mrf.mxu0 }
 0x49a   :  { %v3551_v29 = vpop.f32.mrf.mxu1 }
 0x49c   :  { %3560 = vrot.lane.b32.xlu0 %v3506_v36, %s8760_s17  ;;  %3566 = vrot.lane.b32.xlu1 %v3551_v29, %s8760_s17  ;;  %v3553_v2 = vpop.f32.mrf.mxu1 }
 0x4a0   :  { %3568 = vrot.lane.b32.xlu0 %v3549_v7, %s8760_s17  ;;  %3562 = vrot.lane.b32.xlu1 %v3510_v54, %s8760_s17 }
 0x4a3   :  { %v3662_v8 = vpop.f32.mrf.mxu0 }
 0x4a4   :  { %3570 = vrot.lane.b32.xlu1 %v3553_v2, %s8760_s17  ;;  %3714 = vrot.lane.b32.xlu0 %v3662_v8, %s8761_s18 }
 0x4a5   :  { %v3664_v21 = vpop.f32.mrf.mxu0 }
 0x4a6   :  { %v3705_v32 = vpop.f32.mrf.mxu1 }
 0x4a7   :  { %v3666_v15 = vpop.f32.mrf.mxu0 }
 0x4a8   :  { %3722 = vrot.lane.b32.xlu0 %v3705_v32, %s8761_s18  ;;  %3716 = vrot.lane.b32.xlu1 %v3666_v15, %s8761_s18  ;;  %v3707_v23 = vpop.f32.mrf.mxu1 }
 0x4a9   :  { %v3668_v57 = vpop.f32.mrf.mxu0 }
 0x4aa   :  { %v3709_v18 = vpop.f32.mrf.mxu1 }
 0x4ac   :  { %3718 = vrot.lane.b32.xlu0 %v3664_v21, %s8761_s18  ;;  %3724 = vrot.lane.b32.xlu1 %v3709_v18, %s8761_s18  ;;  %v3711_v24 = vpop.f32.mrf.mxu1 }
 0x4b0   :  { %3726 = vrot.lane.b32.xlu0 %v3707_v23, %s8761_s18  ;;  %3720 = vrot.lane.b32.xlu1 %v3668_v57, %s8761_s18 }
 0x4b3   :  { %v3820_v52 = vpop.f32.mrf.mxu0 }
 0x4b4   :  { %3728 = vrot.lane.b32.xlu1 %v3711_v24, %s8761_s18  ;;  %3872 = vrot.lane.b32.xlu0 %v3820_v52, %s8762_s19 }
 0x4b5   :  { %v3822_v28 = vpop.f32.mrf.mxu0 }
 0x4b6   :  { %v3863_v41 = vpop.f32.mrf.mxu1 }
 0x4b7   :  { %v3824_v53 = vpop.f32.mrf.mxu0 }
 0x4b8   :  { %3880 = vrot.lane.b32.xlu0 %v3863_v41, %s8762_s19  ;;  %3874 = vrot.lane.b32.xlu1 %v3824_v53, %s8762_s19  ;;  %v3865_v60 = vpop.f32.mrf.mxu1 }
 0x4b9   :  { %v3826_v58 = vpop.f32.mrf.mxu0 }
 0x4ba   :  { %v3867_v22 = vpop.f32.mrf.mxu1 }
 0x4bc   :  { %3876 = vrot.lane.b32.xlu0 %v3822_v28, %s8762_s19  ;;  %3882 = vrot.lane.b32.xlu1 %v3867_v22, %s8762_s19  ;;  %v3869_v10 = vpop.f32.mrf.mxu1 }
 0x4c0   :  { %3884 = vrot.lane.b32.xlu0 %v3865_v60, %s8762_s19  ;;  %3878 = vrot.lane.b32.xlu1 %v3826_v58, %s8762_s19 }
 0x4c3   :  { %v3978_v38 = vpop.f32.mrf.mxu0 }
 0x4c4   :  { %3886 = vrot.lane.b32.xlu1 %v3869_v10, %s8762_s19  ;;  %4030 = vrot.lane.b32.xlu0 %v3978_v38, %s8763_s20 }
 0x4c5   :  { %v3980_v50 = vpop.f32.mrf.mxu0 }
 0x4c6   :  { %v4021_v6 = vpop.f32.mrf.mxu1 }
 0x4c7   :  { %v3982_v12 = vpop.f32.mrf.mxu0 }
 0x4c8   :  { %4038 = vrot.lane.b32.xlu0 %v4021_v6, %s8763_s20  ;;  %4032 = vrot.lane.b32.xlu1 %v3982_v12, %s8763_s20  ;;  %v4023_v63 = vpop.f32.mrf.mxu1 }
 0x4c9   :  { %v3984_v40 = vpop.f32.mrf.mxu0 }
 0x4ca   :  { %v4025_v49 = vpop.f32.mrf.mxu1 }
 0x4cc   :  { %4034 = vrot.lane.b32.xlu0 %v3980_v50, %s8763_s20  ;;  %4040 = vrot.lane.b32.xlu1 %v4025_v49, %s8763_s20  ;;  %v4027_v61 = vpop.f32.mrf.mxu1 }
 0x4d0   :  { %4042 = vrot.lane.b32.xlu0 %v4023_v63, %s8763_s20  ;;  %4036 = vrot.lane.b32.xlu1 %v3984_v40, %s8763_s20 }
 0x4d3   :  { %v4136_v19 = vpop.f32.mrf.mxu0 }
 0x4d4   :  { %4044 = vrot.lane.b32.xlu1 %v4027_v61, %s8763_s20  ;;  %4188 = vrot.lane.b32.xlu0 %v4136_v19, %s8764_s21 }
 0x4d5   :  { %v4138_v39 = vpop.f32.mrf.mxu0 }
 0x4d6   :  { %v4179_v59 = vpop.f32.mrf.mxu1 }
 0x4d7   :  { %v4140_v5 = vpop.f32.mrf.mxu0 }
 0x4d8   :  { %4196 = vrot.lane.b32.xlu0 %v4179_v59, %s8764_s21  ;;  %4190 = vrot.lane.b32.xlu1 %v4140_v5, %s8764_s21  ;;  %v4181_v34 = vpop.f32.mrf.mxu1 }
 0x4d9   :  { %v4142_v9 = vpop.f32.mrf.mxu0 }
 0x4da   :  { %v4183_v36 = vpop.f32.mrf.mxu1 }
 0x4dc   :  { %4192 = vrot.lane.b32.xlu0 %v4138_v39, %s8764_s21  ;;  %4198 = vrot.lane.b32.xlu1 %v4183_v36, %s8764_s21  ;;  %v4185_v42 = vpop.f32.mrf.mxu1 }
 0x4e0   :  { %4200 = vrot.lane.b32.xlu0 %v4181_v34, %s8764_s21  ;;  %4194 = vrot.lane.b32.xlu1 %v4142_v9, %s8764_s21 }
 0x4e3   :  { %v4294_v7 = vpop.f32.mrf.mxu0 }
 0x4e4   :  { %4202 = vrot.lane.b32.xlu1 %v4185_v42, %s8764_s21  ;;  %4346 = vrot.lane.b32.xlu0 %v4294_v7, %s8765_s22 }
 0x4e5   :  { %v4296_v29 = vpop.f32.mrf.mxu0 }
 0x4e6   :  { %v4337_v54 = vpop.f32.mrf.mxu1 }
 0x4e7   :  { %v4298_v2 = vpop.f32.mrf.mxu0 }
 0x4e8   :  { %4354 = vrot.lane.b32.xlu0 %v4337_v54, %s8765_s22  ;;  %4348 = vrot.lane.b32.xlu1 %v4298_v2, %s8765_s22  ;;  %v4339_v8 = vpop.f32.mrf.mxu1 }
 0x4e9   :  { %v4300_v32 = vpop.f32.mrf.mxu0 }
 0x4ea   :  { %v4341_v21 = vpop.f32.mrf.mxu1 }
 0x4ec   :  { %4350 = vrot.lane.b32.xlu0 %v4296_v29, %s8765_s22  ;;  %4356 = vrot.lane.b32.xlu1 %v4341_v21, %s8765_s22  ;;  %v4343_v15 = vpop.f32.mrf.mxu1 }
 0x4f0   :  { %4358 = vrot.lane.b32.xlu0 %v4339_v8, %s8765_s22  ;;  %4352 = vrot.lane.b32.xlu1 %v4300_v32, %s8765_s22 }
 0x4f3   :  { %v4452_v23 = vpop.f32.mrf.mxu0 }
 0x4f4   :  { %4360 = vrot.lane.b32.xlu1 %v4343_v15, %s8765_s22  ;;  %4504 = vrot.lane.b32.xlu0 %v4452_v23, %s8766_s23 }
 0x4f5   :  { %v4454_v18 = vpop.f32.mrf.mxu0 }
 0x4f6   :  { %v10806_v57 = vpop.permute.xlu0 %3398  ;;  %v4495_v24 = vpop.f32.mrf.mxu1 }
 0x4f7   :  { %v4456_v52 = vpop.f32.mrf.mxu0 }
 0x4f8   :  { %4512 = vrot.lane.b32.xlu0 %v4495_v24, %s8766_s23  ;;  %4506 = vrot.lane.b32.xlu1 %v4456_v52, %s8766_s23  ;;  %v4497_v28 = vpop.f32.mrf.mxu1 }
 0x4f9   :  { %v4458_v10 = vpop.f32.mrf.mxu0 }
 0x4fa   :  { %v10810_v41 = vpop.permute.xlu0 %3406  ;;  %v10812_v53 = vpop.permute.xlu1 %3400 }
 0x4fb   :  { %v4499_v60 = vpop.f32.mrf.mxu1 }
 0x4fc   :  { %4508 = vrot.lane.b32.xlu0 %v4454_v18, %s8766_s23  ;;  %4514 = vrot.lane.b32.xlu1 %v4499_v60, %s8766_s23 }
 0x4fd   :  { %v4501_v6 = vpop.f32.mrf.mxu1 }
 0x4fe   :  { %v10816_v22 = vpop.permute.xlu0 %3402  ;;  %v10818_v58 = vpop.permute.xlu1 %3408 }
 0x500   :  { %4516 = vrot.lane.b32.xlu0 %v4497_v28, %s8766_s23  ;;  %4510 = vrot.lane.b32.xlu1 %v4458_v10, %s8766_s23 }
 0x502   :  { %v10822_v38 = vpop.permute.xlu0 %3410  ;;  %v10824_v50 = vpop.permute.xlu1 %3404 }
 0x504   :  { %4518 = vrot.lane.b32.xlu1 %v4501_v6, %s8766_s23  ;;  %v3109_v6 = vld [vmem:[%s13788_s7] sm:$0xff] }
 0x505   :  { %v10915_v13 = vadd.f32 %v10733_v11, %v3109_v6  ;;  %v10932_v11 = vadd.f32 %v10743_v27, %v3115_v31  ;;  %v8483_v31 = vld [vmem:[%s13784_s1 + $0x3] ss:$8 sm:$0xf]  ;;  %v10957_v27 = vrot.slane %v8475_v56, %v9206_v0  ;;  %v10976_v56 = vrot.slane %v8479_v3, %v9206_v0 }
 0x506   :  { %v10827_v12 = vpop.permute.xlu1 %3412  ;;  %v10829_v63 = vpop.permute.xlu0 %3556 }
 0x50a   :  { %v10831_v49 = vpop.permute.xlu0 %3564  ;;  %v10833_v40 = vpop.permute.xlu1 %3558 }
 0x50e   :  { %v10835_v61 = vpop.permute.xlu0 %3560  ;;  %v10837_v19 = vpop.permute.xlu1 %3566 }
 0x512   :  { %v10839_v39 = vpop.permute.xlu0 %3568  ;;  %v10841_v59 = vpop.permute.xlu1 %3562 }
 0x516   :  { %v10843_v5 = vpop.permute.xlu1 %3570  ;;  %v10845_v34 = vpop.permute.xlu0 %3714 }
 0x51a   :  { %v10847_v36 = vpop.permute.xlu0 %3722  ;;  %v10849_v9 = vpop.permute.xlu1 %3716 }
 0x51e   :  { %v10851_v42 = vpop.permute.xlu0 %3718  ;;  %v10853_v7 = vpop.permute.xlu1 %3724 }
 0x522   :  { %v10855_v29 = vpop.permute.xlu0 %3726  ;;  %v10857_v54 = vpop.permute.xlu1 %3720 }
 0x526   :  { %v10859_v2 = vpop.permute.xlu1 %3728  ;;  %v10861_v8 = vpop.permute.xlu0 %3872 }
 0x527   :  { %14177 = vst [vmem:[#allocation31_spill] sm:$0xff] %v10861_v8 }
 0x52a   :  { %v10863_v21 = vpop.permute.xlu0 %3880  ;;  %v10865_v32 = vpop.permute.xlu1 %3874 }
 0x52b   :  { %14178 = vst [vmem:[#allocation27_spill] sm:$0xff] %v10865_v32  ;;  %v10999_v32 = vrot.slane %v8483_v31, %v9206_v0 }
 0x52d   :  { %14195 = vst [vmem:[#allocation38_spill] sm:$0xff] %v10999_v32 }
 0x52e   :  { %v10867_v15 = vpop.permute.xlu0 %3876  ;;  %v10869_v23 = vpop.permute.xlu1 %3882 }
 0x52f   :  { %14179 = vst [vmem:[#allocation23_spill] sm:$0xff] %v10869_v23  ;;  %v11005_v23 = vrot.slane %v8487_v1, %v14188_v20 }
 0x531   :  { %14197 = vst [vmem:[#allocation40_spill] sm:$0xff] %v11005_v23  ;;  %v8499_v23 = vld [vmem:[%s13784_s1 + $0x20] ss:$8 sm:$0xf] }
 0x532   :  { %v10871_v18 = vpop.permute.xlu0 %3884  ;;  %v10873_v24 = vpop.permute.xlu1 %3878 }
 0x533   :  { %14180 = vst [vmem:[#allocation32_spill] sm:$0xff] %v10871_v18  ;;  %14181 = vst [vmem:[#allocation33_spill] sm:$0xff] %v10873_v24  ;;  %v11002_v24 = vrot.slane %v8487_v1, %v14189_v4 }
 0x535   :  { %14196 = vst [vmem:[#allocation39_spill] sm:$0xff] %v11002_v24 }
 0x536   :  { %v10875_v52 = vpop.permute.xlu1 %3886  ;;  %v10877_v28 = vpop.permute.xlu0 %4030 }
 0x537   :  { %14182 = vst [vmem:[#allocation28_spill] sm:$0xff] %v10875_v52  ;;  %14183 = vst [vmem:[#allocation22_spill] sm:$0xff] %v10877_v28  ;;  %v10973_v28 = vrot.slane %v8479_v3, %v14189_v4  ;;  %v10996_v52 = vrot.slane %v8483_v31, %v14189_v4 }
 0x539   :  { %14194 = vst [vmem:[#allocation37_spill] sm:$0xff] %v10996_v52 }
 0x53a   :  { %v10879_v60 = vpop.permute.xlu0 %4038  ;;  %v10881_v10 = vpop.permute.xlu1 %4032 }
 0x53b   :  { %14184 = vst [vmem:[#allocation16_spill] sm:$0xff] %v10879_v60  ;;  %14185 = vst [vmem:[#allocation34_spill] sm:$0xff] %v10881_v10  ;;  %v10967_v10 = vrot.slane %v8479_v3, %v14188_v20  ;;  %v10990_v60 = vrot.slane %v8483_v31, %v14188_v20 }
 0x53d   :  { %14192 = vst [vmem:[#allocation29_spill] sm:$0xff] %v10990_v60  ;;  %v11011_v60 = vrot.slane %v8487_v1, %v14108_v55 }
 0x53e   :  { %v10910_v44 = vpop.permute.xlu0 %4034  ;;  %v10912_v43 = vpop.permute.xlu1 %4040 }
 0x53f   :  { %14186 = vst [vmem:[#allocation35_spill] sm:$0xff] %v10910_v44  ;;  %14187 = vst [vmem:[#allocation17_spill] sm:$0xff] %v10912_v43  ;;  %v10970_v43 = vrot.slane %v8479_v3, %v14108_v55  ;;  %v8491_v44 = vld [vmem:[%s13784_s1 + $0x6] ss:$8 sm:$0xf]  ;;  %v10993_v3 = vrot.slane %v8483_v31, %v14108_v55 }
 0x540   :  { %14198 = vst [vmem:[#allocation41_spill] sm:$0xff] %v11011_v60  ;;  %v11021_v32 = vrot.slane %v8491_v44, %v14189_v4  ;;  %v11024_v24 = vrot.slane %v8491_v44, %v14188_v20  ;;  %v11030_v60 = vrot.slane %v8491_v44, %v14108_v55 }
 0x541   :  { %14193 = vst [vmem:[#allocation36_spill] sm:$0xff] %v10993_v3  ;;  %v11014_v3 = vrot.slane %v8487_v1, %v9206_v0  ;;  %v11033_v1 = vrot.slane %v8491_v44, %v9206_v0  ;;  %v3420_v44 = vsel %vm389_vm1, %v10822_v38, %v10806_v57 }
 0x542   :  { %v10962_v62 = vpop.permute.xlu0 %4042  ;;  %v10964_v6 = vpop.permute.xlu1 %4036  ;;  %14201 = vst [vmem:[#allocation44_spill] sm:$0xff] %v11021_v32  ;;  %14202 = vst [vmem:[#allocation45_spill] sm:$0xff] %v11024_v24 }
 0x543   :  { %14190 = vst [vmem:[#allocation24_spill] sm:$0xff] %v10962_v62  ;;  %14191 = vst [vmem:[#allocation30_spill] sm:$0xff] %v10964_v6  ;;  %v3416_v6 = vsel %vm389_vm1, %v10816_v22, %v10810_v41  ;;  %v3418_v62 = vsel %vm389_vm1, %v10806_v57, %v10816_v22  ;;  %v8495_v22 = vld [vmem:[%s13784_s1 + $0x7] ss:$8 sm:$0xf]  ;;  %v11074_v57 = vrot.slane %v8499_v23, %v14108_v55 }
 0x544   :  { %v3445_v18 = vmul.f32 %v3431_v46, %v3418_v62  ;;  %v3446_v8 = vmul.f32 %v3435_v51, %v3416_v6  ;;  %v11039_v32 = vrot.slane %v8495_v22, %v14188_v20  ;;  %v11042_v24 = vrot.slane %v8495_v22, %v14108_v55 }
 0x545   :  { %v3414_v62 = vsel %vm389_vm1, %v10810_v41, %v10822_v38  ;;  %v11056_v6 = vrot.slane %v8499_v23, %v14189_v4  ;;  %v3419_v41 = vsel %vm389_vm1, %v10812_v53, %v10824_v50  ;;  %v11077_v38 = vrot.slane %v8499_v23, %v9206_v0 }
 0x546   :  { %v11016_v52 = vpop.permute.xlu1 %4044  ;;  %v11018_v31 = vpop.permute.xlu0 %4188  ;;  %14204 = vst [vmem:[#allocation47_spill] sm:$0xff] %v11039_v32  ;;  %14205 = vst [vmem:[#allocation48_spill] sm:$0xff] %v11042_v24  ;;  %v11059_v32 = vrot.slane %v8499_v23, %v14188_v20  ;;  %v3454_v20 = vadd.f32 %v3446_v8, %v3296_v47  ;;  %v3574_v23 = vsel %vm548_vm2, %v10835_v61, %v10831_v49 }
 0x547   :  { %14199 = vst [vmem:[#allocation42_spill] sm:$0xff] %v11016_v52  ;;  %14200 = vst [vmem:[#allocation43_spill] sm:$0xff] %v11018_v31  ;;  %v11036_v31 = vrot.slane %v8495_v22, %v14189_v4  ;;  %v11045_v52 = vrot.slane %v8495_v22, %v9206_v0  ;;  %v3417_v22 = vsel %vm389_vm1, %v10824_v50, %v10818_v58 }
 0x548   :  { %14207 = vst [vmem:[#allocation50_spill] sm:$0xff] %v11056_v6  ;;  %14208 = vst [vmem:[#allocation51_spill] sm:$0xff] %v11059_v32  ;;  %v3453_v4 = vadd.f32 %v3445_v18, %v3295_v30  ;;  %v3415_v32 = vsel %vm389_vm1, %v10818_v58, %v10827_v12  ;;  %v3421_v50 = vsel %vm389_vm1, %v10827_v12, %v10812_v53 }
 0x549   :  { %14203 = vst [vmem:[#allocation46_spill] sm:$0xff] %v11036_v31  ;;  %14206 = vst [vmem:[#allocation49_spill] sm:$0xff] %v11045_v52  ;;  %v3444_v6 = vmul.f32 %v3427_v14, %v3420_v44  ;;  %v3447_v31 = vmul.f32 %v3439_v17, %v3414_v62  ;;  %v3576_v47 = vsel %vm548_vm2, %v10829_v63, %v10835_v61 }
 0x54a   :  { %v11069_v52 = vpop.permute.xlu0 %4196  ;;  %v11071_v24 = vpop.permute.xlu1 %4190  ;;  %v3449_v30 = vmul.f32 %v3431_v46, %v3419_v41  ;;  %v3450_v8 = vmul.f32 %v3435_v51, %v3417_v22  ;;  %v3572_v58 = vsel %vm548_vm2, %v10831_v49, %v10839_v39  ;;  %v3578_v53 = vsel %vm548_vm2, %v10839_v39, %v10829_v63 }
 0x54b   :  { %v3448_v12 = vmul.f32 %v3427_v14, %v3421_v50  ;;  %v3451_v18 = vmul.f32 %v3439_v17, %v3415_v32  ;;  %v3575_v62 = vsel %vm548_vm2, %v10841_v59, %v10837_v19  ;;  %v3577_v61 = vsel %vm548_vm2, %v10833_v40, %v10841_v59 }
 0x54c   :  { %v3603_v51 = vmul.f32 %v10948_v26, %v3576_v47  ;;  %v3604_v63 = vmul.f32 %v10951_v16, %v3574_v23  ;;  %v3573_v39 = vsel %vm548_vm2, %v10837_v19, %v10843_v5  ;;  %v3579_v32 = vsel %vm548_vm2, %v10843_v5, %v10833_v40 }
 0x54d   :  { %v3602_v59 = vmul.f32 %v10954_v35, %v3578_v53  ;;  %v3605_v14 = vmul.f32 %v10957_v27, %v3572_v58  ;;  %v3732_v17 = vsel %vm708_vm3, %v10851_v42, %v10847_v36  ;;  %v3734_v44 = vsel %vm708_vm3, %v10845_v34, %v10851_v42 }
 0x54e   :  { %v11111_v46 = vpop.permute.xlu0 %4192  ;;  %v11113_v49 = vpop.permute.xlu1 %4198  ;;  %v3452_v19 = vadd.f32 %v3444_v6, %v10915_v13  ;;  %v3455_v22 = vadd.f32 %v3447_v31, %v10929_v25  ;;  %v3607_v40 = vmul.f32 %v10948_v26, %v3577_v61  ;;  %v3608_v5 = vmul.f32 %v10951_v16, %v3575_v62 }
 0x54f   :  { %v3457_v41 = vadd.f32 %v3449_v30, %v10926_v37  ;;  %v3458_v50 = vadd.f32 %v3450_v8, %v10932_v11  ;;  %v3606_v23 = vmul.f32 %v10954_v35, %v3579_v32  ;;  %v3609_v47 = vmul.f32 %v10957_v27, %v3573_v39  ;;  %v14210_v32 = vld [vmem:[#allocation32_spill] sm:$0xff] }
 0x550   :  { %v3456_v13 = vadd.f32 %v3448_v12, %v10919_v45  ;;  %v3459_v25 = vadd.f32 %v3451_v18, %v10935_v33  ;;  %v3761_v42 = vmul.f32 %v10967_v10, %v3734_v44  ;;  %v3762_v26 = vmul.f32 %v10970_v43, %v3732_v17  ;;  %v14211_v17 = vld [vmem:[#allocation23_spill] sm:$0xff] }
 0x551   :  { %v3611_v16 = vadd.f32 %v3603_v51, %v3453_v4  ;;  %v3612_v37 = vadd.f32 %v3604_v63, %v3454_v20  ;;  %v3610_v31 = vadd.f32 %v3602_v59, %v3452_v19  ;;  %v3613_v11 = vadd.f32 %v3605_v14, %v3455_v22  ;;  %v14209_v51 = vld [vmem:[#allocation31_spill] sm:$0xff]  ;;  %v14214_v22 = vld [vmem:[#allocation29_spill] sm:$0xff] }
 0x552   :  { %v11143_v58 = vpop.permute.xlu0 %4200  ;;  %v11145_v53 = vpop.permute.xlu1 %4194  ;;  %v3615_v6 = vadd.f32 %v3607_v40, %v3457_v41  ;;  %v3616_v35 = vadd.f32 %v3608_v5, %v3458_v50  ;;  %v3730_v27 = vsel %vm708_vm3, %v10847_v36, %v10855_v29  ;;  %v3736_v45 = vsel %vm708_vm3, %v10855_v29, %v10845_v34  ;;  %v14215_v5 = vld [vmem:[#allocation36_spill] sm:$0xff] }
 0x553   :  { %v3614_v33 = vadd.f32 %v3606_v23, %v3456_v13  ;;  %v3617_v30 = vadd.f32 %v3609_v47, %v3459_v25  ;;  %v3733_v20 = vsel %vm708_vm3, %v10857_v54, %v10853_v7  ;;  %v3735_v4 = vsel %vm708_vm3, %v10849_v9, %v10857_v54  ;;  %v14216_v41 = vld [vmem:[#allocation28_spill] sm:$0xff]  ;;  %v14217_v13 = vld [vmem:[#allocation37_spill] sm:$0xff] }
 0x554   :  { %v3769_v12 = vadd.f32 %v3761_v42, %v3611_v16  ;;  %v3770_v18 = vadd.f32 %v3762_v26, %v3612_v37  ;;  %v3731_v34 = vsel %vm708_vm3, %v10853_v7, %v10859_v2  ;;  %v3737_v29 = vsel %vm708_vm3, %v10859_v2, %v10849_v9  ;;  %v14218_v42 = vld [vmem:[#allocation38_spill] sm:$0xff] }
 0x555   :  { %v3760_v62 = vmul.f32 %v10973_v28, %v3736_v45  ;;  %v3763_v54 = vmul.f32 %v10976_v56, %v3730_v27  ;;  %v3890_v61 = vsel %vm868_vm4, %v10867_v15, %v10863_v21  ;;  %v3892_v63 = vsel %vm868_vm4, %v14209_v51, %v10867_v15  ;;  %v14212_v15 = vld [vmem:[#allocation33_spill] sm:$0xff]  ;;  %v14219_v27 = vld [vmem:[#allocation16_spill] sm:$0xff]  ;;  %v14220_v45 = vld [vmem:[#allocation35_spill] sm:$0xff] }
 0x556   :  { %v11167_v8 = vpop.permute.xlu1 %4202  ;;  %v11169_v36 = vpop.permute.xlu0 %4346  ;;  %v3765_v7 = vmul.f32 %v10967_v10, %v3735_v4  ;;  %v3766_v39 = vmul.f32 %v10970_v43, %v3733_v20  ;;  %v3888_v9 = vsel %vm868_vm4, %v10863_v21, %v14210_v32  ;;  %v3894_v2 = vsel %vm868_vm4, %v14210_v32, %v14209_v51  ;;  %v14213_v43 = vld [vmem:[#allocation27_spill] sm:$0xff]  ;;  %v14221_v4 = vld [vmem:[#allocation22_spill] sm:$0xff] }
 0x557   :  { %v3764_v59 = vmul.f32 %v10973_v28, %v3737_v29  ;;  %v3767_v14 = vmul.f32 %v10976_v56, %v3731_v34  ;;  %v3891_v10 = vsel %vm868_vm4, %v14212_v15, %v14211_v17  ;;  %v3893_v44 = vsel %vm868_vm4, %v14213_v43, %v14212_v15  ;;  %v14223_v15 = vld [vmem:[#allocation40_spill] sm:$0xff] }
 0x558   :  { %v3919_v40 = vmul.f32 %v14214_v22, %v3892_v63  ;;  %v3920_v28 = vmul.f32 %v14215_v5, %v3890_v61  ;;  %v3889_v56 = vsel %vm868_vm4, %v14211_v17, %v14216_v41  ;;  %v3895_v50 = vsel %vm868_vm4, %v14216_v41, %v14213_v43  ;;  %v14224_v43 = vld [vmem:[#allocation24_spill] sm:$0xff]  ;;  %v14228_v41 = vld [vmem:[#allocation41_spill] sm:$0xff] }
 0x559   :  { %v3768_v23 = vadd.f32 %v3760_v62, %v3610_v31  ;;  %v3771_v47 = vadd.f32 %v3763_v54, %v3613_v11  ;;  %v3918_v25 = vmul.f32 %v14217_v13, %v3894_v2  ;;  %v3921_v26 = vmul.f32 %v14218_v42, %v3888_v9  ;;  %v14222_v2 = vld [vmem:[#allocation39_spill] sm:$0xff] }
 0x55a   :  { %v11209_v21 = vpop.permute.xlu0 %4354  ;;  %v11211_v19 = vpop.permute.xlu1 %4348  ;;  %v3923_v16 = vmul.f32 %v14214_v22, %v3893_v44  ;;  %v3924_v37 = vmul.f32 %v14215_v5, %v3891_v10  ;;  %v4048_v20 = vsel %vm1028_vm5, %v14220_v45, %v14219_v27  ;;  %v4050_v34 = vsel %vm1028_vm5, %v14221_v4, %v14220_v45  ;;  %v14227_v22 = vld [vmem:[#allocation34_spill] sm:$0xff] }
 0x55b   :  { %v3773_v31 = vadd.f32 %v3765_v7, %v3615_v6  ;;  %v3774_v11 = vadd.f32 %v3766_v39, %v3616_v35  ;;  %v3922_v29 = vmul.f32 %v14217_v13, %v3895_v50  ;;  %v3925_v62 = vmul.f32 %v14218_v42, %v3889_v56 }
 0x55c   :  { %v3772_v51 = vadd.f32 %v3764_v59, %v3614_v33  ;;  %v3775_v63 = vadd.f32 %v3767_v14, %v3617_v30  ;;  %v3927_v32 = vadd.f32 %v3919_v40, %v3769_v12  ;;  %v3928_v9 = vadd.f32 %v3920_v28, %v3770_v18  ;;  %v14225_v59 = vld [vmem:[#allocation17_spill] sm:$0xff]  ;;  %v14226_v14 = vld [vmem:[#allocation30_spill] sm:$0xff] }
 0x55d   :  { %v4076_v17 = vmul.f32 %v14222_v2, %v4050_v34  ;;  %v4077_v10 = vmul.f32 %v14223_v15, %v4048_v20  ;;  %v4046_v6 = vsel %vm1028_vm5, %v14219_v27, %v14224_v43  ;;  %v4052_v35 = vsel %vm1028_vm5, %v14224_v43, %v14221_v4 }
 0x55e   :  { %v4351_v54 = vpop.permute.xlu0 %4350  ;;  %v11237_v61 = vpop.permute.xlu1 %4356  ;;  %v3926_v7 = vadd.f32 %v3918_v25, %v3768_v23  ;;  %v3929_v39 = vadd.f32 %v3921_v26, %v3771_v47  ;;  %v3931_v33 = vadd.f32 %v3923_v16, %v3773_v31  ;;  %v3932_v30 = vadd.f32 %v3924_v37, %v3774_v11  ;;  %v14229_v23 = vld [vmem:[#allocation42_spill] sm:$0xff]  ;;  %v14230_v16 = vld [vmem:[#allocation43_spill] sm:$0xff] }
 0x55f   :  { %v3930_v12 = vadd.f32 %v3922_v29, %v3772_v51  ;;  %v3933_v18 = vadd.f32 %v3925_v62, %v3775_v63  ;;  %v4049_v44 = vsel %vm1028_vm5, %v14226_v14, %v14225_v59  ;;  %v4051_v40 = vsel %vm1028_vm5, %v14227_v22, %v14226_v14  ;;  %v14231_v63 = vld [vmem:[#allocation44_spill] sm:$0xff] }
 0x560   :  { %v4078_v56 = vmul.f32 %v14228_v41, %v4046_v6  ;;  %v4079_v50 = vmul.f32 %v11014_v3, %v4052_v35  ;;  %v4047_v47 = vsel %vm1028_vm5, %v14225_v59, %v14229_v23  ;;  %v4053_v13 = vsel %vm1028_vm5, %v14229_v23, %v14227_v22  ;;  %v14235_v23 = vld [vmem:[#allocation48_spill] sm:$0xff] }
 0x561   :  { %v4084_v25 = vadd.f32 %v4076_v17, %v3926_v7  ;;  %v4085_v42 = vadd.f32 %v4077_v10, %v3927_v32  ;;  %v4206_v26 = vsel %vm1188_vm6, %v11111_v46, %v11069_v52  ;;  %v4208_v37 = vsel %vm1188_vm6, %v14230_v16, %v11111_v46  ;;  %v14232_v32 = vld [vmem:[#allocation45_spill] sm:$0xff] }
 0x562   :  { %v4359_v5 = vpop.permute.xlu0 %4358  ;;  %v4353_v28 = vpop.permute.xlu1 %4352  ;;  %v4080_v27 = vmul.f32 %v14222_v2, %v4051_v40  ;;  %v4081_v45 = vmul.f32 %v14223_v15, %v4049_v44  ;;  %v4204_v20 = vsel %vm1188_vm6, %v11069_v52, %v11143_v58  ;;  %v4210_v4 = vsel %vm1188_vm6, %v11143_v58, %v14230_v16 }
 0x563   :  { %v4082_v34 = vmul.f32 %v14228_v41, %v4047_v47  ;;  %v4083_v31 = vmul.f32 %v11014_v3, %v4053_v13  ;;  %v4207_v46 = vsel %vm1188_vm6, %v11145_v53, %v11113_v49  ;;  %v4209_v11 = vsel %vm1188_vm6, %v11071_v24, %v11145_v53  ;;  %v14236_v47 = vld [vmem:[#allocation49_spill] sm:$0xff] }
 0x564   :  { %v4086_v62 = vadd.f32 %v4078_v56, %v3928_v9  ;;  %v4087_v51 = vadd.f32 %v4079_v50, %v3929_v39  ;;  %v4234_v58 = vmul.f32 %v14231_v63, %v4208_v37  ;;  %v4235_v2 = vmul.f32 %v14232_v32, %v4206_v26 }
 0x565   :  { %v4236_v3 = vmul.f32 %v11030_v60, %v4204_v20  ;;  %v4237_v17 = vmul.f32 %v11033_v1, %v4210_v4  ;;  %v4205_v15 = vsel %vm1188_vm6, %v11113_v49, %v11167_v8  ;;  %v4211_v53 = vsel %vm1188_vm6, %v11167_v8, %v11071_v24  ;;  %v14237_v20 = vld [vmem:[#allocation50_spill] sm:$0xff] }
 0x566   :  { %v4361_v52 = vpop.permute.xlu1 %4360  ;;  %v4505_v29 = vpop.permute.xlu0 %4504  ;;  %v4238_v9 = vmul.f32 %v14231_v63, %v4209_v11  ;;  %v4239_v10 = vmul.f32 %v14232_v32, %v4207_v46  ;;  %v4364_v43 = vsel %vm1348_vm7, %v4351_v54, %v11209_v21  ;;  %v4366_v6 = vsel %vm1348_vm7, %v11169_v36, %v4351_v54 }
 0x567   :  { %v4088_v35 = vadd.f32 %v4080_v27, %v3930_v12  ;;  %v4089_v7 = vadd.f32 %v4081_v45, %v3931_v33  ;;  %v4090_v49 = vadd.f32 %v4082_v34, %v3932_v30  ;;  %v4091_v39 = vadd.f32 %v4083_v31, %v3933_v18  ;;  %v14233_v12 = vld [vmem:[#allocation46_spill] sm:$0xff]  ;;  %v14234_v30 = vld [vmem:[#allocation47_spill] sm:$0xff] }
 0x568   :  { %v4240_v24 = vmul.f32 %v11030_v60, %v4205_v15  ;;  %v4241_v8 = vmul.f32 %v11033_v1, %v4211_v53  ;;  %v4362_v44 = vsel %vm1348_vm7, %v11209_v21, %v4359_v5  ;;  %v4368_v22 = vsel %vm1348_vm7, %v4359_v5, %v11169_v36  ;;  %v14238_v34 = vld [vmem:[#allocation51_spill] sm:$0xff] }
 0x569   :  { %v4242_v40 = vadd.f32 %v4234_v58, %v4084_v25  ;;  %v4243_v54 = vadd.f32 %v4235_v2, %v4085_v42  ;;  %v4392_v33 = vmul.f32 %v14233_v12, %v4366_v6  ;;  %v4393_v18 = vmul.f32 %v14234_v30, %v4364_v43 }
 0x56a   :  { %v4513_v59 = vpop.permute.xlu0 %4512  ;;  %v4507_v14 = vpop.permute.xlu1 %4506  ;;  %v4244_v41 = vadd.f32 %v4236_v3, %v4086_v62  ;;  %v4245_v56 = vadd.f32 %v4237_v17, %v4087_v51  ;;  %v4246_v50 = vadd.f32 %v4238_v9, %v4088_v35  ;;  %v4247_v60 = vadd.f32 %v4239_v10, %v4089_v7 }
 0x56b   :  { %v4394_v1 = vmul.f32 %v14235_v23, %v4362_v44  ;;  %v4395_v13 = vmul.f32 %v14236_v47, %v4368_v22  ;;  %v4365_v21 = vsel %vm1348_vm7, %v4353_v28, %v11237_v61  ;;  %v4367_v36 = vsel %vm1348_vm7, %v11211_v19, %v4353_v28 }
 0x56c   :  { %v4248_v42 = vadd.f32 %v4240_v24, %v4090_v49  ;;  %v4249_v26 = vadd.f32 %v4241_v8, %v4091_v39  ;;  %v4400_v27 = vadd.f32 %v4392_v33, %v4242_v40  ;;  %v4401_v45 = vadd.f32 %v4393_v18, %v4243_v54 }
 0x56d   :  { %v4396_v46 = vmul.f32 %v14233_v12, %v4367_v36  ;;  %v4397_v28 = vmul.f32 %v14234_v30, %v4365_v21  ;;  %v4363_v11 = vsel %vm1348_vm7, %v11237_v61, %v4361_v52  ;;  %v4369_v62 = vsel %vm1348_vm7, %v4361_v52, %v11211_v19 }
 0x56e   :  { %v4509_v5 = vpop.permute.xlu0 %4508  ;;  %v4515_v25 = vpop.permute.xlu1 %4514  ;;  %v4402_v51 = vadd.f32 %v4394_v1, %v4244_v41  ;;  %v4403_v63 = vadd.f32 %v4395_v13, %v4245_v56  ;;  %v4398_v19 = vmul.f32 %v14235_v23, %v4363_v11  ;;  %v4399_v52 = vmul.f32 %v14236_v47, %v4369_v62  ;;  %v14251_v11 = vld [vmem:[#allocation11_spill] sm:$0xff]  ;;  %v14252_v62 = vld [vmem:[#allocation5_spill] sm:$0xff] }
 0x56f   :  { %v4522_v16 = vsel %vm1508_vm8, %v4509_v5, %v4513_v59  ;;  %v4524_v37 = vsel %vm1508_vm8, %v4505_v29, %v4509_v5  ;;  %v4404_v43 = vadd.f32 %v4396_v46, %v4246_v50  ;;  %v4405_v6 = vadd.f32 %v4397_v28, %v4247_v60  ;;  %v14249_v46 = vld [vmem:[#allocation14_spill] sm:$0xff]  ;;  %v14250_v28 = vld [vmem:[#allocation3_spill] sm:$0xff] }
 0x570   :  { %v4550_v4 = vmul.f32 %v14237_v20, %v4524_v37  ;;  %v4551_v31 = vmul.f32 %v14238_v34, %v4522_v16  ;;  %v4406_v54 = vadd.f32 %v4398_v19, %v4248_v42  ;;  %v4407_v12 = vadd.f32 %v4399_v52, %v4249_v26  ;;  %v8734_v19 = vld [vmem:[%s13787_s8 + $0x10] sm:$0xff]   ;;  %v8735_v52 = vld [vmem:[%s13787_s8 + $0x18] sm:$0xff]  }
 0x572   :  { %v4558_v58 = vadd.f32 %v4550_v4, %v4400_v27  ;;  %v4559_v32 = vadd.f32 %v4551_v31, %v4401_v45  ;;  %v4517_v2 = vpop.permute.xlu0 %4516  ;;  %v4511_v3 = vpop.permute.xlu1 %4510  ;;  %v14243_v27 = vld [vmem:[#allocation26_spill] sm:$0xff]  ;;  %v14244_v45 = vld [vmem:[#allocation15_spill] sm:$0xff]  ;;  %v14246_v4 = vld [vmem:[#allocation13_spill] sm:$0xff] }
 0x573   :  { %v4520_v17 = vsel %vm1508_vm8, %v4513_v59, %v4517_v2  ;;  %v4526_v15 = vsel %vm1508_vm8, %v4517_v2, %v4505_v29  ;;  %v4523_v53 = vsel %vm1508_vm8, %v4511_v3, %v4515_v25  ;;  %v4525_v61 = vsel %vm1508_vm8, %v4507_v14, %v4511_v3  ;;  %v14248_v31 = vld [vmem:[#allocation12_spill] sm:$0xff]  ;;  %v14256_v2 = vld [vmem:[#allocation9_spill] sm:$0xff] }
 0x574   :  { %v4552_v9 = vmul.f32 %v11074_v57, %v4520_v17  ;;  %v4553_v10 = vmul.f32 %v11077_v38, %v4526_v15  ;;  %v4554_v35 = vmul.f32 %v14237_v20, %v4525_v61  ;;  %v4555_v29 = vmul.f32 %v14238_v34, %v4523_v53  ;;  %v14245_v20 = vld [vmem:[#allocation25_spill] sm:$0xff]  ;;  %v14257_v3 = vld [vmem:[#allocation8_spill] sm:$0xff]  ;;  %v14258_v17 = vld [vmem:[#allocation10_spill] sm:$0xff] }
 0x575   :  { %v4566_v7 = vmul.f32 0.2, %v4558_v58  ;;  %v4567_v49 = vmul.f32 0.2, %v4559_v32  ;;  %v14247_v34 = vld [vmem:[#allocation21_spill] sm:$0xff]  ;;  %v14259_v15 = vmov 0  }
 0x576   :  { %v4560_v39 = vadd.f32 %v4552_v9, %v4402_v51  ;;  %v4561_v59 = vadd.f32 %v4553_v10, %v4403_v63  ;;  %v4519_v24 = vpop.permute.xlu1 %4518  ;;  %v4562_v8 = vadd.f32 %v4554_v35, %v4404_v43  ;;  %v4563_v44 = vadd.f32 %v4555_v29, %v4405_v6  ;;  %v14253_v51 = vld [vmem:[#allocation4_spill] sm:$0xff]  ;;  %v14254_v63 = vld [vmem:[#allocation7_spill] sm:$0xff]  ;;  %v8737_v10 = vld [vmem:[%s13787_s8 + $0x30] sm:$0xff]  }
 0x577   :  { %v4521_v22 = vsel %vm1508_vm8, %v4515_v25, %v4519_v24  ;;  %v4527_v40 = vsel %vm1508_vm8, %v4519_v24, %v4507_v14  ;;  %v4574_v1 = vmax.f32 %v4558_v58, %v4566_v7  ;;  %v4575_v47 = vmax.f32 %v4559_v32, %v4567_v49  ;;  %v14255_v58 = vld [vmem:[#allocation6_spill] sm:$0xff]  ;;  %v8731_v32 = vld [vmem:[%s13787_s8 + $0x20] sm:$0xff]   ;;  %v8733_v61 = vld [vmem:[%s13787_s8 + $0x8] sm:$0xff]  }
 0x578   :  { %v4556_v33 = vmul.f32 %v11074_v57, %v4521_v22  ;;  %v4557_v30 = vmul.f32 %v11077_v38, %v4527_v40  ;;  %v4570_v18 = vmul.f32 0.2, %v4562_v8  ;;  %v4571_v41 = vmul.f32 0.2, %v4563_v44  ;;  %v8732_v53 = vld [vmem:[%s13787_s8] sm:$0xff]   ;;  %v8736_v9 = vld [vmem:[%s13787_s8 + $0x28] sm:$0xff]  }
 0x579   :  { %v4568_v56 = vmul.f32 0.2, %v4560_v39  ;;  %v4569_v50 = vmul.f32 0.2, %v4561_v59  ;;  %v8738_v43 = vld [vmem:[%s13787_s8 + $0x38] sm:$0xff]   ;;  %v8739_v6 = vld [vmem:[%s13787_s8 + $0x40] sm:$0xff]  }
 0x57a   :  { %v4564_v60 = vadd.f32 %v4556_v33, %v4406_v54  ;;  %v4565_v23 = vadd.f32 %v4557_v30, %v4407_v12  ;;  %v4578_v13 = vmax.f32 %v4562_v8, %v4570_v18  ;;  %v4579_v21 = vmax.f32 %v4563_v44, %v4571_v41 }
 0x57b   :  { %v4576_v42 = vmax.f32 %v4560_v39, %v4568_v56  ;;  %v4577_v57 = vmax.f32 %v4561_v59, %v4569_v50 }
 0x57c   :  { %v4572_v36 = vmul.f32 0.2, %v4564_v60  ;;  %v4573_v5 = vmul.f32 0.2, %v4565_v23  ;;  %v11367_v25 = vpack.c.bf16 %v4578_v13, %v4574_v1  ;;  %v11369_v14 = vpack.c.bf16 %v4579_v21, %v4575_v47 }
 0x57e   :  { %14239 = vst [vmem:[#allocation31_spill] sm:$0xff] %v11367_v25  ;;  %14240 = vst [vmem:[#allocation32_spill] sm:$0xff] %v11369_v14  ;;  %v4580_v26 = vmax.f32 %v4564_v60, %v4572_v36  ;;  %v4581_v38 = vmax.f32 %v4565_v23, %v4573_v5  ;;  %4755 = vmatprep.subr.bf16.mxu0 %v11369_v14 }
 0x57f   :  { %4756 = vmatpush1.bf16.msra.mxu0 %v11367_v25 }
 0x580   :  { %v11372_v16 = vpack.c.bf16 %v4580_v26, %v4576_v42  ;;  %v11374_v37 = vpack.c.bf16 %v4581_v38, %v4577_v57  ;;  %4757 = vmatprep.subr.bf16.mxu0 %v14243_v27 }
 0x582   :  { %14241 = vst [vmem:[#allocation23_spill] sm:$0xff] %v11372_v16  ;;  %14242 = vst [vmem:[#allocation33_spill] sm:$0xff] %v11374_v37  ;;  %4798 = vmatprep.subr.bf16.mxu1 %v11374_v37 }
 0x583   :  { %4799 = vmatpush1.bf16.msra.mxu1 %v11372_v16  ;;  %4758 = vmatpush1.bf16.msra.mxu0 %v14244_v45 }
 0x584   :  { %4800 = vmatprep.subr.bf16.mxu1 %v14245_v20  ;;  %4759 = vmatprep.subr.bf16.mxu0 %v14246_v4 }
 0x587   :  { %4801 = vmatpush1.bf16.msra.mxu1 %v14247_v34  ;;  %4760 = vmatpush1.bf16.msra.mxu0 %v14248_v31 }
 0x588   :  { %4802 = vmatprep.subr.bf16.mxu1 %v14249_v46  ;;  %4761 = vmatprep.subr.bf16.mxu0 %v14250_v28 }
 0x58b   :  { %4803 = vmatpush1.bf16.msra.mxu1 %v14251_v11  ;;  %4762 = vmatpush1.bf16.msra.mxu0 %v14252_v62 }
 0x58c   :  { %4804 = vmatprep.subr.bf16.mxu1 %v14253_v51  ;;  %4763 = vmatprep.subr.bf16.mxu0 %v14254_v63 }
 0x58f   :  { %4805 = vmatpush1.bf16.msra.mxu1 %v14255_v58  ;;  %4764 = vmatpush1.bf16.msra.mxu0 %v14256_v2 }
 0x590   :  { %4806 = vmatprep.subr.bf16.mxu1 %v14257_v3  ;;  %4859 = vmatprep.subr.bf16.mxu0 %v11369_v14 }
 0x592   :  { %8525 = vmatmul.mubr.msk.bf16.vlgmr.msra.gmra.mxu0 %vm4745_vm11, %v8731_v32 }
 0x593   :  { %4807 = vmatpush1.bf16.msra.mxu1 %v14258_v17  ;;  %4860 = vmatpush1.bf16.msra.mxu0 %v11367_v25 }
 0x594   :  { %4902 = vmatprep.subr.bf16.mxu1 %v11374_v37  ;;  %4861 = vmatprep.subr.bf16.mxu0 %v14243_v27 }
 0x595   :  { %4885 = vmatprep.mubr.bf16.mxu0 %v14259_v15 }
 0x596   :  { %8526 = vmatmul.mubr.msk.bf16.vlgmr.msra.gmra.mxu1 %vm4745_vm11, %v8731_v32 }
 0x597   :  { %4903 = vmatpush1.bf16.msra.mxu1 %v11372_v16  ;;  %4928 = vmatprep.mubr.bf16.mxu1 %v14259_v15 }
 0x598   :  { %4862 = vmatpush1.bf16.msra.mxu0 %v14244_v45  ;;  %4904 = vmatprep.subr.bf16.mxu1 %v14245_v20 }
 0x599   :  { %4863 = vmatprep.subr.bf16.mxu0 %v14246_v4 }
 0x59b   :  { %4905 = vmatpush1.bf16.msra.mxu1 %v14247_v34 }
 0x59c   :  { %4864 = vmatpush1.bf16.msra.mxu0 %v14248_v31  ;;  %4906 = vmatprep.subr.bf16.mxu1 %v14249_v46 }
 0x59d   :  { %4865 = vmatprep.subr.bf16.mxu0 %v14250_v28 }
 0x59f   :  { %4907 = vmatpush1.bf16.msra.mxu1 %v14251_v11 }
 0x5a0   :  { %4866 = vmatpush1.bf16.msra.mxu0 %v14252_v62  ;;  %4908 = vmatprep.subr.bf16.mxu1 %v14253_v51 }
 0x5a1   :  { %4867 = vmatprep.subr.bf16.mxu0 %v14254_v63 }
 0x5a3   :  { %4909 = vmatpush1.bf16.msra.mxu1 %v14255_v58 }
 0x5a4   :  { %4868 = vmatpush1.bf16.msra.mxu0 %v14256_v2  ;;  %4910 = vmatprep.subr.bf16.mxu1 %v14257_v3 }
 0x5a5   :  { %5017 = vmatprep.subr.bf16.mxu0 %v11369_v14 }
 0x5a7   :  { %8528 = vmatmul.mubr.msk.bf16.vlgmr.msra.gmra.mxu0 %vm4745_vm11, %v8732_v53  ;;  %4911 = vmatpush1.bf16.msra.mxu1 %v14258_v17 }
 0x5a8   :  { %5018 = vmatpush1.bf16.msra.mxu0 %v11367_v25  ;;  %5060 = vmatprep.subr.bf16.mxu1 %v11374_v37 }
 0x5a9   :  { %5019 = vmatprep.subr.bf16.mxu0 %v14243_v27  ;;  %5043 = vmatprep.mubr.bf16.mxu0 %v14259_v15 }
 0x5aa   :  { %8529 = vmatmul.mubr.msk.bf16.vlgmr.msra.gmra.mxu1 %vm4745_vm11, %v8732_v53 }
 0x5ab   :  { %5061 = vmatpush1.bf16.msra.mxu1 %v11372_v16  ;;  %5086 = vmatprep.mubr.bf16.mxu1 %v14259_v15 }
 0x5ac   :  { %5020 = vmatpush1.bf16.msra.mxu0 %v14244_v45  ;;  %5062 = vmatprep.subr.bf16.mxu1 %v14245_v20 }
 0x5ad   :  { %5021 = vmatprep.subr.bf16.mxu0 %v14246_v4 }
 0x5af   :  { %5063 = vmatpush1.bf16.msra.mxu1 %v14247_v34 }
 0x5b0   :  { %5022 = vmatpush1.bf16.msra.mxu0 %v14248_v31  ;;  %5064 = vmatprep.subr.bf16.mxu1 %v14249_v46 }
 0x5b1   :  { %5023 = vmatprep.subr.bf16.mxu0 %v14250_v28 }
 0x5b3   :  { %5065 = vmatpush1.bf16.msra.mxu1 %v14251_v11 }
 0x5b4   :  { %5024 = vmatpush1.bf16.msra.mxu0 %v14252_v62  ;;  %5066 = vmatprep.subr.bf16.mxu1 %v14253_v51 }
 0x5b5   :  { %5025 = vmatprep.subr.bf16.mxu0 %v14254_v63 }
 0x5b7   :  { %5067 = vmatpush1.bf16.msra.mxu1 %v14255_v58 }
 0x5b8   :  { %5026 = vmatpush1.bf16.msra.mxu0 %v14256_v2  ;;  %5068 = vmatprep.subr.bf16.mxu1 %v14257_v3 }
 0x5b9   :  { %5175 = vmatprep.subr.bf16.mxu0 %v11369_v14 }
 0x5bb   :  { %8531 = vmatmul.mubr.msk.bf16.vlgmr.msra.gmra.mxu0 %vm4745_vm11, %v8733_v61  ;;  %5069 = vmatpush1.bf16.msra.mxu1 %v14258_v17 }
 0x5bc   :  { %5176 = vmatpush1.bf16.msra.mxu0 %v11367_v25  ;;  %5218 = vmatprep.subr.bf16.mxu1 %v11374_v37 }
 0x5bd   :  { %5177 = vmatprep.subr.bf16.mxu0 %v14243_v27  ;;  %5201 = vmatprep.mubr.bf16.mxu0 %v14259_v15 }
 0x5be   :  { %8532 = vmatmul.mubr.msk.bf16.vlgmr.msra.gmra.mxu1 %vm4745_vm11, %v8733_v61 }
 0x5bf   :  { %5219 = vmatpush1.bf16.msra.mxu1 %v11372_v16  ;;  %5244 = vmatprep.mubr.bf16.mxu1 %v14259_v15 }
 0x5c0   :  { %5178 = vmatpush1.bf16.msra.mxu0 %v14244_v45  ;;  %5220 = vmatprep.subr.bf16.mxu1 %v14245_v20 }
 0x5c1   :  { %5179 = vmatprep.subr.bf16.mxu0 %v14246_v4 }
 0x5c3   :  { %5221 = vmatpush1.bf16.msra.mxu1 %v14247_v34 }
 0x5c4   :  { %5180 = vmatpush1.bf16.msra.mxu0 %v14248_v31  ;;  %5222 = vmatprep.subr.bf16.mxu1 %v14249_v46 }
 0x5c5   :  { %5181 = vmatprep.subr.bf16.mxu0 %v14250_v28 }
 0x5c7   :  { %5223 = vmatpush1.bf16.msra.mxu1 %v14251_v11 }
 0x5c8   :  { %5182 = vmatpush1.bf16.msra.mxu0 %v14252_v62  ;;  %5224 = vmatprep.subr.bf16.mxu1 %v14253_v51 }
 0x5c9   :  { %5183 = vmatprep.subr.bf16.mxu0 %v14254_v63 }
 0x5cb   :  { %5225 = vmatpush1.bf16.msra.mxu1 %v14255_v58 }
 0x5cc   :  { %5184 = vmatpush1.bf16.msra.mxu0 %v14256_v2  ;;  %5226 = vmatprep.subr.bf16.mxu1 %v14257_v3 }
 0x5cd   :  { %5333 = vmatprep.subr.bf16.mxu0 %v11369_v14 }
 0x5cf   :  { %8535 = vmatmul.mubr.msk.bf16.vlgmr.msra.gmra.mxu0 %vm4745_vm11, %v8734_v19  ;;  %5227 = vmatpush1.bf16.msra.mxu1 %v14258_v17 }
 0x5d0   :  { %5334 = vmatpush1.bf16.msra.mxu0 %v11367_v25  ;;  %5376 = vmatprep.subr.bf16.mxu1 %v11374_v37 }
 0x5d1   :  { %5335 = vmatprep.subr.bf16.mxu0 %v14243_v27  ;;  %5359 = vmatprep.mubr.bf16.mxu0 %v14259_v15 }
 0x5d2   :  { %8536 = vmatmul.mubr.msk.bf16.vlgmr.msra.gmra.mxu1 %vm4745_vm11, %v8734_v19 }
 0x5d3   :  { %5377 = vmatpush1.bf16.msra.mxu1 %v11372_v16  ;;  %5402 = vmatprep.mubr.bf16.mxu1 %v14259_v15 }
 0x5d4   :  { %5336 = vmatpush1.bf16.msra.mxu0 %v14244_v45  ;;  %5378 = vmatprep.subr.bf16.mxu1 %v14245_v20 }
 0x5d5   :  { %5337 = vmatprep.subr.bf16.mxu0 %v14246_v4 }
 0x5d7   :  { %5379 = vmatpush1.bf16.msra.mxu1 %v14247_v34 }
 0x5d8   :  { %5338 = vmatpush1.bf16.msra.mxu0 %v14248_v31  ;;  %5380 = vmatprep.subr.bf16.mxu1 %v14249_v46 }
 0x5d9   :  { %5339 = vmatprep.subr.bf16.mxu0 %v14250_v28 }
 0x5db   :  { %5381 = vmatpush1.bf16.msra.mxu1 %v14251_v11 }
 0x5dc   :  { %5340 = vmatpush1.bf16.msra.mxu0 %v14252_v62  ;;  %5382 = vmatprep.subr.bf16.mxu1 %v14253_v51 }
 0x5dd   :  { %5341 = vmatprep.subr.bf16.mxu0 %v14254_v63 }
 0x5df   :  { %5383 = vmatpush1.bf16.msra.mxu1 %v14255_v58 }
 0x5e0   :  { %5342 = vmatpush1.bf16.msra.mxu0 %v14256_v2  ;;  %5384 = vmatprep.subr.bf16.mxu1 %v14257_v3 }
 0x5e1   :  { %5491 = vmatprep.subr.bf16.mxu0 %v11369_v14 }
 0x5e3   :  { %8539 = vmatmul.mubr.msk.bf16.vlgmr.msra.gmra.mxu0 %vm4745_vm11, %v8735_v52  ;;  %5385 = vmatpush1.bf16.msra.mxu1 %v14258_v17 }
 0x5e4   :  { %5492 = vmatpush1.bf16.msra.mxu0 %v11367_v25  ;;  %5534 = vmatprep.subr.bf16.mxu1 %v11374_v37 }
 0x5e5   :  { %5493 = vmatprep.subr.bf16.mxu0 %v14243_v27  ;;  %5517 = vmatprep.mubr.bf16.mxu0 %v14259_v15 }
 0x5e6   :  { %8540 = vmatmul.mubr.msk.bf16.vlgmr.msra.gmra.mxu1 %vm4745_vm11, %v8735_v52 }
 0x5e7   :  { %5535 = vmatpush1.bf16.msra.mxu1 %v11372_v16  ;;  %5560 = vmatprep.mubr.bf16.mxu1 %v14259_v15 }
 0x5e8   :  { %5494 = vmatpush1.bf16.msra.mxu0 %v14244_v45  ;;  %5536 = vmatprep.subr.bf16.mxu1 %v14245_v20 }
 0x5e9   :  { %5495 = vmatprep.subr.bf16.mxu0 %v14246_v4 }
 0x5eb   :  { %5537 = vmatpush1.bf16.msra.mxu1 %v14247_v34 }
 0x5ec   :  { %5496 = vmatpush1.bf16.msra.mxu0 %v14248_v31  ;;  %5538 = vmatprep.subr.bf16.mxu1 %v14249_v46 }
 0x5ed   :  { %5497 = vmatprep.subr.bf16.mxu0 %v14250_v28 }
 0x5ef   :  { %5539 = vmatpush1.bf16.msra.mxu1 %v14251_v11 }
 0x5f0   :  { %5498 = vmatpush1.bf16.msra.mxu0 %v14252_v62  ;;  %5540 = vmatprep.subr.bf16.mxu1 %v14253_v51 }
 0x5f1   :  { %5499 = vmatprep.subr.bf16.mxu0 %v14254_v63 }
 0x5f3   :  { %5541 = vmatpush1.bf16.msra.mxu1 %v14255_v58 }
 0x5f4   :  { %5500 = vmatpush1.bf16.msra.mxu0 %v14256_v2  ;;  %5542 = vmatprep.subr.bf16.mxu1 %v14257_v3 }
 0x5f5   :  { %5649 = vmatprep.subr.bf16.mxu0 %v11369_v14 }
 0x5f7   :  { %8543 = vmatmul.mubr.msk.bf16.vlgmr.msra.gmra.mxu0 %vm4745_vm11, %v8736_v9  ;;  %5543 = vmatpush1.bf16.msra.mxu1 %v14258_v17 }
 0x5f8   :  { %5650 = vmatpush1.bf16.msra.mxu0 %v11367_v25  ;;  %5692 = vmatprep.subr.bf16.mxu1 %v11374_v37 }
 0x5f9   :  { %5651 = vmatprep.subr.bf16.mxu0 %v14243_v27  ;;  %5675 = vmatprep.mubr.bf16.mxu0 %v14259_v15 }
 0x5fa   :  { %8544 = vmatmul.mubr.msk.bf16.vlgmr.msra.gmra.mxu1 %vm4745_vm11, %v8736_v9 }
 0x5fb   :  { %5693 = vmatpush1.bf16.msra.mxu1 %v11372_v16  ;;  %5718 = vmatprep.mubr.bf16.mxu1 %v14259_v15 }
 0x5fc   :  { %5652 = vmatpush1.bf16.msra.mxu0 %v14244_v45  ;;  %5694 = vmatprep.subr.bf16.mxu1 %v14245_v20 }
 0x5fd   :  { %5653 = vmatprep.subr.bf16.mxu0 %v14246_v4 }
 0x5ff   :  { %5695 = vmatpush1.bf16.msra.mxu1 %v14247_v34 }
 0x600   :  { %5654 = vmatpush1.bf16.msra.mxu0 %v14248_v31  ;;  %5696 = vmatprep.subr.bf16.mxu1 %v14249_v46 }
 0x601   :  { %5655 = vmatprep.subr.bf16.mxu0 %v14250_v28 }
 0x603   :  { %5697 = vmatpush1.bf16.msra.mxu1 %v14251_v11 }
 0x604   :  { %5656 = vmatpush1.bf16.msra.mxu0 %v14252_v62  ;;  %5698 = vmatprep.subr.bf16.mxu1 %v14253_v51 }
 0x605   :  { %5657 = vmatprep.subr.bf16.mxu0 %v14254_v63 }
 0x607   :  { %5699 = vmatpush1.bf16.msra.mxu1 %v14255_v58 }
 0x608   :  { %5658 = vmatpush1.bf16.msra.mxu0 %v14256_v2  ;;  %5700 = vmatprep.subr.bf16.mxu1 %v14257_v3 }
 0x609   :  { %5807 = vmatprep.subr.bf16.mxu0 %v11369_v14 }
 0x60b   :  { %8547 = vmatmul.mubr.msk.bf16.vlgmr.msra.gmra.mxu0 %vm4745_vm11, %v8737_v10  ;;  %5701 = vmatpush1.bf16.msra.mxu1 %v14258_v17 }
 0x60c   :  { %5808 = vmatpush1.bf16.msra.mxu0 %v11367_v25  ;;  %5850 = vmatprep.subr.bf16.mxu1 %v11374_v37 }
 0x60d   :  { %5809 = vmatprep.subr.bf16.mxu0 %v14243_v27  ;;  %5833 = vmatprep.mubr.bf16.mxu0 %v14259_v15 }
 0x60e   :  { %8548 = vmatmul.mubr.msk.bf16.vlgmr.msra.gmra.mxu1 %vm4745_vm11, %v8737_v10 }
 0x60f   :  { %5851 = vmatpush1.bf16.msra.mxu1 %v11372_v16  ;;  %5876 = vmatprep.mubr.bf16.mxu1 %v14259_v15 }
 0x610   :  { %5810 = vmatpush1.bf16.msra.mxu0 %v14244_v45  ;;  %5852 = vmatprep.subr.bf16.mxu1 %v14245_v20 }
 0x611   :  { %5811 = vmatprep.subr.bf16.mxu0 %v14246_v4 }
 0x613   :  { %5853 = vmatpush1.bf16.msra.mxu1 %v14247_v34 }
 0x614   :  { %5812 = vmatpush1.bf16.msra.mxu0 %v14248_v31  ;;  %5854 = vmatprep.subr.bf16.mxu1 %v14249_v46 }
 0x615   :  { %5813 = vmatprep.subr.bf16.mxu0 %v14250_v28 }
 0x617   :  { %5855 = vmatpush1.bf16.msra.mxu1 %v14251_v11 }
 0x618   :  { %5814 = vmatpush1.bf16.msra.mxu0 %v14252_v62  ;;  %5856 = vmatprep.subr.bf16.mxu1 %v14253_v51 }
 0x619   :  { %5815 = vmatprep.subr.bf16.mxu0 %v14254_v63 }
 0x61b   :  { %5857 = vmatpush1.bf16.msra.mxu1 %v14255_v58 }
 0x61c   :  { %5816 = vmatpush1.bf16.msra.mxu0 %v14256_v2  ;;  %5858 = vmatprep.subr.bf16.mxu1 %v14257_v3 }
 0x61d   :  { %5965 = vmatprep.subr.bf16.mxu0 %v11369_v14 }
 0x61f   :  { %8551 = vmatmul.mubr.msk.bf16.vlgmr.msra.gmra.mxu0 %vm4745_vm11, %v8738_v43  ;;  %5859 = vmatpush1.bf16.msra.mxu1 %v14258_v17 }
 0x620   :  { %5966 = vmatpush1.bf16.msra.mxu0 %v11367_v25  ;;  %6008 = vmatprep.subr.bf16.mxu1 %v11374_v37 }
 0x621   :  { %5967 = vmatprep.subr.bf16.mxu0 %v14243_v27  ;;  %5991 = vmatprep.mubr.bf16.mxu0 %v14259_v15  ;;  %v4963_v27 = vld [vmem:[%s13784_s1] ss:$8 sm:$0xf] }
 0x622   :  { %8552 = vmatmul.mubr.msk.bf16.vlgmr.msra.gmra.mxu1 %vm4745_vm11, %v8738_v43 }
 0x623   :  { %6009 = vmatpush1.bf16.msra.mxu1 %v11372_v16  ;;  %6034 = vmatprep.mubr.bf16.mxu1 %v14259_v15 }
 0x624   :  { %5968 = vmatpush1.bf16.msra.mxu0 %v14244_v45  ;;  %6010 = vmatprep.subr.bf16.mxu1 %v14245_v20  ;;  %v4637_v45 = vld [vmem:[%s13790_s9 + $0x38] sm:$0xff] }
 0x625   :  { %5969 = vmatprep.subr.bf16.mxu0 %v14246_v4  ;;  %v4636_v4 = vld [vmem:[%s13790_s9 + $0x30] sm:$0xff] }
 0x627   :  { %6011 = vmatpush1.bf16.msra.mxu1 %v14247_v34  ;;  %v4633_v34 = vld [vmem:[%s13790_s9 + $0x18] sm:$0xff] }
 0x628   :  { %5970 = vmatpush1.bf16.msra.mxu0 %v14248_v31  ;;  %6012 = vmatprep.subr.bf16.mxu1 %v14249_v46  ;;  %v4632_v31 = vld [vmem:[%s13790_s9 + $0x10] sm:$0xff]  ;;  %v4635_v46 = vld [vmem:[%s13790_s9 + $0x28] sm:$0xff] }
 0x629   :  { %5971 = vmatprep.subr.bf16.mxu0 %v14250_v28  ;;  %v4634_v28 = vld [vmem:[%s13790_s9 + $0x20] sm:$0xff] }
 0x62b   :  { %6013 = vmatpush1.bf16.msra.mxu1 %v14251_v11  ;;  %v4631_v11 = vld [vmem:[%s13790_s9 + $0x8] sm:$0xff] }
 0x62c   :  { %5972 = vmatpush1.bf16.msra.mxu0 %v14252_v62  ;;  %6014 = vmatprep.subr.bf16.mxu1 %v14253_v51  ;;  %v4630_v51 = vld [vmem:[%s13790_s9] sm:$0xff] }
 0x62d   :  { %5973 = vmatprep.subr.bf16.mxu0 %v14254_v63 }
 0x62f   :  { %6015 = vmatpush1.bf16.msra.mxu1 %v14255_v58 }
 0x630   :  { %5974 = vmatpush1.bf16.msra.mxu0 %v14256_v2  ;;  %6016 = vmatprep.subr.bf16.mxu1 %v14257_v3 }
 0x633   :  { %8555 = vmatmul.mubr.msk.bf16.vlgmr.msra.gmra.mxu0 %vm4745_vm11, %v8739_v6  ;;  %6017 = vmatpush1.bf16.msra.mxu1 %v14258_v17 }
 0x634   :  { %6364 = vmatprep.mubr.bf16.mxu0 %v14259_v15 }
 0x636   :  { %8556 = vmatmul.mubr.msk.bf16.vlgmr.msra.gmra.mxu1 %vm4745_vm11, %v8739_v6 }
 0x637   :  { %6417 = vmatprep.mubr.bf16.mxu1 %v14259_v15 }
 0x652   :  { %v11618_v35 = vpop.f32.mrf.mxu0 }
 0x653   :  { %v11808_v25 = vadd.f32 %v11618_v35, %v4630_v51  ;;  %v4976_v35 = vrot.slane %v4963_v27, %v14108_v55 }
 0x654   :  { %v11622_v7 = vpop.f32.mrf.mxu0 }
 0x655   :  { %v4836_v37 = vadd.f32 %v11622_v7, %v4631_v11 }
 0x656   :  { %v11620_v29 = vpop.f32.mrf.mxu1  ;;  %v11626_v39 = vpop.f32.mrf.mxu0 }
 0x657   :  { %v11812_v14 = vadd.f32 %v11626_v39, %v4634_v28  ;;  %v8537_v28 = vld [vmem:[%s13784_s1 + $0x2] ss:$8 sm:$0xf] }
 0x658   :  { %v11624_v49 = vpop.f32.mrf.mxu1  ;;  %v11630_v24 = vpop.f32.mrf.mxu0 }
 0x65a   :  { %v11628_v59 = vpop.f32.mrf.mxu1 }
 0x65c   :  { %v11632_v44 = vpop.f32.mrf.mxu1 }
 0x65d   :  { %v11826_v51 = vadd.f32 %v11632_v44, %v4637_v45 }
 0x667   :  { %v4887_v8 = vpop.f32.mrf.mxu0 }
 0x668   :  { %4939 = vrot.lane.b32.xlu0 %v4887_v8, %s8759_s2 }
 0x669   :  { %v4889_v22 = vpop.f32.mrf.mxu0 }
 0x66a   :  { %v4930_v40 = vpop.f32.mrf.mxu1 }
 0x66b   :  { %v4891_v54 = vpop.f32.mrf.mxu0 }
 0x66c   :  { %4947 = vrot.lane.b32.xlu0 %v4930_v40, %s8759_s2  ;;  %4941 = vrot.lane.b32.xlu1 %v4891_v54, %s8759_s2  ;;  %v4932_v12 = vpop.f32.mrf.mxu1 }
 0x66d   :  { %v4893_v30 = vpop.f32.mrf.mxu0 }
 0x66e   :  { %v4934_v33 = vpop.f32.mrf.mxu1 }
 0x670   :  { %4943 = vrot.lane.b32.xlu0 %v4889_v22, %s8759_s2  ;;  %4949 = vrot.lane.b32.xlu1 %v4934_v33, %s8759_s2  ;;  %v4936_v18 = vpop.f32.mrf.mxu1 }
 0x674   :  { %4951 = vrot.lane.b32.xlu0 %v4932_v12, %s8759_s2  ;;  %4945 = vrot.lane.b32.xlu1 %v4893_v30, %s8759_s2 }
 0x678   :  { %4953 = vrot.lane.b32.xlu1 %v4936_v18, %s8759_s2 }
 0x67b   :  { %v5045_v41 = vpop.f32.mrf.mxu0 }
 0x67c   :  { %5097 = vrot.lane.b32.xlu0 %v5045_v41, %s8760_s17 }
 0x67d   :  { %v5047_v56 = vpop.f32.mrf.mxu0 }
 0x67e   :  { %v5088_v50 = vpop.f32.mrf.mxu1 }
 0x67f   :  { %v5049_v60 = vpop.f32.mrf.mxu0 }
 0x680   :  { %5105 = vrot.lane.b32.xlu0 %v5088_v50, %s8760_s17  ;;  %5099 = vrot.lane.b32.xlu1 %v5049_v60, %s8760_s17  ;;  %v5090_v23 = vpop.f32.mrf.mxu1 }
 0x681   :  { %v5051_v47 = vpop.f32.mrf.mxu0 }
 0x682   :  { %v5092_v1 = vpop.f32.mrf.mxu1 }
 0x684   :  { %5101 = vrot.lane.b32.xlu0 %v5047_v56, %s8760_s17  ;;  %5107 = vrot.lane.b32.xlu1 %v5092_v1, %s8760_s17  ;;  %v5094_v13 = vpop.f32.mrf.mxu1 }
 0x688   :  { %5109 = vrot.lane.b32.xlu0 %v5090_v23, %s8760_s17  ;;  %5103 = vrot.lane.b32.xlu1 %v5051_v47, %s8760_s17 }
 0x68c   :  { %5111 = vrot.lane.b32.xlu1 %v5094_v13, %s8760_s17 }
 0x68f   :  { %v5203_v21 = vpop.f32.mrf.mxu0 }
 0x690   :  { %5255 = vrot.lane.b32.xlu0 %v5203_v21, %s8761_s18 }
 0x691   :  { %v5205_v36 = vpop.f32.mrf.mxu0 }
 0x692   :  { %v5246_v5 = vpop.f32.mrf.mxu1 }
 0x693   :  { %v5207_v42 = vpop.f32.mrf.mxu0 }
 0x694   :  { %5263 = vrot.lane.b32.xlu0 %v5246_v5, %s8761_s18  ;;  %5257 = vrot.lane.b32.xlu1 %v5207_v42, %s8761_s18  ;;  %v5248_v57 = vpop.f32.mrf.mxu1 }
 0x695   :  { %v5209_v38 = vpop.f32.mrf.mxu0 }
 0x696   :  { %v5250_v26 = vpop.f32.mrf.mxu1 }
 0x698   :  { %5259 = vrot.lane.b32.xlu0 %v5205_v36, %s8761_s18  ;;  %5265 = vrot.lane.b32.xlu1 %v5250_v26, %s8761_s18  ;;  %v5252_v32 = vpop.f32.mrf.mxu1 }
 0x69c   :  { %5267 = vrot.lane.b32.xlu0 %v5248_v57, %s8761_s18  ;;  %5261 = vrot.lane.b32.xlu1 %v5209_v38, %s8761_s18 }
 0x6a0   :  { %5269 = vrot.lane.b32.xlu1 %v5252_v32, %s8761_s18 }
 0x6a3   :  { %v5361_v53 = vpop.f32.mrf.mxu0 }
 0x6a4   :  { %5413 = vrot.lane.b32.xlu0 %v5361_v53, %s8762_s19 }
 0x6a5   :  { %v5363_v61 = vpop.f32.mrf.mxu0 }
 0x6a6   :  { %v5404_v19 = vpop.f32.mrf.mxu1 }
 0x6a7   :  { %v5365_v52 = vpop.f32.mrf.mxu0 }
 0x6a8   :  { %5421 = vrot.lane.b32.xlu0 %v5404_v19, %s8762_s19  ;;  %5415 = vrot.lane.b32.xlu1 %v5365_v52, %s8762_s19  ;;  %v5406_v9 = vpop.f32.mrf.mxu1 }
 0x6a9   :  { %v5367_v43 = vpop.f32.mrf.mxu0 }
 0x6aa   :  { %v5408_v10 = vpop.f32.mrf.mxu1 }
 0x6ac   :  { %5417 = vrot.lane.b32.xlu0 %v5363_v61, %s8762_s19  ;;  %5423 = vrot.lane.b32.xlu1 %v5408_v10, %s8762_s19  ;;  %v5410_v6 = vpop.f32.mrf.mxu1 }
 0x6b0   :  { %5425 = vrot.lane.b32.xlu0 %v5406_v9, %s8762_s19  ;;  %5419 = vrot.lane.b32.xlu1 %v5367_v43, %s8762_s19 }
 0x6b4   :  { %5427 = vrot.lane.b32.xlu1 %v5410_v6, %s8762_s19 }
 0x6b7   :  { %v5519_v8 = vpop.f32.mrf.mxu0 }
 0x6b8   :  { %5571 = vrot.lane.b32.xlu0 %v5519_v8, %s8763_s20 }
 0x6b9   :  { %v5521_v22 = vpop.f32.mrf.mxu0 }
 0x6ba   :  { %v5562_v40 = vpop.f32.mrf.mxu1 }
 0x6bb   :  { %v5523_v54 = vpop.f32.mrf.mxu0 }
 0x6bc   :  { %5579 = vrot.lane.b32.xlu0 %v5562_v40, %s8763_s20  ;;  %5573 = vrot.lane.b32.xlu1 %v5523_v54, %s8763_s20  ;;  %v5564_v12 = vpop.f32.mrf.mxu1 }
 0x6bd   :  { %v5525_v30 = vpop.f32.mrf.mxu0 }
 0x6be   :  { %v5566_v33 = vpop.f32.mrf.mxu1 }
 0x6c0   :  { %5575 = vrot.lane.b32.xlu0 %v5521_v22, %s8763_s20  ;;  %5581 = vrot.lane.b32.xlu1 %v5566_v33, %s8763_s20  ;;  %v5568_v18 = vpop.f32.mrf.mxu1 }
 0x6c4   :  { %5583 = vrot.lane.b32.xlu0 %v5564_v12, %s8763_s20  ;;  %5577 = vrot.lane.b32.xlu1 %v5525_v30, %s8763_s20 }
 0x6c8   :  { %5585 = vrot.lane.b32.xlu1 %v5568_v18, %s8763_s20 }
 0x6cb   :  { %v5677_v41 = vpop.f32.mrf.mxu0 }
 0x6cc   :  { %5729 = vrot.lane.b32.xlu0 %v5677_v41, %s8764_s21 }
 0x6cd   :  { %v5679_v56 = vpop.f32.mrf.mxu0 }
 0x6ce   :  { %v5720_v50 = vpop.f32.mrf.mxu1 }
 0x6cf   :  { %v5681_v60 = vpop.f32.mrf.mxu0 }
 0x6d0   :  { %5737 = vrot.lane.b32.xlu0 %v5720_v50, %s8764_s21  ;;  %5731 = vrot.lane.b32.xlu1 %v5681_v60, %s8764_s21  ;;  %v5722_v23 = vpop.f32.mrf.mxu1 }
 0x6d1   :  { %v5683_v47 = vpop.f32.mrf.mxu0 }
 0x6d2   :  { %v5724_v1 = vpop.f32.mrf.mxu1 }
 0x6d4   :  { %5733 = vrot.lane.b32.xlu0 %v5679_v56, %s8764_s21  ;;  %5739 = vrot.lane.b32.xlu1 %v5724_v1, %s8764_s21  ;;  %v5726_v21 = vpop.f32.mrf.mxu1 }
 0x6d8   :  { %5741 = vrot.lane.b32.xlu0 %v5722_v23, %s8764_s21  ;;  %5735 = vrot.lane.b32.xlu1 %v5683_v47, %s8764_s21 }
 0x6da   :  { %v11681_v13 = vpop.permute.xlu0 %4939 }
 0x6dc   :  { %5743 = vrot.lane.b32.xlu1 %v5726_v21, %s8764_s21 }
 0x6de   :  { %v11684_v36 = vpop.permute.xlu0 %4947  ;;  %v11686_v5 = vpop.permute.xlu1 %4941 }
 0x6df   :  { %v5835_v42 = vpop.f32.mrf.mxu0 }
 0x6e0   :  { %5887 = vrot.lane.b32.xlu0 %v5835_v42, %s8765_s22 }
 0x6e1   :  { %v5837_v57 = vpop.f32.mrf.mxu0 }
 0x6e2   :  { %v11689_v26 = vpop.permute.xlu1 %4949  ;;  %v5878_v32 = vpop.f32.mrf.mxu1 }
 0x6e3   :  { %v5839_v38 = vpop.f32.mrf.mxu0  ;;  %v11691_v53 = vpop.permute.xlu0 %4943 }
 0x6e4   :  { %5895 = vrot.lane.b32.xlu0 %v5878_v32, %s8765_s22  ;;  %5889 = vrot.lane.b32.xlu1 %v5839_v38, %s8765_s22  ;;  %v5880_v61 = vpop.f32.mrf.mxu1 }
 0x6e5   :  { %v5841_v10 = vpop.f32.mrf.mxu0 }
 0x6e6   :  { %v5882_v19 = vpop.f32.mrf.mxu1  ;;  %v11695_v52 = vpop.permute.xlu1 %4945 }
 0x6e7   :  { %v11699_v9 = vpop.permute.xlu0 %4951 }
 0x6e8   :  { %5891 = vrot.lane.b32.xlu0 %v5837_v57, %s8765_s22  ;;  %5897 = vrot.lane.b32.xlu1 %v5882_v19, %s8765_s22  ;;  %v5884_v8 = vpop.f32.mrf.mxu1 }
 0x6ea   :  { %v11703_v43 = vpop.permute.xlu1 %4953 }
 0x6ec   :  { %5899 = vrot.lane.b32.xlu0 %v5880_v61, %s8765_s22  ;;  %5893 = vrot.lane.b32.xlu1 %v5841_v10, %s8765_s22 }
 0x6ee   :  { %v11705_v6 = vpop.permute.xlu0 %5097 }
 0x6f0   :  { %5901 = vrot.lane.b32.xlu1 %v5884_v8, %s8765_s22 }
 0x6f2   :  { %v11708_v22 = vpop.permute.xlu0 %5105  ;;  %v11710_v40 = vpop.permute.xlu1 %5099 }
 0x6f3   :  { %v5993_v54 = vpop.f32.mrf.mxu0 }
 0x6f4   :  { %6045 = vrot.lane.b32.xlu0 %v5993_v54, %s8766_s23 }
 0x6f5   :  { %v5995_v12 = vpop.f32.mrf.mxu0 }
 0x6f6   :  { %v11713_v33 = vpop.permute.xlu1 %5107  ;;  %v6036_v18 = vpop.f32.mrf.mxu1 }
 0x6f7   :  { %v5997_v30 = vpop.f32.mrf.mxu0  ;;  %v11715_v41 = vpop.permute.xlu0 %5101 }
 0x6f8   :  { %6053 = vrot.lane.b32.xlu0 %v6036_v18, %s8766_s23  ;;  %6047 = vrot.lane.b32.xlu1 %v5997_v30, %s8766_s23  ;;  %v6038_v56 = vpop.f32.mrf.mxu1 }
 0x6f9   :  { %v5999_v1 = vpop.f32.mrf.mxu0 }
 0x6fa   :  { %v6040_v50 = vpop.f32.mrf.mxu1  ;;  %v11719_v60 = vpop.permute.xlu1 %5103 }
 0x6fb   :  { %v11723_v23 = vpop.permute.xlu0 %5109 }
 0x6fc   :  { %6049 = vrot.lane.b32.xlu0 %v5995_v12, %s8766_s23  ;;  %6055 = vrot.lane.b32.xlu1 %v6040_v50, %s8766_s23  ;;  %v6042_v42 = vpop.f32.mrf.mxu1 }
 0x6fe   :  { %v11727_v47 = vpop.permute.xlu1 %5111 }
 0x700   :  { %6057 = vrot.lane.b32.xlu0 %v6038_v56, %s8766_s23  ;;  %6051 = vrot.lane.b32.xlu1 %v5999_v1, %s8766_s23 }
 0x702   :  { %v11729_v21 = vpop.permute.xlu0 %5255 }
 0x704   :  { %6059 = vrot.lane.b32.xlu1 %v6042_v42, %s8766_s23 }
 0x706   :  { %v11732_v57 = vpop.permute.xlu0 %5263  ;;  %v11734_v38 = vpop.permute.xlu1 %5257 }
 0x70a   :  { %v11736_v32 = vpop.permute.xlu1 %5265  ;;  %v11738_v61 = vpop.permute.xlu0 %5259 }
 0x70e   :  { %v11740_v19 = vpop.permute.xlu1 %5261  ;;  %v11742_v10 = vpop.permute.xlu0 %5267 }
 0x712   :  { %v11744_v8 = vpop.permute.xlu1 %5269 }
 0x716   :  { %v11746_v54 = vpop.permute.xlu0 %5413 }
 0x717   :  { %14260 = vst [vmem:[#allocation27_spill] sm:$0xff] %v11746_v54 }
 0x71a   :  { %v11748_v12 = vpop.permute.xlu0 %5421  ;;  %v11750_v30 = vpop.permute.xlu1 %5415 }
 0x71b   :  { %14261 = vst [vmem:[#allocation29_spill] sm:$0xff] %v11750_v30 }
 0x71e   :  { %v11752_v18 = vpop.permute.xlu1 %5423  ;;  %v11754_v56 = vpop.permute.xlu0 %5417 }
 0x71f   :  { %14262 = vst [vmem:[#allocation36_spill] sm:$0xff] %v11752_v18 }
 0x722   :  { %v11756_v50 = vpop.permute.xlu1 %5419  ;;  %v11758_v1 = vpop.permute.xlu0 %5425 }
 0x723   :  { %14263 = vst [vmem:[#allocation28_spill] sm:$0xff] %v11756_v50  ;;  %14264 = vst [vmem:[#allocation37_spill] sm:$0xff] %v11758_v1 }
 0x726   :  { %v11760_v42 = vpop.permute.xlu1 %5427 }
 0x727   :  { %14265 = vst [vmem:[#allocation38_spill] sm:$0xff] %v11760_v42 }
 0x72a   :  { %v11762_v15 = vpop.permute.xlu0 %5571 }
 0x72b   :  { %14266 = vst [vmem:[#allocation16_spill] sm:$0xff] %v11762_v15  ;;  %v4959_v15 = vsel %vm389_vm1, %v11681_v13, %v11691_v53 }
 0x72e   :  { %v11764_v17 = vpop.permute.xlu0 %5579  ;;  %v11766_v2 = vpop.permute.xlu1 %5573 }
 0x72f   :  { %14267 = vst [vmem:[#allocation35_spill] sm:$0xff] %v11764_v17  ;;  %14268 = vst [vmem:[#allocation22_spill] sm:$0xff] %v11766_v2  ;;  %v4837_v2 = vadd.f32 %v11620_v29, %v4632_v31  ;;  %v14275_v31 = vld [vmem:[#allocation18_spill] sm:$0xff]  ;;  %v14276_v29 = vld [vmem:[#allocation20_spill] sm:$0xff] }
 0x730   :  { %v4972_v11 = vrot.slane %v4963_v27, %v14275_v31  ;;  %v4968_v7 = vrot.slane %v4963_v27, %v14276_v29  ;;  %v11858_v44 = vrot.slane %v8537_v28, %v14275_v31 }
 0x732   :  { %v11768_v3 = vpop.permute.xlu1 %5581  ;;  %v11770_v58 = vpop.permute.xlu0 %5575 }
 0x733   :  { %14269 = vst [vmem:[#allocation39_spill] sm:$0xff] %v11768_v3  ;;  %14270 = vst [vmem:[#allocation40_spill] sm:$0xff] %v11770_v58  ;;  %v11823_v3 = vadd.f32 %v11628_v59, %v4636_v4  ;;  %v8541_v4 = vld [vmem:[%s13784_s1 + $0x3] ss:$8 sm:$0xf] }
 0x734   :  { %v11878_v58 = vrot.slane %v8541_v4, %v14275_v31  ;;  %v11881_v17 = vrot.slane %v8541_v4, %v14108_v55  ;;  %v11887_v42 = vrot.slane %v8541_v4, %v14276_v29  ;;  %v11890_v30 = vrot.slane %v8541_v4, %v9206_v0 }
 0x735   :  { %v4961_v4 = vsel %vm389_vm1, %v11699_v9, %v11681_v13 }
 0x736   :  { %v11772_v63 = vpop.permute.xlu1 %5577  ;;  %v11774_v62 = vpop.permute.xlu0 %5583  ;;  %14279 = vst [vmem:[#allocation43_spill] sm:$0xff] %v11878_v58  ;;  %14280 = vst [vmem:[#allocation44_spill] sm:$0xff] %v11881_v17  ;;  %v8553_v17 = vld [vmem:[%s13784_s1 + $0x7] ss:$8 sm:$0xf] }
 0x737   :  { %14271 = vst [vmem:[#allocation24_spill] sm:$0xff] %v11772_v63  ;;  %14272 = vst [vmem:[#allocation17_spill] sm:$0xff] %v11774_v62  ;;  %v4838_v63 = vadd.f32 %v11624_v49, %v4633_v34  ;;  %v11867_v62 = vrot.slane %v8537_v28, %v9206_v0 }
 0x738   :  { %14281 = vst [vmem:[#allocation45_spill] sm:$0xff] %v11887_v42  ;;  %14282 = vst [vmem:[#allocation46_spill] sm:$0xff] %v11890_v30  ;;  %v4955_v42 = vsel %vm389_vm1, %v11684_v36, %v11699_v9  ;;  %v11932_v9 = vrot.slane %v8553_v17, %v14276_v29 }
 0x73a   :  { %v11800_v20 = vpop.permute.xlu1 %5585  ;;  %14290 = vst [vmem:[#allocation54_spill] sm:$0xff] %v11932_v9 }
 0x73b   :  { %14273 = vst [vmem:[#allocation30_spill] sm:$0xff] %v11800_v20  ;;  %v8533_v20 = vld [vmem:[%s13784_s1 + $0x1] ss:$8 sm:$0xf] }
 0x73c   :  { %v11843_v49 = vrot.slane %v8533_v20, %v14275_v31  ;;  %v11846_v39 = vrot.slane %v8533_v20, %v14108_v55  ;;  %v11849_v59 = vrot.slane %v8533_v20, %v14276_v29 }
 0x73e   :  { %v11802_v16 = vpop.permute.xlu0 %5729 }
 0x73f   :  { %14274 = vst [vmem:[#allocation34_spill] sm:$0xff] %v11802_v16  ;;  %v11819_v16 = vadd.f32 %v11630_v24, %v4635_v46  ;;  %v4980_v46 = vrot.slane %v4963_v27, %v9206_v0  ;;  %v11852_v24 = vrot.slane %v8533_v20, %v9206_v0  ;;  %v8545_v27 = vld [vmem:[%s13784_s1 + $0x5] ss:$8 sm:$0xf]  ;;  %v4957_v20 = vsel %vm389_vm1, %v11691_v53, %v11684_v36 }
 0x740   :  { %v11893_v50 = vrot.slane %v8545_v27, %v14276_v29  ;;  %v11896_v53 = vrot.slane %v8545_v27, %v14275_v31  ;;  %v4987_v30 = vmul.f32 %v4976_v35, %v4957_v20 }
 0x741   :  { %v4988_v20 = vmul.f32 %v4980_v46, %v4955_v42  ;;  %v4962_v42 = vsel %vm389_vm1, %v11703_v43, %v11686_v5 }
 0x742   :  { %v11838_v34 = vpop.permute.xlu0 %5737  ;;  %v11840_v45 = vpop.permute.xlu1 %5731  ;;  %14283 = vst [vmem:[#allocation47_spill] sm:$0xff] %v11893_v50  ;;  %14284 = vst [vmem:[#allocation48_spill] sm:$0xff] %v11896_v53  ;;  %v11912_v50 = vrot.slane %v8545_v27, %v14108_v55  ;;  %v11915_v53 = vrot.slane %v8545_v27, %v9206_v0  ;;  %v4985_v27 = vmul.f32 %v4968_v7, %v4961_v4 }
 0x743   :  { %14277 = vst [vmem:[#allocation41_spill] sm:$0xff] %v11838_v34  ;;  %14278 = vst [vmem:[#allocation42_spill] sm:$0xff] %v11840_v45  ;;  %v11861_v45 = vrot.slane %v8537_v28, %v14108_v55  ;;  %v11864_v34 = vrot.slane %v8537_v28, %v14276_v29  ;;  %v8549_v28 = vld [vmem:[%s13784_s1 + $0x6] ss:$8 sm:$0xf]  ;;  %v11954_v4 = vrot.slane %v8553_v17, %v14108_v55 }
 0x744   :  { %v11918_v18 = vrot.slane %v8549_v28, %v14276_v29  ;;  %v11921_v1 = vrot.slane %v8549_v28, %v14275_v31  ;;  %v11926_v54 = vrot.slane %v8549_v28, %v14108_v55  ;;  %v11929_v13 = vrot.slane %v8549_v28, %v9206_v0 }
 0x745   :  { %v4956_v28 = vsel %vm389_vm1, %v11689_v26, %v11703_v43 }
 0x746   :  { %v11898_v58 = vpop.permute.xlu1 %5739  ;;  %14286 = vst [vmem:[#allocation50_spill] sm:$0xff] %v11918_v18  ;;  %14287 = vst [vmem:[#allocation51_spill] sm:$0xff] %v11921_v1  ;;  %v11923_v36 = vpop.permute.xlu0 %5733  ;;  %v4958_v1 = vsel %vm389_vm1, %v11695_v52, %v11689_v26  ;;  %v5117_v26 = vsel %vm548_vm2, %v11705_v6, %v11715_v41 }
 0x747   :  { %14285 = vst [vmem:[#allocation49_spill] sm:$0xff] %v11898_v58  ;;  %v4986_v58 = vmul.f32 %v4972_v11, %v4959_v15  ;;  %14288 = vst [vmem:[#allocation52_spill] sm:$0xff] %v11926_v54  ;;  %v11935_v15 = vrot.slane %v8553_v17, %v14275_v31  ;;  %v4960_v54 = vsel %vm389_vm1, %v11686_v5, %v11695_v52 }
 0x748   :  { %14289 = vst [vmem:[#allocation53_spill] sm:$0xff] %v11929_v13  ;;  %v4995_v13 = vadd.f32 %v4987_v30, %v4837_v2  ;;  %v5115_v52 = vsel %vm548_vm2, %v11715_v41, %v11708_v22  ;;  %v4990_v5 = vmul.f32 %v4972_v11, %v4960_v54  ;;  %v4991_v43 = vmul.f32 %v4976_v35, %v4958_v1  ;;  %v8557_v54 = vld [vmem:[%s13784_s1 + $0x20] ss:$8 sm:$0xf] }
 0x749   :  { %14291 = vst [vmem:[#allocation55_spill] sm:$0xff] %v11935_v15  ;;  %v11957_v15 = vrot.slane %v8553_v17, %v9206_v0  ;;  %v4994_v9 = vadd.f32 %v4986_v58, %v4836_v37  ;;  %v5113_v37 = vsel %vm548_vm2, %v11708_v22, %v11723_v23  ;;  %v5119_v58 = vsel %vm548_vm2, %v11723_v23, %v11705_v6 }
 0x74a   :  { %v11967_v18 = vpop.permute.xlu1 %5735  ;;  %v4993_v2 = vadd.f32 %v4985_v27, %v11808_v25  ;;  %v4996_v17 = vadd.f32 %v4988_v20, %v4838_v63  ;;  %v4989_v30 = vmul.f32 %v4968_v7, %v4962_v42  ;;  %v11978_v41 = vpop.permute.xlu0 %5741  ;;  %v5144_v1 = vmul.f32 %v11843_v49, %v5117_v26 }
 0x74b   :  { %14292 = vst [vmem:[#allocation56_spill] sm:$0xff] %v11957_v15  ;;  %v4992_v15 = vmul.f32 %v4980_v46, %v4956_v28  ;;  %v5145_v22 = vmul.f32 %v11846_v39, %v5115_v52  ;;  %v5116_v6 = vsel %vm548_vm2, %v11719_v60, %v11713_v33  ;;  %v5118_v25 = vsel %vm548_vm2, %v11710_v40, %v11719_v60 }
 0x74c   :  { %v5143_v63 = vmul.f32 %v11849_v59, %v5119_v58  ;;  %v5146_v23 = vmul.f32 %v11852_v24, %v5113_v37  ;;  %v5114_v11 = vsel %vm548_vm2, %v11713_v33, %v11727_v47  ;;  %v5120_v35 = vsel %vm548_vm2, %v11727_v47, %v11710_v40 }
 0x74d   :  { %v4998_v7 = vadd.f32 %v4990_v5, %v11819_v16  ;;  %v4999_v46 = vadd.f32 %v4991_v43, %v11823_v3  ;;  %v12006_v60 = vrot.slane %v8557_v54, %v14276_v29  ;;  %v12009_v27 = vrot.slane %v8557_v54, %v14275_v31 }
 0x74e   :  { %v4997_v20 = vadd.f32 %v4989_v30, %v11812_v14  ;;  %v5000_v28 = vadd.f32 %v4992_v15, %v11826_v51  ;;  %v5148_v33 = vmul.f32 %v11843_v49, %v5118_v25  ;;  %v5149_v42 = vmul.f32 %v11846_v39, %v5116_v6  ;;  %v12015_v52 = vpop.permute.xlu1 %5743  ;;  %v14293_v6 = vld [vmem:[#allocation27_spill] sm:$0xff] }
 0x74f   :  { %v5147_v16 = vmul.f32 %v11849_v59, %v5120_v35  ;;  %v5150_v3 = vmul.f32 %v11852_v24, %v5114_v11  ;;  %v12022_v47 = vrot.slane %v8557_v54, %v14108_v55  ;;  %v12025_v26 = vrot.slane %v8557_v54, %v9206_v0  ;;  %v14296_v11 = vld [vmem:[#allocation28_spill] sm:$0xff] }
 0x750   :  { %v5152_v14 = vadd.f32 %v5144_v1, %v4994_v9  ;;  %v5153_v51 = vadd.f32 %v5145_v22, %v4995_v13  ;;  %v5151_v15 = vadd.f32 %v5143_v63, %v4993_v2  ;;  %v5154_v49 = vadd.f32 %v5146_v23, %v4996_v17  ;;  %v14294_v63 = vld [vmem:[#allocation37_spill] sm:$0xff]  ;;  %v14295_v23 = vld [vmem:[#allocation36_spill] sm:$0xff] }
 0x751   :  { %v5273_v39 = vsel %vm708_vm3, %v11738_v61, %v11732_v57  ;;  %v5275_v59 = vsel %vm708_vm3, %v11729_v21, %v11738_v61  ;;  %v5271_v24 = vsel %vm708_vm3, %v11732_v57, %v11742_v10  ;;  %v5277_v13 = vsel %vm708_vm3, %v11742_v10, %v11729_v21 }
 0x752   :  { %v12017_v40 = vpop.permute.xlu0 %5887  ;;  %v5156_v9 = vadd.f32 %v5148_v33, %v4998_v7  ;;  %v5157_v5 = vadd.f32 %v5149_v42, %v4999_v46  ;;  %v5274_v43 = vsel %vm708_vm3, %v11740_v19, %v11736_v32  ;;  %v5276_v61 = vsel %vm708_vm3, %v11734_v38, %v11740_v19  ;;  %v14299_v33 = vld [vmem:[#allocation43_spill] sm:$0xff] }
 0x753   :  { %v5155_v58 = vadd.f32 %v5147_v16, %v4997_v20  ;;  %v5158_v2 = vadd.f32 %v5150_v3, %v5000_v28  ;;  %v5272_v21 = vsel %vm708_vm3, %v11736_v32, %v11744_v8  ;;  %v5278_v10 = vsel %vm708_vm3, %v11744_v8, %v11734_v38  ;;  %v14300_v16 = vld [vmem:[#allocation44_spill] sm:$0xff] }
 0x754   :  { %v5302_v17 = vmul.f32 %v11858_v44, %v5275_v59  ;;  %v5303_v19 = vmul.f32 %v11861_v45, %v5273_v39  ;;  %v5301_v30 = vmul.f32 %v11864_v34, %v5277_v13  ;;  %v5304_v54 = vmul.f32 %v11867_v62, %v5271_v24  ;;  %v14301_v13 = vld [vmem:[#allocation45_spill] sm:$0xff] }
 0x755   :  { %v5306_v1 = vmul.f32 %v11858_v44, %v5276_v61  ;;  %v5307_v22 = vmul.f32 %v11861_v45, %v5274_v43  ;;  %v5431_v32 = vsel %vm868_vm4, %v11754_v56, %v11748_v12  ;;  %v5433_v38 = vsel %vm868_vm4, %v14293_v6, %v11754_v56  ;;  %v14297_v56 = vld [vmem:[#allocation29_spill] sm:$0xff]  ;;  %v14302_v61 = vld [vmem:[#allocation46_spill] sm:$0xff] }
 0x756   :  { %v12051_v37 = vpop.permute.xlu0 %5895  ;;  %v12053_v57 = vpop.permute.xlu1 %5889  ;;  %v5305_v8 = vmul.f32 %v11864_v34, %v5278_v10  ;;  %v5308_v25 = vmul.f32 %v11867_v62, %v5272_v21  ;;  %v5429_v44 = vsel %vm868_vm4, %v11748_v12, %v14294_v63  ;;  %v5435_v45 = vsel %vm868_vm4, %v14294_v63, %v14293_v6  ;;  %v14298_v34 = vld [vmem:[#allocation38_spill] sm:$0xff] }
 0x757   :  { %v5432_v35 = vsel %vm868_vm4, %v14296_v11, %v14295_v23  ;;  %v5434_v62 = vsel %vm868_vm4, %v14297_v56, %v14296_v11  ;;  %v5430_v12 = vsel %vm868_vm4, %v14295_v23, %v14298_v34  ;;  %v5436_v7 = vsel %vm868_vm4, %v14298_v34, %v14297_v56  ;;  %v14307_v56 = vld [vmem:[#allocation47_spill] sm:$0xff]  ;;  %v14308_v34 = vld [vmem:[#allocation48_spill] sm:$0xff] }
 0x758   :  { %v5310_v20 = vadd.f32 %v5302_v17, %v5152_v14  ;;  %v5311_v28 = vadd.f32 %v5303_v19, %v5153_v51  ;;  %v5460_v42 = vmul.f32 %v14299_v33, %v5433_v38  ;;  %v5461_v3 = vmul.f32 %v14300_v16, %v5431_v32 }
 0x759   :  { %v5309_v59 = vadd.f32 %v5301_v30, %v5151_v15  ;;  %v5312_v24 = vadd.f32 %v5304_v54, %v5154_v49  ;;  %v5459_v43 = vmul.f32 %v14301_v13, %v5435_v45  ;;  %v5462_v21 = vmul.f32 %v14302_v61, %v5429_v44  ;;  %v14303_v15 = vld [vmem:[#allocation35_spill] sm:$0xff]  ;;  %v14304_v49 = vld [vmem:[#allocation40_spill] sm:$0xff] }
 0x75a   :  { %v12103_v46 = vpop.permute.xlu1 %5897  ;;  %v5892_v39 = vpop.permute.xlu0 %5891  ;;  %v5464_v10 = vmul.f32 %v14299_v33, %v5434_v62  ;;  %v5465_v6 = vmul.f32 %v14300_v16, %v5432_v35  ;;  %v5463_v63 = vmul.f32 %v14301_v13, %v5436_v7  ;;  %v5466_v14 = vmul.f32 %v14302_v61, %v5430_v12  ;;  %v14305_v54 = vld [vmem:[#allocation16_spill] sm:$0xff]  ;;  %v14309_v7 = vld [vmem:[#allocation39_spill] sm:$0xff]  ;;  %v14311_v33 = vld [vmem:[#allocation22_spill] sm:$0xff] }
 0x75b   :  { %v5314_v51 = vadd.f32 %v5306_v1, %v5156_v9  ;;  %v5315_v17 = vadd.f32 %v5307_v22, %v5157_v5  ;;  %v5313_v19 = vadd.f32 %v5305_v8, %v5155_v58  ;;  %v5316_v38 = vadd.f32 %v5308_v25, %v5158_v2  ;;  %v14306_v9 = vld [vmem:[#allocation17_spill] sm:$0xff] }
 0x75c   :  { %v5468_v32 = vadd.f32 %v5460_v42, %v5310_v20  ;;  %v5469_v23 = vadd.f32 %v5461_v3, %v5311_v28  ;;  %v5589_v30 = vsel %vm1028_vm5, %v14304_v49, %v14303_v15  ;;  %v5591_v44 = vsel %vm1028_vm5, %v14305_v54, %v14304_v49  ;;  %v14310_v20 = vld [vmem:[#allocation24_spill] sm:$0xff] }
 0x75d   :  { %v5467_v11 = vadd.f32 %v5459_v43, %v5309_v59  ;;  %v5470_v35 = vadd.f32 %v5462_v21, %v5312_v24  ;;  %v5587_v5 = vsel %vm1028_vm5, %v14303_v15, %v14306_v9  ;;  %v5593_v58 = vsel %vm1028_vm5, %v14306_v9, %v14305_v54  ;;  %v14312_v59 = vld [vmem:[#allocation30_spill] sm:$0xff]  ;;  %v14313_v43 = vld [vmem:[#allocation41_spill] sm:$0xff] }
 0x75e   :  { %v12121_v45 = vpop.permute.xlu1 %5893  ;;  %v5472_v2 = vadd.f32 %v5464_v10, %v5314_v51  ;;  %v5473_v1 = vadd.f32 %v5465_v6, %v5315_v17  ;;  %v5471_v22 = vadd.f32 %v5463_v63, %v5313_v19  ;;  %v5474_v8 = vadd.f32 %v5466_v14, %v5316_v38  ;;  %v5900_v25 = vpop.permute.xlu0 %5899  ;;  %v14314_v21 = vld [vmem:[#allocation34_spill] sm:$0xff]  ;;  %v14315_v17 = vld [vmem:[#allocation49_spill] sm:$0xff] }
 0x75f   :  { %v5617_v62 = vmul.f32 %v14307_v56, %v5591_v44  ;;  %v5618_v12 = vmul.f32 %v14308_v34, %v5589_v30  ;;  %v5590_v28 = vsel %vm1028_vm5, %v14310_v20, %v14309_v7  ;;  %v5592_v42 = vsel %vm1028_vm5, %v14311_v33, %v14310_v20  ;;  %v14317_v9 = vld [vmem:[#allocation50_spill] sm:$0xff]  ;;  %v14320_v20 = vld [vmem:[#allocation53_spill] sm:$0xff] }
 0x760   :  { %v5619_v16 = vmul.f32 %v11912_v50, %v5587_v5  ;;  %v5620_v3 = vmul.f32 %v11915_v53, %v5593_v58  ;;  %v5588_v24 = vsel %vm1028_vm5, %v14309_v7, %v14312_v59  ;;  %v5594_v13 = vsel %vm1028_vm5, %v14312_v59, %v14311_v33  ;;  %v14318_v58 = vld [vmem:[#allocation51_spill] sm:$0xff] }
 0x761   :  { %v5747_v61 = vsel %vm1188_vm6, %v11923_v36, %v14313_v43  ;;  %v5749_v10 = vsel %vm1188_vm6, %v14314_v21, %v11923_v36  ;;  %v5745_v6 = vsel %vm1188_vm6, %v14313_v43, %v11978_v41  ;;  %v5751_v63 = vsel %vm1188_vm6, %v11978_v41, %v14314_v21  ;;  %v14316_v36 = vld [vmem:[#allocation42_spill] sm:$0xff] }
 0x762   :  { %v5621_v14 = vmul.f32 %v14307_v56, %v5592_v42  ;;  %v5622_v51 = vmul.f32 %v14308_v34, %v5590_v28  ;;  %v5748_v19 = vsel %vm1188_vm6, %v11967_v18, %v14315_v17  ;;  %v5750_v38 = vsel %vm1188_vm6, %v14316_v36, %v11967_v18  ;;  %v5902_v15 = vpop.permute.xlu1 %5901  ;;  %v14319_v34 = vld [vmem:[#allocation52_spill] sm:$0xff]  ;;  %v14321_v21 = vld [vmem:[#allocation54_spill] sm:$0xff] }
 0x763   :  { %v5625_v30 = vadd.f32 %v5617_v62, %v5467_v11  ;;  %v5626_v54 = vadd.f32 %v5618_v12, %v5468_v32  ;;  %v5623_v41 = vmul.f32 %v11912_v50, %v5588_v24  ;;  %v5624_v44 = vmul.f32 %v11915_v53, %v5594_v13 }
 0x764   :  { %v5775_v5 = vmul.f32 %v14317_v9, %v5749_v10  ;;  %v5776_v56 = vmul.f32 %v14318_v58, %v5747_v61  ;;  %v5777_v7 = vmul.f32 %v14319_v34, %v5745_v6  ;;  %v5778_v28 = vmul.f32 %v14320_v20, %v5751_v63  ;;  %v14322_v10 = vld [vmem:[#allocation55_spill] sm:$0xff] }
 0x765   :  { %v5627_v33 = vadd.f32 %v5619_v16, %v5469_v23  ;;  %v5628_v42 = vadd.f32 %v5620_v3, %v5470_v35  ;;  %v5779_v18 = vmul.f32 %v14317_v9, %v5750_v38  ;;  %v5780_v59 = vmul.f32 %v14318_v58, %v5748_v19 }
 0x766   :  { %v6046_v49 = vpop.permute.xlu0 %6045  ;;  %v5629_v11 = vadd.f32 %v5621_v14, %v5471_v22  ;;  %v5630_v32 = vadd.f32 %v5622_v51, %v5472_v2  ;;  %v5905_v50 = vsel %vm1348_vm7, %v5892_v39, %v12051_v37  ;;  %v5907_v53 = vsel %vm1348_vm7, %v12017_v40, %v5892_v39 }
 0x767   :  { %v5631_v24 = vadd.f32 %v5623_v41, %v5473_v1  ;;  %v5632_v13 = vadd.f32 %v5624_v44, %v5474_v8  ;;  %v5903_v23 = vsel %vm1348_vm7, %v12051_v37, %v5900_v25  ;;  %v5909_v35 = vsel %vm1348_vm7, %v5900_v25, %v12017_v40  ;;  %v14323_v8 = vld [vmem:[#allocation56_spill] sm:$0xff] }
 0x768   :  { %v5783_v2 = vadd.f32 %v5775_v5, %v5625_v30  ;;  %v5784_v22 = vadd.f32 %v5776_v56, %v5626_v54  ;;  %v5785_v16 = vadd.f32 %v5777_v7, %v5627_v33  ;;  %v5786_v3 = vadd.f32 %v5778_v28, %v5628_v42 }
 0x769   :  { %v5787_v43 = vadd.f32 %v5779_v18, %v5629_v11  ;;  %v5788_v61 = vadd.f32 %v5780_v59, %v5630_v32  ;;  %v5933_v39 = vmul.f32 %v14321_v21, %v5907_v53  ;;  %v5934_v6 = vmul.f32 %v14322_v10, %v5905_v50 }
 0x76a   :  { %v6054_v62 = vpop.permute.xlu0 %6053  ;;  %v6048_v12 = vpop.permute.xlu1 %6047  ;;  %v5746_v1 = vsel %vm1188_vm6, %v14315_v17, %v12015_v52  ;;  %v5752_v40 = vsel %vm1188_vm6, %v12015_v52, %v14316_v36  ;;  %v5935_v37 = vmul.f32 %v11954_v4, %v5903_v23  ;;  %v5936_v25 = vmul.f32 %v14323_v8, %v5909_v35 }
 0x76b   :  { %v5906_v14 = vsel %vm1348_vm7, %v12121_v45, %v12103_v46  ;;  %v5908_v51 = vsel %vm1348_vm7, %v12053_v57, %v12121_v45  ;;  %v5904_v36 = vsel %vm1348_vm7, %v12103_v46, %v5902_v15  ;;  %v5910_v38 = vsel %vm1348_vm7, %v5902_v15, %v12053_v57 }
 0x76c   :  { %v5781_v45 = vmul.f32 %v14319_v34, %v5746_v1  ;;  %v5782_v41 = vmul.f32 %v14320_v20, %v5752_v40  ;;  %v5941_v44 = vadd.f32 %v5933_v39, %v5783_v2  ;;  %v5942_v9 = vadd.f32 %v5934_v6, %v5784_v22 }
 0x76d   :  { %v5943_v5 = vadd.f32 %v5935_v37, %v5785_v16  ;;  %v5944_v58 = vadd.f32 %v5936_v25, %v5786_v3  ;;  %v5937_v56 = vmul.f32 %v14321_v21, %v5908_v51  ;;  %v5938_v46 = vmul.f32 %v14322_v10, %v5906_v14 }
 0x76e   :  { %v6050_v63 = vpop.permute.xlu0 %6049  ;;  %v6056_v19 = vpop.permute.xlu1 %6055  ;;  %v5939_v28 = vmul.f32 %v11954_v4, %v5904_v36  ;;  %v5940_v57 = vmul.f32 %v14323_v8, %v5910_v38  ;;  %v5789_v11 = vadd.f32 %v5781_v45, %v5631_v24  ;;  %v5790_v32 = vadd.f32 %v5782_v41, %v5632_v13  ;;  %v14324_v45 = vld [vmem:[#allocation32_spill] sm:$0xff]  ;;  %v14325_v41 = vld [vmem:[#allocation33_spill] sm:$0xff] }
 0x76f   :  { %v6063_v17 = vsel %vm1508_vm8, %v6050_v63, %v6054_v62  ;;  %v6065_v52 = vsel %vm1508_vm8, %v6046_v49, %v6050_v63  ;;  %v5945_v53 = vadd.f32 %v5937_v56, %v5787_v43  ;;  %v14330_v56 = vld [vmem:[#allocation15_spill] sm:$0xff] }
 0x770   :  { %v6091_v30 = vmul.f32 %v12006_v60, %v6065_v52  ;;  %v6092_v54 = vmul.f32 %v12009_v27, %v6063_v17  ;;  %v5948_v2 = vadd.f32 %v5940_v57, %v5790_v32  ;;  %v14334_v57 = vld [vmem:[#allocation12_spill] sm:$0xff]  ;;  %v14342_v32 = vld [vmem:[#allocation9_spill] sm:$0xff] }
 0x772   :  { %v6058_v7 = vpop.permute.xlu0 %6057  ;;  %v6052_v20 = vpop.permute.xlu1 %6051  ;;  %v6099_v33 = vadd.f32 %v6091_v30, %v5941_v44  ;;  %v6100_v42 = vadd.f32 %v6092_v54, %v5942_v9  ;;  %v14326_v44 = vld [vmem:[#allocation31_spill] sm:$0xff]  ;;  %v14327_v9 = vld [vmem:[#allocation26_spill] sm:$0xff] }
 0x773   :  { %v6061_v15 = vsel %vm1508_vm8, %v6054_v62, %v6058_v7  ;;  %v6067_v34 = vsel %vm1508_vm8, %v6058_v7, %v6046_v49  ;;  %v6064_v4 = vsel %vm1508_vm8, %v6052_v20, %v6056_v19  ;;  %v6066_v50 = vsel %vm1508_vm8, %v6048_v12, %v6052_v20  ;;  %v14332_v7 = vld [vmem:[#allocation21_spill] sm:$0xff]  ;;  %v14337_v20 = vld [vmem:[#allocation4_spill] sm:$0xff] }
 0x774   :  { %v6093_v18 = vmul.f32 %v12022_v47, %v6061_v15  ;;  %v6094_v59 = vmul.f32 %v12025_v26, %v6067_v34  ;;  %v5946_v62 = vadd.f32 %v5938_v46, %v5788_v61  ;;  %v5947_v49 = vadd.f32 %v5939_v28, %v5789_v11  ;;  %v14331_v46 = vld [vmem:[#allocation13_spill] sm:$0xff]  ;;  %v14333_v28 = vld [vmem:[#allocation14_spill] sm:$0xff]  ;;  %v14335_v15 = vld [vmem:[#allocation3_spill] sm:$0xff] }
 0x775   :  { %v6095_v22 = vmul.f32 %v12006_v60, %v6066_v50  ;;  %v6096_v16 = vmul.f32 %v12009_v27, %v6064_v4  ;;  %v6107_v21 = vmul.f32 0.2, %v6099_v33  ;;  %v6108_v24 = vmul.f32 0.2, %v6100_v42  ;;  %v14336_v34 = vld [vmem:[#allocation11_spill] sm:$0xff]  ;;  %v14341_v11 = vld [vmem:[#allocation8_spill] sm:$0xff] }
 0x776   :  { %v6101_v23 = vadd.f32 %v6093_v18, %v5943_v5  ;;  %v6102_v35 = vadd.f32 %v6094_v59, %v5944_v58  ;;  %v6060_v3 = vpop.permute.xlu1 %6059  ;;  %v14328_v5 = vld [vmem:[#allocation23_spill] sm:$0xff]  ;;  %v14329_v58 = vld [vmem:[#allocation25_spill] sm:$0xff]  ;;  %v14340_v18 = vld [vmem:[#allocation6_spill] sm:$0xff]  ;;  %v14344_v50 = vmov 0  }
 0x777   :  { %v6062_v13 = vsel %vm1508_vm8, %v6056_v19, %v6060_v3  ;;  %v6068_v39 = vsel %vm1508_vm8, %v6060_v3, %v6048_v12  ;;  %v6103_v10 = vadd.f32 %v6095_v22, %v5945_v53  ;;  %v6104_v43 = vadd.f32 %v6096_v16, %v5946_v62  ;;  %v8740_v59 = vld [vmem:[%s13789_s10 + $0x40] sm:$0xff]   ;;  %v14343_v4 = vld [vmem:[#allocation10_spill] sm:$0xff]  ;;  %v8741_v53 = vld [vmem:[%s13789_s10 + $0x48] sm:$0xff]  }
 0x778   :  { %v6097_v61 = vmul.f32 %v12022_v47, %v6062_v13  ;;  %v6098_v6 = vmul.f32 %v12025_v26, %v6068_v39  ;;  %v6109_v1 = vmul.f32 0.2, %v6101_v23  ;;  %v6110_v40 = vmul.f32 0.2, %v6102_v35  ;;  %v8742_v62 = vld [vmem:[%s13789_s10] sm:$0xff]   ;;  %v8747_v22 = vld [vmem:[%s13789_s10 + $0x28] sm:$0xff]  }
 0x779   :  { %v6111_v60 = vmul.f32 0.2, %v6103_v10  ;;  %v6112_v37 = vmul.f32 0.2, %v6104_v43  ;;  %v6115_v25 = vmax.f32 %v6099_v33, %v6107_v21  ;;  %v6116_v63 = vmax.f32 %v6100_v42, %v6108_v24  ;;  %v14338_v33 = vld [vmem:[#allocation5_spill] sm:$0xff]  ;;  %v14339_v42 = vld [vmem:[#allocation7_spill] sm:$0xff] }
 0x77a   :  { %v6105_v27 = vadd.f32 %v6097_v61, %v5947_v49  ;;  %v6106_v8 = vadd.f32 %v6098_v6, %v5948_v2  ;;  %v6117_v19 = vmax.f32 %v6101_v23, %v6109_v1  ;;  %v6118_v12 = vmax.f32 %v6102_v35, %v6110_v40  ;;  %v8743_v23 = vld [vmem:[%s13789_s10 + $0x8] sm:$0xff]   ;;  %v8744_v35 = vld [vmem:[%s13789_s10 + $0x10] sm:$0xff]   ;;  %v8745_v49 = vld [vmem:[%s13789_s10 + $0x18] sm:$0xff]  }
 0x77b   :  { %v6119_v14 = vmax.f32 %v6103_v10, %v6111_v60  ;;  %v6120_v51 = vmax.f32 %v6104_v43, %v6112_v37  ;;  %v8746_v2 = vld [vmem:[%s13789_s10 + $0x20] sm:$0xff]   ;;  %v8748_v16 = vld [vmem:[%s13789_s10 + $0x30] sm:$0xff]   ;;  %v8749_v3 = vld [vmem:[%s13789_s10 + $0x38] sm:$0xff]  }
 0x77c   :  { %v6113_v17 = vmul.f32 0.2, %v6105_v27  ;;  %v6114_v52 = vmul.f32 0.2, %v6106_v8  ;;  %v8750_v21 = vld [vmem:[%s13789_s10 + $0x50] sm:$0xff]   ;;  %v8751_v24 = vld [vmem:[%s13789_s10 + $0x58] sm:$0xff]  }
 0x77d   :  { %v12253_v36 = vpack.c.bf16 %v6119_v14, %v6115_v25  ;;  %v12255_v38 = vpack.c.bf16 %v6120_v51, %v6116_v63  ;;  %v8752_v13 = vld [vmem:[%s13789_s10 + $0x60] sm:$0xff]   ;;  %v8753_v39 = vld [vmem:[%s13789_s10 + $0x68] sm:$0xff]   ;;  %v8754_v10 = vld [vmem:[%s13789_s10 + $0x70] sm:$0xff]  }
 0x77e   :  { %v6121_v47 = vmax.f32 %v6105_v27, %v6113_v17  ;;  %v6122_v26 = vmax.f32 %v6106_v8, %v6114_v52  ;;  %v8755_v43 = vld [vmem:[%s13789_s10 + $0x78] sm:$0xff]   ;;  %v8756_v61 = vld [vmem:[%s13789_s10 + $0x80] sm:$0xff]   ;;  %v8757_v27 = vld [vmem:[%s13789_s10 + $0x88] sm:$0xff]  }
 0x77f   :  { %6336 = vmatprep.subr.bf16.mxu0 %v12255_v38 }
 0x780   :  { %v12257_v30 = vpack.c.bf16 %v6121_v47, %v6117_v19  ;;  %v12259_v54 = vpack.c.bf16 %v6122_v26, %v6118_v12  ;;  %6337 = vmatpush1.bf16.msra.mxu0 %v12253_v36 }
 0x781   :  { %6338 = vmatprep.subr.bf16.mxu0 %v14324_v45 }
 0x782   :  { %6389 = vmatprep.subr.bf16.mxu1 %v12259_v54 }
 0x783   :  { %6390 = vmatpush1.bf16.msra.mxu1 %v12257_v30 }
 0x784   :  { %6391 = vmatprep.subr.bf16.mxu1 %v14325_v41  ;;  %6339 = vmatpush1.bf16.msra.mxu0 %v14326_v44 }
 0x785   :  { %6340 = vmatprep.subr.bf16.mxu0 %v14327_v9 }
 0x787   :  { %6392 = vmatpush1.bf16.msra.mxu1 %v14328_v5 }
 0x788   :  { %6393 = vmatprep.subr.bf16.mxu1 %v14329_v58  ;;  %6341 = vmatpush1.bf16.msra.mxu0 %v14330_v56 }
 0x789   :  { %6342 = vmatprep.subr.bf16.mxu0 %v14331_v46 }
 0x78b   :  { %6394 = vmatpush1.bf16.msra.mxu1 %v14332_v7 }
 0x78c   :  { %6395 = vmatprep.subr.bf16.mxu1 %v14333_v28  ;;  %6343 = vmatpush1.bf16.msra.mxu0 %v14334_v57 }
 0x78d   :  { %6344 = vmatprep.subr.bf16.mxu0 %v14335_v15 }
 0x78f   :  { %6396 = vmatpush1.bf16.msra.mxu1 %v14336_v34 }
 0x790   :  { %6397 = vmatprep.subr.bf16.mxu1 %v14337_v20  ;;  %6345 = vmatpush1.bf16.msra.mxu0 %v14338_v33 }
 0x791   :  { %6346 = vmatprep.subr.bf16.mxu0 %v14339_v42 }
 0x793   :  { %6398 = vmatpush1.bf16.msra.mxu1 %v14340_v18 }
 0x794   :  { %6399 = vmatprep.subr.bf16.mxu1 %v14341_v11  ;;  %6347 = vmatpush1.bf16.msra.mxu0 %v14342_v32 }
 0x795   :  { %6478 = vmatprep.subr.bf16.mxu0 %v12255_v38 }
 0x797   :  { %6400 = vmatpush1.bf16.msra.mxu1 %v14343_v4  ;;  %8588 = vmatmul.mubr.msk.bf16.vlgmr.msra.gmra.mxu0 %vm6325_vm12, %v8740_v59 }
 0x798   :  { %6531 = vmatprep.subr.bf16.mxu1 %v12259_v54  ;;  %6479 = vmatpush1.bf16.msra.mxu0 %v12253_v36 }
 0x799   :  { %6374 = vmatprep.mubr.bf16.mxu0 %v14344_v50  ;;  %6480 = vmatprep.subr.bf16.mxu0 %v14324_v45 }
 0x79a   :  { %8590 = vmatmul.mubr.msk.bf16.vlgmr.msra.gmra.mxu1 %vm6325_vm12, %v8740_v59 }
 0x79b   :  { %6532 = vmatpush1.bf16.msra.mxu1 %v12257_v30  ;;  %6427 = vmatprep.mubr.bf16.mxu1 %v14344_v50 }
 0x79c   :  { %6533 = vmatprep.subr.bf16.mxu1 %v14325_v41  ;;  %6481 = vmatpush1.bf16.msra.mxu0 %v14326_v44 }
 0x79d   :  { %6482 = vmatprep.subr.bf16.mxu0 %v14327_v9 }
 0x79f   :  { %6534 = vmatpush1.bf16.msra.mxu1 %v14328_v5  ;;  %8589 = vmatmul.mubr.msk.bf16.gmra.mxu0 %vm6325_vm12, %v8741_v53 }
 0x7a0   :  { %6535 = vmatprep.subr.bf16.mxu1 %v14329_v58  ;;  %6483 = vmatpush1.bf16.msra.mxu0 %v14330_v56 }
 0x7a1   :  { %6506 = vmatprep.mubr.bf16.mxu0 %v14344_v50  ;;  %6484 = vmatprep.subr.bf16.mxu0 %v14331_v46 }
 0x7a2   :  { %8591 = vmatmul.mubr.msk.bf16.gmra.mxu1 %vm6325_vm12, %v8741_v53 }
 0x7a3   :  { %6536 = vmatpush1.bf16.msra.mxu1 %v14332_v7  ;;  %6559 = vmatprep.mubr.bf16.mxu1 %v14344_v50 }
 0x7a4   :  { %6537 = vmatprep.subr.bf16.mxu1 %v14333_v28  ;;  %6485 = vmatpush1.bf16.msra.mxu0 %v14334_v57 }
 0x7a5   :  { %6486 = vmatprep.subr.bf16.mxu0 %v14335_v15 }
 0x7a7   :  { %6538 = vmatpush1.bf16.msra.mxu1 %v14336_v34 }
 0x7a8   :  { %6539 = vmatprep.subr.bf16.mxu1 %v14337_v20  ;;  %6487 = vmatpush1.bf16.msra.mxu0 %v14338_v33 }
 0x7a9   :  { %6488 = vmatprep.subr.bf16.mxu0 %v14339_v42 }
 0x7ab   :  { %6540 = vmatpush1.bf16.msra.mxu1 %v14340_v18 }
 0x7ac   :  { %6541 = vmatprep.subr.bf16.mxu1 %v14341_v11  ;;  %6489 = vmatpush1.bf16.msra.mxu0 %v14342_v32 }
 0x7ad   :  { %6706 = vmatprep.subr.bf16.mxu0 %v12255_v38 }
 0x7af   :  { %6542 = vmatpush1.bf16.msra.mxu1 %v14343_v4  ;;  %8594 = vmatmul.mubr.msk.bf16.vlgmr.msra.gmra.mxu0 %vm6325_vm12, %v8742_v62 }
 0x7b0   :  { %6759 = vmatprep.subr.bf16.mxu1 %v12259_v54  ;;  %6707 = vmatpush1.bf16.msra.mxu0 %v12253_v36 }
 0x7b1   :  { %6516 = vmatprep.mubr.bf16.mxu0 %v14344_v50  ;;  %6708 = vmatprep.subr.bf16.mxu0 %v14324_v45 }
 0x7b2   :  { %8596 = vmatmul.mubr.msk.bf16.vlgmr.msra.gmra.mxu1 %vm6325_vm12, %v8742_v62 }
 0x7b3   :  { %6760 = vmatpush1.bf16.msra.mxu1 %v12257_v30  ;;  %6569 = vmatprep.mubr.bf16.mxu1 %v14344_v50 }
 0x7b4   :  { %6761 = vmatprep.subr.bf16.mxu1 %v14325_v41  ;;  %6709 = vmatpush1.bf16.msra.mxu0 %v14326_v44 }
 0x7b5   :  { %6710 = vmatprep.subr.bf16.mxu0 %v14327_v9 }
 0x7b7   :  { %6762 = vmatpush1.bf16.msra.mxu1 %v14328_v5  ;;  %8595 = vmatmul.mubr.msk.bf16.gmra.mxu0 %vm6325_vm12, %v8743_v23 }
 0x7b8   :  { %6763 = vmatprep.subr.bf16.mxu1 %v14329_v58  ;;  %6711 = vmatpush1.bf16.msra.mxu0 %v14330_v56 }
 0x7b9   :  { %6734 = vmatprep.mubr.bf16.mxu0 %v14344_v50  ;;  %6712 = vmatprep.subr.bf16.mxu0 %v14331_v46 }
 0x7ba   :  { %8597 = vmatmul.mubr.msk.bf16.gmra.mxu1 %vm6325_vm12, %v8743_v23 }
 0x7bb   :  { %6764 = vmatpush1.bf16.msra.mxu1 %v14332_v7  ;;  %6787 = vmatprep.mubr.bf16.mxu1 %v14344_v50 }
 0x7bc   :  { %6765 = vmatprep.subr.bf16.mxu1 %v14333_v28  ;;  %6713 = vmatpush1.bf16.msra.mxu0 %v14334_v57 }
 0x7bd   :  { %6714 = vmatprep.subr.bf16.mxu0 %v14335_v15 }
 0x7bf   :  { %6766 = vmatpush1.bf16.msra.mxu1 %v14336_v34 }
 0x7c0   :  { %6767 = vmatprep.subr.bf16.mxu1 %v14337_v20  ;;  %6715 = vmatpush1.bf16.msra.mxu0 %v14338_v33 }
 0x7c1   :  { %6716 = vmatprep.subr.bf16.mxu0 %v14339_v42 }
 0x7c3   :  { %6768 = vmatpush1.bf16.msra.mxu1 %v14340_v18 }
 0x7c4   :  { %6769 = vmatprep.subr.bf16.mxu1 %v14341_v11  ;;  %6717 = vmatpush1.bf16.msra.mxu0 %v14342_v32 }
 0x7c5   :  { %6934 = vmatprep.subr.bf16.mxu0 %v12255_v38 }
 0x7c7   :  { %6770 = vmatpush1.bf16.msra.mxu1 %v14343_v4  ;;  %8600 = vmatmul.mubr.msk.bf16.vlgmr.msra.gmra.mxu0 %vm6325_vm12, %v8744_v35 }
 0x7c8   :  { %6987 = vmatprep.subr.bf16.mxu1 %v12259_v54  ;;  %6935 = vmatpush1.bf16.msra.mxu0 %v12253_v36 }
 0x7c9   :  { %6744 = vmatprep.mubr.bf16.mxu0 %v14344_v50  ;;  %6936 = vmatprep.subr.bf16.mxu0 %v14324_v45 }
 0x7ca   :  { %8602 = vmatmul.mubr.msk.bf16.vlgmr.msra.gmra.mxu1 %vm6325_vm12, %v8744_v35 }
 0x7cb   :  { %6988 = vmatpush1.bf16.msra.mxu1 %v12257_v30  ;;  %6797 = vmatprep.mubr.bf16.mxu1 %v14344_v50 }
 0x7cc   :  { %6989 = vmatprep.subr.bf16.mxu1 %v14325_v41  ;;  %6937 = vmatpush1.bf16.msra.mxu0 %v14326_v44 }
 0x7cd   :  { %6938 = vmatprep.subr.bf16.mxu0 %v14327_v9 }
 0x7cf   :  { %6990 = vmatpush1.bf16.msra.mxu1 %v14328_v5  ;;  %8601 = vmatmul.mubr.msk.bf16.gmra.mxu0 %vm6325_vm12, %v8745_v49 }
 0x7d0   :  { %6991 = vmatprep.subr.bf16.mxu1 %v14329_v58  ;;  %6939 = vmatpush1.bf16.msra.mxu0 %v14330_v56 }
 0x7d1   :  { %6962 = vmatprep.mubr.bf16.mxu0 %v14344_v50  ;;  %6940 = vmatprep.subr.bf16.mxu0 %v14331_v46 }
 0x7d2   :  { %8603 = vmatmul.mubr.msk.bf16.gmra.mxu1 %vm6325_vm12, %v8745_v49 }
 0x7d3   :  { %6992 = vmatpush1.bf16.msra.mxu1 %v14332_v7  ;;  %7015 = vmatprep.mubr.bf16.mxu1 %v14344_v50 }
 0x7d4   :  { %6993 = vmatprep.subr.bf16.mxu1 %v14333_v28  ;;  %6941 = vmatpush1.bf16.msra.mxu0 %v14334_v57 }
 0x7d5   :  { %6942 = vmatprep.subr.bf16.mxu0 %v14335_v15 }
 0x7d7   :  { %6994 = vmatpush1.bf16.msra.mxu1 %v14336_v34 }
 0x7d8   :  { %6995 = vmatprep.subr.bf16.mxu1 %v14337_v20  ;;  %6943 = vmatpush1.bf16.msra.mxu0 %v14338_v33 }
 0x7d9   :  { %6944 = vmatprep.subr.bf16.mxu0 %v14339_v42 }
 0x7db   :  { %6996 = vmatpush1.bf16.msra.mxu1 %v14340_v18 }
 0x7dc   :  { %6997 = vmatprep.subr.bf16.mxu1 %v14341_v11  ;;  %6945 = vmatpush1.bf16.msra.mxu0 %v14342_v32 }
 0x7dd   :  { %7162 = vmatprep.subr.bf16.mxu0 %v12255_v38 }
 0x7df   :  { %6998 = vmatpush1.bf16.msra.mxu1 %v14343_v4  ;;  %8607 = vmatmul.mubr.msk.bf16.vlgmr.msra.gmra.mxu0 %vm6325_vm12, %v8746_v2 }
 0x7e0   :  { %7215 = vmatprep.subr.bf16.mxu1 %v12259_v54  ;;  %7163 = vmatpush1.bf16.msra.mxu0 %v12253_v36 }
 0x7e1   :  { %6972 = vmatprep.mubr.bf16.mxu0 %v14344_v50  ;;  %7164 = vmatprep.subr.bf16.mxu0 %v14324_v45 }
 0x7e2   :  { %8609 = vmatmul.mubr.msk.bf16.vlgmr.msra.gmra.mxu1 %vm6325_vm12, %v8746_v2 }
 0x7e3   :  { %7216 = vmatpush1.bf16.msra.mxu1 %v12257_v30  ;;  %7025 = vmatprep.mubr.bf16.mxu1 %v14344_v50 }
 0x7e4   :  { %7217 = vmatprep.subr.bf16.mxu1 %v14325_v41  ;;  %7165 = vmatpush1.bf16.msra.mxu0 %v14326_v44 }
 0x7e5   :  { %7166 = vmatprep.subr.bf16.mxu0 %v14327_v9 }
 0x7e7   :  { %7218 = vmatpush1.bf16.msra.mxu1 %v14328_v5  ;;  %8608 = vmatmul.mubr.msk.bf16.gmra.mxu0 %vm6325_vm12, %v8747_v22 }
 0x7e8   :  { %7219 = vmatprep.subr.bf16.mxu1 %v14329_v58  ;;  %7167 = vmatpush1.bf16.msra.mxu0 %v14330_v56 }
 0x7e9   :  { %7190 = vmatprep.mubr.bf16.mxu0 %v14344_v50  ;;  %7168 = vmatprep.subr.bf16.mxu0 %v14331_v46 }
 0x7ea   :  { %8610 = vmatmul.mubr.msk.bf16.gmra.mxu1 %vm6325_vm12, %v8747_v22 }
 0x7eb   :  { %7220 = vmatpush1.bf16.msra.mxu1 %v14332_v7  ;;  %7243 = vmatprep.mubr.bf16.mxu1 %v14344_v50 }
 0x7ec   :  { %7221 = vmatprep.subr.bf16.mxu1 %v14333_v28  ;;  %7169 = vmatpush1.bf16.msra.mxu0 %v14334_v57 }
 0x7ed   :  { %7170 = vmatprep.subr.bf16.mxu0 %v14335_v15 }
 0x7ef   :  { %7222 = vmatpush1.bf16.msra.mxu1 %v14336_v34 }
 0x7f0   :  { %7223 = vmatprep.subr.bf16.mxu1 %v14337_v20  ;;  %7171 = vmatpush1.bf16.msra.mxu0 %v14338_v33 }
 0x7f1   :  { %7172 = vmatprep.subr.bf16.mxu0 %v14339_v42 }
 0x7f3   :  { %7224 = vmatpush1.bf16.msra.mxu1 %v14340_v18 }
 0x7f4   :  { %7225 = vmatprep.subr.bf16.mxu1 %v14341_v11  ;;  %7173 = vmatpush1.bf16.msra.mxu0 %v14342_v32 }
 0x7f5   :  { %7390 = vmatprep.subr.bf16.mxu0 %v12255_v38 }
 0x7f7   :  { %7226 = vmatpush1.bf16.msra.mxu1 %v14343_v4  ;;  %8614 = vmatmul.mubr.msk.bf16.vlgmr.msra.gmra.mxu0 %vm6325_vm12, %v8748_v16 }
 0x7f8   :  { %7443 = vmatprep.subr.bf16.mxu1 %v12259_v54  ;;  %7391 = vmatpush1.bf16.msra.mxu0 %v12253_v36 }
 0x7f9   :  { %7200 = vmatprep.mubr.bf16.mxu0 %v14344_v50  ;;  %7392 = vmatprep.subr.bf16.mxu0 %v14324_v45 }
 0x7fa   :  { %8616 = vmatmul.mubr.msk.bf16.vlgmr.msra.gmra.mxu1 %vm6325_vm12, %v8748_v16 }
 0x7fb   :  { %7444 = vmatpush1.bf16.msra.mxu1 %v12257_v30  ;;  %7253 = vmatprep.mubr.bf16.mxu1 %v14344_v50 }
 0x7fc   :  { %7445 = vmatprep.subr.bf16.mxu1 %v14325_v41  ;;  %7393 = vmatpush1.bf16.msra.mxu0 %v14326_v44 }
 0x7fd   :  { %7394 = vmatprep.subr.bf16.mxu0 %v14327_v9 }
 0x7ff   :  { %7446 = vmatpush1.bf16.msra.mxu1 %v14328_v5  ;;  %8615 = vmatmul.mubr.msk.bf16.gmra.mxu0 %vm6325_vm12, %v8749_v3 }
 0x800   :  { %7447 = vmatprep.subr.bf16.mxu1 %v14329_v58  ;;  %7395 = vmatpush1.bf16.msra.mxu0 %v14330_v56 }
 0x801   :  { %7418 = vmatprep.mubr.bf16.mxu0 %v14344_v50  ;;  %7396 = vmatprep.subr.bf16.mxu0 %v14331_v46 }
 0x802   :  { %8617 = vmatmul.mubr.msk.bf16.gmra.mxu1 %vm6325_vm12, %v8749_v3 }
 0x803   :  { %7448 = vmatpush1.bf16.msra.mxu1 %v14332_v7  ;;  %7471 = vmatprep.mubr.bf16.mxu1 %v14344_v50 }
 0x804   :  { %7449 = vmatprep.subr.bf16.mxu1 %v14333_v28  ;;  %7397 = vmatpush1.bf16.msra.mxu0 %v14334_v57 }
 0x805   :  { %7398 = vmatprep.subr.bf16.mxu0 %v14335_v15 }
 0x807   :  { %7450 = vmatpush1.bf16.msra.mxu1 %v14336_v34 }
 0x808   :  { %7451 = vmatprep.subr.bf16.mxu1 %v14337_v20  ;;  %7399 = vmatpush1.bf16.msra.mxu0 %v14338_v33 }
 0x809   :  { %7400 = vmatprep.subr.bf16.mxu0 %v14339_v42 }
 0x80b   :  { %7452 = vmatpush1.bf16.msra.mxu1 %v14340_v18 }
 0x80c   :  { %7453 = vmatprep.subr.bf16.mxu1 %v14341_v11  ;;  %7401 = vmatpush1.bf16.msra.mxu0 %v14342_v32 }
 0x80d   :  { %7618 = vmatprep.subr.bf16.mxu0 %v12255_v38 }
 0x80f   :  { %7454 = vmatpush1.bf16.msra.mxu1 %v14343_v4  ;;  %8621 = vmatmul.mubr.msk.bf16.vlgmr.msra.gmra.mxu0 %vm6325_vm12, %v8750_v21 }
 0x810   :  { %7671 = vmatprep.subr.bf16.mxu1 %v12259_v54  ;;  %7619 = vmatpush1.bf16.msra.mxu0 %v12253_v36 }
 0x811   :  { %7428 = vmatprep.mubr.bf16.mxu0 %v14344_v50  ;;  %7620 = vmatprep.subr.bf16.mxu0 %v14324_v45 }
 0x812   :  { %8623 = vmatmul.mubr.msk.bf16.vlgmr.msra.gmra.mxu1 %vm6325_vm12, %v8750_v21 }
 0x813   :  { %7672 = vmatpush1.bf16.msra.mxu1 %v12257_v30  ;;  %7481 = vmatprep.mubr.bf16.mxu1 %v14344_v50 }
 0x814   :  { %7673 = vmatprep.subr.bf16.mxu1 %v14325_v41  ;;  %7621 = vmatpush1.bf16.msra.mxu0 %v14326_v44 }
 0x815   :  { %7622 = vmatprep.subr.bf16.mxu0 %v14327_v9 }
 0x817   :  { %7674 = vmatpush1.bf16.msra.mxu1 %v14328_v5  ;;  %8622 = vmatmul.mubr.msk.bf16.gmra.mxu0 %vm6325_vm12, %v8751_v24 }
 0x818   :  { %7675 = vmatprep.subr.bf16.mxu1 %v14329_v58  ;;  %7623 = vmatpush1.bf16.msra.mxu0 %v14330_v56 }
 0x819   :  { %7646 = vmatprep.mubr.bf16.mxu0 %v14344_v50  ;;  %7624 = vmatprep.subr.bf16.mxu0 %v14331_v46 }
 0x81a   :  { %8624 = vmatmul.mubr.msk.bf16.gmra.mxu1 %vm6325_vm12, %v8751_v24 }
 0x81b   :  { %7676 = vmatpush1.bf16.msra.mxu1 %v14332_v7  ;;  %7699 = vmatprep.mubr.bf16.mxu1 %v14344_v50 }
 0x81c   :  { %7677 = vmatprep.subr.bf16.mxu1 %v14333_v28  ;;  %7625 = vmatpush1.bf16.msra.mxu0 %v14334_v57 }
 0x81d   :  { %7626 = vmatprep.subr.bf16.mxu0 %v14335_v15 }
 0x81f   :  { %7678 = vmatpush1.bf16.msra.mxu1 %v14336_v34 }
 0x820   :  { %7679 = vmatprep.subr.bf16.mxu1 %v14337_v20  ;;  %7627 = vmatpush1.bf16.msra.mxu0 %v14338_v33 }
 0x821   :  { %7628 = vmatprep.subr.bf16.mxu0 %v14339_v42 }
 0x823   :  { %7680 = vmatpush1.bf16.msra.mxu1 %v14340_v18 }
 0x824   :  { %7681 = vmatprep.subr.bf16.mxu1 %v14341_v11  ;;  %7629 = vmatpush1.bf16.msra.mxu0 %v14342_v32 }
 0x825   :  { %7846 = vmatprep.subr.bf16.mxu0 %v12255_v38 }
 0x827   :  { %7682 = vmatpush1.bf16.msra.mxu1 %v14343_v4  ;;  %8628 = vmatmul.mubr.msk.bf16.vlgmr.msra.gmra.mxu0 %vm6325_vm12, %v8752_v13 }
 0x828   :  { %7899 = vmatprep.subr.bf16.mxu1 %v12259_v54  ;;  %7847 = vmatpush1.bf16.msra.mxu0 %v12253_v36 }
 0x829   :  { %7656 = vmatprep.mubr.bf16.mxu0 %v14344_v50  ;;  %7848 = vmatprep.subr.bf16.mxu0 %v14324_v45 }
 0x82a   :  { %8630 = vmatmul.mubr.msk.bf16.vlgmr.msra.gmra.mxu1 %vm6325_vm12, %v8752_v13 }
 0x82b   :  { %7900 = vmatpush1.bf16.msra.mxu1 %v12257_v30  ;;  %7709 = vmatprep.mubr.bf16.mxu1 %v14344_v50 }
 0x82c   :  { %7901 = vmatprep.subr.bf16.mxu1 %v14325_v41  ;;  %7849 = vmatpush1.bf16.msra.mxu0 %v14326_v44 }
 0x82d   :  { %7850 = vmatprep.subr.bf16.mxu0 %v14327_v9 }
 0x82f   :  { %7902 = vmatpush1.bf16.msra.mxu1 %v14328_v5  ;;  %8629 = vmatmul.mubr.msk.bf16.gmra.mxu0 %vm6325_vm12, %v8753_v39 }
 0x830   :  { %7903 = vmatprep.subr.bf16.mxu1 %v14329_v58  ;;  %7851 = vmatpush1.bf16.msra.mxu0 %v14330_v56 }
 0x831   :  { %7874 = vmatprep.mubr.bf16.mxu0 %v14344_v50  ;;  %7852 = vmatprep.subr.bf16.mxu0 %v14331_v46 }
 0x832   :  { %8631 = vmatmul.mubr.msk.bf16.gmra.mxu1 %vm6325_vm12, %v8753_v39 }
 0x833   :  { %7904 = vmatpush1.bf16.msra.mxu1 %v14332_v7  ;;  %7927 = vmatprep.mubr.bf16.mxu1 %v14344_v50 }
 0x834   :  { %7905 = vmatprep.subr.bf16.mxu1 %v14333_v28  ;;  %7853 = vmatpush1.bf16.msra.mxu0 %v14334_v57 }
 0x835   :  { %7854 = vmatprep.subr.bf16.mxu0 %v14335_v15 }
 0x837   :  { %7906 = vmatpush1.bf16.msra.mxu1 %v14336_v34 }
 0x838   :  { %7907 = vmatprep.subr.bf16.mxu1 %v14337_v20  ;;  %7855 = vmatpush1.bf16.msra.mxu0 %v14338_v33 }
 0x839   :  { %7856 = vmatprep.subr.bf16.mxu0 %v14339_v42 }
 0x83b   :  { %7908 = vmatpush1.bf16.msra.mxu1 %v14340_v18 }
 0x83c   :  { %7909 = vmatprep.subr.bf16.mxu1 %v14341_v11  ;;  %7857 = vmatpush1.bf16.msra.mxu0 %v14342_v32 }
 0x83d   :  { %8074 = vmatprep.subr.bf16.mxu0 %v12255_v38 }
 0x83f   :  { %7910 = vmatpush1.bf16.msra.mxu1 %v14343_v4  ;;  %8635 = vmatmul.mubr.msk.bf16.vlgmr.msra.gmra.mxu0 %vm6325_vm12, %v8754_v10 }
 0x840   :  { %8127 = vmatprep.subr.bf16.mxu1 %v12259_v54  ;;  %8075 = vmatpush1.bf16.msra.mxu0 %v12253_v36 }
 0x841   :  { %7884 = vmatprep.mubr.bf16.mxu0 %v14344_v50  ;;  %8076 = vmatprep.subr.bf16.mxu0 %v14324_v45 }
 0x842   :  { %8637 = vmatmul.mubr.msk.bf16.vlgmr.msra.gmra.mxu1 %vm6325_vm12, %v8754_v10 }
 0x843   :  { %8128 = vmatpush1.bf16.msra.mxu1 %v12257_v30  ;;  %7937 = vmatprep.mubr.bf16.mxu1 %v14344_v50 }
 0x844   :  { %8129 = vmatprep.subr.bf16.mxu1 %v14325_v41  ;;  %8077 = vmatpush1.bf16.msra.mxu0 %v14326_v44 }
 0x845   :  { %8078 = vmatprep.subr.bf16.mxu0 %v14327_v9 }
 0x847   :  { %8130 = vmatpush1.bf16.msra.mxu1 %v14328_v5  ;;  %8636 = vmatmul.mubr.msk.bf16.gmra.mxu0 %vm6325_vm12, %v8755_v43 }
 0x848   :  { %8131 = vmatprep.subr.bf16.mxu1 %v14329_v58  ;;  %8079 = vmatpush1.bf16.msra.mxu0 %v14330_v56 }
 0x849   :  { %8102 = vmatprep.mubr.bf16.mxu0 %v14344_v50  ;;  %8080 = vmatprep.subr.bf16.mxu0 %v14331_v46 }
 0x84a   :  { %8638 = vmatmul.mubr.msk.bf16.gmra.mxu1 %vm6325_vm12, %v8755_v43 }
 0x84b   :  { %8132 = vmatpush1.bf16.msra.mxu1 %v14332_v7  ;;  %8155 = vmatprep.mubr.bf16.mxu1 %v14344_v50 }
 0x84c   :  { %8133 = vmatprep.subr.bf16.mxu1 %v14333_v28  ;;  %8081 = vmatpush1.bf16.msra.mxu0 %v14334_v57 }
 0x84d   :  { %8082 = vmatprep.subr.bf16.mxu0 %v14335_v15 }
 0x84f   :  { %8134 = vmatpush1.bf16.msra.mxu1 %v14336_v34 }
 0x850   :  { %8135 = vmatprep.subr.bf16.mxu1 %v14337_v20  ;;  %8083 = vmatpush1.bf16.msra.mxu0 %v14338_v33 }
 0x851   :  { %8084 = vmatprep.subr.bf16.mxu0 %v14339_v42 }
 0x853   :  { %8136 = vmatpush1.bf16.msra.mxu1 %v14340_v18 }
 0x854   :  { %8137 = vmatprep.subr.bf16.mxu1 %v14341_v11  ;;  %8085 = vmatpush1.bf16.msra.mxu0 %v14342_v32 }
 0x857   :  { %8138 = vmatpush1.bf16.msra.mxu1 %v14343_v4  ;;  %v12592_v6 = vpop.f32.mrf.mxu0  ;;  %8642 = vmatmul.mubr.msk.bf16.vlgmr.msra.gmra.mxu0 %vm6325_vm12, %v8756_v61 }
 0x858   :  { %8112 = vmatprep.mubr.bf16.mxu0 %v14344_v50 }
 0x859   :  { %v12596_v1 = vpop.f32.mrf.mxu0 }
 0x85a   :  { %v12598_v40 = vpop.f32.mrf.mxu1  ;;  %8644 = vmatmul.mubr.msk.bf16.vlgmr.msra.gmra.mxu1 %vm6325_vm12, %v8756_v61 }
 0x85b   :  { %8165 = vmatprep.mubr.bf16.mxu1 %v14344_v50  ;;  %v12602_v60 = vpop.f32.mrf.mxu0 }
 0x85c   :  { %v12604_v37 = vpop.f32.mrf.mxu1 }
 0x85d   :  { %v12611_v25 = vpop.f32.mrf.mxu0 }
 0x85e   :  { %v12609_v8 = vpop.f32.mrf.mxu1 }
 0x85f   :  { %8643 = vmatmul.mubr.msk.bf16.gmra.mxu0 %vm6325_vm12, %v8757_v27  ;;  %v12616_v14 = vpop.f32.mrf.mxu0 }
 0x860   :  { %v12614_v63 = vpop.f32.mrf.mxu1 }
 0x861   :  { %v12621_v17 = vpop.f32.mrf.mxu0 }
 0x862   :  { %8645 = vmatmul.mubr.msk.bf16.gmra.mxu1 %vm6325_vm12, %v8757_v27  ;;  %v12619_v51 = vpop.f32.mrf.mxu1  ;;  %14346 = vst [vmem:[#allocation37_spill] sm:$0xff] %v12621_v17 }
 0x863   :  { %14345 = vst [vmem:[#allocation27_spill] sm:$0xff] %v12619_v51  ;;  %v12625_v19 = vpop.f32.mrf.mxu0 }
 0x864   :  { %v12623_v52 = vpop.f32.mrf.mxu1 }
 0x865   :  { %v12629_v36 = vpop.f32.mrf.mxu0 }
 0x866   :  { %v12627_v12 = vpop.f32.mrf.mxu1  ;;  %14348 = vst [vmem:[#allocation28_spill] sm:$0xff] %v12629_v36 }
 0x867   :  { %14347 = vst [vmem:[#allocation36_spill] sm:$0xff] %v12627_v12 }
 0x868   :  { %v12631_v38 = vpop.f32.mrf.mxu1 }
 0x86f   :  { %v6508_v47 = vpop.f32.mrf.mxu0 }
 0x870   :  { %6580 = vrot.lane.b32.xlu0 %v6508_v47, %s8759_s2 }
 0x871   :  { %v6510_v26 = vpop.f32.mrf.mxu0 }
 0x872   :  { %v6561_v30 = vpop.f32.mrf.mxu1 }
 0x873   :  { %v6512_v54 = vpop.f32.mrf.mxu0 }
 0x874   :  { %v6563_v45 = vpop.f32.mrf.mxu1  ;;  %6596 = vrot.lane.b32.xlu0 %v6561_v30, %s8759_s2  ;;  %6582 = vrot.lane.b32.xlu1 %v6512_v54, %s8759_s2 }
 0x875   :  { %v6514_v44 = vpop.f32.mrf.mxu0 }
 0x876   :  { %v6565_v41 = vpop.f32.mrf.mxu1 }
 0x877   :  { %v6518_v9 = vpop.f32.mrf.mxu0 }
 0x878   :  { %6588 = vrot.lane.b32.xlu0 %v6510_v26, %s8759_s2  ;;  %6598 = vrot.lane.b32.xlu1 %v6565_v41, %s8759_s2  ;;  %v6567_v5 = vpop.f32.mrf.mxu1 }
 0x879   :  { %v6520_v58 = vpop.f32.mrf.mxu0 }
 0x87a   :  { %v6571_v56 = vpop.f32.mrf.mxu1 }
 0x87b   :  { %v6522_v46 = vpop.f32.mrf.mxu0 }
 0x87c   :  { %6604 = vrot.lane.b32.xlu0 %v6563_v45, %s8759_s2  ;;  %6590 = vrot.lane.b32.xlu1 %v6514_v44, %s8759_s2  ;;  %v6573_v7 = vpop.f32.mrf.mxu1 }
 0x87d   :  { %v6524_v57 = vpop.f32.mrf.mxu0 }
 0x87e   :  { %v6575_v28 = vpop.f32.mrf.mxu1 }
 0x880   :  { %6606 = vrot.lane.b32.xlu1 %v6567_v5, %s8759_s2  ;;  %6584 = vrot.lane.b32.xlu0 %v6518_v9, %s8759_s2  ;;  %v6577_v34 = vpop.f32.mrf.mxu1 }
 0x884   :  { %6600 = vrot.lane.b32.xlu0 %v6571_v56, %s8759_s2  ;;  %6586 = vrot.lane.b32.xlu1 %v6522_v46, %s8759_s2 }
 0x887   :  { %v6736_v15 = vpop.f32.mrf.mxu0 }
 0x888   :  { %6592 = vrot.lane.b32.xlu0 %v6520_v58, %s8759_s2  ;;  %6602 = vrot.lane.b32.xlu1 %v6575_v28, %s8759_s2 }
 0x889   :  { %v6738_v20 = vpop.f32.mrf.mxu0 }
 0x88a   :  { %v6789_v33 = vpop.f32.mrf.mxu1 }
 0x88b   :  { %v6740_v42 = vpop.f32.mrf.mxu0 }
 0x88c   :  { %6608 = vrot.lane.b32.xlu0 %v6573_v7, %s8759_s2  ;;  %6594 = vrot.lane.b32.xlu1 %v6524_v57, %s8759_s2  ;;  %v6791_v18 = vpop.f32.mrf.mxu1 }
 0x88d   :  { %v6742_v11 = vpop.f32.mrf.mxu0 }
 0x88e   :  { %v6793_v59 = vpop.f32.mrf.mxu1 }
 0x88f   :  { %v6746_v32 = vpop.f32.mrf.mxu0 }
 0x890   :  { %6610 = vrot.lane.b32.xlu1 %v6577_v34, %s8759_s2  ;;  %6808 = vrot.lane.b32.xlu0 %v6736_v15, %s8760_s17  ;;  %v6795_v4 = vpop.f32.mrf.mxu1 }
 0x891   :  { %v6748_v50 = vpop.f32.mrf.mxu0 }
 0x892   :  { %v6799_v53 = vpop.f32.mrf.mxu1 }
 0x893   :  { %v6750_v62 = vpop.f32.mrf.mxu0 }
 0x894   :  { %6824 = vrot.lane.b32.xlu0 %v6789_v33, %s8760_s17  ;;  %6810 = vrot.lane.b32.xlu1 %v6740_v42, %s8760_s17  ;;  %v6801_v23 = vpop.f32.mrf.mxu1 }
 0x895   :  { %v6752_v49 = vpop.f32.mrf.mxu0 }
 0x896   :  { %v6803_v35 = vpop.f32.mrf.mxu1 }
 0x898   :  { %6816 = vrot.lane.b32.xlu0 %v6738_v20, %s8760_s17  ;;  %6826 = vrot.lane.b32.xlu1 %v6793_v59, %s8760_s17  ;;  %v6805_v22 = vpop.f32.mrf.mxu1 }
 0x89c   :  { %6832 = vrot.lane.b32.xlu0 %v6791_v18, %s8760_s17  ;;  %6818 = vrot.lane.b32.xlu1 %v6742_v11, %s8760_s17 }
 0x89f   :  { %v6964_v2 = vpop.f32.mrf.mxu0 }
 0x8a0   :  { %6834 = vrot.lane.b32.xlu1 %v6795_v4, %s8760_s17  ;;  %6812 = vrot.lane.b32.xlu0 %v6746_v32, %s8760_s17 }
 0x8a1   :  { %v6966_v16 = vpop.f32.mrf.mxu0 }
 0x8a2   :  { %v7017_v3 = vpop.f32.mrf.mxu1 }
 0x8a3   :  { %v6968_v21 = vpop.f32.mrf.mxu0 }
 0x8a4   :  { %6828 = vrot.lane.b32.xlu0 %v6799_v53, %s8760_s17  ;;  %6814 = vrot.lane.b32.xlu1 %v6750_v62, %s8760_s17  ;;  %v7019_v24 = vpop.f32.mrf.mxu1 }
 0x8a5   :  { %v6970_v39 = vpop.f32.mrf.mxu0 }
 0x8a6   :  { %v7021_v13 = vpop.f32.mrf.mxu1 }
 0x8a7   :  { %v6974_v10 = vpop.f32.mrf.mxu0 }
 0x8a8   :  { %6820 = vrot.lane.b32.xlu0 %v6748_v50, %s8760_s17  ;;  %6830 = vrot.lane.b32.xlu1 %v6803_v35, %s8760_s17  ;;  %v7023_v43 = vpop.f32.mrf.mxu1 }
 0x8a9   :  { %v6976_v61 = vpop.f32.mrf.mxu0 }
 0x8aa   :  { %v7027_v27 = vpop.f32.mrf.mxu1 }
 0x8ab   :  { %v6978_v47 = vpop.f32.mrf.mxu0 }
 0x8ac   :  { %6836 = vrot.lane.b32.xlu0 %v6801_v23, %s8760_s17  ;;  %6822 = vrot.lane.b32.xlu1 %v6752_v49, %s8760_s17  ;;  %v7029_v26 = vpop.f32.mrf.mxu1 }
 0x8ad   :  { %v6980_v54 = vpop.f32.mrf.mxu0 }
 0x8ae   :  { %v7031_v30 = vpop.f32.mrf.mxu1 }
 0x8b0   :  { %6838 = vrot.lane.b32.xlu1 %v6805_v22, %s8760_s17  ;;  %7036 = vrot.lane.b32.xlu0 %v6964_v2, %s8761_s18  ;;  %v7033_v41 = vpop.f32.mrf.mxu1 }
 0x8b4   :  { %7052 = vrot.lane.b32.xlu0 %v7017_v3, %s8761_s18  ;;  %7038 = vrot.lane.b32.xlu1 %v6968_v21, %s8761_s18 }
 0x8b7   :  { %v7192_v45 = vpop.f32.mrf.mxu0 }
 0x8b8   :  { %7044 = vrot.lane.b32.xlu0 %v6966_v16, %s8761_s18  ;;  %7054 = vrot.lane.b32.xlu1 %v7021_v13, %s8761_s18 }
 0x8b9   :  { %v7194_v44 = vpop.f32.mrf.mxu0 }
 0x8ba   :  { %v7245_v9 = vpop.f32.mrf.mxu1 }
 0x8bb   :  { %v7196_v5 = vpop.f32.mrf.mxu0 }
 0x8bc   :  { %7060 = vrot.lane.b32.xlu0 %v7019_v24, %s8761_s18  ;;  %7046 = vrot.lane.b32.xlu1 %v6970_v39, %s8761_s18  ;;  %v7247_v58 = vpop.f32.mrf.mxu1 }
 0x8bd   :  { %v7198_v46 = vpop.f32.mrf.mxu0 }
 0x8be   :  { %v7249_v56 = vpop.f32.mrf.mxu1 }
 0x8bf   :  { %v7202_v7 = vpop.f32.mrf.mxu0 }
 0x8c0   :  { %7062 = vrot.lane.b32.xlu1 %v7023_v43, %s8761_s18  ;;  %7040 = vrot.lane.b32.xlu0 %v6974_v10, %s8761_s18  ;;  %v7251_v28 = vpop.f32.mrf.mxu1 }
 0x8c1   :  { %v7204_v57 = vpop.f32.mrf.mxu0 }
 0x8c2   :  { %v7255_v15 = vpop.f32.mrf.mxu1 }
 0x8c3   :  { %v7206_v20 = vpop.f32.mrf.mxu0 }
 0x8c4   :  { %7056 = vrot.lane.b32.xlu0 %v7027_v27, %s8761_s18  ;;  %7042 = vrot.lane.b32.xlu1 %v6978_v47, %s8761_s18  ;;  %v7257_v33 = vpop.f32.mrf.mxu1 }
 0x8c5   :  { %v7208_v11 = vpop.f32.mrf.mxu0 }
 0x8c6   :  { %v7259_v59 = vpop.f32.mrf.mxu1 }
 0x8c8   :  { %7048 = vrot.lane.b32.xlu0 %v6976_v61, %s8761_s18  ;;  %7058 = vrot.lane.b32.xlu1 %v7031_v30, %s8761_s18  ;;  %v7261_v53 = vpop.f32.mrf.mxu1 }
 0x8cc   :  { %7064 = vrot.lane.b32.xlu0 %v7029_v26, %s8761_s18  ;;  %7050 = vrot.lane.b32.xlu1 %v6980_v54, %s8761_s18 }
 0x8cf   :  { %v7420_v50 = vpop.f32.mrf.mxu0 }
 0x8d0   :  { %7066 = vrot.lane.b32.xlu1 %v7033_v41, %s8761_s18  ;;  %7264 = vrot.lane.b32.xlu0 %v7192_v45, %s8762_s19 }
 0x8d1   :  { %v7422_v35 = vpop.f32.mrf.mxu0 }
 0x8d2   :  { %v7473_v49 = vpop.f32.mrf.mxu1 }
 0x8d3   :  { %v7424_v16 = vpop.f32.mrf.mxu0 }
 0x8d4   :  { %7280 = vrot.lane.b32.xlu0 %v7245_v9, %s8762_s19  ;;  %7266 = vrot.lane.b32.xlu1 %v7196_v5, %s8762_s19  ;;  %v7475_v3 = vpop.f32.mrf.mxu1 }
 0x8d5   :  { %v7426_v39 = vpop.f32.mrf.mxu0 }
 0x8d6   :  { %v7477_v13 = vpop.f32.mrf.mxu1 }
 0x8d7   :  { %v7430_v61 = vpop.f32.mrf.mxu0 }
 0x8d8   :  { %7272 = vrot.lane.b32.xlu0 %v7194_v44, %s8762_s19  ;;  %7282 = vrot.lane.b32.xlu1 %v7249_v56, %s8762_s19  ;;  %v7479_v27 = vpop.f32.mrf.mxu1 }
 0x8d9   :  { %v7432_v30 = vpop.f32.mrf.mxu0 }
 0x8da   :  { %v7483_v54 = vpop.f32.mrf.mxu1 }
 0x8db   :  { %v7434_v44 = vpop.f32.mrf.mxu0 }
 0x8dc   :  { %7288 = vrot.lane.b32.xlu0 %v7247_v58, %s8762_s19  ;;  %7274 = vrot.lane.b32.xlu1 %v7198_v46, %s8762_s19  ;;  %v7485_v9 = vpop.f32.mrf.mxu1 }
 0x8dd   :  { %v7436_v46 = vpop.f32.mrf.mxu0 }
 0x8de   :  { %v7487_v56 = vpop.f32.mrf.mxu1 }
 0x8e0   :  { %7290 = vrot.lane.b32.xlu1 %v7251_v28, %s8762_s19  ;;  %7268 = vrot.lane.b32.xlu0 %v7202_v7, %s8762_s19 }
 0x8e2   :  { %v12690_v34 = vpop.permute.xlu0 %6580 }
 0x8e4   :  { %7284 = vrot.lane.b32.xlu0 %v7255_v15, %s8762_s19  ;;  %7270 = vrot.lane.b32.xlu1 %v7206_v20, %s8762_s19  ;;  %v7489_v15 = vpop.f32.mrf.mxu1 }
 0x8e6   :  { %v12694_v42 = vpop.permute.xlu0 %6596  ;;  %v12696_v18 = vpop.permute.xlu1 %6582 }
 0x8e8   :  { %7276 = vrot.lane.b32.xlu0 %v7204_v57, %s8762_s19  ;;  %7286 = vrot.lane.b32.xlu1 %v7259_v59, %s8762_s19  ;;  %v7648_v57 = vpop.f32.mrf.mxu0 }
 0x8ea   :  { %v12700_v32 = vpop.permute.xlu0 %6588  ;;  %v12702_v4 = vpop.permute.xlu1 %6598 }
 0x8eb   :  { %v7650_v59 = vpop.f32.mrf.mxu0  ;;  %v6620_v17 = vsel %vm389_vm1, %v12690_v34, %v12700_v32 }
 0x8ec   :  { %7292 = vrot.lane.b32.xlu0 %v7257_v33, %s8762_s19  ;;  %7278 = vrot.lane.b32.xlu1 %v7208_v11, %s8762_s19  ;;  %v7701_v11 = vpop.f32.mrf.mxu1 }
 0x8ee   :  { %v12706_v62 = vpop.permute.xlu0 %6604  ;;  %v12708_v23 = vpop.permute.xlu1 %6590 }
 0x8f0   :  { %7294 = vrot.lane.b32.xlu1 %v7261_v53, %s8762_s19  ;;  %7492 = vrot.lane.b32.xlu0 %v7420_v50, %s8763_s20 }
 0x8f2   :  { %v12712_v2 = vpop.permute.xlu1 %6606  ;;  %v12714_v22 = vpop.permute.xlu0 %6584 }
 0x8f3   :  { %14349 = vst [vmem:[#allocation29_spill] sm:$0xff] %v12714_v22 }
 0x8f4   :  { %7494 = vrot.lane.b32.xlu1 %v7424_v16, %s8763_s20  ;;  %7508 = vrot.lane.b32.xlu0 %v7473_v49, %s8763_s20  ;;  %v6176_v49 = vld [vmem:[%s13791_s11 + $0x8] sm:$0xff]  ;;  %v6179_v16 = vld [vmem:[%s13791_s11 + $0x20] sm:$0xff] }
 0x8f6   :  { %v12718_v21 = vpop.permute.xlu0 %6600  ;;  %v12720_v24 = vpop.permute.xlu1 %6586 }
 0x8f7   :  { %14350 = vst [vmem:[#allocation38_spill] sm:$0xff] %v12718_v21  ;;  %14351 = vst [vmem:[#allocation43_spill] sm:$0xff] %v12720_v24 }
 0x8f8   :  { %7510 = vrot.lane.b32.xlu1 %v7477_v13, %s8763_s20  ;;  %7500 = vrot.lane.b32.xlu0 %v7422_v35, %s8763_s20  ;;  %v6175_v35 = vld [vmem:[%s13791_s11] sm:$0xff]  ;;  %v7703_v13 = vpop.f32.mrf.mxu1 }
 0x8fa   :  { %v12724_v10 = vpop.permute.xlu0 %6592  ;;  %v12726_v43 = vpop.permute.xlu1 %6602 }
 0x8fb   :  { %14352 = vst [vmem:[#allocation44_spill] sm:$0xff] %v12724_v10  ;;  %14353 = vst [vmem:[#allocation45_spill] sm:$0xff] %v12726_v43 }
 0x8fc   :  { %7502 = vrot.lane.b32.xlu1 %v7426_v39, %s8763_s20  ;;  %7516 = vrot.lane.b32.xlu0 %v7475_v3, %s8763_s20  ;;  %v7652_v3 = vpop.f32.mrf.mxu0  ;;  %v6177_v39 = vld [vmem:[%s13791_s11 + $0x10] sm:$0xff] }
 0x8fe   :  { %v12730_v47 = vpop.permute.xlu0 %6608  ;;  %v12732_v26 = vpop.permute.xlu1 %6594 }
 0x8ff   :  { %14354 = vst [vmem:[#allocation46_spill] sm:$0xff] %v12732_v26 }
 0x900   :  { %7518 = vrot.lane.b32.xlu1 %v7479_v27, %s8763_s20  ;;  %7496 = vrot.lane.b32.xlu0 %v7430_v61, %s8763_s20  ;;  %v6180_v61 = vld [vmem:[%s13791_s11 + $0x28] sm:$0xff]  ;;  %v6178_v27 = vld [vmem:[%s13791_s11 + $0x18] sm:$0xff] }
 0x902   :  { %v12736_v45 = vpop.permute.xlu1 %6610  ;;  %v12738_v41 = vpop.permute.xlu0 %6808 }
 0x904   :  { %7498 = vrot.lane.b32.xlu1 %v7434_v44, %s8763_s20  ;;  %7512 = vrot.lane.b32.xlu0 %v7483_v54, %s8763_s20  ;;  %v6182_v54 = vld [vmem:[%s13791_s11 + $0x38] sm:$0xff]  ;;  %v12791_v44 = vadd.f32 %v12592_v6, %v6175_v35  ;;  %v12810_v6 = vadd.f32 %v12598_v40, %v6177_v39  ;;  %v12816_v35 = vadd.f32 %v12604_v37, %v6178_v27  ;;  %v7705_v40 = vpop.f32.mrf.mxu1 }
 0x905   :  { %v6614_v37 = vsel %vm389_vm1, %v12718_v21, %v12730_v47  ;;  %v6626_v39 = vsel %vm389_vm1, %v12730_v47, %v12714_v22  ;;  %v8611_v47 = vld [vmem:[%s13784_s1 + $0x2] ss:$8 sm:$0xf] }
 0x906   :  { %v12742_v5 = vpop.permute.xlu0 %6824  ;;  %v12744_v58 = vpop.permute.xlu1 %6810 }
 0x908   :  { %7514 = vrot.lane.b32.xlu1 %v7487_v56, %s8763_s20  ;;  %7504 = vrot.lane.b32.xlu0 %v7432_v30, %s8763_s20  ;;  %v6181_v30 = vld [vmem:[%s13791_s11 + $0x30] sm:$0xff]  ;;  %v6183_v56 = vld [vmem:[%s13791_s11 + $0x40] sm:$0xff] }
 0x90a   :  { %v12748_v7 = vpop.permute.xlu0 %6816  ;;  %v12750_v28 = vpop.permute.xlu1 %6826 }
 0x90c   :  { %7506 = vrot.lane.b32.xlu1 %v7436_v46, %s8763_s20  ;;  %7520 = vrot.lane.b32.xlu0 %v7485_v9, %s8763_s20  ;;  %v12794_v9 = vadd.f32 %v12596_v1, %v6176_v49  ;;  %v6187_v46 = vld [vmem:[%s13791_s11 + $0x60] sm:$0xff]  ;;  %v12813_v1 = vadd.f32 %v12611_v25, %v6180_v61  ;;  %v6186_v49 = vld [vmem:[%s13791_s11 + $0x58] sm:$0xff]  ;;  %v12831_v25 = vadd.f32 %v12614_v63, %v6182_v54  ;;  %v7654_v54 = vpop.f32.mrf.mxu0 }
 0x90d   :  { %v8604_v61 = vld [vmem:[%s13784_s1 + $0x1] ss:$8 sm:$0xf]  ;;  %v12847_v63 = vadd.f32 %v12625_v19, %v6187_v46 }
 0x90e   :  { %v12754_v20 = vpop.permute.xlu0 %6832  ;;  %v12756_v33 = vpop.permute.xlu1 %6818  ;;  %v12874_v51 = vrot.slane %v8604_v61, %v14275_v31 }
 0x910   :  { %7522 = vrot.lane.b32.xlu1 %v7489_v15, %s8763_s20  ;;  %7720 = vrot.lane.b32.xlu0 %v7648_v57, %s8764_s21 }
 0x912   :  { %v12760_v50 = vpop.permute.xlu1 %6834  ;;  %v12762_v53 = vpop.permute.xlu0 %6812 }
 0x914   :  { %7722 = vrot.lane.b32.xlu1 %v7652_v3, %s8764_s21  ;;  %7736 = vrot.lane.b32.xlu0 %v7701_v11, %s8764_s21  ;;  %v12807_v11 = vadd.f32 %v12602_v60, %v6179_v16  ;;  %v6190_v3 = vld [vmem:[%s13791_s11 + $0x78] sm:$0xff]  ;;  %v12828_v16 = vadd.f32 %v12609_v8, %v6181_v30  ;;  %v6446_v8 = vadd.f32 %v12616_v14, %v6183_v56 }
 0x915   :  { %v6628_v60 = vld [vmem:[%s13784_s1] ss:$8 sm:$0xf]  ;;  %v6453_v14 = vadd.f32 %v12631_v38, %v6190_v3  ;;  %v7658_v38 = vpop.f32.mrf.mxu0  ;;  %v12883_v3 = vrot.slane %v8604_v61, %v9206_v0 }
 0x916   :  { %v12802_v57 = vpop.permute.xlu0 %6828  ;;  %v12804_v15 = vpop.permute.xlu1 %6814  ;;  %v12850_v27 = vrot.slane %v6628_v60, %v14276_v29  ;;  %v12853_v30 = vrot.slane %v6628_v60, %v9206_v0  ;;  %v12862_v19 = vrot.slane %v6628_v60, %v14275_v31  ;;  %v12865_v56 = vrot.slane %v6628_v60, %v14108_v55 }
 0x917   :  { %v12887_v60 = vrot.slane %v8611_v47, %v14275_v31  ;;  %v6612_v31 = vsel %vm389_vm1, %v12694_v42, %v12706_v62 }
 0x918   :  { %7738 = vrot.lane.b32.xlu1 %v7705_v40, %s8764_s21  ;;  %7728 = vrot.lane.b32.xlu0 %v7650_v59, %s8764_s21  ;;  %v6449_v40 = vadd.f32 %v12623_v52, %v6186_v49  ;;  %v6658_v59 = vmul.f32 %v12850_v27, %v6626_v39  ;;  %v6661_v36 = vmul.f32 %v12853_v30, %v6614_v37 }
 0x919   :  { %v12877_v52 = vrot.slane %v8604_v61, %v14108_v55  ;;  %v12880_v49 = vrot.slane %v8604_v61, %v14276_v29  ;;  %v12890_v37 = vrot.slane %v8611_v47, %v14108_v55  ;;  %v6616_v39 = vsel %vm389_vm1, %v12700_v32, %v12694_v42  ;;  %v7707_v55 = vpop.f32.mrf.mxu1 }
 0x91a   :  { %v12867_v46 = vpop.permute.xlu0 %6820  ;;  %v12869_v12 = vpop.permute.xlu1 %6830  ;;  %v6615_v61 = vsel %vm389_vm1, %v12726_v43, %v12736_v45  ;;  %v6624_v32 = vsel %vm389_vm1, %v12706_v62, %v12690_v34  ;;  %v6674_v26 = vadd.f32 %v6658_v59, %v6446_v8  ;;  %v6677_v42 = vadd.f32 %v6661_v36, %v6449_v40 }
 0x91b   :  { %14355 = vst [vmem:[#allocation35_spill] sm:$0xff] %v12867_v46  ;;  %v6617_v46 = vsel %vm389_vm1, %v12708_v23, %v12702_v4  ;;  %v7660_v43 = vpop.f32.mrf.mxu0  ;;  %v7711_v22 = vpop.f32.mrf.mxu1  ;;  %v6665_v21 = vmul.f32 %v12853_v30, %v6615_v61  ;;  %v6651_v36 = vmul.f32 %v12862_v19, %v6620_v17  ;;  %v6652_v8 = vmul.f32 %v12865_v56, %v6616_v39 }
 0x91c   :  { %7730 = vrot.lane.b32.xlu1 %v7654_v54, %s8764_s21  ;;  %v6627_v54 = vsel %vm389_vm1, %v12736_v45, %v12720_v24  ;;  %7744 = vrot.lane.b32.xlu0 %v7703_v13, %s8764_s21  ;;  %v6621_v45 = vsel %vm389_vm1, %v12696_v18, %v12708_v23  ;;  %v12942_v40 = vrot.slane %v8611_v47, %v14276_v29 }
 0x91d   :  { %v6662_v10 = vmul.f32 %v12850_v27, %v6627_v54  ;;  %v12945_v59 = vrot.slane %v8611_v47, %v9206_v0  ;;  %v6650_v61 = vmul.f32 %v12850_v27, %v6624_v32  ;;  %v6653_v54 = vmul.f32 %v12853_v30, %v6612_v31  ;;  %v7713_v29 = vpop.f32.mrf.mxu1 }
 0x91e   :  { %v6837_v13 = vpop.permute.xlu0 %6836  ;;  %v12925_v24 = vpop.permute.xlu1 %6822  ;;  %v6655_v39 = vmul.f32 %v12862_v19, %v6621_v45  ;;  %v6848_v45 = vsel %vm548_vm2, %v12738_v41, %v12748_v7 }
 0x91f   :  { %14356 = vst [vmem:[#allocation40_spill] sm:$0xff] %v12925_v24  ;;  %v6842_v34 = vsel %vm548_vm2, %v12802_v57, %v6837_v13  ;;  %v6854_v62 = vsel %vm548_vm2, %v6837_v13, %v12762_v53 }
 0x920   :  { %v6886_v23 = vmul.f32 %v12880_v49, %v6854_v62  ;;  %v6889_v24 = vmul.f32 %v12883_v3, %v6842_v34  ;;  %7746 = vrot.lane.b32.xlu1 %v7707_v55, %s8764_s21  ;;  %7724 = vrot.lane.b32.xlu0 %v7658_v38, %s8764_s21  ;;  %v6656_v38 = vmul.f32 %v12865_v56, %v6617_v46  ;;  %v7662_v62 = vpop.f32.mrf.mxu0 }
 0x921   :  { %v6844_v46 = vsel %vm548_vm2, %v12748_v7, %v12742_v5  ;;  %v6849_v7 = vsel %vm548_vm2, %v12744_v58, %v12756_v33 }
 0x922   :  { %v12949_v13 = vadd.f32 %v6886_v23, %v6674_v26  ;;  %v12951_v34 = vadd.f32 %v6889_v24, %v6677_v42  ;;  %v6839_v55 = vpop.permute.xlu1 %6838  ;;  %v12953_v17 = vpop.permute.xlu0 %7036  ;;  %v6678_v24 = vadd.f32 %v6662_v10, %v12847_v63  ;;  %v6681_v26 = vadd.f32 %v6665_v21, %v6453_v14 }
 0x923   :  { %v6843_v47 = vsel %vm548_vm2, %v12869_v12, %v6839_v55  ;;  %v6855_v31 = vsel %vm548_vm2, %v6839_v55, %v12804_v15  ;;  %v6840_v21 = vsel %vm548_vm2, %v12742_v5, %v12754_v20  ;;  %v6852_v10 = vsel %vm548_vm2, %v12754_v20, %v12738_v41 }
 0x924   :  { %v6890_v32 = vmul.f32 %v12880_v49, %v6855_v31  ;;  %v6893_v42 = vmul.f32 %v12883_v3, %v6843_v47  ;;  %7726 = vrot.lane.b32.xlu1 %v7662_v62, %s8764_s21  ;;  %7740 = vrot.lane.b32.xlu0 %v7711_v22, %s8764_s21  ;;  %v6845_v63 = vsel %vm548_vm2, %v12756_v33, %v12750_v28  ;;  %v7715_v62 = vpop.f32.mrf.mxu1 }
 0x925   :  { %v6667_v41 = vadd.f32 %v6651_v36, %v12794_v9  ;;  %v6668_v22 = vadd.f32 %v6652_v8, %v12810_v6  ;;  %v6613_v20 = vsel %vm389_vm1, %v12702_v4, %v12712_v2  ;;  %v6625_v33 = vsel %vm389_vm1, %v12712_v2, %v12696_v18  ;;  %v7664_v18 = vpop.f32.mrf.mxu0 }
 0x926   :  { %v12992_v14 = vadd.f32 %v6890_v32, %v6678_v24  ;;  %v12994_v5 = vadd.f32 %v6893_v42, %v6681_v26  ;;  %v7053_v23 = vpop.permute.xlu0 %7052  ;;  %v12996_v55 = vpop.permute.xlu1 %7038  ;;  %v6666_v47 = vadd.f32 %v6650_v61, %v12791_v44  ;;  %v6669_v31 = vadd.f32 %v6653_v54, %v12816_v35 }
 0x927   :  { %v6879_v24 = vmul.f32 %v12874_v51, %v6848_v45  ;;  %v6880_v9 = vmul.f32 %v12877_v52, %v6844_v46  ;;  %v6878_v6 = vmul.f32 %v12880_v49, %v6852_v10  ;;  %v6881_v4 = vmul.f32 %v12883_v3, %v6840_v21 }
 0x928   :  { %7742 = vrot.lane.b32.xlu1 %v7715_v62, %s8764_s21  ;;  %v6883_v36 = vmul.f32 %v12874_v51, %v6849_v7  ;;  %v6884_v8 = vmul.f32 %v12877_v52, %v6845_v63  ;;  %7732 = vrot.lane.b32.xlu0 %v7660_v43, %s8764_s21  ;;  %v6671_v2 = vadd.f32 %v6655_v39, %v12813_v1 }
 0x929   :  { %v6672_v44 = vadd.f32 %v6656_v38, %v12828_v16  ;;  %v6654_v35 = vmul.f32 %v12850_v27, %v6625_v33  ;;  %v6657_v61 = vmul.f32 %v12853_v30, %v6613_v20  ;;  %v6841_v32 = vsel %vm548_vm2, %v12750_v28, %v12760_v50  ;;  %v7876_v27 = vpop.f32.mrf.mxu0 }
 0x92a   :  { %v7045_v54 = vpop.permute.xlu0 %7044  ;;  %v7055_v26 = vpop.permute.xlu1 %7054  ;;  %v6853_v43 = vsel %vm548_vm2, %v12760_v50, %v12744_v58  ;;  %v6895_v30 = vadd.f32 %v6879_v24, %v6667_v41  ;;  %v6896_v39 = vadd.f32 %v6880_v9, %v6668_v22  ;;  %v6894_v28 = vadd.f32 %v6878_v6, %v6666_v47  ;;  %v14357_v6 = vld [vmem:[#allocation38_spill] sm:$0xff] }
 0x92b   :  { %v7072_v1 = vsel %vm708_vm3, %v7045_v54, %v7053_v23  ;;  %v7076_v16 = vsel %vm708_vm3, %v12953_v17, %v7045_v54  ;;  %v6897_v46 = vadd.f32 %v6881_v4, %v6669_v31  ;;  %v6899_v45 = vadd.f32 %v6883_v36, %v6671_v2  ;;  %v7717_v50 = vpop.f32.mrf.mxu1  ;;  %v7878_v20 = vpop.f32.mrf.mxu0  ;;  %v14358_v4 = vld [vmem:[#allocation44_spill] sm:$0xff] }
 0x92c   :  { %v7107_v38 = vmul.f32 %v12887_v60, %v7076_v16  ;;  %v7108_v42 = vmul.f32 %v12890_v37, %v7072_v1  ;;  %7734 = vrot.lane.b32.xlu1 %v7664_v18, %s8764_s21  ;;  %v6900_v58 = vadd.f32 %v6884_v8, %v6672_v44  ;;  %7748 = vrot.lane.b32.xlu0 %v7713_v29, %s8764_s21  ;;  %v14359_v8 = vld [vmem:[#allocation29_spill] sm:$0xff]  ;;  %v14362_v1 = vld [vmem:[#allocation43_spill] sm:$0xff] }
 0x92d   :  { %v6882_v21 = vmul.f32 %v12880_v49, %v6853_v43  ;;  %v6885_v10 = vmul.f32 %v12883_v3, %v6841_v32  ;;  %v7929_v33 = vpop.f32.mrf.mxu1  ;;  %v6618_v36 = vsel %vm389_vm1, %v14358_v4, %v14357_v6  ;;  %v6622_v18 = vsel %vm389_vm1, %v14359_v8, %v14358_v4  ;;  %v14361_v32 = vld [vmem:[#allocation46_spill] sm:$0xff]  ;;  %v14366_v6 = vld [vmem:[#allocation27_spill] sm:$0xff] }
 0x92e   :  { %v13041_v63 = vadd.f32 %v7107_v38, %v6895_v30  ;;  %v13043_v7 = vadd.f32 %v7108_v42, %v6896_v39  ;;  %v7061_v41 = vpop.permute.xlu0 %7060  ;;  %v7047_v22 = vpop.permute.xlu1 %7046  ;;  %v6623_v16 = vsel %vm389_vm1, %v14362_v1, %v14361_v32 }
 0x92f   :  { %v7068_v62 = vsel %vm708_vm3, %v7053_v23, %v7061_v41  ;;  %v7080_v47 = vsel %vm708_vm3, %v7061_v41, %v12953_v17  ;;  %v7073_v29 = vsel %vm708_vm3, %v7047_v22, %v7055_v26  ;;  %v7077_v49 = vsel %vm708_vm3, %v12996_v55, %v7047_v22  ;;  %v7931_v30 = vpop.f32.mrf.mxu1  ;;  %v6189_v41 = vld [vmem:[%s13791_s11 + $0x70] sm:$0xff] }
 0x930   :  { %v7106_v3 = vmul.f32 %v12942_v40, %v7080_v47  ;;  %v7109_v31 = vmul.f32 %v12945_v59, %v7068_v62  ;;  %v7111_v24 = vmul.f32 %v12887_v60, %v7077_v49  ;;  %v7112_v9 = vmul.f32 %v12890_v37, %v7073_v29  ;;  %7750 = vrot.lane.b32.xlu1 %v7717_v50, %s8764_s21  ;;  %v14363_v50 = vld [vmem:[#allocation35_spill] sm:$0xff] }
 0x931   :  { %v6670_v23 = vadd.f32 %v6654_v35, %v12807_v11  ;;  %v6673_v17 = vadd.f32 %v6657_v61, %v12831_v25  ;;  %7948 = vrot.lane.b32.xlu0 %v7876_v27, %s8765_s22  ;;  %v14360_v61 = vld [vmem:[#allocation45_spill] sm:$0xff]  ;;  %v7880_v27 = vpop.f32.mrf.mxu0  ;;  %v6659_v22 = vmul.f32 %v12862_v19, %v6622_v18  ;;  %v6660_v62 = vmul.f32 %v12865_v56, %v6618_v36  ;;  %v14368_v18 = vld [vmem:[#allocation36_spill] sm:$0xff] }
 0x932   :  { %v13071_v2 = vadd.f32 %v7106_v3, %v6894_v28  ;;  %v13073_v44 = vadd.f32 %v7109_v31, %v6897_v46  ;;  %v13075_v54 = vadd.f32 %v7111_v24, %v6899_v45  ;;  %v13077_v11 = vadd.f32 %v7112_v9, %v6900_v58  ;;  %v7063_v25 = vpop.permute.xlu1 %7062  ;;  %v13079_v35 = vpop.permute.xlu0 %7040  ;;  %v6184_v58 = vld [vmem:[%s13791_s11 + $0x48] sm:$0xff] }
 0x933   :  { %v6619_v43 = vsel %vm389_vm1, %v14361_v32, %v14360_v61  ;;  %v7069_v39 = vsel %vm708_vm3, %v7055_v26, %v7063_v25  ;;  %v7081_v38 = vsel %vm708_vm3, %v7063_v25, %v12996_v55  ;;  %v6898_v42 = vadd.f32 %v6882_v21, %v6670_v23  ;;  %v6185_v26 = vld [vmem:[%s13791_s11 + $0x50] sm:$0xff]  ;;  %v14364_v3 = vld [vmem:[#allocation40_spill] sm:$0xff]  ;;  %v7933_v9 = vpop.f32.mrf.mxu1  ;;  %v7882_v25 = vpop.f32.mrf.mxu0 }
 0x934   :  { %v6901_v28 = vadd.f32 %v6885_v10, %v6673_v17  ;;  %v7110_v46 = vmul.f32 %v12942_v40, %v7081_v38  ;;  %v7113_v45 = vmul.f32 %v12945_v59, %v7069_v39  ;;  %7950 = vrot.lane.b32.xlu1 %v7880_v27, %s8765_s22  ;;  %v6846_v55 = vsel %vm548_vm2, %v14363_v50, %v12802_v57  ;;  %v6188_v10 = vld [vmem:[%s13791_s11 + $0x68] sm:$0xff]  ;;  %v14365_v23 = vld [vmem:[#allocation37_spill] sm:$0xff] }
 0x935   :  { %v6850_v21 = vsel %vm548_vm2, %v12762_v53, %v14363_v50  ;;  %7964 = vrot.lane.b32.xlu0 %v7929_v33, %s8765_s22  ;;  %v6663_v33 = vmul.f32 %v12862_v19, %v6623_v16  ;;  %v6664_v49 = vmul.f32 %v12865_v56, %v6619_v43  ;;  %v6847_v31 = vsel %vm548_vm2, %v14364_v3, %v12869_v12  ;;  %v14367_v56 = vld [vmem:[#allocation28_spill] sm:$0xff] }
 0x936   :  { %v13120_v57 = vadd.f32 %v7110_v46, %v6898_v42  ;;  %v13122_v47 = vadd.f32 %v7113_v45, %v6901_v28  ;;  %v7057_v29 = vpop.permute.xlu0 %7056  ;;  %v7043_v53 = vpop.permute.xlu1 %7042  ;;  %v6851_v24 = vsel %vm548_vm2, %v12804_v15, %v14364_v3  ;;  %v6447_v17 = vadd.f32 %v14365_v23, %v6184_v58 }
 0x937   :  { %v6448_v4 = vadd.f32 %v14366_v6, %v6185_v26  ;;  %v6887_v36 = vmul.f32 %v12874_v51, %v6850_v21  ;;  %v6888_v19 = vmul.f32 %v12877_v52, %v6846_v55  ;;  %v6451_v8 = vadd.f32 %v14367_v56, %v6188_v10  ;;  %v7886_v28 = vpop.f32.mrf.mxu0 }
 0x938   :  { %7966 = vrot.lane.b32.xlu1 %v7933_v9, %s8765_s22  ;;  %v6452_v12 = vadd.f32 %v14368_v18, %v6189_v41  ;;  %v6675_v61 = vadd.f32 %v6659_v22, %v6447_v17  ;;  %v6891_v32 = vmul.f32 %v12874_v51, %v6851_v24  ;;  %v6892_v43 = vmul.f32 %v12877_v52, %v6847_v31  ;;  %v7935_v52 = vpop.f32.mrf.mxu1 }
 0x939   :  { %7956 = vrot.lane.b32.xlu0 %v7878_v20, %s8765_s22  ;;  %v6676_v15 = vadd.f32 %v6660_v62, %v6448_v4  ;;  %v6679_v27 = vadd.f32 %v6663_v33, %v6451_v8  ;;  %v7888_v41 = vpop.f32.mrf.mxu0 }
 0x93a   :  { %v7049_v1 = vpop.permute.xlu0 %7048  ;;  %v7059_v16 = vpop.permute.xlu1 %7058  ;;  %v6680_v39 = vadd.f32 %v6664_v49, %v6452_v12  ;;  %v6903_v46 = vadd.f32 %v6887_v36, %v6675_v61  ;;  %v14370_v61 = vld [vmem:[#allocation19_spill] sm:$0xff] }
 0x93b   :  { %v7074_v38 = vsel %vm708_vm3, %v7049_v1, %v7057_v29  ;;  %v7078_v42 = vsel %vm708_vm3, %v13079_v35, %v7049_v1  ;;  %v6904_v20 = vadd.f32 %v6888_v19, %v6676_v15  ;;  %v6907_v58 = vadd.f32 %v6891_v32, %v6679_v27  ;;  %v7939_v22 = vpop.f32.mrf.mxu1  ;;  %v7890_v36 = vpop.f32.mrf.mxu0 }
 0x93c   :  { %v7115_v45 = vmul.f32 %v12887_v60, %v7078_v42  ;;  %v7116_v51 = vmul.f32 %v12890_v37, %v7074_v38  ;;  %7958 = vrot.lane.b32.xlu1 %v7882_v25, %s8765_s22  ;;  %v6908_v26 = vadd.f32 %v6892_v43, %v6680_v39  ;;  %v14371_v38 = vld [vmem:[#allocation20_spill] sm:$0xff] }
 0x93d   :  { %7972 = vrot.lane.b32.xlu0 %v7931_v30, %s8765_s22  ;;  %v7892_v32 = vpop.f32.mrf.mxu0 }
 0x93e   :  { %v13153_v50 = vadd.f32 %v7115_v45, %v6903_v46  ;;  %v13155_v55 = vadd.f32 %v7116_v51, %v6904_v20  ;;  %v7065_v21 = vpop.permute.xlu0 %7064  ;;  %v7051_v10 = vpop.permute.xlu1 %7050 }
 0x93f   :  { %v7070_v62 = vsel %vm708_vm3, %v7057_v29, %v7065_v21  ;;  %v7082_v33 = vsel %vm708_vm3, %v7065_v21, %v13079_v35  ;;  %v7075_v30 = vsel %vm708_vm3, %v7051_v10, %v7059_v16  ;;  %v7079_v49 = vsel %vm708_vm3, %v7043_v53, %v7051_v10 }
 0x940   :  { %v7114_v3 = vmul.f32 %v12942_v40, %v7082_v33  ;;  %v7117_v31 = vmul.f32 %v12945_v59, %v7070_v62  ;;  %v7119_v24 = vmul.f32 %v12887_v60, %v7079_v49  ;;  %v7120_v9 = vmul.f32 %v12890_v37, %v7075_v30  ;;  %7974 = vrot.lane.b32.xlu1 %v7935_v52, %s8765_s22  ;;  %v7941_v60 = vpop.f32.mrf.mxu1 }
 0x941   :  { %7952 = vrot.lane.b32.xlu0 %v7886_v28, %s8765_s22 }
 0x942   :  { %v13173_v35 = vadd.f32 %v7114_v3, %v12949_v13  ;;  %v13176_v29 = vadd.f32 %v7117_v31, %v12951_v34  ;;  %v13178_v23 = vadd.f32 %v7119_v24, %v6907_v58  ;;  %v13180_v17 = vadd.f32 %v7120_v9, %v6908_v26  ;;  %v7067_v6 = vpop.permute.xlu1 %7066  ;;  %v7265_v4 = vpop.permute.xlu0 %7264  ;;  %v8618_v34 = vld [vmem:[%s13784_s1 + $0x3] ss:$8 sm:$0xf] }
 0x943   :  { %v7071_v37 = vsel %vm708_vm3, %v7059_v16, %v7067_v6  ;;  %v7083_v19 = vsel %vm708_vm3, %v7067_v6, %v7043_v53  ;;  %v7943_v25 = vpop.f32.mrf.mxu1  ;;  %v13204_v15 = vrot.slane %v8618_v34, %v14370_v61  ;;  %v8104_v16 = vpop.f32.mrf.mxu0  ;;  %v13215_v42 = vrot.slane %v8618_v34, %v14371_v38 }
 0x944   :  { %v7118_v13 = vmul.f32 %v12942_v40, %v7083_v19  ;;  %v7121_v56 = vmul.f32 %v12945_v59, %v7071_v37  ;;  %7954 = vrot.lane.b32.xlu1 %v7890_v36, %s8765_s22  ;;  %v14369_v40 = vld [vmem:[#allocation18_spill] sm:$0xff]  ;;  %v13218_v28 = vrot.slane %v8618_v34, %v9206_v0 }
 0x945   :  { %7968 = vrot.lane.b32.xlu0 %v7939_v22, %s8765_s22  ;;  %v13201_v59 = vrot.slane %v8618_v34, %v14369_v40  ;;  %v7945_v46 = vpop.f32.mrf.mxu1  ;;  %v8106_v58 = vpop.f32.mrf.mxu0 }
 0x946   :  { %v13194_v8 = vadd.f32 %v7118_v13, %v12992_v14  ;;  %v13197_v18 = vadd.f32 %v7121_v56, %v12994_v5  ;;  %v7281_v12 = vpop.permute.xlu0 %7280  ;;  %v7267_v53 = vpop.permute.xlu1 %7266 }
 0x947   :  { %v8157_v26 = vpop.f32.mrf.mxu1  ;;  %v8108_v6 = vpop.f32.mrf.mxu0 }
 0x948   :  { %7970 = vrot.lane.b32.xlu1 %v7943_v25, %s8765_s22 }
 0x949   :  { %7960 = vrot.lane.b32.xlu0 %v7888_v41, %s8765_s22  ;;  %v8110_v13 = vpop.f32.mrf.mxu0 }
 0x94a   :  { %v7273_v43 = vpop.permute.xlu0 %7272  ;;  %v7283_v14 = vpop.permute.xlu1 %7282 }
 0x94b   :  { %v7300_v5 = vsel %vm868_vm4, %v7273_v43, %v7281_v12  ;;  %v7304_v1 = vsel %vm868_vm4, %v7265_v4, %v7273_v43  ;;  %v8114_v34 = vpop.f32.mrf.mxu0 }
 0x94c   :  { %v7335_v27 = vmul.f32 %v13201_v59, %v7304_v1  ;;  %v7336_v39 = vmul.f32 %v13204_v15, %v7300_v5  ;;  %7962 = vrot.lane.b32.xlu1 %v7892_v32, %s8765_s22 }
 0x94d   :  { %7976 = vrot.lane.b32.xlu0 %v7941_v60, %s8765_s22 }
 0x94e   :  { %v13222_v20 = vadd.f32 %v7335_v27, %v13041_v63  ;;  %v13225_v45 = vadd.f32 %v7336_v39, %v13043_v7  ;;  %v7289_v51 = vpop.permute.xlu0 %7288  ;;  %v7275_v52 = vpop.permute.xlu1 %7274 }
 0x94f   :  { %v7296_v21 = vsel %vm868_vm4, %v7281_v12, %v7289_v51  ;;  %v7308_v10 = vsel %vm868_vm4, %v7289_v51, %v7265_v4  ;;  %v7301_v41 = vsel %vm868_vm4, %v7275_v52, %v7283_v14  ;;  %v7305_v63 = vsel %vm868_vm4, %v7267_v53, %v7275_v52  ;;  %v8159_v4 = vpop.f32.mrf.mxu1 }
 0x950   :  { %v7334_v22 = vmul.f32 %v13215_v42, %v7308_v10  ;;  %v7337_v7 = vmul.f32 %v13218_v28, %v7296_v21  ;;  %v7339_v62 = vmul.f32 %v13201_v59, %v7305_v63  ;;  %v7340_v33 = vmul.f32 %v13204_v15, %v7301_v41  ;;  %7978 = vrot.lane.b32.xlu1 %v7945_v46, %s8765_s22 }
 0x951   :  { %8176 = vrot.lane.b32.xlu0 %v8104_v16, %s8766_s23  ;;  %v8161_v56 = vpop.f32.mrf.mxu1 }
 0x952   :  { %v13242_v30 = vadd.f32 %v7334_v22, %v13071_v2  ;;  %v13245_v49 = vadd.f32 %v7337_v7, %v13073_v44  ;;  %v13248_v3 = vadd.f32 %v7339_v62, %v13075_v54  ;;  %v13251_v31 = vadd.f32 %v7340_v33, %v13077_v11  ;;  %v7291_v24 = vpop.permute.xlu1 %7290  ;;  %v7269_v9 = vpop.permute.xlu0 %7268 }
 0x953   :  { %v7297_v36 = vsel %vm868_vm4, %v7283_v14, %v7291_v24  ;;  %v7309_v2 = vsel %vm868_vm4, %v7291_v24, %v7267_v53  ;;  %v8163_v43 = vpop.f32.mrf.mxu1  ;;  %v8116_v14 = vpop.f32.mrf.mxu0 }
 0x954   :  { %v7338_v60 = vmul.f32 %v13215_v42, %v7309_v2  ;;  %v7341_v44 = vmul.f32 %v13218_v28, %v7297_v36  ;;  %8178 = vrot.lane.b32.xlu1 %v8108_v6, %s8766_s23  ;;  %v8625_v6 = vld [vmem:[%s13784_s1 + $0x5] ss:$8 sm:$0xf] }
 0x955   :  { %8192 = vrot.lane.b32.xlu0 %v8157_v26, %s8766_s23  ;;  %v8167_v39 = vpop.f32.mrf.mxu1  ;;  %v8118_v7 = vpop.f32.mrf.mxu0 }
 0x956   :  { %v13262_v54 = vadd.f32 %v7338_v60, %v13120_v57  ;;  %v13265_v11 = vadd.f32 %v7341_v44, %v13122_v47  ;;  %v7285_v37 = vpop.permute.xlu0 %7284  ;;  %v7271_v19 = vpop.permute.xlu1 %7270 }
 0x957   :  { %v8169_v62 = vpop.f32.mrf.mxu1  ;;  %v8120_v2 = vpop.f32.mrf.mxu0 }
 0x958   :  { %8194 = vrot.lane.b32.xlu1 %v8161_v56, %s8766_s23  ;;  %v7557_v56 = vrot.slane %v8625_v6, %v9206_v0 }
 0x959   :  { %8184 = vrot.lane.b32.xlu0 %v8106_v58, %s8766_s23 }
 0x95a   :  { %v7277_v12 = vpop.permute.xlu0 %7276  ;;  %v7287_v53 = vpop.permute.xlu1 %7286 }
 0x95b   :  { %v7302_v25 = vsel %vm868_vm4, %v7277_v12, %v7285_v37  ;;  %v7306_v57 = vsel %vm868_vm4, %v7269_v9, %v7277_v12 }
 0x95c   :  { %v7343_v47 = vmul.f32 %v13201_v59, %v7306_v57  ;;  %v7344_v32 = vmul.f32 %v13204_v15, %v7302_v25  ;;  %8186 = vrot.lane.b32.xlu1 %v8110_v13, %s8766_s23  ;;  %v7553_v13 = vrot.slane %v8625_v6, %v14370_v61 }
 0x95d   :  { %8200 = vrot.lane.b32.xlu0 %v8159_v4, %s8766_s23  ;;  %v8171_v4 = vpop.f32.mrf.mxu1 }
 0x95e   :  { %v13278_v5 = vadd.f32 %v7343_v47, %v13153_v50  ;;  %v13281_v1 = vadd.f32 %v7344_v32, %v13155_v55  ;;  %v7293_v16 = vpop.permute.xlu0 %7292  ;;  %v7279_v27 = vpop.permute.xlu1 %7278 }
 0x95f   :  { %v7298_v46 = vsel %vm868_vm4, %v7285_v37, %v7293_v16  ;;  %v7310_v51 = vsel %vm868_vm4, %v7293_v16, %v7269_v9  ;;  %v7303_v52 = vsel %vm868_vm4, %v7279_v27, %v7287_v53  ;;  %v7307_v58 = vsel %vm868_vm4, %v7271_v19, %v7279_v27  ;;  %v8173_v12 = vpop.f32.mrf.mxu1 }
 0x960   :  { %v7342_v50 = vmul.f32 %v13215_v42, %v7310_v51  ;;  %v7345_v55 = vmul.f32 %v13218_v28, %v7298_v46  ;;  %v7347_v26 = vmul.f32 %v13201_v59, %v7307_v58  ;;  %v7348_v21 = vmul.f32 %v13204_v15, %v7303_v52  ;;  %8202 = vrot.lane.b32.xlu1 %v8163_v43, %s8766_s23 }
 0x961   :  { %8180 = vrot.lane.b32.xlu0 %v8114_v34, %s8766_s23 }
 0x962   :  { %v13298_v10 = vadd.f32 %v7342_v50, %v13173_v35  ;;  %v13301_v41 = vadd.f32 %v7345_v55, %v13176_v29  ;;  %v13304_v63 = vadd.f32 %v7347_v26, %v13178_v23  ;;  %v13307_v22 = vadd.f32 %v7348_v21, %v13180_v17  ;;  %v7295_v59 = vpop.permute.xlu1 %7294  ;;  %v7493_v35 = vpop.permute.xlu0 %7492 }
 0x963   :  { %v7299_v15 = vsel %vm868_vm4, %v7287_v53, %v7295_v59  ;;  %v7311_v33 = vsel %vm868_vm4, %v7295_v59, %v7271_v19 }
 0x964   :  { %v7346_v24 = vmul.f32 %v13215_v42, %v7311_v33  ;;  %v7349_v29 = vmul.f32 %v13218_v28, %v7299_v15  ;;  %8182 = vrot.lane.b32.xlu1 %v8118_v7, %s8766_s23  ;;  %v7545_v42 = vrot.slane %v8625_v6, %v14371_v38  ;;  %v7549_v28 = vrot.slane %v8625_v6, %v14369_v40 }
 0x965   :  { %8196 = vrot.lane.b32.xlu0 %v8167_v39, %s8766_s23 }
 0x966   :  { %v13318_v23 = vadd.f32 %v7346_v24, %v13194_v8  ;;  %v13321_v17 = vadd.f32 %v7349_v29, %v13197_v18  ;;  %v7495_v9 = vpop.permute.xlu1 %7494  ;;  %v7509_v36 = vpop.permute.xlu0 %7508 }
 0x968   :  { %8198 = vrot.lane.b32.xlu1 %v8171_v4, %s8766_s23 }
 0x969   :  { %8188 = vrot.lane.b32.xlu0 %v8116_v14, %s8766_s23 }
 0x96a   :  { %v7511_v8 = vpop.permute.xlu1 %7510  ;;  %v7501_v60 = vpop.permute.xlu0 %7500 }
 0x96b   :  { %v7528_v18 = vsel %vm1028_vm5, %v7501_v60, %v7509_v36  ;;  %v7532_v44 = vsel %vm1028_vm5, %v7493_v35, %v7501_v60 }
 0x96c   :  { %8190 = vrot.lane.b32.xlu1 %v8120_v2, %s8766_s23  ;;  %v7562_v37 = vmul.f32 %v7545_v42, %v7532_v44  ;;  %v7563_v19 = vmul.f32 %v7549_v28, %v7528_v18 }
 0x96d   :  { %8204 = vrot.lane.b32.xlu0 %v8169_v62, %s8766_s23 }
 0x96e   :  { %v7503_v34 = vpop.permute.xlu1 %7502  ;;  %v13339_v53 = vadd.f32 %v7562_v37, %v13242_v30  ;;  %v13342_v25 = vadd.f32 %v7563_v19, %v13222_v20  ;;  %v7517_v57 = vpop.permute.xlu0 %7516 }
 0x96f   :  { %v7529_v47 = vsel %vm1028_vm5, %v7503_v34, %v7511_v8  ;;  %v7533_v32 = vsel %vm1028_vm5, %v7495_v9, %v7503_v34  ;;  %v7524_v43 = vsel %vm1028_vm5, %v7509_v36, %v7517_v57  ;;  %v7536_v14 = vsel %vm1028_vm5, %v7517_v57, %v7493_v35 }
 0x970   :  { %v7566_v16 = vmul.f32 %v7545_v42, %v7533_v32  ;;  %v7567_v27 = vmul.f32 %v7549_v28, %v7529_v47  ;;  %8206 = vrot.lane.b32.xlu1 %v8173_v12, %s8766_s23  ;;  %v7564_v30 = vmul.f32 %v7553_v13, %v7524_v43  ;;  %v7565_v20 = vmul.f32 %v7557_v56, %v7536_v14 }
 0x972   :  { %v13354_v39 = vadd.f32 %v7566_v16, %v13262_v54  ;;  %v13357_v46 = vadd.f32 %v7567_v27, %v13248_v3  ;;  %v7519_v51 = vpop.permute.xlu1 %7518  ;;  %v13360_v52 = vadd.f32 %v7564_v30, %v13225_v45  ;;  %v13363_v58 = vadd.f32 %v7565_v20, %v13245_v49  ;;  %v7497_v26 = vpop.permute.xlu0 %7496 }
 0x973   :  { %v7525_v50 = vsel %vm1028_vm5, %v7511_v8, %v7519_v51  ;;  %v7537_v55 = vsel %vm1028_vm5, %v7519_v51, %v7495_v9 }
 0x974   :  { %v7568_v21 = vmul.f32 %v7553_v13, %v7525_v50  ;;  %v7569_v54 = vmul.f32 %v7557_v56, %v7537_v55 }
 0x976   :  { %v13370_v7 = vadd.f32 %v7568_v21, %v13251_v31  ;;  %v13373_v3 = vadd.f32 %v7569_v54, %v13265_v11  ;;  %v7499_v45 = vpop.permute.xlu1 %7498  ;;  %v7513_v59 = vpop.permute.xlu0 %7512 }
 0x97a   :  { %v7515_v62 = vpop.permute.xlu1 %7514  ;;  %v7505_v49 = vpop.permute.xlu0 %7504 }
 0x97b   :  { %v7530_v15 = vsel %vm1028_vm5, %v7505_v49, %v7513_v59  ;;  %v7534_v33 = vsel %vm1028_vm5, %v7497_v26, %v7505_v49 }
 0x97c   :  { %v7570_v35 = vmul.f32 %v7545_v42, %v7534_v33  ;;  %v7571_v24 = vmul.f32 %v7549_v28, %v7530_v15 }
 0x97e   :  { %v7507_v29 = vpop.permute.xlu1 %7506  ;;  %v13380_v9 = vadd.f32 %v7570_v35, %v13298_v10  ;;  %v13383_v31 = vadd.f32 %v7571_v24, %v13278_v5  ;;  %v7521_v11 = vpop.permute.xlu0 %7520 }
 0x97f   :  { %v7531_v6 = vsel %vm1028_vm5, %v7507_v29, %v7515_v62  ;;  %v7535_v4 = vsel %vm1028_vm5, %v7499_v45, %v7507_v29  ;;  %v7526_v36 = vsel %vm1028_vm5, %v7513_v59, %v7521_v11  ;;  %v7538_v8 = vsel %vm1028_vm5, %v7521_v11, %v7497_v26 }
 0x980   :  { %v7574_v2 = vmul.f32 %v7545_v42, %v7535_v4  ;;  %v7575_v60 = vmul.f32 %v7549_v28, %v7531_v6  ;;  %v7572_v10 = vmul.f32 %v7553_v13, %v7526_v36  ;;  %v7573_v18 = vmul.f32 %v7557_v56, %v7538_v8 }
 0x982   :  { %v13394_v5 = vadd.f32 %v7574_v2, %v13318_v23  ;;  %v13397_v44 = vadd.f32 %v7575_v60, %v13304_v63  ;;  %v7523_v37 = vpop.permute.xlu1 %7522  ;;  %v13400_v19 = vadd.f32 %v7572_v10, %v13281_v1  ;;  %v13403_v34 = vadd.f32 %v7573_v18, %v13301_v41  ;;  %v7721_v28 = vpop.permute.xlu0 %7720  ;;  %v8632_v41 = vld [vmem:[%s13784_s1 + $0x6] ss:$8 sm:$0xf] }
 0x983   :  { %v7527_v12 = vsel %vm1028_vm5, %v7515_v62, %v7523_v37  ;;  %v7539_v42 = vsel %vm1028_vm5, %v7523_v37, %v7499_v45  ;;  %v7773_v43 = vrot.slane %v8632_v41, %v14371_v38  ;;  %v7777_v14 = vrot.slane %v8632_v41, %v14369_v40 }
 0x984   :  { %v7576_v57 = vmul.f32 %v7553_v13, %v7527_v12  ;;  %v7577_v23 = vmul.f32 %v7557_v56, %v7539_v42  ;;  %v7781_v30 = vrot.slane %v8632_v41, %v14370_v61  ;;  %v7785_v20 = vrot.slane %v8632_v41, %v9206_v0 }
 0x986   :  { %v13410_v47 = vadd.f32 %v7576_v57, %v13307_v22  ;;  %v13413_v63 = vadd.f32 %v7577_v23, %v13321_v17  ;;  %v7723_v1 = vpop.permute.xlu1 %7722  ;;  %v7737_v32 = vpop.permute.xlu0 %7736 }
 0x98a   :  { %v7739_v16 = vpop.permute.xlu1 %7738  ;;  %v7729_v27 = vpop.permute.xlu0 %7728 }
 0x98b   :  { %v7756_v13 = vsel %vm1188_vm6, %v7729_v27, %v7737_v32  ;;  %v7760_v22 = vsel %vm1188_vm6, %v7721_v28, %v7729_v27 }
 0x98c   :  { %v7790_v17 = vmul.f32 %v7773_v43, %v7760_v22  ;;  %v7791_v56 = vmul.f32 %v7777_v14, %v7756_v13 }
 0x98e   :  { %v7731_v51 = vpop.permute.xlu1 %7730  ;;  %v13427_v50 = vadd.f32 %v7790_v17, %v13339_v53  ;;  %v13430_v55 = vadd.f32 %v7791_v56, %v13342_v25  ;;  %v7745_v26 = vpop.permute.xlu0 %7744 }
 0x98f   :  { %v7757_v21 = vsel %vm1188_vm6, %v7731_v51, %v7739_v16  ;;  %v7761_v54 = vsel %vm1188_vm6, %v7723_v1, %v7731_v51  ;;  %v7752_v45 = vsel %vm1188_vm6, %v7737_v32, %v7745_v26  ;;  %v7764_v59 = vsel %vm1188_vm6, %v7745_v26, %v7721_v28 }
 0x990   :  { %v7794_v62 = vmul.f32 %v7773_v43, %v7761_v54  ;;  %v7795_v49 = vmul.f32 %v7777_v14, %v7757_v21  ;;  %v7792_v53 = vmul.f32 %v7781_v30, %v7752_v45  ;;  %v7793_v15 = vmul.f32 %v7785_v20, %v7764_v59 }
 0x992   :  { %v13441_v25 = vadd.f32 %v7794_v62, %v13354_v39  ;;  %v13444_v33 = vadd.f32 %v7795_v49, %v13357_v46  ;;  %v7747_v35 = vpop.permute.xlu1 %7746  ;;  %v13447_v24 = vadd.f32 %v7792_v53, %v13360_v52  ;;  %v13450_v29 = vadd.f32 %v7793_v15, %v13363_v58  ;;  %v7725_v4 = vpop.permute.xlu0 %7724 }
 0x993   :  { %v7753_v11 = vsel %vm1188_vm6, %v7739_v16, %v7747_v35  ;;  %v7765_v6 = vsel %vm1188_vm6, %v7747_v35, %v7723_v1 }
 0x994   :  { %v7796_v36 = vmul.f32 %v7781_v30, %v7753_v11  ;;  %v7797_v39 = vmul.f32 %v7785_v20, %v7765_v6  ;;  %v8639_v11 = vld [vmem:[%s13784_s1 + $0x7] ss:$8 sm:$0xf] }
 0x996   :  { %v13457_v8 = vadd.f32 %v7796_v36, %v13370_v7  ;;  %v13460_v46 = vadd.f32 %v7797_v39, %v13373_v3  ;;  %v7727_v52 = vpop.permute.xlu1 %7726  ;;  %v7741_v2 = vpop.permute.xlu0 %7740  ;;  %v13523_v36 = vrot.slane %v8639_v11, %v14369_v40 }
 0x99a   :  { %v7743_v60 = vpop.permute.xlu1 %7742  ;;  %v7733_v58 = vpop.permute.xlu0 %7732 }
 0x99b   :  { %v7758_v10 = vsel %vm1188_vm6, %v7733_v58, %v7741_v2  ;;  %v7762_v18 = vsel %vm1188_vm6, %v7725_v4, %v7733_v58  ;;  %v13533_v58 = vrot.slane %v8639_v11, %v9206_v0 }
 0x99c   :  { %v7798_v37 = vmul.f32 %v7773_v43, %v7762_v18  ;;  %v7799_v12 = vmul.f32 %v7777_v14, %v7758_v10 }
 0x99e   :  { %v7735_v42 = vpop.permute.xlu1 %7734  ;;  %v13467_v28 = vadd.f32 %v7798_v37, %v13380_v9  ;;  %v13470_v7 = vadd.f32 %v7799_v12, %v13383_v31  ;;  %v7749_v3 = vpop.permute.xlu0 %7748 }
 0x99f   :  { %v7759_v57 = vsel %vm1188_vm6, %v7735_v42, %v7743_v60  ;;  %v7763_v23 = vsel %vm1188_vm6, %v7727_v52, %v7735_v42  ;;  %v7754_v1 = vsel %vm1188_vm6, %v7741_v2, %v7749_v3  ;;  %v7766_v41 = vsel %vm1188_vm6, %v7749_v3, %v7725_v4  ;;  %v8646_v3 = vld [vmem:[%s13784_s1 + $0x20] ss:$8 sm:$0xf] }
 0x9a0   :  { %v7802_v32 = vmul.f32 %v7773_v43, %v7763_v23  ;;  %v7803_v16 = vmul.f32 %v7777_v14, %v7759_v57  ;;  %v7800_v9 = vmul.f32 %v7781_v30, %v7754_v1  ;;  %v7801_v27 = vmul.f32 %v7785_v20, %v7766_v41 }
 0x9a1   :  { %v13520_v4 = vrot.slane %v8639_v11, %v14371_v38 }
 0x9a2   :  { %v13481_v31 = vadd.f32 %v7802_v32, %v13394_v5  ;;  %v13484_v13 = vadd.f32 %v7803_v16, %v13397_v44  ;;  %v7751_v22 = vpop.permute.xlu1 %7750  ;;  %v13487_v17 = vadd.f32 %v7800_v9, %v13400_v19  ;;  %v13490_v56 = vadd.f32 %v7801_v27, %v13403_v34 }
 0x9a3   :  { %v7755_v51 = vsel %vm1188_vm6, %v7743_v60, %v7751_v22  ;;  %v7767_v43 = vsel %vm1188_vm6, %v7751_v22, %v7727_v52  ;;  %v7949_v14 = vpop.permute.xlu0 %7948  ;;  %v13530_v60 = vrot.slane %v8639_v11, %v14370_v61 }
 0x9a4   :  { %v7804_v26 = vmul.f32 %v7781_v30, %v7755_v51  ;;  %v7805_v5 = vmul.f32 %v7785_v20, %v7767_v43  ;;  %v13559_v51 = vrot.slane %v8646_v3, %v14371_v38  ;;  %v13562_v43 = vrot.slane %v8646_v3, %v14369_v40 }
 0x9a6   :  { %v13497_v21 = vadd.f32 %v7804_v26, %v13410_v47  ;;  %v13500_v44 = vadd.f32 %v7805_v5, %v13413_v63  ;;  %v7951_v19 = vpop.permute.xlu1 %7950 }
 0x9a7   :  { %v7965_v54 = vpop.permute.xlu0 %7964 }
 0x9aa   :  { %v7967_v45 = vpop.permute.xlu1 %7966 }
 0x9ab   :  { %v7957_v34 = vpop.permute.xlu0 %7956 }
 0x9ac   :  { %v7984_v52 = vsel %vm1348_vm7, %v7957_v34, %v7965_v54  ;;  %v7988_v2 = vsel %vm1348_vm7, %v7949_v14, %v7957_v34  ;;  %v13569_v34 = vrot.slane %v8646_v3, %v14370_v61 }
 0x9ad   :  { %v8018_v57 = vmul.f32 %v13520_v4, %v7988_v2  ;;  %v8019_v23 = vmul.f32 %v13523_v36, %v7984_v52 }
 0x9ae   :  { %v7959_v59 = vpop.permute.xlu1 %7958 }
 0x9af   :  { %v7973_v62 = vpop.permute.xlu0 %7972  ;;  %v7985_v10 = vsel %vm1348_vm7, %v7959_v59, %v7967_v45  ;;  %v7989_v18 = vsel %vm1348_vm7, %v7951_v19, %v7959_v59  ;;  %v13572_v59 = vrot.slane %v8646_v3, %v9206_v0 }
 0x9b0   :  { %v7980_v37 = vsel %vm1348_vm7, %v7965_v54, %v7973_v62  ;;  %v7992_v12 = vsel %vm1348_vm7, %v7973_v62, %v7949_v14  ;;  %v8022_v16 = vmul.f32 %v13520_v4, %v7989_v18  ;;  %v8023_v9 = vmul.f32 %v13523_v36, %v7985_v10 }
 0x9b1   :  { %v8020_v27 = vmul.f32 %v13530_v60, %v7980_v37  ;;  %v8021_v22 = vmul.f32 %v13533_v58, %v7992_v12  ;;  %v8035_v54 = vadd.f32 %v8019_v23, %v13430_v55  ;;  %v8295_v37 = vld [vmem:[%s13780_s0 + $0x8] sm:$0xff] }
 0x9b2   :  { %v7975_v49 = vpop.permute.xlu1 %7974  ;;  %v8038_v38 = vadd.f32 %v8022_v16, %v13441_v25  ;;  %v8039_v40 = vadd.f32 %v8023_v9, %v13444_v33 }
 0x9b3   :  { %v13502_v53 = vpop.permute.xlu0 %7952  ;;  %v7981_v1 = vsel %vm1348_vm7, %v7967_v45, %v7975_v49  ;;  %v7993_v41 = vsel %vm1348_vm7, %v7975_v49, %v7951_v19  ;;  %v8034_v19 = vadd.f32 %v8018_v57, %v13427_v50  ;;  %v8036_v50 = vadd.f32 %v8020_v27, %v13447_v24 }
 0x9b4   :  { %v8024_v14 = vmul.f32 %v13530_v60, %v7981_v1  ;;  %v8025_v26 = vmul.f32 %v13533_v58, %v7993_v41  ;;  %v8037_v55 = vadd.f32 %v8021_v22, %v13450_v29 }
 0x9b6   :  { %v13504_v15 = vpop.permute.xlu1 %7954  ;;  %v8040_v0 = vadd.f32 %v8024_v14, %v13457_v8  ;;  %v8041_v25 = vadd.f32 %v8025_v26, %v13460_v46  ;;  %v8294_v46 = vld [vmem:[%s13780_s0] sm:$0xff] }
 0x9b7   :  { %v13506_v35 = vpop.permute.xlu0 %7968 }
 0x9ba   :  { %v13508_v30 = vpop.permute.xlu1 %7970 }
 0x9bb   :  { %v7961_v47 = vpop.permute.xlu0 %7960 }
 0x9bc   :  { %v7986_v33 = vsel %vm1348_vm7, %v7961_v47, %v13506_v35  ;;  %v7990_v52 = vsel %vm1348_vm7, %v13502_v53, %v7961_v47 }
 0x9be   :  { %v13510_v20 = vpop.permute.xlu1 %7962 }
 0x9bf   :  { %v13512_v63 = vpop.permute.xlu0 %7976  ;;  %v7987_v9 = vsel %vm1348_vm7, %v13510_v20, %v13508_v30 }
 0x9c2   :  { %v13517_v6 = vpop.permute.xlu1 %7978 }
 0x9c3   :  { %v8177_v39 = vpop.permute.xlu0 %8176 }
 0x9c6   :  { %v13543_v42 = vpop.permute.xlu1 %8178 }
 0x9c7   :  { %v8193_v32 = vpop.permute.xlu0 %8192 }
 0x9ca   :  { %v8195_v5 = vpop.permute.xlu1 %8194 }
 0x9cb   :  { %v8185_v45 = vpop.permute.xlu0 %8184 }
 0x9cc   :  { %v8212_v62 = vsel %vm1508_vm8, %v8185_v45, %v8193_v32  ;;  %v8216_v49 = vsel %vm1508_vm8, %v8177_v39, %v8185_v45  ;;  %v8298_v45 = vld [vmem:[%s13780_s0 + $0x20] sm:$0xff] }
 0x9cd   :  { %v8246_v61 = vmul.f32 %v13559_v51, %v8216_v49  ;;  %v8247_v11 = vmul.f32 %v13562_v43, %v8212_v62  ;;  %v8299_v62 = vld [vmem:[%s13780_s0 + $0x28] sm:$0xff] }
 0x9ce   :  { %v8187_v2 = vpop.permute.xlu1 %8186 }
 0x9cf   :  { %v8262_v24 = vadd.f32 %v8246_v61, %v8034_v19  ;;  %v8263_v10 = vadd.f32 %v8247_v11, %v8035_v54  ;;  %v8201_v29 = vpop.permute.xlu0 %8200  ;;  %v8213_v18 = vsel %vm1508_vm8, %v8187_v2, %v8195_v5  ;;  %v8217_v8 = vsel %vm1508_vm8, %v13543_v42, %v8187_v2 }
 0x9d0   :  { %v8208_v47 = vsel %vm1508_vm8, %v8193_v32, %v8201_v29  ;;  %v8220_v12 = vsel %vm1508_vm8, %v8201_v29, %v8177_v39  ;;  %v8250_v3 = vmul.f32 %v13559_v51, %v8217_v8  ;;  %v8251_v57 = vmul.f32 %v13562_v43, %v8213_v18 }
 0x9d1   :  { %v8278_v23 = vmul.f32 0.2, %v8262_v24  ;;  %v8279_v1 = vmul.f32 0.2, %v8263_v10  ;;  %v8248_v41 = vmul.f32 %v13569_v34, %v8208_v47  ;;  %v8249_v16 = vmul.f32 %v13572_v59, %v8220_v12 }
 0x9d2   :  { %v7991_v39 = vsel %vm1348_vm7, %v13504_v15, %v13510_v20  ;;  %v8266_v32 = vadd.f32 %v8250_v3, %v8038_v38  ;;  %v8267_v27 = vadd.f32 %v8251_v57, %v8039_v40  ;;  %v8203_v22 = vpop.permute.xlu1 %8202  ;;  %v8296_v20 = vld [vmem:[%s13780_s0 + $0x10] sm:$0xff]  ;;  %v8297_v38 = vld [vmem:[%s13780_s0 + $0x18] sm:$0xff]  ;;  %v8026_v57 = vmul.f32 %v13520_v4, %v7990_v52 }
 0x9d3   :  { %v8310_v14 = vadd.f32 %v8294_v46, %v8278_v23  ;;  %v8311_v26 = vadd.f32 %v8295_v37, %v8279_v1  ;;  %v8264_v19 = vadd.f32 %v8248_v41, %v8036_v50  ;;  %v8265_v54 = vadd.f32 %v8249_v16, %v8037_v55  ;;  %v13625_v49 = vpop.permute.xlu0 %8180 }
 0x9d4   :  { %v8282_v40 = vmul.f32 0.2, %v8266_v32  ;;  %v8283_v50 = vmul.f32 0.2, %v8267_v27  ;;  %v8209_v55 = vsel %vm1508_vm8, %v8195_v5, %v8203_v22  ;;  %v8221_v61 = vsel %vm1508_vm8, %v8203_v22, %v13543_v42 }
 0x9d5   :  { %8326 = vst [vmem:[%s13792_s12] sm:$0xff] %v8310_v14  ;;  %8327 = vst [vmem:[%s13792_s12 + $0x8] sm:$0xff] %v8311_v26  ;;  %v8280_v11 = vmul.f32 0.2, %v8264_v19  ;;  %v8281_v2 = vmul.f32 0.2, %v8265_v54  ;;  %v8252_v24 = vmul.f32 %v13569_v34, %v8209_v55  ;;  %v8253_v10 = vmul.f32 %v13572_v59, %v8221_v61 }
 0x9d6   :  { %v7982_v5 = vsel %vm1348_vm7, %v13506_v35, %v13512_v63  ;;  %v7994_v42 = vsel %vm1348_vm7, %v13512_v63, %v13502_v53  ;;  %v8314_v29 = vadd.f32 %v8298_v45, %v8282_v40  ;;  %v8315_v18 = vadd.f32 %v8299_v62, %v8283_v50  ;;  %v13654_v8 = vpop.permute.xlu1 %8182  ;;  %v8300_v53 = vld [vmem:[%s13780_s0 + $0x30] sm:$0xff]  ;;  %v8301_v35 = vld [vmem:[%s13780_s0 + $0x38] sm:$0xff] }
 0x9d7   :  { %v8312_v46 = vadd.f32 %v8296_v20, %v8280_v11  ;;  %v8313_v37 = vadd.f32 %v8297_v38, %v8281_v2  ;;  %v8268_v47 = vadd.f32 %v8252_v24, %v8040_v0  ;;  %v8269_v12 = vadd.f32 %v8253_v10, %v8041_v25  ;;  %v8197_v3 = vpop.permute.xlu0 %8196 }
 0x9d8   :  { %v8027_v23 = vmul.f32 %v13523_v36, %v7986_v33  ;;  %8330 = vst [vmem:[%s13792_s12 + $0x20] sm:$0xff] %v8314_v29  ;;  %8331 = vst [vmem:[%s13792_s12 + $0x28] sm:$0xff] %v8315_v18  ;;  %v8030_v63 = vmul.f32 %v13520_v4, %v7991_v39  ;;  %v8031_v0 = vmul.f32 %v13523_v36, %v7987_v9 }
 0x9d9   :  { %8328 = vst [vmem:[%s13792_s12 + $0x10] sm:$0xff] %v8312_v46  ;;  %8329 = vst [vmem:[%s13792_s12 + $0x18] sm:$0xff] %v8313_v37  ;;  %v8284_v25 = vmul.f32 0.2, %v8268_v47  ;;  %v8285_v33 = vmul.f32 0.2, %v8269_v12  ;;  %v8028_v52 = vmul.f32 %v13530_v60, %v7982_v5  ;;  %v8029_v1 = vmul.f32 %v13533_v58, %v7994_v42 }
 0x9da   :  { %v8199_v41 = vpop.permute.xlu1 %8198  ;;  %v7983_v4 = vsel %vm1348_vm7, %v13508_v30, %v13517_v6  ;;  %v7995_v36 = vsel %vm1348_vm7, %v13517_v6, %v13504_v15  ;;  %v8042_v32 = vadd.f32 %v8026_v57, %v13467_v28  ;;  %v8043_v27 = vadd.f32 %v8027_v23, %v13470_v7 }
 0x9db   :  { %v8316_v16 = vadd.f32 %v8300_v53, %v8284_v25  ;;  %v8317_v9 = vadd.f32 %v8301_v35, %v8285_v33  ;;  %v8189_v39 = vpop.permute.xlu0 %8188  ;;  %v8046_v30 = vadd.f32 %v8030_v63, %v13481_v31  ;;  %v8047_v26 = vadd.f32 %v8031_v0, %v13484_v13 }
 0x9dc   :  { %v8214_v22 = vsel %vm1508_vm8, %v8189_v39, %v8197_v3  ;;  %v8218_v14 = vsel %vm1508_vm8, %v13625_v49, %v8189_v39  ;;  %v8044_v15 = vadd.f32 %v8028_v52, %v13487_v17  ;;  %v8045_v6 = vadd.f32 %v8029_v1, %v13490_v56  ;;  %v8302_v17 = vld [vmem:[%s13780_s0 + $0x40] sm:$0xff]  ;;  %v8303_v56 = vld [vmem:[%s13780_s0 + $0x48] sm:$0xff] }
 0x9dd   :  { %8332 = vst [vmem:[%s13792_s12 + $0x30] sm:$0xff] %v8316_v16  ;;  %8333 = vst [vmem:[%s13792_s12 + $0x38] sm:$0xff] %v8317_v9  ;;  %v8254_v28 = vmul.f32 %v13559_v51, %v8218_v14  ;;  %v8255_v7 = vmul.f32 %v13562_v43, %v8214_v22  ;;  %v8032_v31 = vmul.f32 %v13530_v60, %v7983_v4 }
 0x9de   :  { %v8033_v13 = vmul.f32 %v13533_v58, %v7995_v36  ;;  %v8191_v19 = vpop.permute.xlu1 %8190 }
 0x9df   :  { %v8270_v54 = vadd.f32 %v8254_v28, %v8042_v32  ;;  %v8271_v45 = vadd.f32 %v8255_v7, %v8043_v27  ;;  %v8205_v62 = vpop.permute.xlu0 %8204  ;;  %v8215_v20 = vsel %vm1508_vm8, %v8191_v19, %v8199_v41  ;;  %v8219_v38 = vsel %vm1508_vm8, %v13654_v8, %v8191_v19 }
 0x9e0   :  { %v8210_v60 = vsel %vm1508_vm8, %v8197_v3, %v8205_v62  ;;  %v8222_v58 = vsel %vm1508_vm8, %v8205_v62, %v13625_v49  ;;  %v8258_v40 = vmul.f32 %v13559_v51, %v8219_v38  ;;  %v8259_v50 = vmul.f32 %v13562_v43, %v8215_v20  ;;  %v8306_v51 = vld [vmem:[%s13780_s0 + $0x60] sm:$0xff]  ;;  %v8307_v43 = vld [vmem:[%s13780_s0 + $0x68] sm:$0xff] }
 0x9e1   :  { %v8286_v55 = vmul.f32 0.2, %v8270_v54  ;;  %v8287_v61 = vmul.f32 0.2, %v8271_v45  ;;  %v8256_v11 = vmul.f32 %v13569_v34, %v8210_v60  ;;  %v8257_v2 = vmul.f32 %v13572_v59, %v8222_v58 }
 0x9e2   :  { %v8048_v24 = vadd.f32 %v8032_v31, %v13497_v21  ;;  %v8049_v10 = vadd.f32 %v8033_v13, %v13500_v44  ;;  %v8274_v5 = vadd.f32 %v8258_v40, %v8046_v30  ;;  %v8275_v42 = vadd.f32 %v8259_v50, %v8047_v26  ;;  %v8207_v29 = vpop.permute.xlu1 %8206  ;;  %v8304_v21 = vld [vmem:[%s13780_s0 + $0x50] sm:$0xff]  ;;  %v8305_v44 = vld [vmem:[%s13780_s0 + $0x58] sm:$0xff] }
 0x9e3   :  { %v8318_v18 = vadd.f32 %v8302_v17, %v8286_v55  ;;  %v8319_v46 = vadd.f32 %v8303_v56, %v8287_v61  ;;  %v8272_v49 = vadd.f32 %v8256_v11, %v8044_v15  ;;  %v8273_v37 = vadd.f32 %v8257_v2, %v8045_v6 }
 0x9e4   :  { %v8290_v47 = vmul.f32 0.2, %v8274_v5  ;;  %v8291_v12 = vmul.f32 0.2, %v8275_v42  ;;  %v8211_v3 = vsel %vm1508_vm8, %v8199_v41, %v8207_v29  ;;  %v8223_v57 = vsel %vm1508_vm8, %v8207_v29, %v13654_v8 }
 0x9e5   :  { %8334 = vst [vmem:[%s13792_s12 + $0x40] sm:$0xff] %v8318_v18  ;;  %8335 = vst [vmem:[%s13792_s12 + $0x48] sm:$0xff] %v8319_v46  ;;  %v8288_v23 = vmul.f32 0.2, %v8272_v49  ;;  %v8289_v53 = vmul.f32 0.2, %v8273_v37  ;;  %v8260_v35 = vmul.f32 %v13569_v34, %v8211_v3  ;;  %v8261_v63 = vmul.f32 %v13572_v59, %v8223_v57 }
 0x9e6   :  { %v8322_v0 = vadd.f32 %v8306_v51, %v8290_v47  ;;  %v8323_v25 = vadd.f32 %v8307_v43, %v8291_v12  ;;  %v8308_v34 = vld [vmem:[%s13780_s0 + $0x70] sm:$0xff]  ;;  %v8309_v59 = vld [vmem:[%s13780_s0 + $0x78] sm:$0xff] }
 0x9e7   :  { %v8320_v33 = vadd.f32 %v8304_v21, %v8288_v23  ;;  %v8321_v52 = vadd.f32 %v8305_v44, %v8289_v53  ;;  %v8276_v48 = vadd.f32 %v8260_v35, %v8048_v24  ;;  %v8277_v8 = vadd.f32 %v8261_v63, %v8049_v10 }
 0x9e8   :  { %8338 = vst [vmem:[%s13792_s12 + $0x60] sm:$0xff] %v8322_v0  ;;  %8339 = vst [vmem:[%s13792_s12 + $0x68] sm:$0xff] %v8323_v25 }
 0x9e9   :  { %8336 = vst [vmem:[%s13792_s12 + $0x50] sm:$0xff] %v8320_v33  ;;  %8337 = vst [vmem:[%s13792_s12 + $0x58] sm:$0xff] %v8321_v52  ;;  %v8292_v1 = vmul.f32 0.2, %v8276_v48  ;;  %v8293_v41 = vmul.f32 0.2, %v8277_v8 }
 0x9eb   :  { %v8324_v4 = vadd.f32 %v8308_v34, %v8292_v1  ;;  %v8325_v36 = vadd.f32 %v8309_v59, %v8293_v41 }
 0x9ed   :  { %8340 = vst [vmem:[%s13792_s12 + $0x70] sm:$0xff] %v8324_v4  ;;  %8341 = vst [vmem:[%s13792_s12 + $0x78] sm:$0xff] %v8325_v36 }

</bundles_post_ra>
